<compile_context>
chip_gen: v7x
topology: tpu7x:2x2x1
jax: 0.10.0
libtpu: 0.0.40
codegen_flags: <defaults>
</compile_context>

<pallas_src>
import math

import numpy as np
import jax
import jax.numpy as jnp
from jax.experimental import pallas as pl
from jax.experimental.pallas import tpu as pltpu


# ----------------------------- model config ---------------------------------
GRID_H = 4
GRID_W = 4
NUM_COLORS = 10
VOCAB = NUM_COLORS + 1

D_MODEL = 32
NUM_HEADS = 4
D_K = D_MODEL // NUM_HEADS
D_FF = 64
NUM_LAYERS = 2
BATCH = 2

S_SRC = GRID_H * GRID_W          # 16
S_TGT = GRID_H * GRID_W          # 16
LN_EPS = 1e-5
INV_SQRT_DK = 1.0 / math.sqrt(D_K)

EMB_PAD = 16                     # VOCAB=11 padded to 16 rows per table
OUT_PAD = 128                    # lane-dense output width
LANES = 128                      # lane width of the packed weight slabs


# ------------------------- packed-weight layout -------------------------------
def _build_layout():
    mat, vec = {}, {}
    mrow, vrow = 0, 0

    def add_mat(name, rows, cols):
        nonlocal mrow
        mat[name] = (mrow, rows, cols)
        mrow += rows

    def add_vec(name, cols):
        nonlocal vrow
        vec[name] = (vrow, cols)
        vrow += 1

    for l in range(NUM_LAYERS):
        p = f'enc{l}_'
        add_mat(p + 'wqkv', D_MODEL, 3 * D_MODEL)
        add_mat(p + 'wo', D_MODEL, D_MODEL)
        add_mat(p + 'w1', D_MODEL, D_FF)
        add_mat(p + 'w2', D_FF, D_MODEL)
        add_vec(p + 'bqkv', 3 * D_MODEL)
        add_vec(p + 'bo', D_MODEL)
        add_vec(p + 'b1', D_FF)
        add_vec(p + 'b2', D_MODEL)
        for n in ('g1', 'be1', 'g2', 'be2'):
            add_vec(p + n, D_MODEL)
    for l in range(NUM_LAYERS):
        p = f'dec{l}_'
        add_mat(p + 'sa_wqkv', D_MODEL, 3 * D_MODEL)
        add_mat(p + 'sa_wo', D_MODEL, D_MODEL)
        add_mat(p + 'ca_wq', D_MODEL, D_MODEL)
        add_mat(p + 'ca_wkv', D_MODEL, 2 * D_MODEL)
        add_mat(p + 'ca_wo', D_MODEL, D_MODEL)
        add_mat(p + 'w1', D_MODEL, D_FF)
        add_mat(p + 'w2', D_FF, D_MODEL)
        add_vec(p + 'sa_bqkv', 3 * D_MODEL)
        add_vec(p + 'sa_bo', D_MODEL)
        add_vec(p + 'ca_bq', D_MODEL)
        add_vec(p + 'ca_bkv', 2 * D_MODEL)
        add_vec(p + 'ca_bo', D_MODEL)
        add_vec(p + 'b1', D_FF)
        add_vec(p + 'b2', D_MODEL)
        for n in ('g1', 'be1', 'g2', 'be2', 'g3', 'be3'):
            add_vec(p + n, D_MODEL)
    add_mat('out_w', D_MODEL, OUT_PAD)
    add_vec('out_b', OUT_PAD)
    return mat, vec, mrow, vrow


MAT_LAYOUT, VEC_LAYOUT, MAT_ROWS, VEC_ROWS = _build_layout()


# ------------------------------ fused kernel ----------------------------------
def transformer_kernel(tok_ref, emb_ref, pe_ref, wmat_ref, wvec_ref, out_ref):
    f32 = jnp.float32
    bf16 = jnp.bfloat16

    def mat(name):                       # bf16 weight block (row offsets 32-aligned)
        r, nr, nc = MAT_LAYOUT[name]
        return wmat_ref[r:r + nr, :nc]

    def vec(name):                       # f32 bias / LN row, shape (1, nc)
        r, nc = VEC_LAYOUT[name]
        return wvec_ref[r:r + 1, :nc]

    def dot(a, w):                       # bf16 MXU dot, f32 accumulation
        return jnp.dot(a.astype(bf16), w, preferred_element_type=f32)

    def layer_norm(v, g, b):             # f32 statistics
        mu = jnp.mean(v, axis=-1, keepdims=True)
        var = jnp.mean(jnp.square(v - mu), axis=-1, keepdims=True)
        return (v - mu) * jax.lax.rsqrt(var + LN_EPS) * g + b

    def split_heads(x3, off):            # (B, S, C) -> (H*B, S, dk), n = h*B + b
        return jnp.concatenate(
            [x3[:, :, off + h * D_K: off + (h + 1) * D_K]
             for h in range(NUM_HEADS)], axis=0)

    def merge_heads(ctx):                # (H*B, S, dk) -> (B*S, H*dk)
        sq = ctx.shape[1]
        return jnp.concatenate(
            [ctx[h * BATCH:(h + 1) * BATCH].reshape(BATCH * sq, D_K)
             for h in range(NUM_HEADS)], axis=-1)

    def attend(q, k, v, keep, neg):      # q,k,v: (H*B, S*, dk) f32 -> (H*B, Sq, dk)
        scores = jnp.einsum('nqe,nke->nqk', q.astype(bf16), k.astype(bf16),
                            preferred_element_type=f32) * INV_SQRT_DK
        if keep is not None:
            # Faithful to `masked_fill(mask == 0, -1e9)` (replace, not add).
            scores = scores * keep + neg
        m = jnp.max(scores, axis=-1, keepdims=True)
        e = jnp.exp(scores - m)
        p = e * pl.reciprocal(jnp.sum(e, axis=-1, keepdims=True), approx=True)
        return jnp.einsum('nqk,nke->nqe', p.astype(bf16), v.astype(bf16),
                          preferred_element_type=f32)

    def self_attention(x, prefix, keep=None, neg=None):
        # ONE lane-dense (B*S, D) @ (D, 3D) projection for Q,K,V.
        qkv = dot(x, mat(prefix + 'wqkv')) + vec(prefix + 'bqkv')      # (B*S, 3D)
        qkv3 = qkv.reshape(BATCH, S_TGT, 3 * D_MODEL)
        q = split_heads(qkv3, 0)
        k = split_heads(qkv3, D_MODEL)
        v = split_heads(qkv3, 2 * D_MODEL)
        ctx = attend(q, k, v, keep, neg)                                # (H*B, S, dk)
        return dot(merge_heads(ctx), mat(prefix + 'wo')) + vec(prefix + 'bo')

    def cross_attention(xq, xkv, prefix):
        q2 = dot(xq, mat(prefix + 'ca_wq')) + vec(prefix + 'ca_bq')     # (B*St, D)
        kv2 = dot(xkv, mat(prefix + 'ca_wkv')) + vec(prefix + 'ca_bkv')  # (B*Ss, 2D)
        q3 = q2.reshape(BATCH, S_TGT, D_MODEL)
        kv3 = kv2.reshape(BATCH, S_SRC, 2 * D_MODEL)
        q = split_heads(q3, 0)
        k = split_heads(kv3, 0)
        v = split_heads(kv3, D_MODEL)
        ctx = attend(q, k, v, None, None)
        return dot(merge_heads(ctx), mat(prefix + 'ca_wo')) + vec(prefix + 'ca_bo')

    def ffn(x, prefix):
        h = jnp.maximum(dot(x, mat(prefix + 'w1')) + vec(prefix + 'b1'), 0.0)
        return dot(h, mat(prefix + 'w2')) + vec(prefix + 'b2')

    # ----- embedding lookup folded in-kernel (one-hot matmul) -----
    tok = tok_ref[...]                                                   # (2*B*S, 1) i32
    lane = jax.lax.broadcasted_iota(jnp.int32, (2 * BATCH * S_SRC, EMB_PAD), 1)
    onehot = (tok == lane).astype(f32)                                   # (2*B*S, 16)
    emb = emb_ref[...]                                                   # (32, D) f32
    pe = pe_ref[...]                                                     # (B*S, D) f32
    x = jnp.dot(onehot[:BATCH * S_SRC], emb[:EMB_PAD],
                preferred_element_type=f32) + pe                         # src tokens
    y = jnp.dot(onehot[BATCH * S_SRC:], emb[EMB_PAD:],
                preferred_element_type=f32) + pe                         # tgt tokens

    # ----- decoder self-attn mask, hoisted & pre-broadcast to score shape -----
    ri = jax.lax.broadcasted_iota(jnp.int32, (S_TGT, S_TGT), 0)
    ci = jax.lax.broadcasted_iota(jnp.int32, (S_TGT, S_TGT), 1)
    keep = jnp.broadcast_to((ci > ri).astype(f32)[None],
                            (NUM_HEADS * BATCH, S_TGT, S_TGT))
    neg = (1.0 - keep) * (-1e9)

    # ----- encoder -----
    for l in range(NUM_LAYERS):
        p = f'enc{l}_'
        attn = self_attention(x, p)
        x = layer_norm(x + attn, vec(p + 'g1'), vec(p + 'be1'))
        x = layer_norm(x + ffn(x, p), vec(p + 'g2'), vec(p + 'be2'))
    enc = x                                                              # stays in VMEM

    # ----- decoder -----
    for l in range(NUM_LAYERS):
        p = f'dec{l}_'
        sa = self_attention(y, p + 'sa_', keep, neg)
        y = layer_norm(y + sa, vec(p + 'g1'), vec(p + 'be1'))
        ca = cross_attention(y, enc, p)
        y = layer_norm(y + ca, vec(p + 'g2'), vec(p + 'be2'))
        y = layer_norm(y + ffn(y, p), vec(p + 'g3'), vec(p + 'be3'))

    # ----- lane-dense output projection (padded to 128, sliced in wrapper) -----
    out_ref[...] = dot(y, mat('out_w')) + vec('out_b')


# ------------------------------ host-side packing ------------------------------
def positional_encoding_table(seq_len, d_model):
    position = np.arange(seq_len, dtype=np.float32)[:, None]
    div_term = np.exp(np.arange(0, d_model, 2, dtype=np.float32)
                      * (-math.log(10000.0) / d_model))
    pe = np.zeros((seq_len, d_model), dtype=np.float32)
    pe[:, 0::2] = np.sin(position * div_term)
    pe[:, 1::2] = np.cos(position * div_term)
    return pe


def pack_params(params):
    """Pack all weights into two lane-padded slabs + emb/pe arrays (done once)."""
    mat_buf = np.zeros((MAT_ROWS, LANES), np.float32)
    vec_buf = np.zeros((VEC_ROWS, LANES), np.float32)

    def put_mat(name, w):
        r, _, _ = MAT_LAYOUT[name]
        w = np.asarray(w, np.float32)
        mat_buf[r:r + w.shape[0], :w.shape[1]] = w

    def put_vec(name, v):
        r, _ = VEC_LAYOUT[name]
        v = np.asarray(v, np.float32)
        vec_buf[r, :v.shape[0]] = v

    for l, p in enumerate(params['encoder']):
        pre = f'enc{l}_'
        put_mat(pre + 'wqkv', np.concatenate([p['wq'], p['wk'], p['wv']], axis=1))
        put_vec(pre + 'bqkv', np.concatenate([p['bq'], p['bk'], p['bv']]))
        put_mat(pre + 'wo', p['wo']); put_vec(pre + 'bo', p['bo'])
        put_mat(pre + 'w1', p['w1']); put_vec(pre + 'b1', p['b1'])
        put_mat(pre + 'w2', p['w2']); put_vec(pre + 'b2', p['b2'])
        for n in ('g1', 'be1', 'g2', 'be2'):
            put_vec(pre + n, p[n])
    for l, p in enumerate(params['decoder']):
        pre = f'dec{l}_'
        put_mat(pre + 'sa_wqkv',
                np.concatenate([p['sa_wq'], p['sa_wk'], p['sa_wv']], axis=1))
        put_vec(pre + 'sa_bqkv',
                np.concatenate([p['sa_bq'], p['sa_bk'], p['sa_bv']]))
        put_mat(pre + 'sa_wo', p['sa_wo']); put_vec(pre + 'sa_bo', p['sa_bo'])
        put_mat(pre + 'ca_wq', p['ca_wq']); put_vec(pre + 'ca_bq', p['ca_bq'])
        put_mat(pre + 'ca_wkv', np.concatenate([p['ca_wk'], p['ca_wv']], axis=1))
        put_vec(pre + 'ca_bkv', np.concatenate([p['ca_bk'], p['ca_bv']]))
        put_mat(pre + 'ca_wo', p['ca_wo']); put_vec(pre + 'ca_bo', p['ca_bo'])
        put_mat(pre + 'w1', p['w1']); put_vec(pre + 'b1', p['b1'])
        put_mat(pre + 'w2', p['w2']); put_vec(pre + 'b2', p['b2'])
        for n in ('g1', 'be1', 'g2', 'be2', 'g3', 'be3'):
            put_vec(pre + n, p[n])
    put_mat('out_w', params['w_out'])
    put_vec('out_b', params['b_out'])

    emb = np.zeros((2 * EMB_PAD, D_MODEL), np.float32)
    emb[:VOCAB] = np.asarray(params['src_embedding'])
    emb[EMB_PAD:EMB_PAD + VOCAB] = np.asarray(params['tgt_embedding'])

    pe = np.tile(positional_encoding_table(S_SRC, D_MODEL), (BATCH, 1))

    return dict(
        wmat=jnp.asarray(mat_buf, dtype=jnp.bfloat16),   # bf16 matmul weights
        wvec=jnp.asarray(vec_buf, dtype=jnp.float32),    # f32 biases / LN params
        emb=jnp.asarray(emb, dtype=jnp.float32),
        pe=jnp.asarray(pe, dtype=jnp.float32),
    )


# ------------------------------ wrapper ----------------------------------------
@jax.jit
def arc_grid_transformer_forward(input_grid, target_grid, packed):
    """Returns logits (B, S_TGT, VOCAB)."""
    src_tok = input_grid.reshape(BATCH * S_SRC).astype(jnp.int32)
    tgt_tok = target_grid.reshape(BATCH * S_TGT).astype(jnp.int32)
    tok = jnp.concatenate([src_tok, tgt_tok], axis=0)[:, None]   # (2*B*S, 1)

    out = pl.pallas_call(
        transformer_kernel,
        out_shape=jax.ShapeDtypeStruct((BATCH * S_TGT, OUT_PAD), jnp.float32),
        in_specs=[pl.BlockSpec(memory_space=pltpu.MemorySpace.VMEM)] * 5,
        out_specs=pl.BlockSpec(memory_space=pltpu.MemorySpace.VMEM),
    )(tok, packed['emb'], packed['pe'], packed['wmat'], packed['wvec'])
    return out[:, :VOCAB].reshape(BATCH, S_TGT, VOCAB)


# ------------------------------ param init -------------------------------------
def init_params(key):
    keys = iter(jax.random.split(key, 96))

    def nrm(shape, scale=0.05):
        return scale * jax.random.normal(next(keys), shape, jnp.float32)

    ones = lambda: jnp.ones((D_MODEL,), jnp.float32)
    zeros = lambda: jnp.zeros((D_MODEL,), jnp.float32)

    params = {
        'src_embedding': 0.02 * jax.random.normal(next(keys), (VOCAB, D_MODEL), jnp.float32),
        'tgt_embedding': 0.02 * jax.random.normal(next(keys), (VOCAB, D_MODEL), jnp.float32),
    }
    enc = []
    for _ in range(NUM_LAYERS):
        enc.append(dict(
            wq=nrm((D_MODEL, D_MODEL)), bq=nrm((D_MODEL,), 0.02),
            wk=nrm((D_MODEL, D_MODEL)), bk=nrm((D_MODEL,), 0.02),
            wv=nrm((D_MODEL, D_MODEL)), bv=nrm((D_MODEL,), 0.02),
            wo=nrm((D_MODEL, D_MODEL)), bo=nrm((D_MODEL,), 0.02),
            w1=nrm((D_MODEL, D_FF)), b1=nrm((D_FF,), 0.02),
            w2=nrm((D_FF, D_MODEL)), b2=nrm((D_MODEL,), 0.02),
            g1=ones(), be1=zeros(), g2=ones(), be2=zeros(),
        ))
    dec = []
    for _ in range(NUM_LAYERS):
        dec.append(dict(
            sa_wq=nrm((D_MODEL, D_MODEL)), sa_bq=nrm((D_MODEL,), 0.02),
            sa_wk=nrm((D_MODEL, D_MODEL)), sa_bk=nrm((D_MODEL,), 0.02),
            sa_wv=nrm((D_MODEL, D_MODEL)), sa_bv=nrm((D_MODEL,), 0.02),
            sa_wo=nrm((D_MODEL, D_MODEL)), sa_bo=nrm((D_MODEL,), 0.02),
            ca_wq=nrm((D_MODEL, D_MODEL)), ca_bq=nrm((D_MODEL,), 0.02),
            ca_wk=nrm((D_MODEL, D_MODEL)), ca_bk=nrm((D_MODEL,), 0.02),
            ca_wv=nrm((D_MODEL, D_MODEL)), ca_bv=nrm((D_MODEL,), 0.02),
            ca_wo=nrm((D_MODEL, D_MODEL)), ca_bo=nrm((D_MODEL,), 0.02),
            w1=nrm((D_MODEL, D_FF)), b1=nrm((D_FF,), 0.02),
            w2=nrm((D_FF, D_MODEL)), b2=nrm((D_MODEL,), 0.02),
            g1=ones(), be1=zeros(), g2=ones(), be2=zeros(), g3=ones(), be3=zeros(),
        ))
    params['encoder'] = enc
    params['decoder'] = dec
    params['w_out'] = nrm((D_MODEL, VOCAB))
    params['b_out'] = nrm((VOCAB,), 0.02)
    return params


# ------------------------------ pure-JAX reference ------------------------------
def _ref_ln(v, g, b):
    mu = jnp.mean(v, axis=-1, keepdims=True)
    var = jnp.mean((v - mu) ** 2, axis=-1, keepdims=True)
    return (v - mu) * jax.lax.rsqrt(var + LN_EPS) * g + b


def _ref_mha(xq, xkv, wq, bq, wk, bk, wv, bv, wo, bo, mask_replace=None):
    b, sq, d = xq.shape
    skv = xkv.shape[1]
    q = xq @ wq + bq
    k = xkv @ wk + bk
    v = xkv @ wv + bv
    qh = q.reshape(b, sq, NUM_HEADS, D_K).transpose(0, 2, 1, 3)
    kh = k.reshape(b, skv, NUM_HEADS, D_K).transpose(0, 2, 1, 3)
    vh = v.reshape(b, skv, NUM_HEADS, D_K).transpose(0, 2, 1, 3)
    scores = jnp.einsum('bhqe,bhke->bhqk', qh, kh) / math.sqrt(D_K)
    if mask_replace is not None:
        scores = jnp.where(mask_replace[None, None], -1e9, scores)
    attn = jax.nn.softmax(scores, axis=-1)
    ctx = jnp.einsum('bhqk,bhke->bhqe', attn, vh)
    ctx = ctx.transpose(0, 2, 1, 3).reshape(b, sq, d)
    return ctx @ wo + bo


def _ref_encoder_layer(x, p):
    a = _ref_mha(x, x, p['wq'], p['bq'], p['wk'], p['bk'], p['wv'], p['bv'],
                 p['wo'], p['bo'])
    x = _ref_ln(x + a, p['g1'], p['be1'])
    ff = jnp.maximum(x @ p['w1'] + p['b1'], 0.0) @ p['w2'] + p['b2']
    return _ref_ln(x + ff, p['g2'], p['be2'])


def _ref_decoder_layer(x, enc, p, mask_replace):
    a = _ref_mha(x, x, p['sa_wq'], p['sa_bq'], p['sa_wk'], p['sa_bk'],
                 p['sa_wv'], p['sa_bv'], p['sa_wo'], p['sa_bo'],
                 mask_replace=mask_replace)
    x = _ref_ln(x + a, p['g1'], p['be1'])
    c = _ref_mha(x, enc, p['ca_wq'], p['ca_bq'], p['ca_wk'], p['ca_bk'],
                 p['ca_wv'], p['ca_bv'], p['ca_wo'], p['ca_bo'])
    x = _ref_ln(x + c, p['g2'], p['be2'])
    ff = jnp.maximum(x @ p['w1'] + p['b1'], 0.0) @ p['w2'] + p['b2']
    return _ref_ln(x + ff, p['g3'], p['be3'])


def _ref_forward(input_grid, target_grid, params):
    src_tok = input_grid.reshape(BATCH, S_SRC)
    tgt_tok = target_grid.reshape(BATCH, S_TGT)
    src = params['src_embedding'][src_tok]
    tgt = params['tgt_embedding'][tgt_tok]
    pe = jnp.asarray(positional_encoding_table(S_SRC, D_MODEL))
    x = src + pe[None]
    for p in params['encoder']:
        x = _ref_encoder_layer(x, p)
    enc = x
    rows = jnp.arange(S_TGT)[:, None]
    cols = jnp.arange(S_TGT)[None, :]
    mask_replace = cols <= rows        # faithful to masked_fill(mask == 0, -1e9)
    y = tgt + pe[None]
    for p in params['decoder']:
        y = _ref_decoder_layer(y, enc, p, mask_replace)
    return y @ params['w_out'] + params['b_out']


# ------------------------------ main --------------------------------------------
if __name__ == "__main__":
    key = jax.random.PRNGKey(0)
    k_in, k_tgt, k_p = jax.random.split(key, 3)
    input_grid = jax.random.randint(k_in, (BATCH, GRID_H, GRID_W), 0, NUM_COLORS)
    target_grid = jax.random.randint(k_tgt, (BATCH, GRID_H, GRID_W), 0, NUM_COLORS)

    params = init_params(k_p)
    packed = pack_params(params)          # host-side weight packing, done once

    out = arc_grid_transformer_forward(input_grid, target_grid, packed)
    out = jax.block_until_ready(out)

    ref = _ref_forward(input_grid, target_grid, params)
    assert out.shape == (BATCH, S_TGT, VOCAB)
    assert bool(jnp.all(jnp.isfinite(out)))
    max_err = float(jnp.max(jnp.abs(out - ref)))
    assert jnp.allclose(out, ref, rtol=2e-2, atol=2e-2), max_err

    print("KERNEL_OK")
</pallas_src>

<mosaic_0001>
module attributes {stable_mosaic.version = 11 : i64} {
  func.func @transformer_kernel(%arg0: memref<64x1xi32, #tpu.memory_space<vmem>>, %arg1: memref<32x32xf32, #tpu.memory_space<vmem>>, %arg2: memref<32x32xf32, #tpu.memory_space<vmem>>, %arg3: memref<864x128xbf16, #tpu.memory_space<vmem>>, %arg4: memref<43x128xf32, #tpu.memory_space<vmem>>, %arg5: memref<32x128xf32, #tpu.memory_space<vmem>>) attributes {dimension_semantics = [], scalar_prefetch = 0 : i64, scratch_operands = 0 : i64, tpu.core_type = #tpu.core_type<tc>} {
    %c0 = arith.constant 0 : index
    %c0_0 = arith.constant 0 : index
    %0 = vector.load %arg0[%c0, %c0_0] : memref<64x1xi32, #tpu.memory_space<vmem>>, vector<64x1xi32>
    %1 = tpu.iota {dimensions = array<i32: 1>} : vector<64x16xi32>
    %2 = vector.broadcast %0 : vector<64x1xi32> to vector<64x16xi32>
    %3 = arith.cmpi eq, %2, %1 : vector<64x16xi32>
    %4 = arith.extui %3 : vector<64x16xi1> to vector<64x16xi32>
    %5 = arith.sitofp %4 : vector<64x16xi32> to vector<64x16xf32>
    %c0_1 = arith.constant 0 : index
    %c0_2 = arith.constant 0 : index
    %6 = vector.load %arg1[%c0_1, %c0_2] : memref<32x32xf32, #tpu.memory_space<vmem>>, vector<32x32xf32>
    %c0_3 = arith.constant 0 : index
    %c0_4 = arith.constant 0 : index
    %7 = vector.load %arg2[%c0_3, %c0_4] : memref<32x32xf32, #tpu.memory_space<vmem>>, vector<32x32xf32>
    %8 = vector.extract_strided_slice %5 {offsets = [0, 0], sizes = [32, 16], strides = [1, 1]} : vector<64x16xf32> to vector<32x16xf32>
    %9 = vector.extract_strided_slice %6 {offsets = [0, 0], sizes = [16, 32], strides = [1, 1]} : vector<32x32xf32> to vector<16x32xf32>
    %cst = arith.constant dense<0.000000e+00> : vector<32x32xf32>
    %10 = tpu.matmul %8, %9, %cst {dimension_numbers = #tpu.dot_dimension_numbers<[1], [0], [0], [1], [0, 0, 1, 1], [], []>} : vector<32x16xf32>, vector<16x32xf32>, vector<32x32xf32> -> vector<32x32xf32>
    %11 = arith.addf %10, %7 : vector<32x32xf32>
    %12 = vector.extract_strided_slice %5 {offsets = [32, 0], sizes = [32, 16], strides = [1, 1]} : vector<64x16xf32> to vector<32x16xf32>
    %13 = vector.extract_strided_slice %6 {offsets = [16, 0], sizes = [16, 32], strides = [1, 1]} : vector<32x32xf32> to vector<16x32xf32>
    %cst_5 = arith.constant dense<0.000000e+00> : vector<32x32xf32>
    %14 = tpu.matmul %12, %13, %cst_5 {dimension_numbers = #tpu.dot_dimension_numbers<[1], [0], [0], [1], [0, 0, 1, 1], [], []>} : vector<32x16xf32>, vector<16x32xf32>, vector<32x32xf32> -> vector<32x32xf32>
    %15 = arith.addf %14, %7 : vector<32x32xf32>
    %16 = tpu.iota {dimensions = array<i32: 0>} : vector<16x16xi32>
    %17 = tpu.iota {dimensions = array<i32: 1>} : vector<16x16xi32>
    %18 = arith.cmpi sgt, %17, %16 : vector<16x16xi32>
    %19 = arith.extui %18 : vector<16x16xi1> to vector<16x16xi32>
    %20 = arith.sitofp %19 : vector<16x16xi32> to vector<16x16xf32>
    %21 = vector.shape_cast %20 : vector<16x16xf32> to vector<1x16x16xf32>
    %22 = vector.shape_cast %21 : vector<1x16x16xf32> to vector<1x16x16xf32>
    %23 = vector.broadcast %22 : vector<1x16x16xf32> to vector<8x16x16xf32>
    %cst_6 = arith.constant 1.000000e+00 : f32
    %24 = vector.broadcast %cst_6 : f32 to vector<8x16x16xf32>
    %25 = arith.subf %24, %23 : vector<8x16x16xf32>
    %cst_7 = arith.constant -1.000000e+09 : f32
    %26 = vector.broadcast %cst_7 : f32 to vector<8x16x16xf32>
    %27 = arith.mulf %25, %26 : vector<8x16x16xf32>
    %c0_8 = arith.constant 0 : index
    %c0_9 = arith.constant 0 : index
    %28 = vector.load %arg3[%c0_8, %c0_9] : memref<864x128xbf16, #tpu.memory_space<vmem>>, vector<32x96xbf16>
    %29 = arith.truncf %11 : vector<32x32xf32> to vector<32x32xbf16>
    %cst_10 = arith.constant dense<0.000000e+00> : vector<32x96xf32>
    %30 = tpu.matmul %29, %28, %cst_10 {dimension_numbers = #tpu.dot_dimension_numbers<[1], [0], [0], [1], [0, 0, 1, 1], [], []>} : vector<32x32xbf16>, vector<32x96xbf16>, vector<32x96xf32> -> vector<32x96xf32>
    %c0_11 = arith.constant 0 : index
    %c0_12 = arith.constant 0 : index
    %31 = vector.load %arg4[%c0_11, %c0_12] : memref<43x128xf32, #tpu.memory_space<vmem>>, vector<1x96xf32>
    %32 = vector.broadcast %31 : vector<1x96xf32> to vector<32x96xf32>
    %33 = arith.addf %30, %32 : vector<32x96xf32>
    %34 = vector.shape_cast %33 : vector<32x96xf32> to vector<2x16x96xf32>
    %35 = vector.extract_strided_slice %34 {offsets = [0, 0, 0], sizes = [2, 16, 8], strides = [1, 1, 1]} : vector<2x16x96xf32> to vector<2x16x8xf32>
    %36 = vector.extract_strided_slice %34 {offsets = [0, 0, 8], sizes = [2, 16, 8], strides = [1, 1, 1]} : vector<2x16x96xf32> to vector<2x16x8xf32>
    %37 = vector.extract_strided_slice %34 {offsets = [0, 0, 16], sizes = [2, 16, 8], strides = [1, 1, 1]} : vector<2x16x96xf32> to vector<2x16x8xf32>
    %38 = vector.extract_strided_slice %34 {offsets = [0, 0, 24], sizes = [2, 16, 8], strides = [1, 1, 1]} : vector<2x16x96xf32> to vector<2x16x8xf32>
    %39 = tpu.concatenate %35, %36, %37, %38 in 0 : vector<2x16x8xf32>, vector<2x16x8xf32>, vector<2x16x8xf32>, vector<2x16x8xf32> -> vector<8x16x8xf32>
    %40 = vector.extract_strided_slice %34 {offsets = [0, 0, 32], sizes = [2, 16, 8], strides = [1, 1, 1]} : vector<2x16x96xf32> to vector<2x16x8xf32>
    %41 = vector.extract_strided_slice %34 {offsets = [0, 0, 40], sizes = [2, 16, 8], strides = [1, 1, 1]} : vector<2x16x96xf32> to vector<2x16x8xf32>
    %42 = vector.extract_strided_slice %34 {offsets = [0, 0, 48], sizes = [2, 16, 8], strides = [1, 1, 1]} : vector<2x16x96xf32> to vector<2x16x8xf32>
    %43 = vector.extract_strided_slice %34 {offsets = [0, 0, 56], sizes = [2, 16, 8], strides = [1, 1, 1]} : vector<2x16x96xf32> to vector<2x16x8xf32>
    %44 = tpu.concatenate %40, %41, %42, %43 in 0 : vector<2x16x8xf32>, vector<2x16x8xf32>, vector<2x16x8xf32>, vector<2x16x8xf32> -> vector<8x16x8xf32>
    %45 = vector.extract_strided_slice %34 {offsets = [0, 0, 64], sizes = [2, 16, 8], strides = [1, 1, 1]} : vector<2x16x96xf32> to vector<2x16x8xf32>
    %46 = vector.extract_strided_slice %34 {offsets = [0, 0, 72], sizes = [2, 16, 8], strides = [1, 1, 1]} : vector<2x16x96xf32> to vector<2x16x8xf32>
    %47 = vector.extract_strided_slice %34 {offsets = [0, 0, 80], sizes = [2, 16, 8], strides = [1, 1, 1]} : vector<2x16x96xf32> to vector<2x16x8xf32>
    %48 = vector.extract_strided_slice %34 {offsets = [0, 0, 88], sizes = [2, 16, 8], strides = [1, 1, 1]} : vector<2x16x96xf32> to vector<2x16x8xf32>
    %49 = tpu.concatenate %45, %46, %47, %48 in 0 : vector<2x16x8xf32>, vector<2x16x8xf32>, vector<2x16x8xf32>, vector<2x16x8xf32> -> vector<8x16x8xf32>
    %50 = arith.truncf %39 : vector<8x16x8xf32> to vector<8x16x8xbf16>
    %51 = arith.truncf %44 : vector<8x16x8xf32> to vector<8x16x8xbf16>
    "tpu.trace_start"() <{level = 10 : i32, message = "nqe,nke->nqk"}> : () -> ()
    %cst_13 = arith.constant dense<0.000000e+00> : vector<8x16x16xf32>
    %52 = tpu.matmul %50, %51, %cst_13 {dimension_numbers = #tpu.dot_dimension_numbers<[2], [2], [1], [1], [0, 0, 0, 1, 1, 1], [0], [0]>} : vector<8x16x8xbf16>, vector<8x16x8xbf16>, vector<8x16x16xf32> -> vector<8x16x16xf32>
    "tpu.trace_stop"() : () -> ()
    %cst_14 = arith.constant 0.353553385 : f32
    %53 = vector.broadcast %cst_14 : f32 to vector<8x16x16xf32>
    %54 = arith.mulf %52, %53 : vector<8x16x16xf32>
    %cst_15 = arith.constant dense<0xFF800000> : vector<8x16xf32>
    %55 = vector.multi_reduction <maximumf>, %54, %cst_15 [2] : vector<8x16x16xf32> to vector<8x16xf32>
    %56 = vector.shape_cast %55 : vector<8x16xf32> to vector<8x16x1xf32>
    %57 = vector.broadcast %56 : vector<8x16x1xf32> to vector<8x16x16xf32>
    %58 = arith.subf %54, %57 : vector<8x16x16xf32>
    %59 = math.exp %58 : vector<8x16x16xf32>
    %cst_16 = arith.constant dense<0.000000e+00> : vector<8x16xf32>
    %60 = vector.multi_reduction <add>, %59, %cst_16 [2] : vector<8x16x16xf32> to vector<8x16xf32>
    %61 = vector.shape_cast %60 : vector<8x16xf32> to vector<8x16x1xf32>
    %62 = tpu.reciprocal %61 {approx = true} : vector<8x16x1xf32> -> vector<8x16x1xf32>
    %63 = vector.broadcast %62 : vector<8x16x1xf32> to vector<8x16x16xf32>
    %64 = arith.mulf %59, %63 : vector<8x16x16xf32>
    %65 = arith.truncf %64 : vector<8x16x16xf32> to vector<8x16x16xbf16>
    %66 = arith.truncf %49 : vector<8x16x8xf32> to vector<8x16x8xbf16>
    "tpu.trace_start"() <{level = 10 : i32, message = "nqk,nke->nqe"}> : () -> ()
    %cst_17 = arith.constant dense<0.000000e+00> : vector<8x16x8xf32>
    %67 = tpu.matmul %65, %66, %cst_17 {dimension_numbers = #tpu.dot_dimension_numbers<[2], [1], [1], [2], [0, 0, 0, 1, 1, 2], [0], [0]>} : vector<8x16x16xbf16>, vector<8x16x8xbf16>, vector<8x16x8xf32> -> vector<8x16x8xf32>
    "tpu.trace_stop"() : () -> ()
    %68 = vector.extract_strided_slice %67 {offsets = [0, 0, 0], sizes = [2, 16, 8], strides = [1, 1, 1]} : vector<8x16x8xf32> to vector<2x16x8xf32>
    %69 = vector.shape_cast %68 : vector<2x16x8xf32> to vector<32x8xf32>
    %70 = vector.extract_strided_slice %67 {offsets = [2, 0, 0], sizes = [2, 16, 8], strides = [1, 1, 1]} : vector<8x16x8xf32> to vector<2x16x8xf32>
    %71 = vector.shape_cast %70 : vector<2x16x8xf32> to vector<32x8xf32>
    %72 = vector.extract_strided_slice %67 {offsets = [4, 0, 0], sizes = [2, 16, 8], strides = [1, 1, 1]} : vector<8x16x8xf32> to vector<2x16x8xf32>
    %73 = vector.shape_cast %72 : vector<2x16x8xf32> to vector<32x8xf32>
    %74 = vector.extract_strided_slice %67 {offsets = [6, 0, 0], sizes = [2, 16, 8], strides = [1, 1, 1]} : vector<8x16x8xf32> to vector<2x16x8xf32>
    %75 = vector.shape_cast %74 : vector<2x16x8xf32> to vector<32x8xf32>
    %76 = tpu.concatenate %69, %71, %73, %75 in 1 : vector<32x8xf32>, vector<32x8xf32>, vector<32x8xf32>, vector<32x8xf32> -> vector<32x32xf32>
    %c32 = arith.constant 32 : index
    %c0_18 = arith.constant 0 : index
    %77 = vector.load %arg3[%c32, %c0_18] : memref<864x128xbf16, #tpu.memory_space<vmem>>, vector<32x32xbf16>
    %78 = arith.truncf %76 : vector<32x32xf32> to vector<32x32xbf16>
    %cst_19 = arith.constant dense<0.000000e+00> : vector<32x32xf32>
    %79 = tpu.matmul %78, %77, %cst_19 {dimension_numbers = #tpu.dot_dimension_numbers<[1], [0], [0], [1], [0, 0, 1, 1], [], []>} : vector<32x32xbf16>, vector<32x32xbf16>, vector<32x32xf32> -> vector<32x32xf32>
    %c1 = arith.constant 1 : index
    %c0_20 = arith.constant 0 : index
    %80 = vector.load %arg4[%c1, %c0_20] : memref<43x128xf32, #tpu.memory_space<vmem>>, vector<1x32xf32>
    %81 = vector.broadcast %80 : vector<1x32xf32> to vector<32x32xf32>
    %82 = arith.addf %79, %81 : vector<32x32xf32>
    %83 = arith.addf %11, %82 : vector<32x32xf32>
    %c4 = arith.constant 4 : index
    %c0_21 = arith.constant 0 : index
    %84 = vector.load %arg4[%c4, %c0_21] : memref<43x128xf32, #tpu.memory_space<vmem>>, vector<1x32xf32>
    %c5 = arith.constant 5 : index
    %c0_22 = arith.constant 0 : index
    %85 = vector.load %arg4[%c5, %c0_22] : memref<43x128xf32, #tpu.memory_space<vmem>>, vector<1x32xf32>
    %cst_23 = arith.constant dense<0.000000e+00> : vector<32xf32>
    %86 = vector.multi_reduction <add>, %83, %cst_23 [1] : vector<32x32xf32> to vector<32xf32>
    %87 = vector.shape_cast %86 : vector<32xf32> to vector<32x1xf32>
    %cst_24 = arith.constant 3.200000e+01 : f32
    %88 = vector.broadcast %cst_24 : f32 to vector<32x1xf32>
    %89 = arith.divf %87, %88 : vector<32x1xf32>
    %90 = vector.broadcast %89 : vector<32x1xf32> to vector<32x32xf32>
    %91 = arith.subf %83, %90 : vector<32x32xf32>
    %92 = arith.mulf %91, %91 : vector<32x32xf32>
    %cst_25 = arith.constant dense<0.000000e+00> : vector<32xf32>
    %93 = vector.multi_reduction <add>, %92, %cst_25 [1] : vector<32x32xf32> to vector<32xf32>
    %94 = vector.shape_cast %93 : vector<32xf32> to vector<32x1xf32>
    %cst_26 = arith.constant 3.200000e+01 : f32
    %95 = vector.broadcast %cst_26 : f32 to vector<32x1xf32>
    %96 = arith.divf %94, %95 : vector<32x1xf32>
    %97 = vector.broadcast %89 : vector<32x1xf32> to vector<32x32xf32>
    %98 = arith.subf %83, %97 : vector<32x32xf32>
    %cst_27 = arith.constant 9.99999974E-6 : f32
    %99 = vector.broadcast %cst_27 : f32 to vector<32x1xf32>
    %100 = arith.addf %96, %99 : vector<32x1xf32>
    %101 = math.rsqrt %100 : vector<32x1xf32>
    %102 = vector.broadcast %101 : vector<32x1xf32> to vector<32x32xf32>
    %103 = arith.mulf %98, %102 : vector<32x32xf32>
    %104 = vector.broadcast %84 : vector<1x32xf32> to vector<32x32xf32>
    %105 = arith.mulf %103, %104 : vector<32x32xf32>
    %106 = vector.broadcast %85 : vector<1x32xf32> to vector<32x32xf32>
    %107 = arith.addf %105, %106 : vector<32x32xf32>
    %c64 = arith.constant 64 : index
    %c0_28 = arith.constant 0 : index
    %108 = vector.load %arg3[%c64, %c0_28] : memref<864x128xbf16, #tpu.memory_space<vmem>>, vector<32x64xbf16>
    %109 = arith.truncf %107 : vector<32x32xf32> to vector<32x32xbf16>
    %cst_29 = arith.constant dense<0.000000e+00> : vector<32x64xf32>
    %110 = tpu.matmul %109, %108, %cst_29 {dimension_numbers = #tpu.dot_dimension_numbers<[1], [0], [0], [1], [0, 0, 1, 1], [], []>} : vector<32x32xbf16>, vector<32x64xbf16>, vector<32x64xf32> -> vector<32x64xf32>
    %c2 = arith.constant 2 : index
    %c0_30 = arith.constant 0 : index
    %111 = vector.load %arg4[%c2, %c0_30] : memref<43x128xf32, #tpu.memory_space<vmem>>, vector<1x64xf32>
    %112 = vector.broadcast %111 : vector<1x64xf32> to vector<32x64xf32>
    %113 = arith.addf %110, %112 : vector<32x64xf32>
    %cst_31 = arith.constant 0.000000e+00 : f32
    %114 = vector.broadcast %cst_31 : f32 to vector<32x64xf32>
    %115 = arith.maximumf %113, %114 : vector<32x64xf32>
    %c96 = arith.constant 96 : index
    %c0_32 = arith.constant 0 : index
    %116 = vector.load %arg3[%c96, %c0_32] : memref<864x128xbf16, #tpu.memory_space<vmem>>, vector<64x32xbf16>
    %117 = arith.truncf %115 : vector<32x64xf32> to vector<32x64xbf16>
    %cst_33 = arith.constant dense<0.000000e+00> : vector<32x32xf32>
    %118 = tpu.matmul %117, %116, %cst_33 {dimension_numbers = #tpu.dot_dimension_numbers<[1], [0], [0], [1], [0, 0, 1, 1], [], []>} : vector<32x64xbf16>, vector<64x32xbf16>, vector<32x32xf32> -> vector<32x32xf32>
    %c3 = arith.constant 3 : index
    %c0_34 = arith.constant 0 : index
    %119 = vector.load %arg4[%c3, %c0_34] : memref<43x128xf32, #tpu.memory_space<vmem>>, vector<1x32xf32>
    %120 = vector.broadcast %119 : vector<1x32xf32> to vector<32x32xf32>
    %121 = arith.addf %118, %120 : vector<32x32xf32>
    %122 = arith.addf %107, %121 : vector<32x32xf32>
    %c6 = arith.constant 6 : index
    %c0_35 = arith.constant 0 : index
    %123 = vector.load %arg4[%c6, %c0_35] : memref<43x128xf32, #tpu.memory_space<vmem>>, vector<1x32xf32>
    %c7 = arith.constant 7 : index
    %c0_36 = arith.constant 0 : index
    %124 = vector.load %arg4[%c7, %c0_36] : memref<43x128xf32, #tpu.memory_space<vmem>>, vector<1x32xf32>
    %cst_37 = arith.constant dense<0.000000e+00> : vector<32xf32>
    %125 = vector.multi_reduction <add>, %122, %cst_37 [1] : vector<32x32xf32> to vector<32xf32>
    %126 = vector.shape_cast %125 : vector<32xf32> to vector<32x1xf32>
    %cst_38 = arith.constant 3.200000e+01 : f32
    %127 = vector.broadcast %cst_38 : f32 to vector<32x1xf32>
    %128 = arith.divf %126, %127 : vector<32x1xf32>
    %129 = vector.broadcast %128 : vector<32x1xf32> to vector<32x32xf32>
    %130 = arith.subf %122, %129 : vector<32x32xf32>
    %131 = arith.mulf %130, %130 : vector<32x32xf32>
    %cst_39 = arith.constant dense<0.000000e+00> : vector<32xf32>
    %132 = vector.multi_reduction <add>, %131, %cst_39 [1] : vector<32x32xf32> to vector<32xf32>
    %133 = vector.shape_cast %132 : vector<32xf32> to vector<32x1xf32>
    %cst_40 = arith.constant 3.200000e+01 : f32
    %134 = vector.broadcast %cst_40 : f32 to vector<32x1xf32>
    %135 = arith.divf %133, %134 : vector<32x1xf32>
    %136 = vector.broadcast %128 : vector<32x1xf32> to vector<32x32xf32>
    %137 = arith.subf %122, %136 : vector<32x32xf32>
    %cst_41 = arith.constant 9.99999974E-6 : f32
    %138 = vector.broadcast %cst_41 : f32 to vector<32x1xf32>
    %139 = arith.addf %135, %138 : vector<32x1xf32>
    %140 = math.rsqrt %139 : vector<32x1xf32>
    %141 = vector.broadcast %140 : vector<32x1xf32> to vector<32x32xf32>
    %142 = arith.mulf %137, %141 : vector<32x32xf32>
    %143 = vector.broadcast %123 : vector<1x32xf32> to vector<32x32xf32>
    %144 = arith.mulf %142, %143 : vector<32x32xf32>
    %145 = vector.broadcast %124 : vector<1x32xf32> to vector<32x32xf32>
    %146 = arith.addf %144, %145 : vector<32x32xf32>
    %c160 = arith.constant 160 : index
    %c0_42 = arith.constant 0 : index
    %147 = vector.load %arg3[%c160, %c0_42] : memref<864x128xbf16, #tpu.memory_space<vmem>>, vector<32x96xbf16>
    %148 = arith.truncf %146 : vector<32x32xf32> to vector<32x32xbf16>
    %cst_43 = arith.constant dense<0.000000e+00> : vector<32x96xf32>
    %149 = tpu.matmul %148, %147, %cst_43 {dimension_numbers = #tpu.dot_dimension_numbers<[1], [0], [0], [1], [0, 0, 1, 1], [], []>} : vector<32x32xbf16>, vector<32x96xbf16>, vector<32x96xf32> -> vector<32x96xf32>
    %c8 = arith.constant 8 : index
    %c0_44 = arith.constant 0 : index
    %150 = vector.load %arg4[%c8, %c0_44] : memref<43x128xf32, #tpu.memory_space<vmem>>, vector<1x96xf32>
    %151 = vector.broadcast %150 : vector<1x96xf32> to vector<32x96xf32>
    %152 = arith.addf %149, %151 : vector<32x96xf32>
    %153 = vector.shape_cast %152 : vector<32x96xf32> to vector<2x16x96xf32>
    %154 = vector.extract_strided_slice %153 {offsets = [0, 0, 0], sizes = [2, 16, 8], strides = [1, 1, 1]} : vector<2x16x96xf32> to vector<2x16x8xf32>
    %155 = vector.extract_strided_slice %153 {offsets = [0, 0, 8], sizes = [2, 16, 8], strides = [1, 1, 1]} : vector<2x16x96xf32> to vector<2x16x8xf32>
    %156 = vector.extract_strided_slice %153 {offsets = [0, 0, 16], sizes = [2, 16, 8], strides = [1, 1, 1]} : vector<2x16x96xf32> to vector<2x16x8xf32>
    %157 = vector.extract_strided_slice %153 {offsets = [0, 0, 24], sizes = [2, 16, 8], strides = [1, 1, 1]} : vector<2x16x96xf32> to vector<2x16x8xf32>
    %158 = tpu.concatenate %154, %155, %156, %157 in 0 : vector<2x16x8xf32>, vector<2x16x8xf32>, vector<2x16x8xf32>, vector<2x16x8xf32> -> vector<8x16x8xf32>
    %159 = vector.extract_strided_slice %153 {offsets = [0, 0, 32], sizes = [2, 16, 8], strides = [1, 1, 1]} : vector<2x16x96xf32> to vector<2x16x8xf32>
    %160 = vector.extract_strided_slice %153 {offsets = [0, 0, 40], sizes = [2, 16, 8], strides = [1, 1, 1]} : vector<2x16x96xf32> to vector<2x16x8xf32>
    %161 = vector.extract_strided_slice %153 {offsets = [0, 0, 48], sizes = [2, 16, 8], strides = [1, 1, 1]} : vector<2x16x96xf32> to vector<2x16x8xf32>
    %162 = vector.extract_strided_slice %153 {offsets = [0, 0, 56], sizes = [2, 16, 8], strides = [1, 1, 1]} : vector<2x16x96xf32> to vector<2x16x8xf32>
    %163 = tpu.concatenate %159, %160, %161, %162 in 0 : vector<2x16x8xf32>, vector<2x16x8xf32>, vector<2x16x8xf32>, vector<2x16x8xf32> -> vector<8x16x8xf32>
    %164 = vector.extract_strided_slice %153 {offsets = [0, 0, 64], sizes = [2, 16, 8], strides = [1, 1, 1]} : vector<2x16x96xf32> to vector<2x16x8xf32>
    %165 = vector.extract_strided_slice %153 {offsets = [0, 0, 72], sizes = [2, 16, 8], strides = [1, 1, 1]} : vector<2x16x96xf32> to vector<2x16x8xf32>
    %166 = vector.extract_strided_slice %153 {offsets = [0, 0, 80], sizes = [2, 16, 8], strides = [1, 1, 1]} : vector<2x16x96xf32> to vector<2x16x8xf32>
    %167 = vector.extract_strided_slice %153 {offsets = [0, 0, 88], sizes = [2, 16, 8], strides = [1, 1, 1]} : vector<2x16x96xf32> to vector<2x16x8xf32>
    %168 = tpu.concatenate %164, %165, %166, %167 in 0 : vector<2x16x8xf32>, vector<2x16x8xf32>, vector<2x16x8xf32>, vector<2x16x8xf32> -> vector<8x16x8xf32>
    %169 = arith.truncf %158 : vector<8x16x8xf32> to vector<8x16x8xbf16>
    %170 = arith.truncf %163 : vector<8x16x8xf32> to vector<8x16x8xbf16>
    "tpu.trace_start"() <{level = 10 : i32, message = "nqe,nke->nqk"}> : () -> ()
    %cst_45 = arith.constant dense<0.000000e+00> : vector<8x16x16xf32>
    %171 = tpu.matmul %169, %170, %cst_45 {dimension_numbers = #tpu.dot_dimension_numbers<[2], [2], [1], [1], [0, 0, 0, 1, 1, 1], [0], [0]>} : vector<8x16x8xbf16>, vector<8x16x8xbf16>, vector<8x16x16xf32> -> vector<8x16x16xf32>
    "tpu.trace_stop"() : () -> ()
    %cst_46 = arith.constant 0.353553385 : f32
    %172 = vector.broadcast %cst_46 : f32 to vector<8x16x16xf32>
    %173 = arith.mulf %171, %172 : vector<8x16x16xf32>
    %cst_47 = arith.constant dense<0xFF800000> : vector<8x16xf32>
    %174 = vector.multi_reduction <maximumf>, %173, %cst_47 [2] : vector<8x16x16xf32> to vector<8x16xf32>
    %175 = vector.shape_cast %174 : vector<8x16xf32> to vector<8x16x1xf32>
    %176 = vector.broadcast %175 : vector<8x16x1xf32> to vector<8x16x16xf32>
    %177 = arith.subf %173, %176 : vector<8x16x16xf32>
    %178 = math.exp %177 : vector<8x16x16xf32>
    %cst_48 = arith.constant dense<0.000000e+00> : vector<8x16xf32>
    %179 = vector.multi_reduction <add>, %178, %cst_48 [2] : vector<8x16x16xf32> to vector<8x16xf32>
    %180 = vector.shape_cast %179 : vector<8x16xf32> to vector<8x16x1xf32>
    %181 = tpu.reciprocal %180 {approx = true} : vector<8x16x1xf32> -> vector<8x16x1xf32>
    %182 = vector.broadcast %181 : vector<8x16x1xf32> to vector<8x16x16xf32>
    %183 = arith.mulf %178, %182 : vector<8x16x16xf32>
    %184 = arith.truncf %183 : vector<8x16x16xf32> to vector<8x16x16xbf16>
    %185 = arith.truncf %168 : vector<8x16x8xf32> to vector<8x16x8xbf16>
    "tpu.trace_start"() <{level = 10 : i32, message = "nqk,nke->nqe"}> : () -> ()
    %cst_49 = arith.constant dense<0.000000e+00> : vector<8x16x8xf32>
    %186 = tpu.matmul %184, %185, %cst_49 {dimension_numbers = #tpu.dot_dimension_numbers<[2], [1], [1], [2], [0, 0, 0, 1, 1, 2], [0], [0]>} : vector<8x16x16xbf16>, vector<8x16x8xbf16>, vector<8x16x8xf32> -> vector<8x16x8xf32>
    "tpu.trace_stop"() : () -> ()
    %187 = vector.extract_strided_slice %186 {offsets = [0, 0, 0], sizes = [2, 16, 8], strides = [1, 1, 1]} : vector<8x16x8xf32> to vector<2x16x8xf32>
    %188 = vector.shape_cast %187 : vector<2x16x8xf32> to vector<32x8xf32>
    %189 = vector.extract_strided_slice %186 {offsets = [2, 0, 0], sizes = [2, 16, 8], strides = [1, 1, 1]} : vector<8x16x8xf32> to vector<2x16x8xf32>
    %190 = vector.shape_cast %189 : vector<2x16x8xf32> to vector<32x8xf32>
    %191 = vector.extract_strided_slice %186 {offsets = [4, 0, 0], sizes = [2, 16, 8], strides = [1, 1, 1]} : vector<8x16x8xf32> to vector<2x16x8xf32>
    %192 = vector.shape_cast %191 : vector<2x16x8xf32> to vector<32x8xf32>
    %193 = vector.extract_strided_slice %186 {offsets = [6, 0, 0], sizes = [2, 16, 8], strides = [1, 1, 1]} : vector<8x16x8xf32> to vector<2x16x8xf32>
    %194 = vector.shape_cast %193 : vector<2x16x8xf32> to vector<32x8xf32>
    %195 = tpu.concatenate %188, %190, %192, %194 in 1 : vector<32x8xf32>, vector<32x8xf32>, vector<32x8xf32>, vector<32x8xf32> -> vector<32x32xf32>
    %c192 = arith.constant 192 : index
    %c0_50 = arith.constant 0 : index
    %196 = vector.load %arg3[%c192, %c0_50] : memref<864x128xbf16, #tpu.memory_space<vmem>>, vector<32x32xbf16>
    %197 = arith.truncf %195 : vector<32x32xf32> to vector<32x32xbf16>
    %cst_51 = arith.constant dense<0.000000e+00> : vector<32x32xf32>
    %198 = tpu.matmul %197, %196, %cst_51 {dimension_numbers = #tpu.dot_dimension_numbers<[1], [0], [0], [1], [0, 0, 1, 1], [], []>} : vector<32x32xbf16>, vector<32x32xbf16>, vector<32x32xf32> -> vector<32x32xf32>
    %c9 = arith.constant 9 : index
    %c0_52 = arith.constant 0 : index
    %199 = vector.load %arg4[%c9, %c0_52] : memref<43x128xf32, #tpu.memory_space<vmem>>, vector<1x32xf32>
    %200 = vector.broadcast %199 : vector<1x32xf32> to vector<32x32xf32>
    %201 = arith.addf %198, %200 : vector<32x32xf32>
    %202 = arith.addf %146, %201 : vector<32x32xf32>
    %c12 = arith.constant 12 : index
    %c0_53 = arith.constant 0 : index
    %203 = vector.load %arg4[%c12, %c0_53] : memref<43x128xf32, #tpu.memory_space<vmem>>, vector<1x32xf32>
    %c13 = arith.constant 13 : index
    %c0_54 = arith.constant 0 : index
    %204 = vector.load %arg4[%c13, %c0_54] : memref<43x128xf32, #tpu.memory_space<vmem>>, vector<1x32xf32>
    %cst_55 = arith.constant dense<0.000000e+00> : vector<32xf32>
    %205 = vector.multi_reduction <add>, %202, %cst_55 [1] : vector<32x32xf32> to vector<32xf32>
    %206 = vector.shape_cast %205 : vector<32xf32> to vector<32x1xf32>
    %cst_56 = arith.constant 3.200000e+01 : f32
    %207 = vector.broadcast %cst_56 : f32 to vector<32x1xf32>
    %208 = arith.divf %206, %207 : vector<32x1xf32>
    %209 = vector.broadcast %208 : vector<32x1xf32> to vector<32x32xf32>
    %210 = arith.subf %202, %209 : vector<32x32xf32>
    %211 = arith.mulf %210, %210 : vector<32x32xf32>
    %cst_57 = arith.constant dense<0.000000e+00> : vector<32xf32>
    %212 = vector.multi_reduction <add>, %211, %cst_57 [1] : vector<32x32xf32> to vector<32xf32>
    %213 = vector.shape_cast %212 : vector<32xf32> to vector<32x1xf32>
    %cst_58 = arith.constant 3.200000e+01 : f32
    %214 = vector.broadcast %cst_58 : f32 to vector<32x1xf32>
    %215 = arith.divf %213, %214 : vector<32x1xf32>
    %216 = vector.broadcast %208 : vector<32x1xf32> to vector<32x32xf32>
    %217 = arith.subf %202, %216 : vector<32x32xf32>
    %cst_59 = arith.constant 9.99999974E-6 : f32
    %218 = vector.broadcast %cst_59 : f32 to vector<32x1xf32>
    %219 = arith.addf %215, %218 : vector<32x1xf32>
    %220 = math.rsqrt %219 : vector<32x1xf32>
    %221 = vector.broadcast %220 : vector<32x1xf32> to vector<32x32xf32>
    %222 = arith.mulf %217, %221 : vector<32x32xf32>
    %223 = vector.broadcast %203 : vector<1x32xf32> to vector<32x32xf32>
    %224 = arith.mulf %222, %223 : vector<32x32xf32>
    %225 = vector.broadcast %204 : vector<1x32xf32> to vector<32x32xf32>
    %226 = arith.addf %224, %225 : vector<32x32xf32>
    %c224 = arith.constant 224 : index
    %c0_60 = arith.constant 0 : index
    %227 = vector.load %arg3[%c224, %c0_60] : memref<864x128xbf16, #tpu.memory_space<vmem>>, vector<32x64xbf16>
    %228 = arith.truncf %226 : vector<32x32xf32> to vector<32x32xbf16>
    %cst_61 = arith.constant dense<0.000000e+00> : vector<32x64xf32>
    %229 = tpu.matmul %228, %227, %cst_61 {dimension_numbers = #tpu.dot_dimension_numbers<[1], [0], [0], [1], [0, 0, 1, 1], [], []>} : vector<32x32xbf16>, vector<32x64xbf16>, vector<32x64xf32> -> vector<32x64xf32>
    %c10 = arith.constant 10 : index
    %c0_62 = arith.constant 0 : index
    %230 = vector.load %arg4[%c10, %c0_62] : memref<43x128xf32, #tpu.memory_space<vmem>>, vector<1x64xf32>
    %231 = vector.broadcast %230 : vector<1x64xf32> to vector<32x64xf32>
    %232 = arith.addf %229, %231 : vector<32x64xf32>
    %cst_63 = arith.constant 0.000000e+00 : f32
    %233 = vector.broadcast %cst_63 : f32 to vector<32x64xf32>
    %234 = arith.maximumf %232, %233 : vector<32x64xf32>
    %c256 = arith.constant 256 : index
    %c0_64 = arith.constant 0 : index
    %235 = vector.load %arg3[%c256, %c0_64] : memref<864x128xbf16, #tpu.memory_space<vmem>>, vector<64x32xbf16>
    %236 = arith.truncf %234 : vector<32x64xf32> to vector<32x64xbf16>
    %cst_65 = arith.constant dense<0.000000e+00> : vector<32x32xf32>
    %237 = tpu.matmul %236, %235, %cst_65 {dimension_numbers = #tpu.dot_dimension_numbers<[1], [0], [0], [1], [0, 0, 1, 1], [], []>} : vector<32x64xbf16>, vector<64x32xbf16>, vector<32x32xf32> -> vector<32x32xf32>
    %c11 = arith.constant 11 : index
    %c0_66 = arith.constant 0 : index
    %238 = vector.load %arg4[%c11, %c0_66] : memref<43x128xf32, #tpu.memory_space<vmem>>, vector<1x32xf32>
    %239 = vector.broadcast %238 : vector<1x32xf32> to vector<32x32xf32>
    %240 = arith.addf %237, %239 : vector<32x32xf32>
    %241 = arith.addf %226, %240 : vector<32x32xf32>
    %c14 = arith.constant 14 : index
    %c0_67 = arith.constant 0 : index
    %242 = vector.load %arg4[%c14, %c0_67] : memref<43x128xf32, #tpu.memory_space<vmem>>, vector<1x32xf32>
    %c15 = arith.constant 15 : index
    %c0_68 = arith.constant 0 : index
    %243 = vector.load %arg4[%c15, %c0_68] : memref<43x128xf32, #tpu.memory_space<vmem>>, vector<1x32xf32>
    %cst_69 = arith.constant dense<0.000000e+00> : vector<32xf32>
    %244 = vector.multi_reduction <add>, %241, %cst_69 [1] : vector<32x32xf32> to vector<32xf32>
    %245 = vector.shape_cast %244 : vector<32xf32> to vector<32x1xf32>
    %cst_70 = arith.constant 3.200000e+01 : f32
    %246 = vector.broadcast %cst_70 : f32 to vector<32x1xf32>
    %247 = arith.divf %245, %246 : vector<32x1xf32>
    %248 = vector.broadcast %247 : vector<32x1xf32> to vector<32x32xf32>
    %249 = arith.subf %241, %248 : vector<32x32xf32>
    %250 = arith.mulf %249, %249 : vector<32x32xf32>
    %cst_71 = arith.constant dense<0.000000e+00> : vector<32xf32>
    %251 = vector.multi_reduction <add>, %250, %cst_71 [1] : vector<32x32xf32> to vector<32xf32>
    %252 = vector.shape_cast %251 : vector<32xf32> to vector<32x1xf32>
    %cst_72 = arith.constant 3.200000e+01 : f32
    %253 = vector.broadcast %cst_72 : f32 to vector<32x1xf32>
    %254 = arith.divf %252, %253 : vector<32x1xf32>
    %255 = vector.broadcast %247 : vector<32x1xf32> to vector<32x32xf32>
    %256 = arith.subf %241, %255 : vector<32x32xf32>
    %cst_73 = arith.constant 9.99999974E-6 : f32
    %257 = vector.broadcast %cst_73 : f32 to vector<32x1xf32>
    %258 = arith.addf %254, %257 : vector<32x1xf32>
    %259 = math.rsqrt %258 : vector<32x1xf32>
    %260 = vector.broadcast %259 : vector<32x1xf32> to vector<32x32xf32>
    %261 = arith.mulf %256, %260 : vector<32x32xf32>
    %262 = vector.broadcast %242 : vector<1x32xf32> to vector<32x32xf32>
    %263 = arith.mulf %261, %262 : vector<32x32xf32>
    %264 = vector.broadcast %243 : vector<1x32xf32> to vector<32x32xf32>
    %265 = arith.addf %263, %264 : vector<32x32xf32>
    %c320 = arith.constant 320 : index
    %c0_74 = arith.constant 0 : index
    %266 = vector.load %arg3[%c320, %c0_74] : memref<864x128xbf16, #tpu.memory_space<vmem>>, vector<32x96xbf16>
    %267 = arith.truncf %15 : vector<32x32xf32> to vector<32x32xbf16>
    %cst_75 = arith.constant dense<0.000000e+00> : vector<32x96xf32>
    %268 = tpu.matmul %267, %266, %cst_75 {dimension_numbers = #tpu.dot_dimension_numbers<[1], [0], [0], [1], [0, 0, 1, 1], [], []>} : vector<32x32xbf16>, vector<32x96xbf16>, vector<32x96xf32> -> vector<32x96xf32>
    %c16 = arith.constant 16 : index
    %c0_76 = arith.constant 0 : index
    %269 = vector.load %arg4[%c16, %c0_76] : memref<43x128xf32, #tpu.memory_space<vmem>>, vector<1x96xf32>
    %270 = vector.broadcast %269 : vector<1x96xf32> to vector<32x96xf32>
    %271 = arith.addf %268, %270 : vector<32x96xf32>
    %272 = vector.shape_cast %271 : vector<32x96xf32> to vector<2x16x96xf32>
    %273 = vector.extract_strided_slice %272 {offsets = [0, 0, 0], sizes = [2, 16, 8], strides = [1, 1, 1]} : vector<2x16x96xf32> to vector<2x16x8xf32>
    %274 = vector.extract_strided_slice %272 {offsets = [0, 0, 8], sizes = [2, 16, 8], strides = [1, 1, 1]} : vector<2x16x96xf32> to vector<2x16x8xf32>
    %275 = vector.extract_strided_slice %272 {offsets = [0, 0, 16], sizes = [2, 16, 8], strides = [1, 1, 1]} : vector<2x16x96xf32> to vector<2x16x8xf32>
    %276 = vector.extract_strided_slice %272 {offsets = [0, 0, 24], sizes = [2, 16, 8], strides = [1, 1, 1]} : vector<2x16x96xf32> to vector<2x16x8xf32>
    %277 = tpu.concatenate %273, %274, %275, %276 in 0 : vector<2x16x8xf32>, vector<2x16x8xf32>, vector<2x16x8xf32>, vector<2x16x8xf32> -> vector<8x16x8xf32>
    %278 = vector.extract_strided_slice %272 {offsets = [0, 0, 32], sizes = [2, 16, 8], strides = [1, 1, 1]} : vector<2x16x96xf32> to vector<2x16x8xf32>
    %279 = vector.extract_strided_slice %272 {offsets = [0, 0, 40], sizes = [2, 16, 8], strides = [1, 1, 1]} : vector<2x16x96xf32> to vector<2x16x8xf32>
    %280 = vector.extract_strided_slice %272 {offsets = [0, 0, 48], sizes = [2, 16, 8], strides = [1, 1, 1]} : vector<2x16x96xf32> to vector<2x16x8xf32>
    %281 = vector.extract_strided_slice %272 {offsets = [0, 0, 56], sizes = [2, 16, 8], strides = [1, 1, 1]} : vector<2x16x96xf32> to vector<2x16x8xf32>
    %282 = tpu.concatenate %278, %279, %280, %281 in 0 : vector<2x16x8xf32>, vector<2x16x8xf32>, vector<2x16x8xf32>, vector<2x16x8xf32> -> vector<8x16x8xf32>
    %283 = vector.extract_strided_slice %272 {offsets = [0, 0, 64], sizes = [2, 16, 8], strides = [1, 1, 1]} : vector<2x16x96xf32> to vector<2x16x8xf32>
    %284 = vector.extract_strided_slice %272 {offsets = [0, 0, 72], sizes = [2, 16, 8], strides = [1, 1, 1]} : vector<2x16x96xf32> to vector<2x16x8xf32>
    %285 = vector.extract_strided_slice %272 {offsets = [0, 0, 80], sizes = [2, 16, 8], strides = [1, 1, 1]} : vector<2x16x96xf32> to vector<2x16x8xf32>
    %286 = vector.extract_strided_slice %272 {offsets = [0, 0, 88], sizes = [2, 16, 8], strides = [1, 1, 1]} : vector<2x16x96xf32> to vector<2x16x8xf32>
    %287 = tpu.concatenate %283, %284, %285, %286 in 0 : vector<2x16x8xf32>, vector<2x16x8xf32>, vector<2x16x8xf32>, vector<2x16x8xf32> -> vector<8x16x8xf32>
    %288 = arith.truncf %277 : vector<8x16x8xf32> to vector<8x16x8xbf16>
    %289 = arith.truncf %282 : vector<8x16x8xf32> to vector<8x16x8xbf16>
    "tpu.trace_start"() <{level = 10 : i32, message = "nqe,nke->nqk"}> : () -> ()
    %cst_77 = arith.constant dense<0.000000e+00> : vector<8x16x16xf32>
    %290 = tpu.matmul %288, %289, %cst_77 {dimension_numbers = #tpu.dot_dimension_numbers<[2], [2], [1], [1], [0, 0, 0, 1, 1, 1], [0], [0]>} : vector<8x16x8xbf16>, vector<8x16x8xbf16>, vector<8x16x16xf32> -> vector<8x16x16xf32>
    "tpu.trace_stop"() : () -> ()
    %cst_78 = arith.constant 0.353553385 : f32
    %291 = vector.broadcast %cst_78 : f32 to vector<8x16x16xf32>
    %292 = arith.mulf %290, %291 : vector<8x16x16xf32>
    %293 = arith.mulf %292, %23 : vector<8x16x16xf32>
    %294 = arith.addf %293, %27 : vector<8x16x16xf32>
    %cst_79 = arith.constant dense<0xFF800000> : vector<8x16xf32>
    %295 = vector.multi_reduction <maximumf>, %294, %cst_79 [2] : vector<8x16x16xf32> to vector<8x16xf32>
    %296 = vector.shape_cast %295 : vector<8x16xf32> to vector<8x16x1xf32>
    %297 = vector.broadcast %296 : vector<8x16x1xf32> to vector<8x16x16xf32>
    %298 = arith.subf %294, %297 : vector<8x16x16xf32>
    %299 = math.exp %298 : vector<8x16x16xf32>
    %cst_80 = arith.constant dense<0.000000e+00> : vector<8x16xf32>
    %300 = vector.multi_reduction <add>, %299, %cst_80 [2] : vector<8x16x16xf32> to vector<8x16xf32>
    %301 = vector.shape_cast %300 : vector<8x16xf32> to vector<8x16x1xf32>
    %302 = tpu.reciprocal %301 {approx = true} : vector<8x16x1xf32> -> vector<8x16x1xf32>
    %303 = vector.broadcast %302 : vector<8x16x1xf32> to vector<8x16x16xf32>
    %304 = arith.mulf %299, %303 : vector<8x16x16xf32>
    %305 = arith.truncf %304 : vector<8x16x16xf32> to vector<8x16x16xbf16>
    %306 = arith.truncf %287 : vector<8x16x8xf32> to vector<8x16x8xbf16>
    "tpu.trace_start"() <{level = 10 : i32, message = "nqk,nke->nqe"}> : () -> ()
    %cst_81 = arith.constant dense<0.000000e+00> : vector<8x16x8xf32>
    %307 = tpu.matmul %305, %306, %cst_81 {dimension_numbers = #tpu.dot_dimension_numbers<[2], [1], [1], [2], [0, 0, 0, 1, 1, 2], [0], [0]>} : vector<8x16x16xbf16>, vector<8x16x8xbf16>, vector<8x16x8xf32> -> vector<8x16x8xf32>
    "tpu.trace_stop"() : () -> ()
    %308 = vector.extract_strided_slice %307 {offsets = [0, 0, 0], sizes = [2, 16, 8], strides = [1, 1, 1]} : vector<8x16x8xf32> to vector<2x16x8xf32>
    %309 = vector.shape_cast %308 : vector<2x16x8xf32> to vector<32x8xf32>
    %310 = vector.extract_strided_slice %307 {offsets = [2, 0, 0], sizes = [2, 16, 8], strides = [1, 1, 1]} : vector<8x16x8xf32> to vector<2x16x8xf32>
    %311 = vector.shape_cast %310 : vector<2x16x8xf32> to vector<32x8xf32>
    %312 = vector.extract_strided_slice %307 {offsets = [4, 0, 0], sizes = [2, 16, 8], strides = [1, 1, 1]} : vector<8x16x8xf32> to vector<2x16x8xf32>
    %313 = vector.shape_cast %312 : vector<2x16x8xf32> to vector<32x8xf32>
    %314 = vector.extract_strided_slice %307 {offsets = [6, 0, 0], sizes = [2, 16, 8], strides = [1, 1, 1]} : vector<8x16x8xf32> to vector<2x16x8xf32>
    %315 = vector.shape_cast %314 : vector<2x16x8xf32> to vector<32x8xf32>
    %316 = tpu.concatenate %309, %311, %313, %315 in 1 : vector<32x8xf32>, vector<32x8xf32>, vector<32x8xf32>, vector<32x8xf32> -> vector<32x32xf32>
    %c352 = arith.constant 352 : index
    %c0_82 = arith.constant 0 : index
    %317 = vector.load %arg3[%c352, %c0_82] : memref<864x128xbf16, #tpu.memory_space<vmem>>, vector<32x32xbf16>
    %318 = arith.truncf %316 : vector<32x32xf32> to vector<32x32xbf16>
    %cst_83 = arith.constant dense<0.000000e+00> : vector<32x32xf32>
    %319 = tpu.matmul %318, %317, %cst_83 {dimension_numbers = #tpu.dot_dimension_numbers<[1], [0], [0], [1], [0, 0, 1, 1], [], []>} : vector<32x32xbf16>, vector<32x32xbf16>, vector<32x32xf32> -> vector<32x32xf32>
    %c17 = arith.constant 17 : index
    %c0_84 = arith.constant 0 : index
    %320 = vector.load %arg4[%c17, %c0_84] : memref<43x128xf32, #tpu.memory_space<vmem>>, vector<1x32xf32>
    %321 = vector.broadcast %320 : vector<1x32xf32> to vector<32x32xf32>
    %322 = arith.addf %319, %321 : vector<32x32xf32>
    %323 = arith.addf %15, %322 : vector<32x32xf32>
    %c23 = arith.constant 23 : index
    %c0_85 = arith.constant 0 : index
    %324 = vector.load %arg4[%c23, %c0_85] : memref<43x128xf32, #tpu.memory_space<vmem>>, vector<1x32xf32>
    %c24 = arith.constant 24 : index
    %c0_86 = arith.constant 0 : index
    %325 = vector.load %arg4[%c24, %c0_86] : memref<43x128xf32, #tpu.memory_space<vmem>>, vector<1x32xf32>
    %cst_87 = arith.constant dense<0.000000e+00> : vector<32xf32>
    %326 = vector.multi_reduction <add>, %323, %cst_87 [1] : vector<32x32xf32> to vector<32xf32>
    %327 = vector.shape_cast %326 : vector<32xf32> to vector<32x1xf32>
    %cst_88 = arith.constant 3.200000e+01 : f32
    %328 = vector.broadcast %cst_88 : f32 to vector<32x1xf32>
    %329 = arith.divf %327, %328 : vector<32x1xf32>
    %330 = vector.broadcast %329 : vector<32x1xf32> to vector<32x32xf32>
    %331 = arith.subf %323, %330 : vector<32x32xf32>
    %332 = arith.mulf %331, %331 : vector<32x32xf32>
    %cst_89 = arith.constant dense<0.000000e+00> : vector<32xf32>
    %333 = vector.multi_reduction <add>, %332, %cst_89 [1] : vector<32x32xf32> to vector<32xf32>
    %334 = vector.shape_cast %333 : vector<32xf32> to vector<32x1xf32>
    %cst_90 = arith.constant 3.200000e+01 : f32
    %335 = vector.broadcast %cst_90 : f32 to vector<32x1xf32>
    %336 = arith.divf %334, %335 : vector<32x1xf32>
    %337 = vector.broadcast %329 : vector<32x1xf32> to vector<32x32xf32>
    %338 = arith.subf %323, %337 : vector<32x32xf32>
    %cst_91 = arith.constant 9.99999974E-6 : f32
    %339 = vector.broadcast %cst_91 : f32 to vector<32x1xf32>
    %340 = arith.addf %336, %339 : vector<32x1xf32>
    %341 = math.rsqrt %340 : vector<32x1xf32>
    %342 = vector.broadcast %341 : vector<32x1xf32> to vector<32x32xf32>
    %343 = arith.mulf %338, %342 : vector<32x32xf32>
    %344 = vector.broadcast %324 : vector<1x32xf32> to vector<32x32xf32>
    %345 = arith.mulf %343, %344 : vector<32x32xf32>
    %346 = vector.broadcast %325 : vector<1x32xf32> to vector<32x32xf32>
    %347 = arith.addf %345, %346 : vector<32x32xf32>
    %c384 = arith.constant 384 : index
    %c0_92 = arith.constant 0 : index
    %348 = vector.load %arg3[%c384, %c0_92] : memref<864x128xbf16, #tpu.memory_space<vmem>>, vector<32x32xbf16>
    %349 = arith.truncf %347 : vector<32x32xf32> to vector<32x32xbf16>
    %cst_93 = arith.constant dense<0.000000e+00> : vector<32x32xf32>
    %350 = tpu.matmul %349, %348, %cst_93 {dimension_numbers = #tpu.dot_dimension_numbers<[1], [0], [0], [1], [0, 0, 1, 1], [], []>} : vector<32x32xbf16>, vector<32x32xbf16>, vector<32x32xf32> -> vector<32x32xf32>
    %c18 = arith.constant 18 : index
    %c0_94 = arith.constant 0 : index
    %351 = vector.load %arg4[%c18, %c0_94] : memref<43x128xf32, #tpu.memory_space<vmem>>, vector<1x32xf32>
    %352 = vector.broadcast %351 : vector<1x32xf32> to vector<32x32xf32>
    %353 = arith.addf %350, %352 : vector<32x32xf32>
    %c416 = arith.constant 416 : index
    %c0_95 = arith.constant 0 : index
    %354 = vector.load %arg3[%c416, %c0_95] : memref<864x128xbf16, #tpu.memory_space<vmem>>, vector<32x64xbf16>
    %355 = arith.truncf %265 : vector<32x32xf32> to vector<32x32xbf16>
    %cst_96 = arith.constant dense<0.000000e+00> : vector<32x64xf32>
    %356 = tpu.matmul %355, %354, %cst_96 {dimension_numbers = #tpu.dot_dimension_numbers<[1], [0], [0], [1], [0, 0, 1, 1], [], []>} : vector<32x32xbf16>, vector<32x64xbf16>, vector<32x64xf32> -> vector<32x64xf32>
    %c19 = arith.constant 19 : index
    %c0_97 = arith.constant 0 : index
    %357 = vector.load %arg4[%c19, %c0_97] : memref<43x128xf32, #tpu.memory_space<vmem>>, vector<1x64xf32>
    %358 = vector.broadcast %357 : vector<1x64xf32> to vector<32x64xf32>
    %359 = arith.addf %356, %358 : vector<32x64xf32>
    %360 = vector.shape_cast %353 : vector<32x32xf32> to vector<2x16x32xf32>
    %361 = vector.shape_cast %359 : vector<32x64xf32> to vector<2x16x64xf32>
    %362 = vector.extract_strided_slice %360 {offsets = [0, 0, 0], sizes = [2, 16, 8], strides = [1, 1, 1]} : vector<2x16x32xf32> to vector<2x16x8xf32>
    %363 = vector.extract_strided_slice %360 {offsets = [0, 0, 8], sizes = [2, 16, 8], strides = [1, 1, 1]} : vector<2x16x32xf32> to vector<2x16x8xf32>
    %364 = vector.extract_strided_slice %360 {offsets = [0, 0, 16], sizes = [2, 16, 8], strides = [1, 1, 1]} : vector<2x16x32xf32> to vector<2x16x8xf32>
    %365 = vector.extract_strided_slice %360 {offsets = [0, 0, 24], sizes = [2, 16, 8], strides = [1, 1, 1]} : vector<2x16x32xf32> to vector<2x16x8xf32>
    %366 = tpu.concatenate %362, %363, %364, %365 in 0 : vector<2x16x8xf32>, vector<2x16x8xf32>, vector<2x16x8xf32>, vector<2x16x8xf32> -> vector<8x16x8xf32>
    %367 = vector.extract_strided_slice %361 {offsets = [0, 0, 0], sizes = [2, 16, 8], strides = [1, 1, 1]} : vector<2x16x64xf32> to vector<2x16x8xf32>
    %368 = vector.extract_strided_slice %361 {offsets = [0, 0, 8], sizes = [2, 16, 8], strides = [1, 1, 1]} : vector<2x16x64xf32> to vector<2x16x8xf32>
    %369 = vector.extract_strided_slice %361 {offsets = [0, 0, 16], sizes = [2, 16, 8], strides = [1, 1, 1]} : vector<2x16x64xf32> to vector<2x16x8xf32>
    %370 = vector.extract_strided_slice %361 {offsets = [0, 0, 24], sizes = [2, 16, 8], strides = [1, 1, 1]} : vector<2x16x64xf32> to vector<2x16x8xf32>
    %371 = tpu.concatenate %367, %368, %369, %370 in 0 : vector<2x16x8xf32>, vector<2x16x8xf32>, vector<2x16x8xf32>, vector<2x16x8xf32> -> vector<8x16x8xf32>
    %372 = vector.extract_strided_slice %361 {offsets = [0, 0, 32], sizes = [2, 16, 8], strides = [1, 1, 1]} : vector<2x16x64xf32> to vector<2x16x8xf32>
    %373 = vector.extract_strided_slice %361 {offsets = [0, 0, 40], sizes = [2, 16, 8], strides = [1, 1, 1]} : vector<2x16x64xf32> to vector<2x16x8xf32>
    %374 = vector.extract_strided_slice %361 {offsets = [0, 0, 48], sizes = [2, 16, 8], strides = [1, 1, 1]} : vector<2x16x64xf32> to vector<2x16x8xf32>
    %375 = vector.extract_strided_slice %361 {offsets = [0, 0, 56], sizes = [2, 16, 8], strides = [1, 1, 1]} : vector<2x16x64xf32> to vector<2x16x8xf32>
    %376 = tpu.concatenate %372, %373, %374, %375 in 0 : vector<2x16x8xf32>, vector<2x16x8xf32>, vector<2x16x8xf32>, vector<2x16x8xf32> -> vector<8x16x8xf32>
    %377 = arith.truncf %366 : vector<8x16x8xf32> to vector<8x16x8xbf16>
    %378 = arith.truncf %371 : vector<8x16x8xf32> to vector<8x16x8xbf16>
    "tpu.trace_start"() <{level = 10 : i32, message = "nqe,nke->nqk"}> : () -> ()
    %cst_98 = arith.constant dense<0.000000e+00> : vector<8x16x16xf32>
    %379 = tpu.matmul %377, %378, %cst_98 {dimension_numbers = #tpu.dot_dimension_numbers<[2], [2], [1], [1], [0, 0, 0, 1, 1, 1], [0], [0]>} : vector<8x16x8xbf16>, vector<8x16x8xbf16>, vector<8x16x16xf32> -> vector<8x16x16xf32>
    "tpu.trace_stop"() : () -> ()
    %cst_99 = arith.constant 0.353553385 : f32
    %380 = vector.broadcast %cst_99 : f32 to vector<8x16x16xf32>
    %381 = arith.mulf %379, %380 : vector<8x16x16xf32>
    %cst_100 = arith.constant dense<0xFF800000> : vector<8x16xf32>
    %382 = vector.multi_reduction <maximumf>, %381, %cst_100 [2] : vector<8x16x16xf32> to vector<8x16xf32>
    %383 = vector.shape_cast %382 : vector<8x16xf32> to vector<8x16x1xf32>
    %384 = vector.broadcast %383 : vector<8x16x1xf32> to vector<8x16x16xf32>
    %385 = arith.subf %381, %384 : vector<8x16x16xf32>
    %386 = math.exp %385 : vector<8x16x16xf32>
    %cst_101 = arith.constant dense<0.000000e+00> : vector<8x16xf32>
    %387 = vector.multi_reduction <add>, %386, %cst_101 [2] : vector<8x16x16xf32> to vector<8x16xf32>
    %388 = vector.shape_cast %387 : vector<8x16xf32> to vector<8x16x1xf32>
    %389 = tpu.reciprocal %388 {approx = true} : vector<8x16x1xf32> -> vector<8x16x1xf32>
    %390 = vector.broadcast %389 : vector<8x16x1xf32> to vector<8x16x16xf32>
    %391 = arith.mulf %386, %390 : vector<8x16x16xf32>
    %392 = arith.truncf %391 : vector<8x16x16xf32> to vector<8x16x16xbf16>
    %393 = arith.truncf %376 : vector<8x16x8xf32> to vector<8x16x8xbf16>
    "tpu.trace_start"() <{level = 10 : i32, message = "nqk,nke->nqe"}> : () -> ()
    %cst_102 = arith.constant dense<0.000000e+00> : vector<8x16x8xf32>
    %394 = tpu.matmul %392, %393, %cst_102 {dimension_numbers = #tpu.dot_dimension_numbers<[2], [1], [1], [2], [0, 0, 0, 1, 1, 2], [0], [0]>} : vector<8x16x16xbf16>, vector<8x16x8xbf16>, vector<8x16x8xf32> -> vector<8x16x8xf32>
    "tpu.trace_stop"() : () -> ()
    %395 = vector.extract_strided_slice %394 {offsets = [0, 0, 0], sizes = [2, 16, 8], strides = [1, 1, 1]} : vector<8x16x8xf32> to vector<2x16x8xf32>
    %396 = vector.shape_cast %395 : vector<2x16x8xf32> to vector<32x8xf32>
    %397 = vector.extract_strided_slice %394 {offsets = [2, 0, 0], sizes = [2, 16, 8], strides = [1, 1, 1]} : vector<8x16x8xf32> to vector<2x16x8xf32>
    %398 = vector.shape_cast %397 : vector<2x16x8xf32> to vector<32x8xf32>
    %399 = vector.extract_strided_slice %394 {offsets = [4, 0, 0], sizes = [2, 16, 8], strides = [1, 1, 1]} : vector<8x16x8xf32> to vector<2x16x8xf32>
    %400 = vector.shape_cast %399 : vector<2x16x8xf32> to vector<32x8xf32>
    %401 = vector.extract_strided_slice %394 {offsets = [6, 0, 0], sizes = [2, 16, 8], strides = [1, 1, 1]} : vector<8x16x8xf32> to vector<2x16x8xf32>
    %402 = vector.shape_cast %401 : vector<2x16x8xf32> to vector<32x8xf32>
    %403 = tpu.concatenate %396, %398, %400, %402 in 1 : vector<32x8xf32>, vector<32x8xf32>, vector<32x8xf32>, vector<32x8xf32> -> vector<32x32xf32>
    %c448 = arith.constant 448 : index
    %c0_103 = arith.constant 0 : index
    %404 = vector.load %arg3[%c448, %c0_103] : memref<864x128xbf16, #tpu.memory_space<vmem>>, vector<32x32xbf16>
    %405 = arith.truncf %403 : vector<32x32xf32> to vector<32x32xbf16>
    %cst_104 = arith.constant dense<0.000000e+00> : vector<32x32xf32>
    %406 = tpu.matmul %405, %404, %cst_104 {dimension_numbers = #tpu.dot_dimension_numbers<[1], [0], [0], [1], [0, 0, 1, 1], [], []>} : vector<32x32xbf16>, vector<32x32xbf16>, vector<32x32xf32> -> vector<32x32xf32>
    %c20 = arith.constant 20 : index
    %c0_105 = arith.constant 0 : index
    %407 = vector.load %arg4[%c20, %c0_105] : memref<43x128xf32, #tpu.memory_space<vmem>>, vector<1x32xf32>
    %408 = vector.broadcast %407 : vector<1x32xf32> to vector<32x32xf32>
    %409 = arith.addf %406, %408 : vector<32x32xf32>
    %410 = arith.addf %347, %409 : vector<32x32xf32>
    %c25 = arith.constant 25 : index
    %c0_106 = arith.constant 0 : index
    %411 = vector.load %arg4[%c25, %c0_106] : memref<43x128xf32, #tpu.memory_space<vmem>>, vector<1x32xf32>
    %c26 = arith.constant 26 : index
    %c0_107 = arith.constant 0 : index
    %412 = vector.load %arg4[%c26, %c0_107] : memref<43x128xf32, #tpu.memory_space<vmem>>, vector<1x32xf32>
    %cst_108 = arith.constant dense<0.000000e+00> : vector<32xf32>
    %413 = vector.multi_reduction <add>, %410, %cst_108 [1] : vector<32x32xf32> to vector<32xf32>
    %414 = vector.shape_cast %413 : vector<32xf32> to vector<32x1xf32>
    %cst_109 = arith.constant 3.200000e+01 : f32
    %415 = vector.broadcast %cst_109 : f32 to vector<32x1xf32>
    %416 = arith.divf %414, %415 : vector<32x1xf32>
    %417 = vector.broadcast %416 : vector<32x1xf32> to vector<32x32xf32>
    %418 = arith.subf %410, %417 : vector<32x32xf32>
    %419 = arith.mulf %418, %418 : vector<32x32xf32>
    %cst_110 = arith.constant dense<0.000000e+00> : vector<32xf32>
    %420 = vector.multi_reduction <add>, %419, %cst_110 [1] : vector<32x32xf32> to vector<32xf32>
    %421 = vector.shape_cast %420 : vector<32xf32> to vector<32x1xf32>
    %cst_111 = arith.constant 3.200000e+01 : f32
    %422 = vector.broadcast %cst_111 : f32 to vector<32x1xf32>
    %423 = arith.divf %421, %422 : vector<32x1xf32>
    %424 = vector.broadcast %416 : vector<32x1xf32> to vector<32x32xf32>
    %425 = arith.subf %410, %424 : vector<32x32xf32>
    %cst_112 = arith.constant 9.99999974E-6 : f32
    %426 = vector.broadcast %cst_112 : f32 to vector<32x1xf32>
    %427 = arith.addf %423, %426 : vector<32x1xf32>
    %428 = math.rsqrt %427 : vector<32x1xf32>
    %429 = vector.broadcast %428 : vector<32x1xf32> to vector<32x32xf32>
    %430 = arith.mulf %425, %429 : vector<32x32xf32>
    %431 = vector.broadcast %411 : vector<1x32xf32> to vector<32x32xf32>
    %432 = arith.mulf %430, %431 : vector<32x32xf32>
    %433 = vector.broadcast %412 : vector<1x32xf32> to vector<32x32xf32>
    %434 = arith.addf %432, %433 : vector<32x32xf32>
    %c480 = arith.constant 480 : index
    %c0_113 = arith.constant 0 : index
    %435 = vector.load %arg3[%c480, %c0_113] : memref<864x128xbf16, #tpu.memory_space<vmem>>, vector<32x64xbf16>
    %436 = arith.truncf %434 : vector<32x32xf32> to vector<32x32xbf16>
    %cst_114 = arith.constant dense<0.000000e+00> : vector<32x64xf32>
    %437 = tpu.matmul %436, %435, %cst_114 {dimension_numbers = #tpu.dot_dimension_numbers<[1], [0], [0], [1], [0, 0, 1, 1], [], []>} : vector<32x32xbf16>, vector<32x64xbf16>, vector<32x64xf32> -> vector<32x64xf32>
    %c21 = arith.constant 21 : index
    %c0_115 = arith.constant 0 : index
    %438 = vector.load %arg4[%c21, %c0_115] : memref<43x128xf32, #tpu.memory_space<vmem>>, vector<1x64xf32>
    %439 = vector.broadcast %438 : vector<1x64xf32> to vector<32x64xf32>
    %440 = arith.addf %437, %439 : vector<32x64xf32>
    %cst_116 = arith.constant 0.000000e+00 : f32
    %441 = vector.broadcast %cst_116 : f32 to vector<32x64xf32>
    %442 = arith.maximumf %440, %441 : vector<32x64xf32>
    %c512 = arith.constant 512 : index
    %c0_117 = arith.constant 0 : index
    %443 = vector.load %arg3[%c512, %c0_117] : memref<864x128xbf16, #tpu.memory_space<vmem>>, vector<64x32xbf16>
    %444 = arith.truncf %442 : vector<32x64xf32> to vector<32x64xbf16>
    %cst_118 = arith.constant dense<0.000000e+00> : vector<32x32xf32>
    %445 = tpu.matmul %444, %443, %cst_118 {dimension_numbers = #tpu.dot_dimension_numbers<[1], [0], [0], [1], [0, 0, 1, 1], [], []>} : vector<32x64xbf16>, vector<64x32xbf16>, vector<32x32xf32> -> vector<32x32xf32>
    %c22 = arith.constant 22 : index
    %c0_119 = arith.constant 0 : index
    %446 = vector.load %arg4[%c22, %c0_119] : memref<43x128xf32, #tpu.memory_space<vmem>>, vector<1x32xf32>
    %447 = vector.broadcast %446 : vector<1x32xf32> to vector<32x32xf32>
    %448 = arith.addf %445, %447 : vector<32x32xf32>
    %449 = arith.addf %434, %448 : vector<32x32xf32>
    %c27 = arith.constant 27 : index
    %c0_120 = arith.constant 0 : index
    %450 = vector.load %arg4[%c27, %c0_120] : memref<43x128xf32, #tpu.memory_space<vmem>>, vector<1x32xf32>
    %c28 = arith.constant 28 : index
    %c0_121 = arith.constant 0 : index
    %451 = vector.load %arg4[%c28, %c0_121] : memref<43x128xf32, #tpu.memory_space<vmem>>, vector<1x32xf32>
    %cst_122 = arith.constant dense<0.000000e+00> : vector<32xf32>
    %452 = vector.multi_reduction <add>, %449, %cst_122 [1] : vector<32x32xf32> to vector<32xf32>
    %453 = vector.shape_cast %452 : vector<32xf32> to vector<32x1xf32>
    %cst_123 = arith.constant 3.200000e+01 : f32
    %454 = vector.broadcast %cst_123 : f32 to vector<32x1xf32>
    %455 = arith.divf %453, %454 : vector<32x1xf32>
    %456 = vector.broadcast %455 : vector<32x1xf32> to vector<32x32xf32>
    %457 = arith.subf %449, %456 : vector<32x32xf32>
    %458 = arith.mulf %457, %457 : vector<32x32xf32>
    %cst_124 = arith.constant dense<0.000000e+00> : vector<32xf32>
    %459 = vector.multi_reduction <add>, %458, %cst_124 [1] : vector<32x32xf32> to vector<32xf32>
    %460 = vector.shape_cast %459 : vector<32xf32> to vector<32x1xf32>
    %cst_125 = arith.constant 3.200000e+01 : f32
    %461 = vector.broadcast %cst_125 : f32 to vector<32x1xf32>
    %462 = arith.divf %460, %461 : vector<32x1xf32>
    %463 = vector.broadcast %455 : vector<32x1xf32> to vector<32x32xf32>
    %464 = arith.subf %449, %463 : vector<32x32xf32>
    %cst_126 = arith.constant 9.99999974E-6 : f32
    %465 = vector.broadcast %cst_126 : f32 to vector<32x1xf32>
    %466 = arith.addf %462, %465 : vector<32x1xf32>
    %467 = math.rsqrt %466 : vector<32x1xf32>
    %468 = vector.broadcast %467 : vector<32x1xf32> to vector<32x32xf32>
    %469 = arith.mulf %464, %468 : vector<32x32xf32>
    %470 = vector.broadcast %450 : vector<1x32xf32> to vector<32x32xf32>
    %471 = arith.mulf %469, %470 : vector<32x32xf32>
    %472 = vector.broadcast %451 : vector<1x32xf32> to vector<32x32xf32>
    %473 = arith.addf %471, %472 : vector<32x32xf32>
    %c576 = arith.constant 576 : index
    %c0_127 = arith.constant 0 : index
    %474 = vector.load %arg3[%c576, %c0_127] : memref<864x128xbf16, #tpu.memory_space<vmem>>, vector<32x96xbf16>
    %475 = arith.truncf %473 : vector<32x32xf32> to vector<32x32xbf16>
    %cst_128 = arith.constant dense<0.000000e+00> : vector<32x96xf32>
    %476 = tpu.matmul %475, %474, %cst_128 {dimension_numbers = #tpu.dot_dimension_numbers<[1], [0], [0], [1], [0, 0, 1, 1], [], []>} : vector<32x32xbf16>, vector<32x96xbf16>, vector<32x96xf32> -> vector<32x96xf32>
    %c29 = arith.constant 29 : index
    %c0_129 = arith.constant 0 : index
    %477 = vector.load %arg4[%c29, %c0_129] : memref<43x128xf32, #tpu.memory_space<vmem>>, vector<1x96xf32>
    %478 = vector.broadcast %477 : vector<1x96xf32> to vector<32x96xf32>
    %479 = arith.addf %476, %478 : vector<32x96xf32>
    %480 = vector.shape_cast %479 : vector<32x96xf32> to vector<2x16x96xf32>
    %481 = vector.extract_strided_slice %480 {offsets = [0, 0, 0], sizes = [2, 16, 8], strides = [1, 1, 1]} : vector<2x16x96xf32> to vector<2x16x8xf32>
    %482 = vector.extract_strided_slice %480 {offsets = [0, 0, 8], sizes = [2, 16, 8], strides = [1, 1, 1]} : vector<2x16x96xf32> to vector<2x16x8xf32>
    %483 = vector.extract_strided_slice %480 {offsets = [0, 0, 16], sizes = [2, 16, 8], strides = [1, 1, 1]} : vector<2x16x96xf32> to vector<2x16x8xf32>
    %484 = vector.extract_strided_slice %480 {offsets = [0, 0, 24], sizes = [2, 16, 8], strides = [1, 1, 1]} : vector<2x16x96xf32> to vector<2x16x8xf32>
    %485 = tpu.concatenate %481, %482, %483, %484 in 0 : vector<2x16x8xf32>, vector<2x16x8xf32>, vector<2x16x8xf32>, vector<2x16x8xf32> -> vector<8x16x8xf32>
    %486 = vector.extract_strided_slice %480 {offsets = [0, 0, 32], sizes = [2, 16, 8], strides = [1, 1, 1]} : vector<2x16x96xf32> to vector<2x16x8xf32>
    %487 = vector.extract_strided_slice %480 {offsets = [0, 0, 40], sizes = [2, 16, 8], strides = [1, 1, 1]} : vector<2x16x96xf32> to vector<2x16x8xf32>
    %488 = vector.extract_strided_slice %480 {offsets = [0, 0, 48], sizes = [2, 16, 8], strides = [1, 1, 1]} : vector<2x16x96xf32> to vector<2x16x8xf32>
    %489 = vector.extract_strided_slice %480 {offsets = [0, 0, 56], sizes = [2, 16, 8], strides = [1, 1, 1]} : vector<2x16x96xf32> to vector<2x16x8xf32>
    %490 = tpu.concatenate %486, %487, %488, %489 in 0 : vector<2x16x8xf32>, vector<2x16x8xf32>, vector<2x16x8xf32>, vector<2x16x8xf32> -> vector<8x16x8xf32>
    %491 = vector.extract_strided_slice %480 {offsets = [0, 0, 64], sizes = [2, 16, 8], strides = [1, 1, 1]} : vector<2x16x96xf32> to vector<2x16x8xf32>
    %492 = vector.extract_strided_slice %480 {offsets = [0, 0, 72], sizes = [2, 16, 8], strides = [1, 1, 1]} : vector<2x16x96xf32> to vector<2x16x8xf32>
    %493 = vector.extract_strided_slice %480 {offsets = [0, 0, 80], sizes = [2, 16, 8], strides = [1, 1, 1]} : vector<2x16x96xf32> to vector<2x16x8xf32>
    %494 = vector.extract_strided_slice %480 {offsets = [0, 0, 88], sizes = [2, 16, 8], strides = [1, 1, 1]} : vector<2x16x96xf32> to vector<2x16x8xf32>
    %495 = tpu.concatenate %491, %492, %493, %494 in 0 : vector<2x16x8xf32>, vector<2x16x8xf32>, vector<2x16x8xf32>, vector<2x16x8xf32> -> vector<8x16x8xf32>
    %496 = arith.truncf %485 : vector<8x16x8xf32> to vector<8x16x8xbf16>
    %497 = arith.truncf %490 : vector<8x16x8xf32> to vector<8x16x8xbf16>
    "tpu.trace_start"() <{level = 10 : i32, message = "nqe,nke->nqk"}> : () -> ()
    %cst_130 = arith.constant dense<0.000000e+00> : vector<8x16x16xf32>
    %498 = tpu.matmul %496, %497, %cst_130 {dimension_numbers = #tpu.dot_dimension_numbers<[2], [2], [1], [1], [0, 0, 0, 1, 1, 1], [0], [0]>} : vector<8x16x8xbf16>, vector<8x16x8xbf16>, vector<8x16x16xf32> -> vector<8x16x16xf32>
    "tpu.trace_stop"() : () -> ()
    %cst_131 = arith.constant 0.353553385 : f32
    %499 = vector.broadcast %cst_131 : f32 to vector<8x16x16xf32>
    %500 = arith.mulf %498, %499 : vector<8x16x16xf32>
    %501 = arith.mulf %500, %23 : vector<8x16x16xf32>
    %502 = arith.addf %501, %27 : vector<8x16x16xf32>
    %cst_132 = arith.constant dense<0xFF800000> : vector<8x16xf32>
    %503 = vector.multi_reduction <maximumf>, %502, %cst_132 [2] : vector<8x16x16xf32> to vector<8x16xf32>
    %504 = vector.shape_cast %503 : vector<8x16xf32> to vector<8x16x1xf32>
    %505 = vector.broadcast %504 : vector<8x16x1xf32> to vector<8x16x16xf32>
    %506 = arith.subf %502, %505 : vector<8x16x16xf32>
    %507 = math.exp %506 : vector<8x16x16xf32>
    %cst_133 = arith.constant dense<0.000000e+00> : vector<8x16xf32>
    %508 = vector.multi_reduction <add>, %507, %cst_133 [2] : vector<8x16x16xf32> to vector<8x16xf32>
    %509 = vector.shape_cast %508 : vector<8x16xf32> to vector<8x16x1xf32>
    %510 = tpu.reciprocal %509 {approx = true} : vector<8x16x1xf32> -> vector<8x16x1xf32>
    %511 = vector.broadcast %510 : vector<8x16x1xf32> to vector<8x16x16xf32>
    %512 = arith.mulf %507, %511 : vector<8x16x16xf32>
    %513 = arith.truncf %512 : vector<8x16x16xf32> to vector<8x16x16xbf16>
    %514 = arith.truncf %495 : vector<8x16x8xf32> to vector<8x16x8xbf16>
    "tpu.trace_start"() <{level = 10 : i32, message = "nqk,nke->nqe"}> : () -> ()
    %cst_134 = arith.constant dense<0.000000e+00> : vector<8x16x8xf32>
    %515 = tpu.matmul %513, %514, %cst_134 {dimension_numbers = #tpu.dot_dimension_numbers<[2], [1], [1], [2], [0, 0, 0, 1, 1, 2], [0], [0]>} : vector<8x16x16xbf16>, vector<8x16x8xbf16>, vector<8x16x8xf32> -> vector<8x16x8xf32>
    "tpu.trace_stop"() : () -> ()
    %516 = vector.extract_strided_slice %515 {offsets = [0, 0, 0], sizes = [2, 16, 8], strides = [1, 1, 1]} : vector<8x16x8xf32> to vector<2x16x8xf32>
    %517 = vector.shape_cast %516 : vector<2x16x8xf32> to vector<32x8xf32>
    %518 = vector.extract_strided_slice %515 {offsets = [2, 0, 0], sizes = [2, 16, 8], strides = [1, 1, 1]} : vector<8x16x8xf32> to vector<2x16x8xf32>
    %519 = vector.shape_cast %518 : vector<2x16x8xf32> to vector<32x8xf32>
    %520 = vector.extract_strided_slice %515 {offsets = [4, 0, 0], sizes = [2, 16, 8], strides = [1, 1, 1]} : vector<8x16x8xf32> to vector<2x16x8xf32>
    %521 = vector.shape_cast %520 : vector<2x16x8xf32> to vector<32x8xf32>
    %522 = vector.extract_strided_slice %515 {offsets = [6, 0, 0], sizes = [2, 16, 8], strides = [1, 1, 1]} : vector<8x16x8xf32> to vector<2x16x8xf32>
    %523 = vector.shape_cast %522 : vector<2x16x8xf32> to vector<32x8xf32>
    %524 = tpu.concatenate %517, %519, %521, %523 in 1 : vector<32x8xf32>, vector<32x8xf32>, vector<32x8xf32>, vector<32x8xf32> -> vector<32x32xf32>
    %c608 = arith.constant 608 : index
    %c0_135 = arith.constant 0 : index
    %525 = vector.load %arg3[%c608, %c0_135] : memref<864x128xbf16, #tpu.memory_space<vmem>>, vector<32x32xbf16>
    %526 = arith.truncf %524 : vector<32x32xf32> to vector<32x32xbf16>
    %cst_136 = arith.constant dense<0.000000e+00> : vector<32x32xf32>
    %527 = tpu.matmul %526, %525, %cst_136 {dimension_numbers = #tpu.dot_dimension_numbers<[1], [0], [0], [1], [0, 0, 1, 1], [], []>} : vector<32x32xbf16>, vector<32x32xbf16>, vector<32x32xf32> -> vector<32x32xf32>
    %c30 = arith.constant 30 : index
    %c0_137 = arith.constant 0 : index
    %528 = vector.load %arg4[%c30, %c0_137] : memref<43x128xf32, #tpu.memory_space<vmem>>, vector<1x32xf32>
    %529 = vector.broadcast %528 : vector<1x32xf32> to vector<32x32xf32>
    %530 = arith.addf %527, %529 : vector<32x32xf32>
    %531 = arith.addf %473, %530 : vector<32x32xf32>
    %c36 = arith.constant 36 : index
    %c0_138 = arith.constant 0 : index
    %532 = vector.load %arg4[%c36, %c0_138] : memref<43x128xf32, #tpu.memory_space<vmem>>, vector<1x32xf32>
    %c37 = arith.constant 37 : index
    %c0_139 = arith.constant 0 : index
    %533 = vector.load %arg4[%c37, %c0_139] : memref<43x128xf32, #tpu.memory_space<vmem>>, vector<1x32xf32>
    %cst_140 = arith.constant dense<0.000000e+00> : vector<32xf32>
    %534 = vector.multi_reduction <add>, %531, %cst_140 [1] : vector<32x32xf32> to vector<32xf32>
    %535 = vector.shape_cast %534 : vector<32xf32> to vector<32x1xf32>
    %cst_141 = arith.constant 3.200000e+01 : f32
    %536 = vector.broadcast %cst_141 : f32 to vector<32x1xf32>
    %537 = arith.divf %535, %536 : vector<32x1xf32>
    %538 = vector.broadcast %537 : vector<32x1xf32> to vector<32x32xf32>
    %539 = arith.subf %531, %538 : vector<32x32xf32>
    %540 = arith.mulf %539, %539 : vector<32x32xf32>
    %cst_142 = arith.constant dense<0.000000e+00> : vector<32xf32>
    %541 = vector.multi_reduction <add>, %540, %cst_142 [1] : vector<32x32xf32> to vector<32xf32>
    %542 = vector.shape_cast %541 : vector<32xf32> to vector<32x1xf32>
    %cst_143 = arith.constant 3.200000e+01 : f32
    %543 = vector.broadcast %cst_143 : f32 to vector<32x1xf32>
    %544 = arith.divf %542, %543 : vector<32x1xf32>
    %545 = vector.broadcast %537 : vector<32x1xf32> to vector<32x32xf32>
    %546 = arith.subf %531, %545 : vector<32x32xf32>
    %cst_144 = arith.constant 9.99999974E-6 : f32
    %547 = vector.broadcast %cst_144 : f32 to vector<32x1xf32>
    %548 = arith.addf %544, %547 : vector<32x1xf32>
    %549 = math.rsqrt %548 : vector<32x1xf32>
    %550 = vector.broadcast %549 : vector<32x1xf32> to vector<32x32xf32>
    %551 = arith.mulf %546, %550 : vector<32x32xf32>
    %552 = vector.broadcast %532 : vector<1x32xf32> to vector<32x32xf32>
    %553 = arith.mulf %551, %552 : vector<32x32xf32>
    %554 = vector.broadcast %533 : vector<1x32xf32> to vector<32x32xf32>
    %555 = arith.addf %553, %554 : vector<32x32xf32>
    %c640 = arith.constant 640 : index
    %c0_145 = arith.constant 0 : index
    %556 = vector.load %arg3[%c640, %c0_145] : memref<864x128xbf16, #tpu.memory_space<vmem>>, vector<32x32xbf16>
    %557 = arith.truncf %555 : vector<32x32xf32> to vector<32x32xbf16>
    %cst_146 = arith.constant dense<0.000000e+00> : vector<32x32xf32>
    %558 = tpu.matmul %557, %556, %cst_146 {dimension_numbers = #tpu.dot_dimension_numbers<[1], [0], [0], [1], [0, 0, 1, 1], [], []>} : vector<32x32xbf16>, vector<32x32xbf16>, vector<32x32xf32> -> vector<32x32xf32>
    %c31 = arith.constant 31 : index
    %c0_147 = arith.constant 0 : index
    %559 = vector.load %arg4[%c31, %c0_147] : memref<43x128xf32, #tpu.memory_space<vmem>>, vector<1x32xf32>
    %560 = vector.broadcast %559 : vector<1x32xf32> to vector<32x32xf32>
    %561 = arith.addf %558, %560 : vector<32x32xf32>
    %c672 = arith.constant 672 : index
    %c0_148 = arith.constant 0 : index
    %562 = vector.load %arg3[%c672, %c0_148] : memref<864x128xbf16, #tpu.memory_space<vmem>>, vector<32x64xbf16>
    %563 = arith.truncf %265 : vector<32x32xf32> to vector<32x32xbf16>
    %cst_149 = arith.constant dense<0.000000e+00> : vector<32x64xf32>
    %564 = tpu.matmul %563, %562, %cst_149 {dimension_numbers = #tpu.dot_dimension_numbers<[1], [0], [0], [1], [0, 0, 1, 1], [], []>} : vector<32x32xbf16>, vector<32x64xbf16>, vector<32x64xf32> -> vector<32x64xf32>
    %c32_150 = arith.constant 32 : index
    %c0_151 = arith.constant 0 : index
    %565 = vector.load %arg4[%c32_150, %c0_151] : memref<43x128xf32, #tpu.memory_space<vmem>>, vector<1x64xf32>
    %566 = vector.broadcast %565 : vector<1x64xf32> to vector<32x64xf32>
    %567 = arith.addf %564, %566 : vector<32x64xf32>
    %568 = vector.shape_cast %561 : vector<32x32xf32> to vector<2x16x32xf32>
    %569 = vector.shape_cast %567 : vector<32x64xf32> to vector<2x16x64xf32>
    %570 = vector.extract_strided_slice %568 {offsets = [0, 0, 0], sizes = [2, 16, 8], strides = [1, 1, 1]} : vector<2x16x32xf32> to vector<2x16x8xf32>
    %571 = vector.extract_strided_slice %568 {offsets = [0, 0, 8], sizes = [2, 16, 8], strides = [1, 1, 1]} : vector<2x16x32xf32> to vector<2x16x8xf32>
    %572 = vector.extract_strided_slice %568 {offsets = [0, 0, 16], sizes = [2, 16, 8], strides = [1, 1, 1]} : vector<2x16x32xf32> to vector<2x16x8xf32>
    %573 = vector.extract_strided_slice %568 {offsets = [0, 0, 24], sizes = [2, 16, 8], strides = [1, 1, 1]} : vector<2x16x32xf32> to vector<2x16x8xf32>
    %574 = tpu.concatenate %570, %571, %572, %573 in 0 : vector<2x16x8xf32>, vector<2x16x8xf32>, vector<2x16x8xf32>, vector<2x16x8xf32> -> vector<8x16x8xf32>
    %575 = vector.extract_strided_slice %569 {offsets = [0, 0, 0], sizes = [2, 16, 8], strides = [1, 1, 1]} : vector<2x16x64xf32> to vector<2x16x8xf32>
    %576 = vector.extract_strided_slice %569 {offsets = [0, 0, 8], sizes = [2, 16, 8], strides = [1, 1, 1]} : vector<2x16x64xf32> to vector<2x16x8xf32>
    %577 = vector.extract_strided_slice %569 {offsets = [0, 0, 16], sizes = [2, 16, 8], strides = [1, 1, 1]} : vector<2x16x64xf32> to vector<2x16x8xf32>
    %578 = vector.extract_strided_slice %569 {offsets = [0, 0, 24], sizes = [2, 16, 8], strides = [1, 1, 1]} : vector<2x16x64xf32> to vector<2x16x8xf32>
    %579 = tpu.concatenate %575, %576, %577, %578 in 0 : vector<2x16x8xf32>, vector<2x16x8xf32>, vector<2x16x8xf32>, vector<2x16x8xf32> -> vector<8x16x8xf32>
    %580 = vector.extract_strided_slice %569 {offsets = [0, 0, 32], sizes = [2, 16, 8], strides = [1, 1, 1]} : vector<2x16x64xf32> to vector<2x16x8xf32>
    %581 = vector.extract_strided_slice %569 {offsets = [0, 0, 40], sizes = [2, 16, 8], strides = [1, 1, 1]} : vector<2x16x64xf32> to vector<2x16x8xf32>
    %582 = vector.extract_strided_slice %569 {offsets = [0, 0, 48], sizes = [2, 16, 8], strides = [1, 1, 1]} : vector<2x16x64xf32> to vector<2x16x8xf32>
    %583 = vector.extract_strided_slice %569 {offsets = [0, 0, 56], sizes = [2, 16, 8], strides = [1, 1, 1]} : vector<2x16x64xf32> to vector<2x16x8xf32>
    %584 = tpu.concatenate %580, %581, %582, %583 in 0 : vector<2x16x8xf32>, vector<2x16x8xf32>, vector<2x16x8xf32>, vector<2x16x8xf32> -> vector<8x16x8xf32>
    %585 = arith.truncf %574 : vector<8x16x8xf32> to vector<8x16x8xbf16>
    %586 = arith.truncf %579 : vector<8x16x8xf32> to vector<8x16x8xbf16>
    "tpu.trace_start"() <{level = 10 : i32, message = "nqe,nke->nqk"}> : () -> ()
    %cst_152 = arith.constant dense<0.000000e+00> : vector<8x16x16xf32>
    %587 = tpu.matmul %585, %586, %cst_152 {dimension_numbers = #tpu.dot_dimension_numbers<[2], [2], [1], [1], [0, 0, 0, 1, 1, 1], [0], [0]>} : vector<8x16x8xbf16>, vector<8x16x8xbf16>, vector<8x16x16xf32> -> vector<8x16x16xf32>
    "tpu.trace_stop"() : () -> ()
    %cst_153 = arith.constant 0.353553385 : f32
    %588 = vector.broadcast %cst_153 : f32 to vector<8x16x16xf32>
    %589 = arith.mulf %587, %588 : vector<8x16x16xf32>
    %cst_154 = arith.constant dense<0xFF800000> : vector<8x16xf32>
    %590 = vector.multi_reduction <maximumf>, %589, %cst_154 [2] : vector<8x16x16xf32> to vector<8x16xf32>
    %591 = vector.shape_cast %590 : vector<8x16xf32> to vector<8x16x1xf32>
    %592 = vector.broadcast %591 : vector<8x16x1xf32> to vector<8x16x16xf32>
    %593 = arith.subf %589, %592 : vector<8x16x16xf32>
    %594 = math.exp %593 : vector<8x16x16xf32>
    %cst_155 = arith.constant dense<0.000000e+00> : vector<8x16xf32>
    %595 = vector.multi_reduction <add>, %594, %cst_155 [2] : vector<8x16x16xf32> to vector<8x16xf32>
    %596 = vector.shape_cast %595 : vector<8x16xf32> to vector<8x16x1xf32>
    %597 = tpu.reciprocal %596 {approx = true} : vector<8x16x1xf32> -> vector<8x16x1xf32>
    %598 = vector.broadcast %597 : vector<8x16x1xf32> to vector<8x16x16xf32>
    %599 = arith.mulf %594, %598 : vector<8x16x16xf32>
    %600 = arith.truncf %599 : vector<8x16x16xf32> to vector<8x16x16xbf16>
    %601 = arith.truncf %584 : vector<8x16x8xf32> to vector<8x16x8xbf16>
    "tpu.trace_start"() <{level = 10 : i32, message = "nqk,nke->nqe"}> : () -> ()
    %cst_156 = arith.constant dense<0.000000e+00> : vector<8x16x8xf32>
    %602 = tpu.matmul %600, %601, %cst_156 {dimension_numbers = #tpu.dot_dimension_numbers<[2], [1], [1], [2], [0, 0, 0, 1, 1, 2], [0], [0]>} : vector<8x16x16xbf16>, vector<8x16x8xbf16>, vector<8x16x8xf32> -> vector<8x16x8xf32>
    "tpu.trace_stop"() : () -> ()
    %603 = vector.extract_strided_slice %602 {offsets = [0, 0, 0], sizes = [2, 16, 8], strides = [1, 1, 1]} : vector<8x16x8xf32> to vector<2x16x8xf32>
    %604 = vector.shape_cast %603 : vector<2x16x8xf32> to vector<32x8xf32>
    %605 = vector.extract_strided_slice %602 {offsets = [2, 0, 0], sizes = [2, 16, 8], strides = [1, 1, 1]} : vector<8x16x8xf32> to vector<2x16x8xf32>
    %606 = vector.shape_cast %605 : vector<2x16x8xf32> to vector<32x8xf32>
    %607 = vector.extract_strided_slice %602 {offsets = [4, 0, 0], sizes = [2, 16, 8], strides = [1, 1, 1]} : vector<8x16x8xf32> to vector<2x16x8xf32>
    %608 = vector.shape_cast %607 : vector<2x16x8xf32> to vector<32x8xf32>
    %609 = vector.extract_strided_slice %602 {offsets = [6, 0, 0], sizes = [2, 16, 8], strides = [1, 1, 1]} : vector<8x16x8xf32> to vector<2x16x8xf32>
    %610 = vector.shape_cast %609 : vector<2x16x8xf32> to vector<32x8xf32>
    %611 = tpu.concatenate %604, %606, %608, %610 in 1 : vector<32x8xf32>, vector<32x8xf32>, vector<32x8xf32>, vector<32x8xf32> -> vector<32x32xf32>
    %c704 = arith.constant 704 : index
    %c0_157 = arith.constant 0 : index
    %612 = vector.load %arg3[%c704, %c0_157] : memref<864x128xbf16, #tpu.memory_space<vmem>>, vector<32x32xbf16>
    %613 = arith.truncf %611 : vector<32x32xf32> to vector<32x32xbf16>
    %cst_158 = arith.constant dense<0.000000e+00> : vector<32x32xf32>
    %614 = tpu.matmul %613, %612, %cst_158 {dimension_numbers = #tpu.dot_dimension_numbers<[1], [0], [0], [1], [0, 0, 1, 1], [], []>} : vector<32x32xbf16>, vector<32x32xbf16>, vector<32x32xf32> -> vector<32x32xf32>
    %c33 = arith.constant 33 : index
    %c0_159 = arith.constant 0 : index
    %615 = vector.load %arg4[%c33, %c0_159] : memref<43x128xf32, #tpu.memory_space<vmem>>, vector<1x32xf32>
    %616 = vector.broadcast %615 : vector<1x32xf32> to vector<32x32xf32>
    %617 = arith.addf %614, %616 : vector<32x32xf32>
    %618 = arith.addf %555, %617 : vector<32x32xf32>
    %c38 = arith.constant 38 : index
    %c0_160 = arith.constant 0 : index
    %619 = vector.load %arg4[%c38, %c0_160] : memref<43x128xf32, #tpu.memory_space<vmem>>, vector<1x32xf32>
    %c39 = arith.constant 39 : index
    %c0_161 = arith.constant 0 : index
    %620 = vector.load %arg4[%c39, %c0_161] : memref<43x128xf32, #tpu.memory_space<vmem>>, vector<1x32xf32>
    %cst_162 = arith.constant dense<0.000000e+00> : vector<32xf32>
    %621 = vector.multi_reduction <add>, %618, %cst_162 [1] : vector<32x32xf32> to vector<32xf32>
    %622 = vector.shape_cast %621 : vector<32xf32> to vector<32x1xf32>
    %cst_163 = arith.constant 3.200000e+01 : f32
    %623 = vector.broadcast %cst_163 : f32 to vector<32x1xf32>
    %624 = arith.divf %622, %623 : vector<32x1xf32>
    %625 = vector.broadcast %624 : vector<32x1xf32> to vector<32x32xf32>
    %626 = arith.subf %618, %625 : vector<32x32xf32>
    %627 = arith.mulf %626, %626 : vector<32x32xf32>
    %cst_164 = arith.constant dense<0.000000e+00> : vector<32xf32>
    %628 = vector.multi_reduction <add>, %627, %cst_164 [1] : vector<32x32xf32> to vector<32xf32>
    %629 = vector.shape_cast %628 : vector<32xf32> to vector<32x1xf32>
    %cst_165 = arith.constant 3.200000e+01 : f32
    %630 = vector.broadcast %cst_165 : f32 to vector<32x1xf32>
    %631 = arith.divf %629, %630 : vector<32x1xf32>
    %632 = vector.broadcast %624 : vector<32x1xf32> to vector<32x32xf32>
    %633 = arith.subf %618, %632 : vector<32x32xf32>
    %cst_166 = arith.constant 9.99999974E-6 : f32
    %634 = vector.broadcast %cst_166 : f32 to vector<32x1xf32>
    %635 = arith.addf %631, %634 : vector<32x1xf32>
    %636 = math.rsqrt %635 : vector<32x1xf32>
    %637 = vector.broadcast %636 : vector<32x1xf32> to vector<32x32xf32>
    %638 = arith.mulf %633, %637 : vector<32x32xf32>
    %639 = vector.broadcast %619 : vector<1x32xf32> to vector<32x32xf32>
    %640 = arith.mulf %638, %639 : vector<32x32xf32>
    %641 = vector.broadcast %620 : vector<1x32xf32> to vector<32x32xf32>
    %642 = arith.addf %640, %641 : vector<32x32xf32>
    %c736 = arith.constant 736 : index
    %c0_167 = arith.constant 0 : index
    %643 = vector.load %arg3[%c736, %c0_167] : memref<864x128xbf16, #tpu.memory_space<vmem>>, vector<32x64xbf16>
    %644 = arith.truncf %642 : vector<32x32xf32> to vector<32x32xbf16>
    %cst_168 = arith.constant dense<0.000000e+00> : vector<32x64xf32>
    %645 = tpu.matmul %644, %643, %cst_168 {dimension_numbers = #tpu.dot_dimension_numbers<[1], [0], [0], [1], [0, 0, 1, 1], [], []>} : vector<32x32xbf16>, vector<32x64xbf16>, vector<32x64xf32> -> vector<32x64xf32>
    %c34 = arith.constant 34 : index
    %c0_169 = arith.constant 0 : index
    %646 = vector.load %arg4[%c34, %c0_169] : memref<43x128xf32, #tpu.memory_space<vmem>>, vector<1x64xf32>
    %647 = vector.broadcast %646 : vector<1x64xf32> to vector<32x64xf32>
    %648 = arith.addf %645, %647 : vector<32x64xf32>
    %cst_170 = arith.constant 0.000000e+00 : f32
    %649 = vector.broadcast %cst_170 : f32 to vector<32x64xf32>
    %650 = arith.maximumf %648, %649 : vector<32x64xf32>
    %c768 = arith.constant 768 : index
    %c0_171 = arith.constant 0 : index
    %651 = vector.load %arg3[%c768, %c0_171] : memref<864x128xbf16, #tpu.memory_space<vmem>>, vector<64x32xbf16>
    %652 = arith.truncf %650 : vector<32x64xf32> to vector<32x64xbf16>
    %cst_172 = arith.constant dense<0.000000e+00> : vector<32x32xf32>
    %653 = tpu.matmul %652, %651, %cst_172 {dimension_numbers = #tpu.dot_dimension_numbers<[1], [0], [0], [1], [0, 0, 1, 1], [], []>} : vector<32x64xbf16>, vector<64x32xbf16>, vector<32x32xf32> -> vector<32x32xf32>
    %c35 = arith.constant 35 : index
    %c0_173 = arith.constant 0 : index
    %654 = vector.load %arg4[%c35, %c0_173] : memref<43x128xf32, #tpu.memory_space<vmem>>, vector<1x32xf32>
    %655 = vector.broadcast %654 : vector<1x32xf32> to vector<32x32xf32>
    %656 = arith.addf %653, %655 : vector<32x32xf32>
    %657 = arith.addf %642, %656 : vector<32x32xf32>
    %c40 = arith.constant 40 : index
    %c0_174 = arith.constant 0 : index
    %658 = vector.load %arg4[%c40, %c0_174] : memref<43x128xf32, #tpu.memory_space<vmem>>, vector<1x32xf32>
    %c41 = arith.constant 41 : index
    %c0_175 = arith.constant 0 : index
    %659 = vector.load %arg4[%c41, %c0_175] : memref<43x128xf32, #tpu.memory_space<vmem>>, vector<1x32xf32>
    %cst_176 = arith.constant dense<0.000000e+00> : vector<32xf32>
    %660 = vector.multi_reduction <add>, %657, %cst_176 [1] : vector<32x32xf32> to vector<32xf32>
    %661 = vector.shape_cast %660 : vector<32xf32> to vector<32x1xf32>
    %cst_177 = arith.constant 3.200000e+01 : f32
    %662 = vector.broadcast %cst_177 : f32 to vector<32x1xf32>
    %663 = arith.divf %661, %662 : vector<32x1xf32>
    %664 = vector.broadcast %663 : vector<32x1xf32> to vector<32x32xf32>
    %665 = arith.subf %657, %664 : vector<32x32xf32>
    %666 = arith.mulf %665, %665 : vector<32x32xf32>
    %cst_178 = arith.constant dense<0.000000e+00> : vector<32xf32>
    %667 = vector.multi_reduction <add>, %666, %cst_178 [1] : vector<32x32xf32> to vector<32xf32>
    %668 = vector.shape_cast %667 : vector<32xf32> to vector<32x1xf32>
    %cst_179 = arith.constant 3.200000e+01 : f32
    %669 = vector.broadcast %cst_179 : f32 to vector<32x1xf32>
    %670 = arith.divf %668, %669 : vector<32x1xf32>
    %671 = vector.broadcast %663 : vector<32x1xf32> to vector<32x32xf32>
    %672 = arith.subf %657, %671 : vector<32x32xf32>
    %cst_180 = arith.constant 9.99999974E-6 : f32
    %673 = vector.broadcast %cst_180 : f32 to vector<32x1xf32>
    %674 = arith.addf %670, %673 : vector<32x1xf32>
    %675 = math.rsqrt %674 : vector<32x1xf32>
    %676 = vector.broadcast %675 : vector<32x1xf32> to vector<32x32xf32>
    %677 = arith.mulf %672, %676 : vector<32x32xf32>
    %678 = vector.broadcast %658 : vector<1x32xf32> to vector<32x32xf32>
    %679 = arith.mulf %677, %678 : vector<32x32xf32>
    %680 = vector.broadcast %659 : vector<1x32xf32> to vector<32x32xf32>
    %681 = arith.addf %679, %680 : vector<32x32xf32>
    %c832 = arith.constant 832 : index
    %c0_181 = arith.constant 0 : index
    %682 = vector.load %arg3[%c832, %c0_181] : memref<864x128xbf16, #tpu.memory_space<vmem>>, vector<32x128xbf16>
    %683 = arith.truncf %681 : vector<32x32xf32> to vector<32x32xbf16>
    %cst_182 = arith.constant dense<0.000000e+00> : vector<32x128xf32>
    %684 = tpu.matmul %683, %682, %cst_182 {dimension_numbers = #tpu.dot_dimension_numbers<[1], [0], [0], [1], [0, 0, 1, 1], [], []>} : vector<32x32xbf16>, vector<32x128xbf16>, vector<32x128xf32> -> vector<32x128xf32>
    %c42 = arith.constant 42 : index
    %c0_183 = arith.constant 0 : index
    %685 = vector.load %arg4[%c42, %c0_183] : memref<43x128xf32, #tpu.memory_space<vmem>>, vector<1x128xf32>
    %686 = vector.broadcast %685 : vector<1x128xf32> to vector<32x128xf32>
    %687 = arith.addf %684, %686 : vector<32x128xf32>
    %c0_184 = arith.constant 0 : index
    %c0_185 = arith.constant 0 : index
    %688 = vector.load %arg5[%c0_184, %c0_185] : memref<32x128xf32, #tpu.memory_space<vmem>>, vector<32x128xf32>
    tpu.vector_store %arg5[%c0_184, %c0_185], %687 {strides = array<i32>} : memref<32x128xf32, #tpu.memory_space<vmem>>, vector<32x128xf32>,
    return
  }
}

</mosaic_0001>

<bundles_post_ra>
// kernel: arc_grid_transformer_forward.1
= control target key start
LH: loop header
LB: loop body
LE: loop exit
PB: predicated region body
PF: predicated region fallthrough
CT: control target
= control target key end

     0   :  { %10 = vsyncpa [#allocation3], 0  ;;  %s14522_s0 = inlined_call_operand.vmem [shape: s32[64,1], index: 0, kind: input, shape index: {}]   ;;  %s14523_s1 = inlined_call_operand.vmem [shape: f32[32,32], index: 1, kind: input, shape index: {}]   ;;  %s14524_s2 = inlined_call_operand.hbm [shape: f32[32,32], index: 2, kind: input, shape index: {}]   ;;  %s14525_s3 = inlined_call_operand.hbm [shape: bf16[864,128], index: 3, kind: input, shape index: {}]   ;;  %s14526_s4 = inlined_call_operand.vmem [shape: f32[43,128], index: 4, kind: input, shape index: {}]   ;;  %s14527_s5 = inlined_call_operand.vmem [shape: f32[32,128], index: 5, kind: output, shape index: {}]  }
   0x1   :  { %11 = vsyncpa [#allocation5], 0  ;;  %s11948_s18 = smov [#allocation2]   ;;  %s11900_s22 = scalar_lea.hbm %s14524_s2, 512 }
   0x2   :  { %s21_s19 = sshll.u32 %s11948_s18, 4  ;;  %p11901_p0 = scmp.ne.s32.totalorder %s14524_s2, %s11900_s22  ;;  %s22_s19 = int_to_ptr.vmem [resolvable:$true] %s21_s19 }
   0x3   :  { %p11904_p1 = scmp.lt.u32.totalorder %s11900_s22, %s14524_s2 }
   0x5   :  { %p11906_p2 = pnand %p11904_p1, %p11901_p0 }
   0x7   :  { %11909 = shalt.err (!%p11906_p2)
}
   0x8   :  { %s11910_s27 = scalar_lea.vmem %s22_s19, 512  ;;  %p11915_p4 = scmp.lt.s32.totalorder %s22_s19, %s22_s19 }
   0x9   :  { %p11911_p3 = scmp.ne.s32.totalorder %s22_s19, %s11910_s27  ;;  %p11916_p5 = scmp.lt.s32.totalorder %s11910_s27, %s11910_s27 }
   0xb   :  { %p11917_p6 = por %p11916_p5, %p11915_p4 }
   0xd   :  { %p11918_p7 = pnand %p11917_p6, %p11911_p3 }
   0xf   :  { %11921 = shalt.err (!%p11918_p7)
}
  0x10   :  { %s11949_s28 = smov 128   ;;  %s11950_s29 = smov 8  }
  0x11   :  { %27 = dma.hbm_to_vmem [thread:$0]  %s14524_s2, 512, %s22_s19, [#allocation3], %s11949_s28, %s11949_s28, %s11950_s29  }
  0x12   :  { %s11951_s7 = smov [#allocation4]   ;;  %s11922_s11 = scalar_lea.hbm %s14525_s3, 6912 }
  0x13   :  { %s33_s8 = sshll.u32 %s11951_s7, 4  ;;  %p11923_p8 = scmp.ne.s32.totalorder %s14525_s3, %s11922_s11  ;;  %s34_s8 = int_to_ptr.vmem [resolvable:$true] %s33_s8 }
  0x14   :  { %p11926_p9 = scmp.lt.u32.totalorder %s11922_s11, %s14525_s3 }
  0x16   :  { %p11928_p10 = pnand %p11926_p9, %p11923_p8 }
  0x18   :  { %11931 = shalt.err (!%p11928_p10)
}
  0x19   :  { %s11932_s16 = scalar_lea.vmem %s34_s8, 6912  ;;  %p11937_p12 = scmp.lt.s32.totalorder %s34_s8, %s34_s8 }
  0x1a   :  { %p11933_p11 = scmp.ne.s32.totalorder %s34_s8, %s11932_s16  ;;  %p11938_p13 = scmp.lt.s32.totalorder %s11932_s16, %s11932_s16 }
  0x1c   :  { %p11939_p0 = por %p11938_p13, %p11937_p12 }
  0x1e   :  { %p11940_p1 = pnand %p11939_p0, %p11933_p11 }
  0x20   :  { %11943 = shalt.err (!%p11940_p1)
}
  0x21   :  { %s11952_s2 = smov 64   ;;  %s11953_s17 = smov 4  }
  0x22   :  { %39 = dma.hbm_to_vmem [thread:$0]  %s14525_s3, 6912, %s34_s8, [#allocation5], %s11952_s2, %s11952_s2, %s11953_s17  }
  0x23   :  { %11944 = dma.done.wait [#allocation3], 512  }
  0x24   :  { %11945 = vsyncadd [#allocation3], 4294966784 }
  0x25   :  { %11946 = dma.done.wait [#allocation5], 6912  }
  0x26   :  { %11947 = vsyncadd [#allocation5], 4294960384  ;;  %v11954_v0 = vmov 0   ;;  %v51_v1 = vld [vmem:[%s14522_s0 + $0x10] sm:$0xff]  ;;  %v49_v2 = vld [vmem:[%s14522_s0] sm:$0xff]  ;;  %v57_v8 = vlaneseq  ;;  %vm115_vm0 = vcmask 130048  }
  0x27   :  { %10957 = vset.pattern.permute.xlu1 %v11954_v0  ;;  %10956 = vset.pattern.permute.xlu0 %v11954_v0  ;;  %v52_v3 = vld [vmem:[%s14522_s0 + $0x18] sm:$0xff]  ;;  %v107_v4 = vld [vmem:[%s14523_s1] sm:$0xff]  ;;  %v108_v5 = vld [vmem:[%s14523_s1 + $0x8] sm:$0xff]  ;;  %v11955_v12 = vmov 0.0   ;;  %vm346_vm5 = vcmask 261120   ;;  %s11956_s9 = smov 120  }
  0x28   :  { %66 = vperm.xlu1 %10957, %v51_v1   ;;  %60 = vperm.xlu0 %10956, %v49_v2   ;;  %v50_v6 = vld [vmem:[%s14522_s0 + $0x8] sm:$0xff]  ;;  %v10933_v7 = vpack.c.bf16 %v108_v5, %v107_v4  ;;  %v12039_v9 = vand.u32 127, %v57_v8  ;;  %v11378_v19 = vld [vmem:[#allocation4] sm:$0xff]   ;;  %v114_v27 = vld [vmem:[#allocation2 + $0x18] sm:$0xff]  ;;  %s11957_s10 = smov 112   ;;  %s11958_s11 = smov 104  }
  0x29   :  { %v11379_v20 = vld [vmem:[#allocation4 + $0x8] sm:$0xff]   ;;  %v111_v22 = vld [vmem:[#allocation2] sm:$0xff]  ;;  %v113_v28 = vld [vmem:[#allocation2 + $0x10] sm:$0xff]  ;;  %vm11960_vm6 = vmmov 0   ;;  %vm453_vm11 = vcmask 64512   ;;  %s11962_s24 = smov 24  }
  0x2a   :  { %10934 = vmatprep.subr.bf16.mxu0 %v10933_v7  ;;  %v112_v21 = vld [vmem:[#allocation2 + $0x8] sm:$0xff]  ;;  %v9594_v36 = vld [vmem:[%s14526_s4] ss:$0 sm:$0xff]  ;;  %v109_v49 = vld [vmem:[%s14523_s1 + $0x10] sm:$0xff]  ;;  %vm1483_vm12 = vcmask 195584   ;;  %vm1762_vm13 = vcmask 523264  }
  0x2b   :  { %10936 = vmatpush3.bf16.msra.mxu0 %v10933_v7  ;;  %v54_v48 = vld [vmem:[%s14522_s0 + $0x28] sm:$0xff]  ;;  %v110_v50 = vld [vmem:[%s14523_s1 + $0x18] sm:$0xff]  ;;  %v53_v51 = vld [vmem:[%s14522_s0 + $0x20] sm:$0xff]  ;;  %s11959_s1 = smov 96  }
  0x2c   :  { %69 = vperm.xlu1 %10957, %v52_v3   ;;  %63 = vperm.xlu0 %10956, %v50_v6   ;;  %v10937_v52 = vpack.c.bf16 %v110_v50, %v109_v49  ;;  %v56_v53 = vld [vmem:[%s14522_s0 + $0x38] sm:$0xff]  ;;  %v55_v54 = vld [vmem:[%s14522_s0 + $0x30] sm:$0xff]  ;;  %s11961_s0 = smov 16  }
  0x2d   :  { %10157 = vmatprep.subr.bf16.mxu0 %v11378_v19 }
  0x2e   :  { %10938 = vmatprep.subr.bf16.mxu1 %v10937_v52 }
  0x2f   :  { %10940 = vmatpush3.bf16.msra.mxu1 %v10937_v52 }
  0x30   :  { %10165 = vmatprep.subr.bf16.mxu1 %v11955_v12 }
  0xa7   :  { %v67_v10 = vpop.permute.xlu1 %66  ;;  %v61_v11 = vpop.permute.xlu0 %60 }
  0xa8   :  { %vm83_vm1 = vcmp.eq.s32.totalorder %v61_v11, %v12039_v9  ;;  %vm85_vm2 = vcmp.eq.s32.totalorder %v67_v10, %v12039_v9 }
  0xa9   :  { %v9576_v13 = vsel %vm83_vm1, 1.0, %v11955_v12  ;;  %v9578_v16 = vsel %vm85_vm2, 1.0, %v11955_v12 }
  0xaa   :  { %10141 = vmatprep.mubr.msk.f32.mxu0 %vm115_vm0, %v9576_v13 }
  0xab   :  { %v70_v14 = vpop.permute.xlu1 %69  ;;  %v64_v15 = vpop.permute.xlu0 %63 }
  0xac   :  { %vm84_vm3 = vcmp.eq.s32.totalorder %v64_v15, %v12039_v9  ;;  %vm86_vm4 = vcmp.eq.s32.totalorder %v70_v14, %v12039_v9 }
  0xad   :  { %v9577_v17 = vsel %vm84_vm3, 1.0, %v11955_v12  ;;  %v9579_v18 = vsel %vm86_vm4, 1.0, %v11955_v12 }
  0xae   :  { %10142 = vmatmul.mubr.msk.f32.vlgmr.msra.gmra.mrb[0].mxu0 %vm115_vm0, %v9577_v17 }
  0xaf   :  { %10144 = vmatprep.mubr.msk.f32.mxu0 %vm115_vm0, %v9578_v16  ;;  %10158 = vmatpush3.bf16.msra.mxu0 %v11378_v19 }
  0xb0   :  { %10159 = vmatprep.subr.bf16.mxu0 %v11379_v20 }
  0xb2   :  { %10145 = vmatmul.mubr.msk.f32.gmra.mrb[2].mxu0 %vm115_vm0, %v9579_v18 }
  0xb3   :  { %10160 = vmatpush3.bf16.msra.mxu0 %v11379_v20 }
  0xb4   :  { %10171 = vmatprep.subr.bf16.mxu0 %v11955_v12 }
 0x181   :  { %v10143_v23 = vpop.f32.mrb[0].mxu0 }
 0x182   :  { %v12054_v24 = vadd.f32 %v10143_v23, %v112_v21  ;;  %v194_v25 = vpop.f32.mrb[1].mxu0 }
 0x183   :  { %v12056_v26 = vadd.f32 %v194_v25, %v111_v22 }
 0x185   :  { %v327_v29 = vpack.c.bf16 %v12054_v24, %v12056_v26  ;;  %v10146_v30 = vpop.f32.mrb[2].mxu0 }
 0x186   :  { %v12060_v31 = vadd.f32 %v10146_v30, %v114_v27  ;;  %v204_v32 = vpop.f32.mrb[3].mxu0 }
 0x187   :  { %v12062_v33 = vadd.f32 %v204_v32, %v113_v28  ;;  %10161 = vmatprep.mubr.msk.bf16.mxu0 %vm346_vm5, %v327_v29 }
 0x189   :  { %v328_v34 = vpack.c.bf16 %v12060_v31, %v12062_v33 }
 0x18b   :  { %10162 = vmatmul.mubr.msk.bf16.vlgmr.msra.gmra.mrb[4].mxu0 %vm346_vm5, %v328_v34 }
 0x18c   :  { %10173 = vmatprep.mubr.msk.bf16.mxu0 %vm11960_vm6, %v11955_v12 }
 0x25e   :  { %v10163_v35 = vpop.f32.mrb[4].mxu0 }
 0x25f   :  { %v387_v37 = vpop.f32.mrb[5].mxu0  ;;  %v396_v39 = vadd.f32 %v10163_v35, %v9594_v36 }
 0x260   :  { %v10164_v38 = vpop.f32.mrb[6].mxu0  ;;  %v388_v42 = vadd.f32 %v9594_v36, %v387_v37 }
 0x261   :  { %v399_v40 = vadd.f32 %v10164_v38, %v9594_v36  ;;  %v390_v41 = vpop.f32.mrb[7].mxu0 }
 0x262   :  { %v391_v43 = vadd.f32 %v9594_v36, %v390_v41 }
 0x263   :  { %v10963_v44 = vpack.i.bf16 %v399_v40, %v396_v39  ;;  %v12071_v45 = vpack.c.bf16 %v399_v40, %v396_v39 }
 0x264   :  { %v10958_v46 = vpack.i.bf16 %v391_v43, %v388_v42  ;;  %v12073_v47 = vpack.c.bf16 %v391_v43, %v388_v42 }
 0x265   :  { %10964 = vrot.lane.b32.xlu1 %v10963_v44, %s11956_s9 }
 0x266   :  { %10959 = vrot.lane.b32.xlu0 %v10958_v46, %s11956_s9 }
 0x269   :  { %10974 = vrot.lane.b32.xlu1 %v10963_v44, %s11957_s10 }
 0x26a   :  { %10969 = vrot.lane.b32.xlu0 %v10958_v46, %s11957_s10 }
 0x26d   :  { %10984 = vrot.lane.b32.xlu1 %v10963_v44, %s11958_s11 }
 0x26e   :  { %10979 = vrot.lane.b32.xlu0 %v10958_v46, %s11958_s11 }
 0x271   :  { %75 = vperm.xlu1 %10957, %v54_v48  }
 0x272   :  { %72 = vperm.xlu0 %10956, %v53_v51  }
 0x275   :  { %81 = vperm.xlu1 %10957, %v56_v53  }
 0x276   :  { %78 = vperm.xlu0 %10956, %v55_v54  }
 0x279   :  { %502 = vrot.lane.b32.xlu1 %v12071_v45, %s11959_s1 }
 0x27a   :  { %451 = vrot.lane.b32.xlu0 %v12073_v47, %s11959_s1 }
 0x2d7   :  { %v10965_v55 = vpop.permute.xlu1 %10964 }
 0x2d8   :  { %v10967_v56 = vunpack.i.h.bf16 %v10965_v55  ;;  %v10966_v57 = vunpack.i.l.bf16 %v10965_v55  ;;  %v10960_v58 = vpop.permute.xlu0 %10959 }
 0x2d9   :  { %v10962_v59 = vunpack.i.h.bf16 %v10960_v58  ;;  %v10961_v60 = vunpack.i.l.bf16 %v10960_v58 }
 0x2da   :  { %v12106_v61 = vpack.c.bf16 %v10967_v56, %v10966_v57 }
 0x2db   :  { %v10975_v62 = vpop.permute.xlu1 %10974  ;;  %v12108_v63 = vpack.c.bf16 %v10962_v59, %v10961_v60 }
 0x2dc   :  { %v10977_v0 = vunpack.i.h.bf16 %v10975_v62  ;;  %v10976_v1 = vunpack.i.l.bf16 %v10975_v62  ;;  %602 = vrot.lane.b32.xlu1 %v12106_v61, %s11959_s1  ;;  %v10970_v2 = vpop.permute.xlu0 %10969 }
 0x2dd   :  { %v10972_v3 = vunpack.i.h.bf16 %v10970_v2  ;;  %v10971_v4 = vunpack.i.l.bf16 %v10970_v2  ;;  %552 = vrot.lane.b32.xlu0 %v12108_v63, %s11959_s1 }
 0x2de   :  { %v12114_v5 = vpack.c.bf16 %v10977_v0, %v10976_v1 }
 0x2df   :  { %v10985_v6 = vpop.permute.xlu1 %10984  ;;  %v12116_v7 = vpack.c.bf16 %v10972_v3, %v10971_v4 }
 0x2e0   :  { %v10987_v10 = vunpack.i.h.bf16 %v10985_v6  ;;  %v10986_v11 = vunpack.i.l.bf16 %v10985_v6  ;;  %702 = vrot.lane.b32.xlu1 %v12114_v5, %s11959_s1  ;;  %v10980_v13 = vpop.permute.xlu0 %10979 }
 0x2e1   :  { %v10982_v14 = vunpack.i.h.bf16 %v10980_v13  ;;  %v10981_v15 = vunpack.i.l.bf16 %v10980_v13  ;;  %652 = vrot.lane.b32.xlu0 %v12116_v7, %s11959_s1 }
 0x2e2   :  { %v12122_v16 = vpack.c.bf16 %v10987_v10, %v10986_v11 }
 0x2e3   :  { %v12124_v17 = vpack.c.bf16 %v10982_v14, %v10981_v15 }
 0x2e4   :  { %802 = vrot.lane.b32.xlu1 %v12122_v16, %s11959_s1 }
 0x2e5   :  { %752 = vrot.lane.b32.xlu0 %v12124_v17, %s11959_s1 }
 0x2e8   :  { %1051 = vrot.lane.b32.xlu1 %v12073_v47, %s11952_s2 }
 0x2f0   :  { %v76_v18 = vpop.permute.xlu1 %75 }
 0x2f1   :  { %vm88_vm7 = vcmp.eq.s32.totalorder %v76_v18, %v12039_v9  ;;  %v73_v19 = vpop.permute.xlu0 %72 }
 0x2f2   :  { %vm87_vm8 = vcmp.eq.s32.totalorder %v73_v19, %v12039_v9  ;;  %v9581_v21 = vsel %vm88_vm7, 1.0, %v11955_v12 }
 0x2f3   :  { %v9580_v20 = vsel %vm87_vm8, 1.0, %v11955_v12 }
 0x2f4   :  { %v82_v22 = vpop.permute.xlu1 %81  ;;  %10151 = vmatprep.mubr.msk.f32.mxu1 %vm115_vm0, %v9580_v20 }
 0x2f5   :  { %vm90_vm9 = vcmp.eq.s32.totalorder %v82_v22, %v12039_v9  ;;  %10152 = vmatmul.mubr.msk.f32.vlgmr.msra.gmra.mrb[0].mxu1 %vm115_vm0, %v9581_v21  ;;  %v79_v23 = vpop.permute.xlu0 %78 }
 0x2f6   :  { %vm89_vm10 = vcmp.eq.s32.totalorder %v79_v23, %v12039_v9  ;;  %v9583_v27 = vsel %vm90_vm9, 1.0, %v11955_v12 }
 0x2f7   :  { %v9582_v25 = vsel %vm89_vm10, 1.0, %v11955_v12 }
 0x2f8   :  { %v503_v28 = vpop.permute.xlu1 %502  ;;  %10154 = vmatprep.mubr.msk.f32.mxu1 %vm115_vm0, %v9582_v25 }
 0x2f9   :  { %v508_v29 = vsel %vm453_vm11, %v503_v28, 0  ;;  %10155 = vmatmul.mubr.msk.f32.gmra.mrb[2].mxu1 %vm115_vm0, %v9583_v27  ;;  %v452_v30 = vpop.permute.xlu0 %451 }
 0x2fa   :  { %v458_v32 = vsel %vm453_vm11, %v452_v30, 0  ;;  %10172 = vmatpush3.bf16.xpose.msra.mxu0 %v508_v29  ;;  %10167 = vmatprep.mubr.msk.bf16.mxu1 %vm11960_vm6, %v11955_v12 }
 0x2fb   :  { %10166 = vmatpush3.bf16.xpose.msra.mxu1 %v458_v32  ;;  %10183 = vmatprep.subr.bf16.mxu0 %v11955_v12 }
 0x2fc   :  { %10177 = vmatprep.subr.bf16.mxu1 %v11955_v12 }
 0x301   :  { %10174 = vmatmul.mubr.msk.bf16.vlgmr.msra.gmra.mrb[8].mxu0 %vm453_vm11, %v12071_v45 }
 0x302   :  { %10168 = vmatmul.mubr.msk.bf16.vlgmr.msra.gmra.mrb[4].mxu1 %vm453_vm11, %v12073_v47  ;;  %10185 = vmatprep.mubr.msk.bf16.mxu0 %vm11960_vm6, %v11955_v12 }
 0x303   :  { %10179 = vmatprep.mubr.msk.bf16.mxu1 %vm11960_vm6, %v11955_v12 }
 0x34e   :  { %v603_v34 = vpop.permute.xlu1 %602 }
 0x34f   :  { %v608_v35 = vsel %vm453_vm11, %v603_v34, 0  ;;  %v553_v36 = vpop.permute.xlu0 %552 }
 0x350   :  { %v558_v37 = vsel %vm453_vm11, %v553_v36, 0  ;;  %10184 = vmatpush3.bf16.xpose.msra.mxu0 %v608_v35 }
 0x351   :  { %10178 = vmatpush3.bf16.xpose.msra.mxu1 %v558_v37  ;;  %10195 = vmatprep.subr.bf16.mxu0 %v11955_v12 }
 0x352   :  { %10189 = vmatprep.subr.bf16.mxu1 %v11955_v12  ;;  %v703_v38 = vpop.permute.xlu1 %702 }
 0x353   :  { %v653_v39 = vpop.permute.xlu0 %652  ;;  %v708_v40 = vsel %vm453_vm11, %v703_v38, 0 }
 0x354   :  { %v658_v41 = vsel %vm453_vm11, %v653_v39, 0 }
 0x356   :  { %v803_v42 = vpop.permute.xlu1 %802 }
 0x357   :  { %10186 = vmatmul.mubr.msk.bf16.vlgmr.msra.gmra.mrb[12].mxu0 %vm453_vm11, %v12106_v61  ;;  %v753_v43 = vpop.permute.xlu0 %752  ;;  %v808_v44 = vsel %vm453_vm11, %v803_v42, 0 }
 0x358   :  { %10180 = vmatmul.mubr.msk.bf16.vlgmr.msra.gmra.mrb[8].mxu1 %vm453_vm11, %v12108_v63  ;;  %10196 = vmatpush3.bf16.xpose.msra.mxu0 %v708_v40  ;;  %v758_v46 = vsel %vm453_vm11, %v753_v43, 0 }
 0x359   :  { %10190 = vmatpush3.bf16.xpose.msra.mxu1 %v658_v41  ;;  %10197 = vmatprep.mubr.msk.bf16.mxu0 %vm11960_vm6, %v11955_v12 }
 0x35a   :  { %10191 = vmatprep.mubr.msk.bf16.mxu1 %vm11960_vm6, %v11955_v12  ;;  %10207 = vmatprep.subr.bf16.mxu0 %v11955_v12  ;;  %v1052_v47 = vpop.permute.xlu1 %1051 }
 0x35b   :  { %10201 = vmatprep.subr.bf16.mxu1 %v11955_v12 }
 0x35f   :  { %10198 = vmatmul.mubr.msk.bf16.vlgmr.msra.gmra.mrb[16].mxu0 %vm453_vm11, %v12114_v5 }
 0x360   :  { %10192 = vmatmul.mubr.msk.bf16.vlgmr.msra.gmra.mrb[12].mxu1 %vm453_vm11, %v12116_v7  ;;  %10208 = vmatpush3.bf16.xpose.msra.mxu0 %v808_v44 }
 0x361   :  { %10202 = vmatpush3.bf16.xpose.msra.mxu1 %v758_v46  ;;  %10209 = vmatprep.mubr.msk.bf16.mxu0 %vm11960_vm6, %v11955_v12 }
 0x362   :  { %10203 = vmatprep.mubr.msk.bf16.mxu1 %vm11960_vm6, %v11955_v12  ;;  %10213 = vmatprep.subr.bf16.mxu1 %v11955_v12 }
 0x363   :  { %10219 = vmatprep.subr.bf16.mxu0 %v11955_v12 }
 0x367   :  { %10210 = vmatmul.mubr.msk.bf16.vlgmr.msra.gmra.mrb[20].mxu0 %vm453_vm11, %v12122_v16 }
 0x368   :  { %10204 = vmatmul.mubr.msk.bf16.vlgmr.msra.gmra.mrb[16].mxu1 %vm453_vm11, %v12124_v17  ;;  %10221 = vmatprep.mubr.msk.bf16.mxu0 %vm11960_vm6, %v11955_v12 }
 0x369   :  { %10214 = vmatpush3.bf16.msra.mxu1 %v1052_v47  ;;  %10215 = vmatprep.mubr.msk.bf16.mxu1 %vm11960_vm6, %v11955_v12 }
 0x36a   :  { %10225 = vmatprep.subr.bf16.mxu1 %v11955_v12 }
 0x3c8   :  { %v12195_v48 = vpop.f32.mrb[0].mxu1 }
 0x3c9   :  { %v12197_v49 = vpop.f32.mrb[1].mxu1 }
 0x3cc   :  { %v12199_v50 = vpop.f32.mrb[2].mxu1 }
 0x3cd   :  { %v12201_v51 = vpop.f32.mrb[3].mxu1 }
 0x3d4   :  { %v544_v52 = vpop.f32.mrb[8].mxu0 }
 0x3d5   :  { %v12203_v53 = vmul.f32 0.35355338, %v544_v52  ;;  %v494_v54 = vpop.f32.mrb[4].mxu1  ;;  %v10175_v55 = vpop.f32.mrb[9].mxu0 }
 0x3d6   :  { %v10169_v56 = vpop.f32.mrb[5].mxu1  ;;  %v547_v57 = vpop.f32.mrb[10].mxu0  ;;  %v12205_v58 = vmul.f32 0.35355338, %v494_v54 }
 0x3d7   :  { %v497_v59 = vpop.f32.mrb[6].mxu1  ;;  %v10176_v60 = vpop.f32.mrb[11].mxu0  ;;  %v873_v62 = vsel %vm115_vm0, %v12203_v53, -inf  ;;  %v12213_v3 = vmul.f32 0.35355338, %v547_v57 }
 0x3d8   :  { %v12209_v0 = vmul.f32 0.35355338, %v497_v59  ;;  %874 = vmax.xlane.f32.xlu0 %v873_v62  ;;  %v10170_v1 = vpop.f32.mrb[7].mxu1  ;;  %v867_v4 = vsel %vm115_vm0, %v12205_v58, -inf }
 0x3d9   :  { %v876_v6 = vsel %vm115_vm0, %v12213_v3, -inf }
 0x3da   :  { %v870_v2 = vsel %vm115_vm0, %v12209_v0, -inf }
 0x3db   :  { %871 = vmax.xlane.f32.xlu1 %v870_v2 }
 0x3dc   :  { %868 = vmax.xlane.f32.xlu0 %v867_v4 }
 0x3e0   :  { %877 = vmax.xlane.f32.xlu0 %v876_v6 }
 0x42a   :  { %v644_v10 = vpop.f32.mrb[12].mxu0 }
 0x42b   :  { %v12219_v11 = vmul.f32 0.35355338, %v644_v10  ;;  %v594_v13 = vpop.f32.mrb[8].mxu1  ;;  %v10187_v14 = vpop.f32.mrb[13].mxu0 }
 0x42c   :  { %v12221_v15 = vmul.f32 0.35355338, %v594_v13  ;;  %v10181_v18 = vpop.f32.mrb[9].mxu1  ;;  %v647_v19 = vpop.f32.mrb[14].mxu0 }
 0x42d   :  { %v12223_v20 = vmul.f32 0.35355338, %v647_v19  ;;  %v597_v21 = vpop.f32.mrb[10].mxu1  ;;  %v10188_v22 = vpop.f32.mrb[15].mxu0  ;;  %v885_v23 = vsel %vm115_vm0, %v12219_v11, -inf }
 0x42e   :  { %886 = vmax.xlane.f32.xlu1 %v885_v23  ;;  %v10182_v25 = vpop.f32.mrb[11].mxu1  ;;  %v12227_v27 = vmul.f32 0.35355338, %v597_v21  ;;  %v879_v29 = vsel %vm115_vm0, %v12221_v15, -inf }
 0x42f   :  { %v888_v28 = vsel %vm115_vm0, %v12223_v20, -inf }
 0x430   :  { %889 = vmax.xlane.f32.xlu0 %v888_v28  ;;  %v882_v36 = vsel %vm115_vm0, %v12227_v27, -inf }
 0x432   :  { %v744_v30 = vpop.f32.mrb[16].mxu0  ;;  %880 = vmax.xlane.f32.xlu1 %v879_v29 }
 0x433   :  { %v12233_v32 = vmul.f32 0.35355338, %v744_v30  ;;  %v694_v34 = vpop.f32.mrb[12].mxu1  ;;  %v10199_v35 = vpop.f32.mrb[17].mxu0 }
 0x434   :  { %v12237_v37 = vmul.f32 0.35355338, %v694_v34  ;;  %v747_v38 = vpop.f32.mrb[18].mxu0  ;;  %883 = vmax.xlane.f32.xlu0 %v882_v36  ;;  %v10193_v39 = vpop.f32.mrb[13].mxu1 }
 0x435   :  { %v12239_v40 = vmul.f32 0.35355338, %v747_v38  ;;  %v697_v41 = vpop.f32.mrb[14].mxu1  ;;  %v10200_v42 = vpop.f32.mrb[19].mxu0  ;;  %v897_v43 = vsel %vm115_vm0, %v12233_v32, -inf }
 0x436   :  { %898 = vmax.xlane.f32.xlu1 %v897_v43  ;;  %v10194_v44 = vpop.f32.mrb[15].mxu1  ;;  %v12243_v46 = vmul.f32 0.35355338, %v697_v41  ;;  %v891_v52 = vsel %vm115_vm0, %v12237_v37, -inf }
 0x437   :  { %v900_v47 = vsel %vm115_vm0, %v12239_v40, -inf }
 0x438   :  { %901 = vmax.xlane.f32.xlu0 %v900_v47  ;;  %v894_v59 = vsel %vm115_vm0, %v12243_v46, -inf }
 0x43a   :  { %v844_v54 = vpop.f32.mrb[20].mxu0  ;;  %892 = vmax.xlane.f32.xlu1 %v891_v52 }
 0x43b   :  { %v12249_v55 = vmul.f32 0.35355338, %v844_v54  ;;  %v794_v56 = vpop.f32.mrb[16].mxu1  ;;  %v10211_v57 = vpop.f32.mrb[21].mxu0 }
 0x43c   :  { %v12253_v60 = vmul.f32 0.35355338, %v794_v56  ;;  %v847_v62 = vpop.f32.mrb[22].mxu0  ;;  %895 = vmax.xlane.f32.xlu0 %v894_v59  ;;  %v10205_v1 = vpop.f32.mrb[17].mxu1 }
 0x43d   :  { %v12255_v2 = vmul.f32 0.35355338, %v847_v62  ;;  %v797_v4 = vpop.f32.mrb[18].mxu1  ;;  %v10212_v6 = vpop.f32.mrb[23].mxu0  ;;  %v909_v10 = vsel %vm115_vm0, %v12249_v55, -inf }
 0x43e   :  { %910 = vmax.xlane.f32.xlu1 %v909_v10  ;;  %v10206_v13 = vpop.f32.mrb[19].mxu1  ;;  %v12259_v14 = vmul.f32 0.35355338, %v797_v4  ;;  %v903_v19 = vsel %vm115_vm0, %v12253_v60, -inf }
 0x43f   :  { %v912_v18 = vsel %vm115_vm0, %v12255_v2, -inf }
 0x440   :  { %913 = vmax.xlane.f32.xlu0 %v912_v18  ;;  %v906_v21 = vsel %vm115_vm0, %v12259_v14, -inf }
 0x442   :  { %904 = vmax.xlane.f32.xlu1 %v903_v19 }
 0x444   :  { %907 = vmax.xlane.f32.xlu0 %v906_v21 }
 0x453   :  { %1145 = vrot.lane.b32.xlu1 %v12108_v63, %s11952_s2 }
 0x457   :  { %1192 = vrot.lane.b32.xlu1 %v12106_v61, %s11952_s2 }
 0x45a   :  { %1098 = vrot.lane.b32.xlu0 %v12071_v45, %s11952_s2 }
 0x45b   :  { %1286 = vrot.lane.b32.xlu1 %v12114_v5, %s11952_s2 }
 0x45e   :  { %1239 = vrot.lane.b32.xlu0 %v12116_v7, %s11952_s2 }
 0x465   :  { %v875_v22 = vpop.xlane.xlu0 %874 }
 0x466   :  { %v917_v23 = vsub.f32 %v12203_v53, %v875_v22 }
 0x468   :  { %v872_v25 = vpop.xlane.xlu1 %871  ;;  %v935_v63 = vmul.f32 1.442695, %v917_v23 }
 0x469   :  { %v869_v28 = vpop.xlane.xlu0 %868  ;;  %v916_v29 = vsub.f32 %v12209_v0, %v872_v25 }
 0x46a   :  { %v915_v30 = vsub.f32 %v12205_v58, %v869_v28  ;;  %11432 = vpow2.f32 %v935_v63 }
 0x46b   :  { %v933_v45 = vmul.f32 1.442695, %v916_v29 }
 0x46c   :  { %v931_v5 = vmul.f32 1.442695, %v915_v30 }
 0x46d   :  { %v878_v61 = vpop.xlane.xlu0 %877 }
 0x46e   :  { %v918_v34 = vsub.f32 %v12213_v3, %v878_v61 }
 0x470   :  { %v937_v35 = vmul.f32 1.442695, %v918_v34 }
 0x472   :  { %11434 = vpow2.f32 %v937_v35 }
 0x473   :  { %11436 = vpow2.f32 %v933_v45 }
 0x474   :  { %11438 = vpow2.f32 %v931_v5  ;;  %v12281_v7 = vpop.eup %11432 }
 0x475   :  { %v969_v58 = vsel %vm115_vm0, %v12281_v7, 0.0 }
 0x47c   :  { %v12283_v53 = vpop.eup %11434 }
 0x47d   :  { %v972_v0 = vsel %vm115_vm0, %v12283_v53, 0.0  ;;  %v12287_v36 = vpop.eup %11436 }
 0x47e   :  { %973 = vadd.xlane.f32.xlu0 %v972_v0  ;;  %v12291_v3 = vpop.eup %11438  ;;  %v966_v38 = vsel %vm115_vm0, %v12287_v36, 0.0 }
 0x47f   :  { %970 = vadd.xlane.f32.xlu1 %v969_v58  ;;  %v963_v39 = vsel %vm115_vm0, %v12291_v3, 0.0 }
 0x482   :  { %967 = vadd.xlane.f32.xlu0 %v966_v38 }
 0x483   :  { %964 = vadd.xlane.f32.xlu1 %v963_v39 }
 0x4bb   :  { %v887_v41 = vpop.xlane.xlu1 %886 }
 0x4bc   :  { %v921_v42 = vsub.f32 %v12219_v11, %v887_v41 }
 0x4bd   :  { %v890_v43 = vpop.xlane.xlu0 %889 }
 0x4be   :  { %v943_v44 = vmul.f32 1.442695, %v921_v42  ;;  %v922_v47 = vsub.f32 %v12223_v20, %v890_v43 }
 0x4bf   :  { %v881_v52 = vpop.xlane.xlu1 %880 }
 0x4c0   :  { %11440 = vpow2.f32 %v943_v44  ;;  %v945_v54 = vmul.f32 1.442695, %v922_v47  ;;  %v919_v56 = vsub.f32 %v12221_v15, %v881_v52 }
 0x4c1   :  { %v884_v57 = vpop.xlane.xlu0 %883 }
 0x4c2   :  { %11442 = vpow2.f32 %v945_v54  ;;  %v939_v59 = vmul.f32 1.442695, %v919_v56  ;;  %v920_v62 = vsub.f32 %v12227_v27, %v884_v57 }
 0x4c3   :  { %v899_v1 = vpop.xlane.xlu1 %898 }
 0x4c4   :  { %11444 = vpow2.f32 %v939_v59  ;;  %v941_v4 = vmul.f32 1.442695, %v920_v62  ;;  %v925_v6 = vsub.f32 %v12233_v32, %v899_v1 }
 0x4c5   :  { %v902_v11 = vpop.xlane.xlu0 %901 }
 0x4c6   :  { %11446 = vpow2.f32 %v941_v4  ;;  %v951_v10 = vmul.f32 1.442695, %v925_v6  ;;  %v926_v20 = vsub.f32 %v12239_v40, %v902_v11 }
 0x4c7   :  { %v893_v13 = vpop.xlane.xlu1 %892 }
 0x4c8   :  { %11448 = vpow2.f32 %v951_v10  ;;  %v953_v18 = vmul.f32 1.442695, %v926_v20  ;;  %v923_v15 = vsub.f32 %v12237_v37, %v893_v13 }
 0x4c9   :  { %v896_v19 = vpop.xlane.xlu0 %895 }
 0x4ca   :  { %v12304_v21 = vpop.eup %11440  ;;  %11450 = vpow2.f32 %v953_v18  ;;  %v947_v27 = vmul.f32 1.442695, %v923_v15  ;;  %v924_v22 = vsub.f32 %v12243_v46, %v896_v19 }
 0x4cb   :  { %v911_v23 = vpop.xlane.xlu1 %910  ;;  %v981_v32 = vsel %vm115_vm0, %v12304_v21, 0.0 }
 0x4cc   :  { %v12309_v25 = vpop.eup %11442  ;;  %11452 = vpow2.f32 %v947_v27  ;;  %v949_v40 = vmul.f32 1.442695, %v924_v22  ;;  %v929_v28 = vsub.f32 %v12249_v55, %v911_v23  ;;  %982 = vadd.xlane.f32.xlu1 %v981_v32 }
 0x4cd   :  { %v914_v29 = vpop.xlane.xlu0 %913  ;;  %v984_v37 = vsel %vm115_vm0, %v12309_v25, 0.0 }
 0x4ce   :  { %v12314_v63 = vpop.eup %11444  ;;  %11454 = vpow2.f32 %v949_v40  ;;  %v959_v30 = vmul.f32 1.442695, %v929_v28  ;;  %v930_v46 = vsub.f32 %v12255_v2, %v914_v29  ;;  %985 = vadd.xlane.f32.xlu0 %v984_v37 }
 0x4cf   :  { %v905_v61 = vpop.xlane.xlu1 %904  ;;  %v975_v34 = vsel %vm115_vm0, %v12314_v63, 0.0 }
 0x4d0   :  { %v12319_v45 = vpop.eup %11446  ;;  %11456 = vpow2.f32 %v959_v30  ;;  %v961_v55 = vmul.f32 1.442695, %v930_v46  ;;  %v927_v35 = vsub.f32 %v12253_v60, %v905_v61  ;;  %976 = vadd.xlane.f32.xlu1 %v975_v34 }
 0x4d1   :  { %v908_v5 = vpop.xlane.xlu0 %907  ;;  %v978_v0 = vsel %vm115_vm0, %v12319_v45, 0.0 }
 0x4d2   :  { %v12324_v58 = vpop.eup %11448  ;;  %11458 = vpow2.f32 %v961_v55  ;;  %v955_v2 = vmul.f32 1.442695, %v927_v35  ;;  %v928_v38 = vsub.f32 %v12259_v14, %v908_v5  ;;  %979 = vadd.xlane.f32.xlu0 %v978_v0 }
 0x4d3   :  { %v993_v39 = vsel %vm115_vm0, %v12324_v58, 0.0  ;;  %v1146_v11 = vpop.permute.xlu1 %1145 }
 0x4d4   :  { %v12329_v41 = vpop.eup %11450  ;;  %11460 = vpow2.f32 %v955_v2  ;;  %v957_v42 = vmul.f32 1.442695, %v928_v38  ;;  %994 = vadd.xlane.f32.xlu1 %v993_v39 }
 0x4d5   :  { %v1099_v60 = vpop.permute.xlu0 %1098  ;;  %v996_v43 = vsel %vm115_vm0, %v12329_v41, 0.0 }
 0x4d6   :  { %v12333_v44 = vpop.eup %11452  ;;  %11462 = vpow2.f32 %v957_v42  ;;  %997 = vadd.xlane.f32.xlu0 %v996_v43  ;;  %10220 = vmatpush3.bf16.msra.mxu0 %v1099_v60 }
 0x4d7   :  { %v987_v14 = vsel %vm115_vm0, %v12333_v44, 0.0  ;;  %10231 = vmatprep.subr.bf16.mxu0 %v11955_v12  ;;  %v1193_v10 = vpop.permute.xlu1 %1192 }
 0x4d8   :  { %v12338_v47 = vpop.eup %11454  ;;  %988 = vadd.xlane.f32.xlu1 %v987_v14 }
 0x4d9   :  { %v990_v52 = vsel %vm115_vm0, %v12338_v47, 0.0  ;;  %v12362_v20 = vpop.permute.xlu0 %1239 }
 0x4da   :  { %v12342_v54 = vpop.eup %11456  ;;  %991 = vadd.xlane.f32.xlu0 %v990_v52 }
 0x4db   :  { %v1005_v56 = vsel %vm115_vm0, %v12342_v54, 0.0  ;;  %v1287_v13 = vpop.permute.xlu1 %1286 }
 0x4dc   :  { %v12346_v57 = vpop.eup %11458  ;;  %1006 = vadd.xlane.f32.xlu1 %v1005_v56 }
 0x4dd   :  { %v1008_v59 = vsel %vm115_vm0, %v12346_v57, 0.0 }
 0x4de   :  { %v12350_v62 = vpop.eup %11460  ;;  %1009 = vadd.xlane.f32.xlu0 %v1008_v59 }
 0x4df   :  { %v999_v1 = vsel %vm115_vm0, %v12350_v62, 0.0 }
 0x4e0   :  { %v12354_v4 = vpop.eup %11462  ;;  %1000 = vadd.xlane.f32.xlu1 %v999_v1 }
 0x4e1   :  { %v1002_v6 = vsel %vm115_vm0, %v12354_v4, 0.0 }
 0x4e2   :  { %1003 = vadd.xlane.f32.xlu0 %v1002_v6 }
 0x4f1   :  { %1380 = vrot.lane.b32.xlu1 %v12122_v16, %s11952_s2 }
 0x4f8   :  { %1333 = vrot.lane.b32.xlu0 %v12124_v17, %s11952_s2 }
 0x50b   :  { %v974_v18 = vpop.xlane.xlu0 %973 }
 0x50c   :  { %11464 = vrcp.f32 %v974_v18  ;;  %v971_v15 = vpop.xlane.xlu1 %970 }
 0x50d   :  { %11466 = vrcp.f32 %v971_v15 }
 0x50f   :  { %v968_v19 = vpop.xlane.xlu0 %967 }
 0x510   :  { %11468 = vrcp.f32 %v968_v19  ;;  %v965_v27 = vpop.xlane.xlu1 %964 }
 0x511   :  { %11470 = vrcp.f32 %v965_v27 }
 0x516   :  { %v11465_v22 = vpop.eup %11464 }
 0x517   :  { %v11467_v23 = vpop.eup %11466  ;;  %v1030_v16 = vmul.f32 %v11465_v22, %v12283_v53 }
 0x518   :  { %v1029_v32 = vmul.f32 %v11467_v23, %v12281_v7 }
 0x51a   :  { %v11469_v17 = vpop.eup %11468  ;;  %v1044_v40 = vpack.c.bf16 %v1030_v16, %v1029_v32 }
 0x51b   :  { %v11471_v28 = vpop.eup %11470  ;;  %v1028_v29 = vmul.f32 %v11469_v17, %v12287_v36 }
 0x51c   :  { %v1027_v37 = vmul.f32 %v11471_v28, %v12291_v3  ;;  %10222 = vmatmul.mubr.msk.bf16.vlgmr.msra.gmra.mrb[24].mxu0 %vm115_vm0, %v1044_v40 }
 0x51d   :  { %10232 = vmatpush3.bf16.msra.mxu0 %v1193_v10  ;;  %10233 = vmatprep.mubr.msk.bf16.mxu0 %vm11960_vm6, %v11955_v12 }
 0x51e   :  { %v1043_v30 = vpack.c.bf16 %v1028_v29, %v1027_v37  ;;  %10243 = vmatprep.subr.bf16.mxu0 %v11955_v12 }
 0x520   :  { %10216 = vmatmul.mubr.msk.bf16.vlgmr.msra.gmra.mrb[20].mxu1 %vm115_vm0, %v1043_v30 }
 0x521   :  { %10226 = vmatpush3.bf16.msra.mxu1 %v1146_v11  ;;  %10227 = vmatprep.mubr.msk.bf16.mxu1 %vm11960_vm6, %v11955_v12 }
 0x522   :  { %10237 = vmatprep.subr.bf16.mxu1 %v11955_v12 }
 0x559   :  { %v983_v7 = vpop.xlane.xlu1 %982 }
 0x55a   :  { %11472 = vrcp.f32 %v983_v7 }
 0x55b   :  { %v986_v53 = vpop.xlane.xlu0 %985 }
 0x55c   :  { %11474 = vrcp.f32 %v986_v53 }
 0x55d   :  { %v977_v36 = vpop.xlane.xlu1 %976 }
 0x55e   :  { %11476 = vrcp.f32 %v977_v36 }
 0x55f   :  { %v980_v3 = vpop.xlane.xlu0 %979 }
 0x560   :  { %11478 = vrcp.f32 %v980_v3 }
 0x561   :  { %v995_v46 = vpop.xlane.xlu1 %994 }
 0x562   :  { %11480 = vrcp.f32 %v995_v46 }
 0x563   :  { %v998_v61 = vpop.xlane.xlu0 %997 }
 0x564   :  { %v11473_v34 = vpop.eup %11472  ;;  %11482 = vrcp.f32 %v998_v61 }
 0x565   :  { %v989_v55 = vpop.xlane.xlu1 %988  ;;  %v1033_v5 = vmul.f32 %v11473_v34, %v12304_v21 }
 0x566   :  { %v11475_v35 = vpop.eup %11474  ;;  %11484 = vrcp.f32 %v989_v55 }
 0x567   :  { %v1034_v0 = vmul.f32 %v11475_v35, %v12309_v25  ;;  %v992_v2 = vpop.xlane.xlu0 %991 }
 0x568   :  { %v11477_v38 = vpop.eup %11476  ;;  %11486 = vrcp.f32 %v992_v2  ;;  %v11380_v2 = vld [vmem:[#allocation4 + $0x10] sm:$0xff]  }
 0x569   :  { %v1007_v39 = vpop.xlane.xlu1 %1006  ;;  %v1046_v42 = vpack.c.bf16 %v1034_v0, %v1033_v5  ;;  %v1031_v43 = vmul.f32 %v11477_v38, %v12314_v63 }
 0x56a   :  { %v11479_v60 = vpop.eup %11478  ;;  %11488 = vrcp.f32 %v1007_v39 }
 0x56b   :  { %v1032_v14 = vmul.f32 %v11479_v60, %v12319_v45  ;;  %10234 = vmatmul.mubr.msk.bf16.vlgmr.msra.gmra.mrb[28].mxu0 %vm115_vm0, %v1046_v42  ;;  %v1010_v52 = vpop.xlane.xlu0 %1009 }
 0x56c   :  { %v11481_v56 = vpop.eup %11480  ;;  %10244 = vmatpush3.bf16.msra.mxu0 %v1287_v13  ;;  %11490 = vrcp.f32 %v1010_v52  ;;  %10245 = vmatprep.mubr.msk.bf16.mxu0 %vm11960_vm6, %v11955_v12 }
 0x56d   :  { %v1001_v21 = vpop.xlane.xlu1 %1000  ;;  %v1045_v25 = vpack.c.bf16 %v1032_v14, %v1031_v43  ;;  %10255 = vmatprep.subr.bf16.mxu0 %v11955_v12  ;;  %v1037_v1 = vmul.f32 %v11481_v56, %v12324_v58  ;;  %v11381_v14 = vld [vmem:[#allocation4 + $0x18] sm:$0xff]  }
 0x56e   :  { %v11483_v59 = vpop.eup %11482  ;;  %11492 = vrcp.f32 %v1001_v21 }
 0x56f   :  { %v1038_v63 = vmul.f32 %v11483_v59, %v12329_v41  ;;  %10228 = vmatmul.mubr.msk.bf16.vlgmr.msra.gmra.mrb[24].mxu1 %vm115_vm0, %v1045_v25  ;;  %v1004_v45 = vpop.xlane.xlu0 %1003 }
 0x570   :  { %v11485_v6 = vpop.eup %11484  ;;  %10238 = vmatpush3.bf16.msra.mxu1 %v12362_v20  ;;  %11494 = vrcp.f32 %v1004_v45  ;;  %10239 = vmatprep.mubr.msk.bf16.mxu1 %vm11960_vm6, %v11955_v12 }
 0x571   :  { %v1381_v11 = vpop.permute.xlu1 %1380  ;;  %v1048_v10 = vpack.c.bf16 %v1038_v63, %v1037_v1  ;;  %10249 = vmatprep.subr.bf16.mxu1 %v11955_v12  ;;  %v1035_v18 = vmul.f32 %v11485_v6, %v12333_v44 }
 0x572   :  { %v11487_v13 = vpop.eup %11486 }
 0x573   :  { %v1036_v58 = vmul.f32 %v11487_v13, %v12338_v47  ;;  %10246 = vmatmul.mubr.msk.bf16.vlgmr.msra.gmra.mrb[32].mxu0 %vm115_vm0, %v1048_v10  ;;  %v1334_v22 = vpop.permute.xlu0 %1333 }
 0x574   :  { %v11489_v41 = vpop.eup %11488  ;;  %10256 = vmatpush3.bf16.msra.mxu0 %v1381_v11  ;;  %10257 = vmatprep.mubr.msk.bf16.mxu0 %vm11960_vm6, %v11955_v12 }
 0x575   :  { %v1047_v20 = vpack.c.bf16 %v1036_v58, %v1035_v18  ;;  %v1041_v19 = vmul.f32 %v11489_v41, %v12342_v54 }
 0x576   :  { %v11491_v15 = vpop.eup %11490 }
 0x577   :  { %v1042_v27 = vmul.f32 %v11491_v15, %v12346_v57  ;;  %10240 = vmatmul.mubr.msk.bf16.vlgmr.msra.gmra.mrb[28].mxu1 %vm115_vm0, %v1047_v20 }
 0x578   :  { %v11493_v23 = vpop.eup %11492  ;;  %10250 = vmatpush3.bf16.msra.mxu1 %v1334_v22  ;;  %10251 = vmatprep.mubr.msk.bf16.mxu1 %vm11960_vm6, %v11955_v12 }
 0x579   :  { %v1050_v44 = vpack.c.bf16 %v1042_v27, %v1041_v19  ;;  %v1039_v16 = vmul.f32 %v11493_v23, %v12350_v62  ;;  %10261 = vmatprep.subr.bf16.mxu1 %v11380_v2 }
 0x57a   :  { %v11495_v47 = vpop.eup %11494 }
 0x57b   :  { %v1040_v32 = vmul.f32 %v11495_v47, %v12354_v4  ;;  %10258 = vmatmul.mubr.msk.bf16.vlgmr.msra.gmra.mrb[36].mxu0 %vm115_vm0, %v1050_v44 }
 0x57d   :  { %v1049_v17 = vpack.c.bf16 %v1040_v32, %v1039_v16 }
 0x57f   :  { %10252 = vmatmul.mubr.msk.bf16.vlgmr.msra.gmra.mrb[32].mxu1 %vm115_vm0, %v1049_v17 }
 0x580   :  { %10262 = vmatpush3.bf16.msra.mxu1 %v11380_v2 }
 0x581   :  { %10263 = vmatprep.subr.bf16.mxu1 %v11381_v14 }
 0x584   :  { %10264 = vmatpush3.bf16.msra.mxu1 %v11381_v14 }
 0x5ef   :  { %v1138_v54 = vpop.f32.mrb[24].mxu0 }
 0x5f0   :  { %v10223_v57 = vpop.f32.mrb[25].mxu0 }
 0x5f1   :  { %v1141_v40 = vpop.f32.mrb[26].mxu0 }
 0x5f2   :  { %v10224_v28 = vpop.f32.mrb[27].mxu0 }
 0x5f3   :  { %v12405_v29 = vpop.f32.mrb[20].mxu1 }
 0x5f4   :  { %v10217_v37 = vpop.f32.mrb[21].mxu1 }
 0x5f5   :  { %v12407_v30 = vpop.f32.mrb[22].mxu1 }
 0x5f6   :  { %v10218_v7 = vpop.f32.mrb[23].mxu1 }
 0x63e   :  { %v1232_v53 = vpop.f32.mrb[28].mxu0 }
 0x63f   :  { %v10235_v36 = vpop.f32.mrb[29].mxu0 }
 0x640   :  { %v1235_v62 = vpop.f32.mrb[30].mxu0 }
 0x641   :  { %v10988_v3 = vpack.i.bf16 %v1235_v62, %v1232_v53  ;;  %v10236_v4 = vpop.f32.mrb[31].mxu0 }
 0x642   :  { %v1185_v46 = vpop.f32.mrb[24].mxu1 }
 0x643   :  { %10989 = vrot.lane.b32.xlu1 %v10988_v3, %s11950_s29  ;;  %v10229_v61 = vpop.f32.mrb[25].mxu1 }
 0x644   :  { %v1188_v34 = vpop.f32.mrb[26].mxu1 }
 0x645   :  { %v10993_v55 = vpack.i.bf16 %v1188_v34, %v1185_v46  ;;  %v10230_v35 = vpop.f32.mrb[27].mxu1 }
 0x646   :  { %v1326_v5 = vpop.f32.mrb[32].mxu0 }
 0x647   :  { %10994 = vrot.lane.b32.xlu0 %v10993_v55, %s11950_s29  ;;  %v10247_v0 = vpop.f32.mrb[33].mxu0 }
 0x648   :  { %v1329_v38 = vpop.f32.mrb[34].mxu0 }
 0x649   :  { %v10998_v39 = vpack.i.bf16 %v1329_v38, %v1326_v5  ;;  %v10248_v42 = vpop.f32.mrb[35].mxu0 }
 0x64a   :  { %v1279_v60 = vpop.f32.mrb[28].mxu1 }
 0x64b   :  { %10999 = vrot.lane.b32.xlu1 %v10998_v39, %s11961_s0  ;;  %v10241_v43 = vpop.f32.mrb[29].mxu1 }
 0x64c   :  { %v1282_v52 = vpop.f32.mrb[30].mxu1 }
 0x64d   :  { %v11003_v56 = vpack.i.bf16 %v1282_v52, %v1279_v60  ;;  %v10242_v21 = vpop.f32.mrb[31].mxu1 }
 0x64e   :  { %v1420_v25 = vpop.f32.mrb[36].mxu0 }
 0x64f   :  { %11004 = vrot.lane.b32.xlu0 %v11003_v56, %s11961_s0  ;;  %v10259_v59 = vpop.f32.mrb[37].mxu0 }
 0x650   :  { %v1423_v1 = vpop.f32.mrb[38].mxu0 }
 0x651   :  { %v11013_v63 = vpack.i.bf16 %v1423_v1, %v1420_v25  ;;  %v10260_v45 = vpop.f32.mrb[39].mxu0 }
 0x652   :  { %v1373_v6 = vpop.f32.mrb[32].mxu1 }
 0x653   :  { %11014 = vrot.lane.b32.xlu1 %v11013_v63, %s11962_s24  ;;  %v10253_v11 = vpop.f32.mrb[33].mxu1 }
 0x654   :  { %v1376_v10 = vpop.f32.mrb[34].mxu1 }
 0x655   :  { %v11008_v13 = vpack.i.bf16 %v1376_v10, %v1373_v6  ;;  %v10254_v18 = vpop.f32.mrb[35].mxu1 }
 0x657   :  { %11009 = vrot.lane.b32.xlu0 %v11008_v13, %s11962_s24 }
 0x6b5   :  { %v10990_v58 = vpop.permute.xlu1 %10989 }
 0x6b6   :  { %v10992_v15 = vunpack.i.h.bf16 %v10990_v58  ;;  %v10991_v19 = vunpack.i.l.bf16 %v10990_v58 }
 0x6b8   :  { %v1478_v44 = vsel %vm453_vm11, %v1141_v40, %v10992_v15  ;;  %v1477_v47 = vsel %vm453_vm11, %v1138_v54, %v10991_v19 }
 0x6b9   :  { %v10995_v41 = vpop.permute.xlu0 %10994 }
 0x6ba   :  { %v10997_v32 = vunpack.i.h.bf16 %v10995_v41  ;;  %v10996_v17 = vunpack.i.l.bf16 %v10995_v41 }
 0x6bc   :  { %v1476_v54 = vsel %vm453_vm11, %v12407_v30, %v10997_v32  ;;  %v1475_v46 = vsel %vm453_vm11, %v12405_v29, %v10996_v17  ;;  %v9615_v30 = vld [vmem:[%s14526_s4 + $0x1] ss:$0 sm:$0xff] }
 0x6bd   :  { %v11000_v20 = vpop.permute.xlu1 %10999  ;;  %v11382_v17 = vld [vmem:[#allocation4 + $0x20] sm:$0xff]  }
 0x6be   :  { %v11002_v27 = vunpack.i.h.bf16 %v11000_v20  ;;  %v11001_v22 = vunpack.i.l.bf16 %v11000_v20  ;;  %10269 = vmatprep.subr.bf16.mxu0 %v11382_v17 }
 0x6bf   :  { %10270 = vmatpush3.bf16.msra.mxu0 %v11382_v17 }
 0x6c0   :  { %v1482_v37 = vsel %vm115_vm0, %v1478_v44, %v11002_v27  ;;  %v1481_v7 = vsel %vm115_vm0, %v1477_v47, %v11001_v22 }
 0x6c1   :  { %v11005_v23 = vpop.permute.xlu0 %11004 }
 0x6c2   :  { %v11007_v53 = vunpack.i.h.bf16 %v11005_v23  ;;  %v11006_v36 = vunpack.i.l.bf16 %v11005_v23 }
 0x6c4   :  { %v1479_v55 = vsel %vm115_vm0, %v1475_v46, %v11006_v36  ;;  %v1480_v35 = vsel %vm115_vm0, %v1476_v54, %v11007_v53 }
 0x6c5   :  { %v11015_v16 = vpop.permute.xlu1 %11014 }
 0x6c6   :  { %v11017_v57 = vunpack.i.h.bf16 %v11015_v16  ;;  %v11016_v28 = vunpack.i.l.bf16 %v11015_v16 }
 0x6c8   :  { %v1487_v62 = vsel %vm1483_vm12, %v1482_v37, %v11017_v57  ;;  %v1486_v3 = vsel %vm1483_vm12, %v1481_v7, %v11016_v28  ;;  %v11383_v57 = vld [vmem:[#allocation4 + $0x28] sm:$0xff]   ;;  %v11384_v28 = vld [vmem:[#allocation4 + $0x30] sm:$0xff]   ;;  %v11385_v37 = vld [vmem:[#allocation4 + $0x38] sm:$0xff]  }
 0x6c9   :  { %v1493_v4 = vpack.c.bf16 %v1487_v62, %v1486_v3  ;;  %v11010_v40 = vpop.permute.xlu0 %11009  ;;  %10271 = vmatprep.subr.bf16.mxu0 %v11383_v57  ;;  %10277 = vmatprep.subr.bf16.mxu1 %v11384_v28 }
 0x6ca   :  { %v11012_v61 = vunpack.i.h.bf16 %v11010_v40  ;;  %v11011_v34 = vunpack.i.l.bf16 %v11010_v40  ;;  %10272 = vmatpush3.bf16.msra.mxu0 %v11383_v57 }
 0x6cc   :  { %v1484_v5 = vsel %vm1483_vm12, %v1479_v55, %v11011_v34  ;;  %v1485_v0 = vsel %vm1483_vm12, %v1480_v35, %v11012_v61 }
 0x6cd   :  { %v1492_v2 = vpack.c.bf16 %v1485_v0, %v1484_v5  ;;  %v9620_v5 = vld [vmem:[%s14526_s4 + $0x4] ss:$0 sm:$0xff] }
 0x6cf   :  { %10265 = vmatprep.mubr.msk.bf16.mxu1 %vm346_vm5, %v1492_v2 }
 0x6d0   :  { %10266 = vmatmul.mubr.msk.bf16.vlgmr.msra.gmra.mrb[36].mxu1 %vm346_vm5, %v1493_v4 }
 0x6d1   :  { %10278 = vmatpush3.bf16.msra.mxu1 %v11384_v28 }
 0x6d2   :  { %10279 = vmatprep.subr.bf16.mxu1 %v11385_v37 }
 0x6d5   :  { %10280 = vmatpush3.bf16.msra.mxu1 %v11385_v37 }
 0x7a3   :  { %v10267_v29 = vpop.f32.mrb[36].mxu1 }
 0x7a4   :  { %v1551_v38 = vpop.f32.mrb[37].mxu1  ;;  %v1560_v39 = vadd.f32 %v10267_v29, %v9615_v30 }
 0x7a5   :  { %v1552_v42 = vadd.f32 %v9615_v30, %v1551_v38  ;;  %v10268_v60 = vpop.f32.mrb[38].mxu1 }
 0x7a6   :  { %v1554_v43 = vpop.f32.mrb[39].mxu1  ;;  %v1563_v56 = vadd.f32 %v10268_v60, %v9615_v30  ;;  %v1568_v59 = vadd.f32 %v1560_v39, %v12062_v33  ;;  %v9621_v39 = vld [vmem:[%s14526_s4 + $0x5] ss:$0 sm:$0xff] }
 0x7a7   :  { %v1555_v14 = vadd.f32 %v9615_v30, %v1554_v43  ;;  %v1566_v52 = vadd.f32 %v1552_v42, %v12056_v26 }
 0x7a8   :  { %v1578_v63 = vsel %vm346_vm5, %v1568_v59, 0.0  ;;  %v1569_v45 = vadd.f32 %v1563_v56, %v12060_v31 }
 0x7a9   :  { %v1572_v21 = vsel %vm346_vm5, %v1566_v52, 0.0  ;;  %v1567_v25 = vadd.f32 %v1555_v14, %v12054_v24 }
 0x7aa   :  { %1573 = vadd.xlane.f32.xlu0 %v1572_v21  ;;  %v1581_v6 = vsel %vm346_vm5, %v1569_v45, 0.0 }
 0x7ab   :  { %v1575_v1 = vsel %vm346_vm5, %v1567_v25, 0.0 }
 0x7ac   :  { %1576 = vadd.xlane.f32.xlu1 %v1575_v1 }
 0x7ae   :  { %1579 = vadd.xlane.f32.xlu0 %v1578_v63 }
 0x7b2   :  { %1582 = vadd.xlane.f32.xlu0 %v1581_v6  ;;  %v11386_v6 = vld [vmem:[#allocation4 + $0x40] sm:$0xff]  }
 0x7b3   :  { %10281 = vmatprep.subr.bf16.mxu1 %v11386_v6 }
 0x7b4   :  { %10282 = vmatpush3.bf16.msra.mxu1 %v11386_v6 }
 0x837   :  { %v1574_v26 = vpop.xlane.xlu0 %1573 }
 0x838   :  { %v1585_v11 = vmul.f32 0.03125, %v1574_v26  ;;  %v11387_v26 = vld [vmem:[#allocation4 + $0x48] sm:$0xff]  }
 0x839   :  { %v1577_v10 = vpop.xlane.xlu1 %1576  ;;  %10283 = vmatprep.subr.bf16.mxu1 %v11387_v26 }
 0x83a   :  { %v1589_v13 = vsub.f32 %v1566_v52, %v1585_v11  ;;  %v1586_v18 = vmul.f32 0.03125, %v1577_v10  ;;  %10284 = vmatpush3.bf16.msra.mxu1 %v11387_v26  ;;  %v9622_v11 = vld [vmem:[%s14526_s4 + $0x2] ss:$0 sm:$0xff] }
 0x83b   :  { %v1580_v24 = vpop.xlane.xlu0 %1579  ;;  %10303 = vmatprep.subr.bf16.mxu1 %v11955_v12 }
 0x83c   :  { %v1590_v58 = vsub.f32 %v1567_v25, %v1586_v18  ;;  %v1587_v33 = vmul.f32 0.03125, %v1580_v24  ;;  %v1593_v41 = vmul.f32 %v1589_v13, %v1589_v13 }
 0x83e   :  { %v1591_v20 = vsub.f32 %v1568_v59, %v1587_v33  ;;  %v1597_v15 = vsel %vm346_vm5, %v1593_v41, 0.0  ;;  %v1594_v19 = vmul.f32 %v1590_v58, %v1590_v58 }
 0x83f   :  { %1598 = vadd.xlane.f32.xlu1 %v1597_v15  ;;  %v1583_v27 = vpop.xlane.xlu0 %1582 }
 0x840   :  { %v1588_v31 = vmul.f32 0.03125, %v1583_v27  ;;  %v1600_v22 = vsel %vm346_vm5, %v1594_v19, 0.0  ;;  %v1595_v23 = vmul.f32 %v1591_v20, %v1591_v20 }
 0x841   :  { %1601 = vadd.xlane.f32.xlu0 %v1600_v22 }
 0x842   :  { %v1592_v44 = vsub.f32 %v1569_v45, %v1588_v31  ;;  %v1603_v47 = vsel %vm346_vm5, %v1595_v23, 0.0 }
 0x843   :  { %1604 = vadd.xlane.f32.xlu1 %v1603_v47 }
 0x844   :  { %v1596_v16 = vmul.f32 %v1592_v44, %v1592_v44 }
 0x846   :  { %v1606_v32 = vsel %vm346_vm5, %v1596_v16, 0.0 }
 0x847   :  { %1607 = vadd.xlane.f32.xlu0 %v1606_v32 }
 0x8cc   :  { %v1599_v7 = vpop.xlane.xlu1 %1598 }
 0x8cd   :  { %v1609_v53 = vmul.f32 0.03125, %v1599_v7 }
 0x8ce   :  { %v1602_v36 = vpop.xlane.xlu0 %1601 }
 0x8cf   :  { %v1613_v62 = vadd.f32 1e-05, %v1609_v53  ;;  %v1610_v3 = vmul.f32 0.03125, %v1602_v36 }
 0x8d0   :  { %v1605_v4 = vpop.xlane.xlu1 %1604 }
 0x8d1   :  { %11496 = vrsqrt.f32 %v1613_v62  ;;  %v1614_v40 = vadd.f32 1e-05, %v1610_v3  ;;  %v1611_v54 = vmul.f32 0.03125, %v1605_v4 }
 0x8d3   :  { %11498 = vrsqrt.f32 %v1614_v40  ;;  %v1615_v46 = vadd.f32 1e-05, %v1611_v54 }
 0x8d4   :  { %v1608_v61 = vpop.xlane.xlu0 %1607 }
 0x8d5   :  { %11500 = vrsqrt.f32 %v1615_v46  ;;  %v1612_v34 = vmul.f32 0.03125, %v1608_v61 }
 0x8d7   :  { %v1616_v55 = vadd.f32 1e-05, %v1612_v34 }
 0x8d9   :  { %11502 = vrsqrt.f32 %v1616_v55 }
 0x8db   :  { %v11497_v35 = vpop.eup %11496 }
 0x8dc   :  { %v1621_v0 = vmul.f32 %v11497_v35, %v1589_v13 }
 0x8dd   :  { %v11499_v2 = vpop.eup %11498 }
 0x8de   :  { %v1622_v30 = vmul.f32 %v11499_v2, %v1590_v58  ;;  %v1629_v29 = vmul.f32 %v9620_v5, %v1621_v0 }
 0x8df   :  { %v11501_v38 = vpop.eup %11500 }
 0x8e0   :  { %v1623_v42 = vmul.f32 %v11501_v38, %v1591_v20  ;;  %v1630_v60 = vmul.f32 %v9620_v5, %v1622_v30  ;;  %v1637_v43 = vadd.f32 %v9621_v39, %v1629_v29 }
 0x8e2   :  { %v1638_v14 = vadd.f32 %v9621_v39, %v1630_v60  ;;  %v1631_v25 = vmul.f32 %v9620_v5, %v1623_v42 }
 0x8e3   :  { %v11503_v52 = vpop.eup %11502 }
 0x8e4   :  { %v1624_v56 = vmul.f32 %v11503_v52, %v1592_v44  ;;  %v1645_v21 = vpack.c.bf16 %v1638_v14, %v1637_v43  ;;  %v1639_v1 = vadd.f32 %v9621_v39, %v1631_v25  ;;  %v9627_v44 = vld [vmem:[%s14526_s4 + $0x3] ss:$0 sm:$0xff] }
 0x8e6   :  { %10273 = vmatprep.mubr.msk.bf16.mxu0 %vm346_vm5, %v1645_v21  ;;  %v1632_v59 = vmul.f32 %v9620_v5, %v1624_v56 }
 0x8e8   :  { %v1640_v63 = vadd.f32 %v9621_v39, %v1632_v59 }
 0x8ea   :  { %v1646_v45 = vpack.c.bf16 %v1640_v63, %v1639_v1 }
 0x8ec   :  { %10274 = vmatmul.mubr.msk.bf16.vlgmr.msra.gmra.mrb[40].mxu0 %vm346_vm5, %v1646_v45 }
 0x9bf   :  { %v10275_v10 = vpop.f32.mrb[40].mxu0 }
 0x9c0   :  { %v1713_v13 = vadd.f32 %v10275_v10, %v9622_v11  ;;  %v1704_v18 = vpop.f32.mrb[41].mxu0 }
 0x9c1   :  { %v1705_v24 = vadd.f32 %v9622_v11, %v1704_v18  ;;  %v10276_v58 = vpop.f32.mrb[42].mxu0 }
 0x9c2   :  { %v1716_v33 = vadd.f32 %v10276_v58, %v9622_v11  ;;  %v1707_v41 = vpop.f32.mrb[43].mxu0  ;;  %v1721_v15 = vmax.f32 %v1713_v13, 0.0 }
 0x9c3   :  { %v1708_v20 = vadd.f32 %v9622_v11, %v1707_v41  ;;  %v1719_v27 = vmax.f32 %v1705_v24, 0.0 }
 0x9c4   :  { %v1722_v19 = vmax.f32 %v1716_v33, 0.0 }
 0x9c5   :  { %v1720_v31 = vmax.f32 %v1708_v20, 0.0 }
 0x9c6   :  { %v1732_v22 = vpack.c.bf16 %v1722_v19, %v1721_v15  ;;  %v9634_v19 = vld [vmem:[%s14526_s4 + $0x6] ss:$0 sm:$0xff] }
 0x9c7   :  { %v1731_v23 = vpack.c.bf16 %v1720_v31, %v1719_v27 }
 0x9c9   :  { %10285 = vmatprep.mubr.msk.bf16.mxu1 %vm1762_vm13, %v1731_v23 }
 0x9ca   :  { %10286 = vmatmul.mubr.msk.bf16.vlgmr.msra.gmra.mrb[40].mxu1 %vm1762_vm13, %v1732_v22 }
 0x9cb   :  { %10305 = vmatprep.mubr.msk.bf16.mxu1 %vm11960_vm6, %v11955_v12 }
 0xa9d   :  { %v10287_v47 = vpop.f32.mrb[40].mxu1 }
 0xa9e   :  { %v1803_v16 = vpop.f32.mrb[41].mxu1  ;;  %v1812_v32 = vadd.f32 %v10287_v47, %v9627_v44  ;;  %v9635_v47 = vld [vmem:[%s14526_s4 + $0x7] ss:$0 sm:$0xff] }
 0xa9f   :  { %v1804_v17 = vadd.f32 %v9627_v44, %v1803_v16  ;;  %v10288_v57 = vpop.f32.mrb[42].mxu1 }
 0xaa0   :  { %v1806_v28 = vpop.f32.mrb[43].mxu1  ;;  %v1815_v37 = vadd.f32 %v10288_v57, %v9627_v44  ;;  %v1820_v3 = vadd.f32 %v1812_v32, %v1639_v1  ;;  %v11388_v1 = vld [vmem:[#allocation4 + $0x50] sm:$0xff]  }
 0xaa1   :  { %v1807_v7 = vadd.f32 %v9627_v44, %v1806_v28  ;;  %v1818_v53 = vadd.f32 %v1804_v17, %v1637_v43  ;;  %10289 = vmatprep.subr.bf16.mxu0 %v11388_v1 }
 0xaa2   :  { %v1821_v40 = vadd.f32 %v1815_v37, %v1640_v63  ;;  %v1830_v54 = vsel %vm346_vm5, %v1820_v3, 0.0  ;;  %v11389_v63 = vld [vmem:[#allocation4 + $0x58] sm:$0xff]   ;;  %10290 = vmatpush3.bf16.msra.mxu0 %v11388_v1 }
 0xaa3   :  { %v1824_v36 = vsel %vm346_vm5, %v1818_v53, 0.0  ;;  %v1819_v62 = vadd.f32 %v1807_v7, %v1638_v14  ;;  %10291 = vmatprep.subr.bf16.mxu0 %v11389_v63 }
 0xaa4   :  { %1825 = vadd.xlane.f32.xlu1 %v1824_v36  ;;  %v1833_v46 = vsel %vm346_vm5, %v1821_v40, 0.0 }
 0xaa5   :  { %v1827_v4 = vsel %vm346_vm5, %v1819_v62, 0.0 }
 0xaa6   :  { %1828 = vadd.xlane.f32.xlu0 %v1827_v4  ;;  %10292 = vmatpush3.bf16.msra.mxu0 %v11389_v63 }
 0xaa7   :  { %10297 = vmatprep.subr.bf16.mxu0 %v11955_v12 }
 0xaa8   :  { %1831 = vadd.xlane.f32.xlu1 %v1830_v54  ;;  %v9636_v54 = vld [vmem:[%s14526_s4 + $0x8] ss:$0 sm:$0xff] }
 0xaaa   :  { %1834 = vadd.xlane.f32.xlu0 %v1833_v46 }
 0xb31   :  { %v1826_v61 = vpop.xlane.xlu1 %1825 }
 0xb32   :  { %v1836_v34 = vmul.f32 0.03125, %v1826_v61 }
 0xb33   :  { %v1829_v55 = vpop.xlane.xlu0 %1828 }
 0xb34   :  { %v1840_v35 = vsub.f32 %v1818_v53, %v1836_v34  ;;  %v1837_v5 = vmul.f32 0.03125, %v1829_v55 }
 0xb35   :  { %v1832_v0 = vpop.xlane.xlu1 %1831 }
 0xb36   :  { %v1841_v2 = vsub.f32 %v1819_v62, %v1837_v5  ;;  %v1838_v30 = vmul.f32 0.03125, %v1832_v0  ;;  %v1844_v29 = vmul.f32 %v1840_v35, %v1840_v35 }
 0xb37   :  { %v1835_v38 = vpop.xlane.xlu0 %1834 }
 0xb38   :  { %v1842_v39 = vsub.f32 %v1820_v3, %v1838_v30  ;;  %v1839_v42 = vmul.f32 0.03125, %v1835_v38  ;;  %v1848_v60 = vsel %vm346_vm5, %v1844_v29, 0.0  ;;  %v1845_v43 = vmul.f32 %v1841_v2, %v1841_v2 }
 0xb39   :  { %1849 = vadd.xlane.f32.xlu1 %v1848_v60 }
 0xb3a   :  { %v1843_v14 = vsub.f32 %v1821_v40, %v1839_v42  ;;  %v1851_v52 = vsel %vm346_vm5, %v1845_v43, 0.0  ;;  %v1846_v56 = vmul.f32 %v1842_v39, %v1842_v39 }
 0xb3b   :  { %1852 = vadd.xlane.f32.xlu0 %v1851_v52 }
 0xb3c   :  { %v1854_v21 = vsel %vm346_vm5, %v1846_v56, 0.0  ;;  %v1847_v25 = vmul.f32 %v1843_v14, %v1843_v14 }
 0xb3d   :  { %1855 = vadd.xlane.f32.xlu1 %v1854_v21 }
 0xb3e   :  { %v1857_v59 = vsel %vm346_vm5, %v1847_v25, 0.0 }
 0xb3f   :  { %1858 = vadd.xlane.f32.xlu0 %v1857_v59 }
 0xbc6   :  { %v1850_v45 = vpop.xlane.xlu1 %1849 }
 0xbc7   :  { %v1860_v6 = vmul.f32 0.03125, %v1850_v45 }
 0xbc8   :  { %v1853_v26 = vpop.xlane.xlu0 %1852 }
 0xbc9   :  { %v1864_v11 = vadd.f32 1e-05, %v1860_v6  ;;  %v1861_v10 = vmul.f32 0.03125, %v1853_v26 }
 0xbca   :  { %v1856_v13 = vpop.xlane.xlu1 %1855 }
 0xbcb   :  { %11504 = vrsqrt.f32 %v1864_v11  ;;  %v1865_v18 = vadd.f32 1e-05, %v1861_v10  ;;  %v1862_v24 = vmul.f32 0.03125, %v1856_v13 }
 0xbcc   :  { %v1859_v58 = vpop.xlane.xlu0 %1858 }
 0xbcd   :  { %11506 = vrsqrt.f32 %v1865_v18  ;;  %v1866_v33 = vadd.f32 1e-05, %v1862_v24  ;;  %v1863_v41 = vmul.f32 0.03125, %v1859_v58 }
 0xbcf   :  { %11508 = vrsqrt.f32 %v1866_v33  ;;  %v1867_v20 = vadd.f32 1e-05, %v1863_v41 }
 0xbd1   :  { %11510 = vrsqrt.f32 %v1867_v20 }
 0xbd5   :  { %v11505_v15 = vpop.eup %11504 }
 0xbd6   :  { %v1872_v27 = vmul.f32 %v11505_v15, %v1840_v35 }
 0xbd7   :  { %v11507_v31 = vpop.eup %11506 }
 0xbd8   :  { %v1873_v22 = vmul.f32 %v11507_v31, %v1841_v2  ;;  %v1880_v23 = vmul.f32 %v9634_v19, %v1872_v27 }
 0xbd9   :  { %v11509_v44 = vpop.eup %11508 }
 0xbda   :  { %v1874_v16 = vmul.f32 %v11509_v44, %v1842_v39  ;;  %v1881_v32 = vmul.f32 %v9634_v19, %v1873_v22  ;;  %v12480_v28 = vadd.f32 %v9635_v47, %v1880_v23 }
 0xbdb   :  { %v11511_v17 = vpop.eup %11510 }
 0xbdc   :  { %v1875_v57 = vmul.f32 %v11511_v17, %v1843_v14  ;;  %v12482_v37 = vadd.f32 %v9635_v47, %v1881_v32  ;;  %v1882_v7 = vmul.f32 %v9634_v19, %v1874_v16 }
 0xbde   :  { %v1896_v53 = vpack.c.bf16 %v12482_v37, %v12480_v28  ;;  %v1883_v36 = vmul.f32 %v9634_v19, %v1875_v57  ;;  %v12487_v62 = vadd.f32 %v9635_v47, %v1882_v7 }
 0xbe0   :  { %10293 = vmatprep.mubr.msk.bf16.mxu0 %vm346_vm5, %v1896_v53  ;;  %v12489_v3 = vadd.f32 %v9635_v47, %v1883_v36 }
 0xbe2   :  { %v1897_v4 = vpack.c.bf16 %v12489_v3, %v12487_v62 }
 0xbe4   :  { %10294 = vmatmul.mubr.msk.bf16.vlgmr.msra.gmra.mrb[44].mxu0 %vm346_vm5, %v1897_v4 }
 0xbe5   :  { %10299 = vmatprep.mubr.msk.bf16.mxu0 %vm11960_vm6, %v11955_v12 }
 0xcb7   :  { %v10295_v40 = vpop.f32.mrb[44].mxu0 }
 0xcb8   :  { %v1955_v46 = vpop.f32.mrb[45].mxu0  ;;  %v1964_v34 = vadd.f32 %v10295_v40, %v9636_v54 }
 0xcb9   :  { %v10296_v61 = vpop.f32.mrb[46].mxu0  ;;  %v1956_v5 = vadd.f32 %v9636_v54, %v1955_v46 }
 0xcba   :  { %v1967_v55 = vadd.f32 %v10296_v61, %v9636_v54  ;;  %v1958_v35 = vpop.f32.mrb[47].mxu0 }
 0xcbb   :  { %v1959_v0 = vadd.f32 %v9636_v54, %v1958_v35 }
 0xcbc   :  { %v11023_v2 = vpack.i.bf16 %v1967_v55, %v1964_v34  ;;  %v12499_v30 = vpack.c.bf16 %v1967_v55, %v1964_v34 }
 0xcbd   :  { %v11018_v29 = vpack.i.bf16 %v1959_v0, %v1956_v5  ;;  %v2010_v38 = vpack.c.bf16 %v1959_v0, %v1956_v5 }
 0xcbe   :  { %11024 = vrot.lane.b32.xlu0 %v11023_v2, %s11956_s9 }
 0xcbf   :  { %11019 = vrot.lane.b32.xlu1 %v11018_v29, %s11956_s9 }
 0xcc2   :  { %11039 = vrot.lane.b32.xlu0 %v11018_v29, %s11958_s11 }
 0xcc3   :  { %11029 = vrot.lane.b32.xlu1 %v11018_v29, %s11957_s10 }
 0xcc6   :  { %2019 = vrot.lane.b32.xlu0 %v2010_v38, %s11959_s1 }
 0xcc7   :  { %11034 = vrot.lane.b32.xlu1 %v11023_v2, %s11957_s10 }
 0xccb   :  { %11044 = vrot.lane.b32.xlu1 %v11023_v2, %s11958_s11 }
 0xccf   :  { %2069 = vrot.lane.b32.xlu1 %v12499_v30, %s11959_s1 }
 0xd30   :  { %v11025_v39 = vpop.permute.xlu0 %11024 }
 0xd31   :  { %v11027_v42 = vunpack.i.h.bf16 %v11025_v39  ;;  %v11026_v60 = vunpack.i.l.bf16 %v11025_v39  ;;  %v11020_v43 = vpop.permute.xlu1 %11019 }
 0xd32   :  { %v11022_v14 = vunpack.i.h.bf16 %v11020_v43  ;;  %v11021_v52 = vunpack.i.l.bf16 %v11020_v43 }
 0xd33   :  { %v12510_v56 = vpack.c.bf16 %v11027_v42, %v11026_v60 }
 0xd34   :  { %v11040_v21 = vpop.permute.xlu0 %11039  ;;  %v12512_v25 = vpack.c.bf16 %v11022_v14, %v11021_v52 }
 0xd35   :  { %2169 = vrot.lane.b32.xlu1 %v12510_v56, %s11959_s1  ;;  %v11030_v59 = vpop.permute.xlu1 %11029  ;;  %v11042_v45 = vunpack.i.h.bf16 %v11040_v21  ;;  %v11041_v6 = vunpack.i.l.bf16 %v11040_v21 }
 0xd36   :  { %v11032_v1 = vunpack.i.h.bf16 %v11030_v59  ;;  %v11031_v63 = vunpack.i.l.bf16 %v11030_v59  ;;  %2119 = vrot.lane.b32.xlu0 %v12512_v25, %s11959_s1 }
 0xd37   :  { %v12526_v33 = vpack.c.bf16 %v11042_v45, %v11041_v6 }
 0xd38   :  { %v2020_v26 = vpop.permute.xlu0 %2019  ;;  %v12518_v11 = vpack.c.bf16 %v11032_v1, %v11031_v63 }
 0xd39   :  { %v2025_v10 = vsel %vm453_vm11, %v2020_v26, 0  ;;  %v11035_v13 = vpop.permute.xlu1 %11034 }
 0xd3a   :  { %v11037_v18 = vunpack.i.h.bf16 %v11035_v13  ;;  %v11036_v24 = vunpack.i.l.bf16 %v11035_v13  ;;  %2219 = vrot.lane.b32.xlu0 %v12518_v11, %s11959_s1  ;;  %10298 = vmatpush3.bf16.xpose.msra.mxu0 %v2025_v10 }
 0xd3b   :  { %10309 = vmatprep.subr.bf16.mxu0 %v11955_v12 }
 0xd3c   :  { %v12524_v58 = vpack.c.bf16 %v11037_v18, %v11036_v24 }
 0xd3d   :  { %v11045_v41 = vpop.permute.xlu1 %11044 }
 0xd3e   :  { %v11047_v20 = vunpack.i.h.bf16 %v11045_v41  ;;  %v11046_v15 = vunpack.i.l.bf16 %v11045_v41  ;;  %2269 = vrot.lane.b32.xlu1 %v12524_v58, %s11959_s1  ;;  %2319 = vrot.lane.b32.xlu0 %v12526_v33, %s11959_s1 }
 0xd40   :  { %v12532_v19 = vpack.c.bf16 %v11047_v20, %v11046_v15 }
 0xd41   :  { %v2070_v27 = vpop.permute.xlu1 %2069  ;;  %10300 = vmatmul.mubr.msk.bf16.vlgmr.msra.gmra.mrb[48].mxu0 %vm453_vm11, %v2010_v38 }
 0xd42   :  { %v2075_v31 = vsel %vm453_vm11, %v2070_v27, 0  ;;  %2369 = vrot.lane.b32.xlu1 %v12532_v19, %s11959_s1  ;;  %10311 = vmatprep.mubr.msk.bf16.mxu0 %vm11960_vm6, %v11955_v12 }
 0xd43   :  { %10304 = vmatpush3.bf16.xpose.msra.mxu1 %v2075_v31 }
 0xd44   :  { %10315 = vmatprep.subr.bf16.mxu1 %v11955_v12 }
 0xd46   :  { %2618 = vrot.lane.b32.xlu1 %v2010_v38, %s11952_s2 }
 0xd4a   :  { %10306 = vmatmul.mubr.msk.bf16.vlgmr.msra.gmra.mrb[44].mxu1 %vm453_vm11, %v12499_v30 }
 0xd4b   :  { %10317 = vmatprep.mubr.msk.bf16.mxu1 %vm11960_vm6, %v11955_v12 }
 0xda7   :  { %v2170_v22 = vpop.permute.xlu1 %2169 }
 0xda8   :  { %v2175_v23 = vsel %vm453_vm11, %v2170_v22, 0  ;;  %v2120_v44 = vpop.permute.xlu0 %2119 }
 0xda9   :  { %v2125_v47 = vsel %vm453_vm11, %v2120_v44, 0  ;;  %10316 = vmatpush3.bf16.xpose.msra.mxu1 %v2175_v23 }
 0xdaa   :  { %10310 = vmatpush3.bf16.xpose.msra.mxu0 %v2125_v47  ;;  %10327 = vmatprep.subr.bf16.mxu1 %v11955_v12 }
 0xdab   :  { %10321 = vmatprep.subr.bf16.mxu0 %v11955_v12 }
 0xdac   :  { %v2220_v16 = vpop.permute.xlu0 %2219 }
 0xdad   :  { %v2225_v17 = vsel %vm453_vm11, %v2220_v16, 0 }
 0xdb0   :  { %10318 = vmatmul.mubr.msk.bf16.vlgmr.msra.gmra.mrb[48].mxu1 %vm453_vm11, %v12510_v56  ;;  %v2270_v32 = vpop.permute.xlu1 %2269  ;;  %v2320_v7 = vpop.permute.xlu0 %2319 }
 0xdb1   :  { %v2275_v57 = vsel %vm453_vm11, %v2270_v32, 0  ;;  %10312 = vmatmul.mubr.msk.bf16.vlgmr.msra.gmra.mrb[52].mxu0 %vm453_vm11, %v12512_v25  ;;  %10329 = vmatprep.mubr.msk.bf16.mxu1 %vm11960_vm6, %v11955_v12  ;;  %v2325_v36 = vsel %vm453_vm11, %v2320_v7, 0 }
 0xdb2   :  { %10322 = vmatpush3.bf16.xpose.msra.mxu0 %v2225_v17  ;;  %10328 = vmatpush3.bf16.xpose.msra.mxu1 %v2275_v57 }
 0xdb3   :  { %10323 = vmatprep.mubr.msk.bf16.mxu0 %vm11960_vm6, %v11955_v12  ;;  %10333 = vmatprep.subr.bf16.mxu0 %v11955_v12 }
 0xdb4   :  { %10339 = vmatprep.subr.bf16.mxu1 %v11955_v12  ;;  %v2370_v53 = vpop.permute.xlu1 %2369 }
 0xdb5   :  { %v2375_v4 = vsel %vm453_vm11, %v2370_v53, 0 }
 0xdb8   :  { %v2619_v40 = vpop.permute.xlu1 %2618 }
 0xdb9   :  { %10324 = vmatmul.mubr.msk.bf16.vlgmr.msra.gmra.mrb[56].mxu0 %vm453_vm11, %v12518_v11  ;;  %10330 = vmatmul.mubr.msk.bf16.vlgmr.msra.gmra.mrb[52].mxu1 %vm453_vm11, %v12524_v58 }
 0xdba   :  { %10334 = vmatpush3.bf16.xpose.msra.mxu0 %v2325_v36  ;;  %10340 = vmatpush3.bf16.xpose.msra.mxu1 %v2375_v4 }
 0xdbb   :  { %10335 = vmatprep.mubr.msk.bf16.mxu0 %vm11960_vm6, %v11955_v12  ;;  %10341 = vmatprep.mubr.msk.bf16.mxu1 %vm11960_vm6, %v11955_v12 }
 0xdbc   :  { %10345 = vmatprep.subr.bf16.mxu0 %v11955_v12  ;;  %10351 = vmatprep.subr.bf16.mxu1 %v11955_v12 }
 0xdc1   :  { %10336 = vmatmul.mubr.msk.bf16.vlgmr.msra.gmra.mrb[60].mxu0 %vm453_vm11, %v12526_v33  ;;  %10342 = vmatmul.mubr.msk.bf16.vlgmr.msra.gmra.mrb[56].mxu1 %vm453_vm11, %v12532_v19 }
 0xdc2   :  { %10346 = vmatpush3.bf16.msra.mxu0 %v2619_v40  ;;  %10353 = vmatprep.mubr.msk.bf16.mxu1 %vm11960_vm6, %v11955_v12 }
 0xdc3   :  { %10347 = vmatprep.mubr.msk.bf16.mxu0 %vm11960_vm6, %v11955_v12  ;;  %10357 = vmatprep.subr.bf16.mxu0 %v11955_v12 }
 0xe14   :  { %v2061_v54 = vpop.f32.mrb[48].mxu0 }
 0xe15   :  { %v10301_v46 = vpop.f32.mrb[49].mxu0  ;;  %v12589_v38 = vmul.f32 0.35355338, %v2061_v54 }
 0xe16   :  { %v2064_v61 = vpop.f32.mrb[50].mxu0 }
 0xe17   :  { %v12583_v34 = vmul.f32 0.35355338, %v2064_v61  ;;  %v10302_v55 = vpop.f32.mrb[51].mxu0  ;;  %v2434_v43 = vsel %vm115_vm0, %v12589_v38, -inf }
 0xe19   :  { %v2437_v35 = vsel %vm115_vm0, %v12583_v34, -inf }
 0xe1a   :  { %2438 = vmax.xlane.f32.xlu1 %v2437_v35 }
 0xe1d   :  { %v2111_v5 = vpop.f32.mrb[44].mxu1 }
 0xe1e   :  { %v12587_v0 = vmul.f32 0.35355338, %v2111_v5  ;;  %v10307_v2 = vpop.f32.mrb[45].mxu1 }
 0xe1f   :  { %v2114_v29 = vpop.f32.mrb[46].mxu1 }
 0xe20   :  { %v10308_v39 = vpop.f32.mrb[47].mxu1  ;;  %v2440_v42 = vsel %vm115_vm0, %v12587_v0, -inf  ;;  %v12593_v60 = vmul.f32 0.35355338, %v2114_v29 }
 0xe21   :  { %2441 = vmax.xlane.f32.xlu0 %v2440_v42 }
 0xe22   :  { %v2443_v14 = vsel %vm115_vm0, %v12593_v60, -inf }
 0xe25   :  { %2435 = vmax.xlane.f32.xlu0 %v2434_v43 }
 0xe29   :  { %2444 = vmax.xlane.f32.xlu0 %v2443_v14 }
 0xe83   :  { %v2211_v52 = vpop.f32.mrb[48].mxu1 }
 0xe84   :  { %v12599_v21 = vmul.f32 0.35355338, %v2211_v52  ;;  %v2161_v59 = vpop.f32.mrb[52].mxu0  ;;  %v10319_v1 = vpop.f32.mrb[49].mxu1 }
 0xe85   :  { %v12601_v63 = vmul.f32 0.35355338, %v2161_v59  ;;  %v10313_v45 = vpop.f32.mrb[53].mxu0  ;;  %v2214_v6 = vpop.f32.mrb[50].mxu1 }
 0xe86   :  { %v12603_v26 = vmul.f32 0.35355338, %v2214_v6  ;;  %v2164_v10 = vpop.f32.mrb[54].mxu0  ;;  %v10320_v13 = vpop.f32.mrb[51].mxu1  ;;  %v2452_v18 = vsel %vm115_vm0, %v12599_v21, -inf }
 0xe87   :  { %2453 = vmax.xlane.f32.xlu1 %v2452_v18  ;;  %v10314_v24 = vpop.f32.mrb[55].mxu0  ;;  %v12607_v41 = vmul.f32 0.35355338, %v2164_v10  ;;  %v2446_v15 = vsel %vm115_vm0, %v12601_v63, -inf }
 0xe88   :  { %v2455_v20 = vsel %vm115_vm0, %v12603_v26, -inf }
 0xe89   :  { %2456 = vmax.xlane.f32.xlu0 %v2455_v20  ;;  %v2449_v22 = vsel %vm115_vm0, %v12607_v41, -inf }
 0xe8b   :  { %2447 = vmax.xlane.f32.xlu1 %v2446_v15 }
 0xe8c   :  { %v2261_v27 = vpop.f32.mrb[56].mxu0  ;;  %v2311_v31 = vpop.f32.mrb[52].mxu1 }
 0xe8d   :  { %v12615_v23 = vmul.f32 0.35355338, %v2311_v31  ;;  %v10331_v44 = vpop.f32.mrb[53].mxu1  ;;  %2450 = vmax.xlane.f32.xlu0 %v2449_v22  ;;  %v10325_v47 = vpop.f32.mrb[57].mxu0  ;;  %v12619_v53 = vmul.f32 0.35355338, %v2261_v27 }
 0xe8e   :  { %v2264_v16 = vpop.f32.mrb[58].mxu0  ;;  %v2314_v32 = vpop.f32.mrb[54].mxu1 }
 0xe8f   :  { %v12617_v17 = vmul.f32 0.35355338, %v2314_v32  ;;  %v10326_v57 = vpop.f32.mrb[59].mxu0  ;;  %v10332_v7 = vpop.f32.mrb[55].mxu1  ;;  %v2464_v36 = vsel %vm115_vm0, %v12615_v23, -inf  ;;  %v2458_v46 = vsel %vm115_vm0, %v12619_v53, -inf }
 0xe90   :  { %v12623_v4 = vmul.f32 0.35355338, %v2264_v16  ;;  %2465 = vmax.xlane.f32.xlu1 %v2464_v36 }
 0xe91   :  { %v2467_v40 = vsel %vm115_vm0, %v12617_v17, -inf }
 0xe92   :  { %2468 = vmax.xlane.f32.xlu0 %v2467_v40  ;;  %v2461_v2 = vsel %vm115_vm0, %v12623_v4, -inf }
 0xe94   :  { %v2411_v54 = vpop.f32.mrb[56].mxu1  ;;  %v2361_v61 = vpop.f32.mrb[60].mxu0  ;;  %2459 = vmax.xlane.f32.xlu1 %v2458_v46 }
 0xe95   :  { %v12629_v55 = vmul.f32 0.35355338, %v2411_v54  ;;  %v10337_v35 = vpop.f32.mrb[61].mxu0  ;;  %v10343_v5 = vpop.f32.mrb[57].mxu1  ;;  %v12635_v52 = vmul.f32 0.35355338, %v2361_v61 }
 0xe96   :  { %v2414_v29 = vpop.f32.mrb[58].mxu1  ;;  %2462 = vmax.xlane.f32.xlu0 %v2461_v2  ;;  %v2364_v39 = vpop.f32.mrb[62].mxu0 }
 0xe97   :  { %v12633_v42 = vmul.f32 0.35355338, %v2414_v29  ;;  %v10338_v43 = vpop.f32.mrb[63].mxu0  ;;  %v10344_v14 = vpop.f32.mrb[59].mxu1  ;;  %v2476_v59 = vsel %vm115_vm0, %v12629_v55, -inf  ;;  %v2470_v6 = vsel %vm115_vm0, %v12635_v52, -inf }
 0xe98   :  { %v12639_v1 = vmul.f32 0.35355338, %v2364_v39  ;;  %2477 = vmax.xlane.f32.xlu1 %v2476_v59 }
 0xe99   :  { %v2479_v45 = vsel %vm115_vm0, %v12633_v42, -inf }
 0xe9a   :  { %2480 = vmax.xlane.f32.xlu0 %v2479_v45  ;;  %v2473_v10 = vsel %vm115_vm0, %v12639_v1, -inf }
 0xe9c   :  { %2471 = vmax.xlane.f32.xlu1 %v2470_v6 }
 0xe9e   :  { %2474 = vmax.xlane.f32.xlu0 %v2473_v10 }
 0xea7   :  { %v2439_v15 = vpop.xlane.xlu1 %2438 }
 0xea8   :  { %v2483_v27 = vsub.f32 %v12583_v34, %v2439_v15 }
 0xead   :  { %2712 = vrot.lane.b32.xlu1 %v12512_v25, %s11952_s2 }
 0xeae   :  { %v2442_v13 = vpop.xlane.xlu0 %2441 }
 0xeaf   :  { %v2484_v25 = vsub.f32 %v12587_v0, %v2442_v13 }
 0xeb1   :  { %2759 = vrot.lane.b32.xlu1 %v12510_v56, %s11952_s2  ;;  %v2502_v56 = vmul.f32 1.442695, %v2484_v25 }
 0xeb2   :  { %v2436_v18 = vpop.xlane.xlu0 %2435 }
 0xeb3   :  { %v2482_v22 = vsub.f32 %v12589_v38, %v2436_v18 }
 0xeb4   :  { %2665 = vrot.lane.b32.xlu0 %v12499_v30, %s11952_s2  ;;  %v2500_v30 = vmul.f32 1.442695, %v2483_v27 }
 0xeb5   :  { %2853 = vrot.lane.b32.xlu1 %v12524_v58, %s11952_s2  ;;  %v2498_v58 = vmul.f32 1.442695, %v2482_v22 }
 0xeb6   :  { %v2445_v24 = vpop.xlane.xlu0 %2444 }
 0xeb7   :  { %v2485_v20 = vsub.f32 %v12593_v60, %v2445_v24 }
 0xeb8   :  { %2806 = vrot.lane.b32.xlu0 %v12518_v11, %s11952_s2 }
 0xeb9   :  { %v2504_v31 = vmul.f32 1.442695, %v2485_v20 }
 0xebb   :  { %11512 = vpow2.f32 %v2504_v31 }
 0xebc   :  { %11514 = vpow2.f32 %v2502_v56 }
 0xebd   :  { %11516 = vpow2.f32 %v2500_v30 }
 0xebe   :  { %11518 = vpow2.f32 %v2498_v58 }
 0xec5   :  { %v12661_v44 = vpop.eup %11512 }
 0xec6   :  { %v12663_v11 = vpop.eup %11514  ;;  %v2539_v60 = vsel %vm115_vm0, %v12661_v44, 0.0 }
 0xec7   :  { %v12667_v0 = vpop.eup %11516  ;;  %v2536_v34 = vsel %vm115_vm0, %v12663_v11, 0.0 }
 0xec8   :  { %v12671_v38 = vpop.eup %11518  ;;  %v2533_v47 = vsel %vm115_vm0, %v12667_v0, 0.0 }
 0xec9   :  { %v2530_v16 = vsel %vm115_vm0, %v12671_v38, 0.0 }
 0xed7   :  { %2540 = vadd.xlane.f32.xlu0 %v2539_v60 }
 0xed9   :  { %2537 = vadd.xlane.f32.xlu1 %v2536_v34 }
 0xedb   :  { %2534 = vadd.xlane.f32.xlu0 %v2533_v47 }
 0xedd   :  { %2531 = vadd.xlane.f32.xlu1 %v2530_v16 }
 0xf14   :  { %v2454_v32 = vpop.xlane.xlu1 %2453 }
 0xf15   :  { %v2488_v57 = vsub.f32 %v12599_v21, %v2454_v32 }
 0xf16   :  { %v2457_v7 = vpop.xlane.xlu0 %2456 }
 0xf17   :  { %v2510_v36 = vmul.f32 1.442695, %v2488_v57  ;;  %v2489_v40 = vsub.f32 %v12603_v26, %v2457_v7 }
 0xf18   :  { %v2448_v54 = vpop.xlane.xlu1 %2447 }
 0xf19   :  { %11520 = vpow2.f32 %v2510_v36  ;;  %v2512_v46 = vmul.f32 1.442695, %v2489_v40  ;;  %v2486_v61 = vsub.f32 %v12601_v63, %v2448_v54 }
 0xf1a   :  { %v2451_v35 = vpop.xlane.xlu0 %2450 }
 0xf1b   :  { %11522 = vpow2.f32 %v2512_v46  ;;  %v2506_v5 = vmul.f32 1.442695, %v2486_v61  ;;  %v2487_v2 = vsub.f32 %v12607_v41, %v2451_v35 }
 0xf1d   :  { %11524 = vpow2.f32 %v2506_v5  ;;  %v2508_v29 = vmul.f32 1.442695, %v2487_v2  ;;  %v2466_v39 = vpop.xlane.xlu1 %2465 }
 0xf1e   :  { %v2492_v21 = vsub.f32 %v12615_v23, %v2466_v39 }
 0xf1f   :  { %11526 = vpow2.f32 %v2508_v29  ;;  %v2469_v43 = vpop.xlane.xlu0 %2468 }
 0xf20   :  { %v2493_v14 = vsub.f32 %v12617_v17, %v2469_v43  ;;  %v2518_v26 = vmul.f32 1.442695, %v2492_v21 }
 0xf21   :  { %v2460_v45 = vpop.xlane.xlu1 %2459 }
 0xf22   :  { %v2520_v59 = vmul.f32 1.442695, %v2493_v14  ;;  %11528 = vpow2.f32 %v2518_v26  ;;  %v2490_v63 = vsub.f32 %v12619_v53, %v2460_v45 }
 0xf23   :  { %v12683_v6 = vpop.eup %11520  ;;  %v2463_v10 = vpop.xlane.xlu0 %2462 }
 0xf24   :  { %11530 = vpow2.f32 %v2520_v59  ;;  %v2491_v41 = vsub.f32 %v12623_v4, %v2463_v10  ;;  %v2548_v13 = vsel %vm115_vm0, %v12683_v6, 0.0  ;;  %v2514_v23 = vmul.f32 1.442695, %v2490_v63 }
 0xf25   :  { %v12689_v18 = vpop.eup %11522  ;;  %2549 = vadd.xlane.f32.xlu1 %v2548_v13  ;;  %v2478_v24 = vpop.xlane.xlu1 %2477 }
 0xf26   :  { %v2516_v17 = vmul.f32 1.442695, %v2491_v41  ;;  %v2551_v20 = vsel %vm115_vm0, %v12689_v18, 0.0  ;;  %11532 = vpow2.f32 %v2514_v23  ;;  %v2496_v53 = vsub.f32 %v12629_v55, %v2478_v24 }
 0xf27   :  { %v12693_v15 = vpop.eup %11524  ;;  %2552 = vadd.xlane.f32.xlu0 %v2551_v20  ;;  %v2481_v25 = vpop.xlane.xlu0 %2480 }
 0xf28   :  { %11534 = vpow2.f32 %v2516_v17  ;;  %v2497_v4 = vsub.f32 %v12633_v42, %v2481_v25  ;;  %v2542_v27 = vsel %vm115_vm0, %v12693_v15, 0.0  ;;  %v2526_v56 = vmul.f32 1.442695, %v2496_v53 }
 0xf29   :  { %v12699_v31 = vpop.eup %11526  ;;  %2543 = vadd.xlane.f32.xlu1 %v2542_v27  ;;  %v2472_v30 = vpop.xlane.xlu1 %2471 }
 0xf2a   :  { %v2528_v22 = vmul.f32 1.442695, %v2497_v4  ;;  %v2545_v58 = vsel %vm115_vm0, %v12699_v31, 0.0  ;;  %11536 = vpow2.f32 %v2526_v56  ;;  %v2494_v55 = vsub.f32 %v12635_v52, %v2472_v30 }
 0xf2b   :  { %2546 = vadd.xlane.f32.xlu0 %v2545_v58  ;;  %v2475_v60 = vpop.xlane.xlu0 %2474 }
 0xf2c   :  { %11538 = vpow2.f32 %v2528_v22  ;;  %v2495_v42 = vsub.f32 %v12639_v1, %v2475_v60  ;;  %v12705_v34 = vpop.eup %11528  ;;  %v2522_v47 = vmul.f32 1.442695, %v2494_v55 }
 0xf2d   :  { %v2560_v57 = vsel %vm115_vm0, %v12705_v34, 0.0  ;;  %v2713_v43 = vpop.permute.xlu1 %2712 }
 0xf2e   :  { %v12707_v16 = vpop.eup %11530  ;;  %v2524_v32 = vmul.f32 1.442695, %v2495_v42  ;;  %11540 = vpow2.f32 %v2522_v47  ;;  %2561 = vadd.xlane.f32.xlu1 %v2560_v57 }
 0xf2f   :  { %v2666_v7 = vpop.permute.xlu0 %2665  ;;  %v2563_v52 = vsel %vm115_vm0, %v12707_v16, 0.0 }
 0xf30   :  { %11542 = vpow2.f32 %v2524_v32  ;;  %2564 = vadd.xlane.f32.xlu0 %v2563_v52  ;;  %10352 = vmatpush3.bf16.msra.mxu1 %v2666_v7  ;;  %v12713_v36 = vpop.eup %11532 }
 0xf31   :  { %10363 = vmatprep.subr.bf16.mxu1 %v11955_v12  ;;  %v2554_v40 = vsel %vm115_vm0, %v12713_v36, 0.0  ;;  %v2760_v14 = vpop.permute.xlu1 %2759 }
 0xf32   :  { %v12716_v1 = vpop.eup %11534  ;;  %2555 = vadd.xlane.f32.xlu1 %v2554_v40 }
 0xf33   :  { %v2557_v54 = vsel %vm115_vm0, %v12716_v1, 0.0  ;;  %v12742_v26 = vpop.permute.xlu0 %2806 }
 0xf34   :  { %2558 = vadd.xlane.f32.xlu0 %v2557_v54  ;;  %v12722_v46 = vpop.eup %11536 }
 0xf35   :  { %v2572_v35 = vsel %vm115_vm0, %v12722_v46, 0.0  ;;  %v2854_v59 = vpop.permute.xlu1 %2853 }
 0xf36   :  { %v12724_v61 = vpop.eup %11538  ;;  %2573 = vadd.xlane.f32.xlu1 %v2572_v35 }
 0xf37   :  { %v2575_v5 = vsel %vm115_vm0, %v12724_v61, 0.0 }
 0xf38   :  { %2576 = vadd.xlane.f32.xlu0 %v2575_v5  ;;  %v12730_v2 = vpop.eup %11540 }
 0xf39   :  { %v2566_v39 = vsel %vm115_vm0, %v12730_v2, 0.0 }
 0xf3a   :  { %v12732_v29 = vpop.eup %11542  ;;  %2567 = vadd.xlane.f32.xlu1 %v2566_v39 }
 0xf3b   :  { %v2569_v21 = vsel %vm115_vm0, %v12732_v29, 0.0 }
 0xf3c   :  { %2570 = vadd.xlane.f32.xlu0 %v2569_v21 }
 0xf4b   :  { %2947 = vrot.lane.b32.xlu1 %v12532_v19, %s11952_s2 }
 0xf52   :  { %2900 = vrot.lane.b32.xlu0 %v12526_v33, %s11952_s2 }
 0xf64   :  { %v2541_v45 = vpop.xlane.xlu0 %2540 }
 0xf65   :  { %11544 = vrcp.f32 %v2541_v45 }
 0xf66   :  { %v2538_v63 = vpop.xlane.xlu1 %2537 }
 0xf67   :  { %11546 = vrcp.f32 %v2538_v63 }
 0xf68   :  { %v2535_v10 = vpop.xlane.xlu0 %2534 }
 0xf69   :  { %11548 = vrcp.f32 %v2535_v10 }
 0xf6a   :  { %v2532_v41 = vpop.xlane.xlu1 %2531 }
 0xf6b   :  { %11550 = vrcp.f32 %v2532_v41 }
 0xf6f   :  { %v11545_v13 = vpop.eup %11544 }
 0xf70   :  { %v2597_v19 = vmul.f32 %v11545_v13, %v12661_v44 }
 0xf71   :  { %v11547_v23 = vpop.eup %11546 }
 0xf72   :  { %v2596_v17 = vmul.f32 %v11547_v23, %v12663_v11 }
 0xf73   :  { %v11549_v33 = vpop.eup %11548 }
 0xf74   :  { %v2611_v24 = vpack.c.bf16 %v2597_v19, %v2596_v17  ;;  %v2595_v53 = vmul.f32 %v11549_v33, %v12667_v0 }
 0xf75   :  { %v11551_v20 = vpop.eup %11550 }
 0xf76   :  { %v2594_v25 = vmul.f32 %v11551_v20, %v12671_v38  ;;  %10354 = vmatmul.mubr.msk.bf16.vlgmr.msra.gmra.mrb[60].mxu1 %vm115_vm0, %v2611_v24 }
 0xf77   :  { %10364 = vmatpush3.bf16.msra.mxu1 %v2760_v14  ;;  %10365 = vmatprep.mubr.msk.bf16.mxu1 %vm11960_vm6, %v11955_v12 }
 0xf78   :  { %v2610_v4 = vpack.c.bf16 %v2595_v53, %v2594_v25  ;;  %10375 = vmatprep.subr.bf16.mxu1 %v11955_v12 }
 0xf7a   :  { %10348 = vmatmul.mubr.msk.bf16.vlgmr.msra.gmra.mrb[64].mxu0 %vm115_vm0, %v2610_v4 }
 0xf7b   :  { %10358 = vmatpush3.bf16.msra.mxu0 %v2713_v43  ;;  %10359 = vmatprep.mubr.msk.bf16.mxu0 %vm11960_vm6, %v11955_v12 }
 0xf7c   :  { %10369 = vmatprep.subr.bf16.mxu0 %v11955_v12 }
 0xfb2   :  { %v2550_v44 = vpop.xlane.xlu1 %2549 }
 0xfb3   :  { %11552 = vrcp.f32 %v2550_v44 }
 0xfb4   :  { %v2553_v11 = vpop.xlane.xlu0 %2552 }
 0xfb5   :  { %11554 = vrcp.f32 %v2553_v11 }
 0xfb6   :  { %v2544_v0 = vpop.xlane.xlu1 %2543 }
 0xfb7   :  { %11556 = vrcp.f32 %v2544_v0 }
 0xfb8   :  { %v2547_v38 = vpop.xlane.xlu0 %2546 }
 0xfb9   :  { %11558 = vrcp.f32 %v2547_v38 }
 0xfbb   :  { %v2562_v27 = vpop.xlane.xlu1 %2561 }
 0xfbc   :  { %11560 = vrcp.f32 %v2562_v27 }
 0xfbd   :  { %v11553_v56 = vpop.eup %11552  ;;  %v2565_v22 = vpop.xlane.xlu0 %2564 }
 0xfbe   :  { %11562 = vrcp.f32 %v2565_v22  ;;  %v2600_v58 = vmul.f32 %v11553_v56, %v12683_v6 }
 0xfbf   :  { %v11555_v30 = vpop.eup %11554  ;;  %v2556_v60 = vpop.xlane.xlu1 %2555 }
 0xfc0   :  { %v2601_v55 = vmul.f32 %v11555_v30, %v12689_v18  ;;  %11564 = vrcp.f32 %v2556_v60 }
 0xfc1   :  { %v11557_v42 = vpop.eup %11556  ;;  %v2559_v47 = vpop.xlane.xlu0 %2558 }
 0xfc2   :  { %11566 = vrcp.f32 %v2559_v47  ;;  %v2613_v32 = vpack.c.bf16 %v2601_v55, %v2600_v58  ;;  %v2598_v7 = vmul.f32 %v11557_v42, %v12693_v15  ;;  %v11390_v47 = vld [vmem:[#allocation4 + $0x60] sm:$0xff]  }
 0xfc3   :  { %v11559_v57 = vpop.eup %11558  ;;  %v2574_v40 = vpop.xlane.xlu1 %2573 }
 0xfc4   :  { %v2599_v52 = vmul.f32 %v11559_v57, %v12699_v31  ;;  %10366 = vmatmul.mubr.msk.bf16.vlgmr.msra.gmra.mrb[64].mxu1 %vm115_vm0, %v2613_v32  ;;  %11568 = vrcp.f32 %v2574_v40 }
 0xfc5   :  { %10376 = vmatpush3.bf16.msra.mxu1 %v2854_v59  ;;  %v2577_v54 = vpop.xlane.xlu0 %2576  ;;  %10377 = vmatprep.mubr.msk.bf16.mxu1 %vm11960_vm6, %v11955_v12 }
 0xfc6   :  { %11570 = vrcp.f32 %v2577_v54  ;;  %v2612_v6 = vpack.c.bf16 %v2599_v52, %v2598_v7  ;;  %10387 = vmatprep.subr.bf16.mxu1 %v11955_v12  ;;  %v11561_v18 = vpop.eup %11560  ;;  %v11391_v54 = vld [vmem:[#allocation4 + $0x68] sm:$0xff]  }
 0xfc7   :  { %v2568_v5 = vpop.xlane.xlu1 %2567  ;;  %v2604_v15 = vmul.f32 %v11561_v18, %v12705_v34 }
 0xfc8   :  { %v11563_v35 = vpop.eup %11562  ;;  %10360 = vmatmul.mubr.msk.bf16.vlgmr.msra.gmra.mrb[68].mxu0 %vm115_vm0, %v2612_v6  ;;  %11572 = vrcp.f32 %v2568_v5 }
 0xfc9   :  { %v2605_v31 = vmul.f32 %v11563_v35, %v12707_v16  ;;  %10370 = vmatpush3.bf16.msra.mxu0 %v12742_v26  ;;  %v2571_v39 = vpop.xlane.xlu0 %2570  ;;  %10371 = vmatprep.mubr.msk.bf16.mxu0 %vm11960_vm6, %v11955_v12 }
 0xfca   :  { %11574 = vrcp.f32 %v2571_v39  ;;  %10381 = vmatprep.subr.bf16.mxu0 %v11955_v12  ;;  %v11565_v21 = vpop.eup %11564 }
 0xfcb   :  { %v2615_v43 = vpack.c.bf16 %v2605_v31, %v2604_v15  ;;  %v2948_v59 = vpop.permute.xlu1 %2947  ;;  %v2602_v45 = vmul.f32 %v11565_v21, %v12713_v36 }
 0xfcc   :  { %v11567_v14 = vpop.eup %11566 }
 0xfcd   :  { %v2603_v34 = vmul.f32 %v11567_v14, %v12716_v1  ;;  %10378 = vmatmul.mubr.msk.bf16.vlgmr.msra.gmra.mrb[68].mxu1 %vm115_vm0, %v2615_v43  ;;  %v2901_v13 = vpop.permute.xlu0 %2900 }
 0xfce   :  { %10388 = vmatpush3.bf16.msra.mxu1 %v2948_v59  ;;  %10389 = vmatprep.mubr.msk.bf16.mxu1 %vm11960_vm6, %v11955_v12  ;;  %v11569_v16 = vpop.eup %11568 }
 0xfcf   :  { %v2614_v26 = vpack.c.bf16 %v2603_v34, %v2602_v45  ;;  %v2608_v10 = vmul.f32 %v11569_v16, %v12722_v46 }
 0xfd0   :  { %v11571_v63 = vpop.eup %11570 }
 0xfd1   :  { %v2609_v41 = vmul.f32 %v11571_v63, %v12724_v61  ;;  %10372 = vmatmul.mubr.msk.bf16.vlgmr.msra.gmra.mrb[72].mxu0 %vm115_vm0, %v2614_v26 }
 0xfd2   :  { %10382 = vmatpush3.bf16.msra.mxu0 %v2901_v13  ;;  %10383 = vmatprep.mubr.msk.bf16.mxu0 %vm11960_vm6, %v11955_v12  ;;  %v11573_v36 = vpop.eup %11572 }
 0xfd3   :  { %v2617_v1 = vpack.c.bf16 %v2609_v41, %v2608_v10  ;;  %v2606_v19 = vmul.f32 %v11573_v36, %v12730_v2  ;;  %10393 = vmatprep.subr.bf16.mxu0 %v11390_v47 }
 0xfd4   :  { %v11575_v23 = vpop.eup %11574 }
 0xfd5   :  { %v2607_v17 = vmul.f32 %v11575_v23, %v12732_v29  ;;  %10390 = vmatmul.mubr.msk.bf16.vlgmr.msra.gmra.mrb[72].mxu1 %vm115_vm0, %v2617_v1 }
 0xfd7   :  { %v2616_v33 = vpack.c.bf16 %v2607_v17, %v2606_v19 }
 0xfd9   :  { %10384 = vmatmul.mubr.msk.bf16.vlgmr.msra.gmra.mrb[76].mxu0 %vm115_vm0, %v2616_v33 }
 0xfda   :  { %10394 = vmatpush3.bf16.msra.mxu0 %v11390_v47 }
 0xfdb   :  { %10395 = vmatprep.subr.bf16.mxu0 %v11391_v54 }
 0xfde   :  { %10396 = vmatpush3.bf16.msra.mxu0 %v11391_v54 }
0x1049   :  { %v2705_v46 = vpop.f32.mrb[60].mxu1 }
0x104a   :  { %v10355_v61 = vpop.f32.mrb[61].mxu1 }
0x104b   :  { %v2708_v24 = vpop.f32.mrb[62].mxu1 }
0x104c   :  { %v10356_v20 = vpop.f32.mrb[63].mxu1 }
0x104d   :  { %v12785_v53 = vpop.f32.mrb[64].mxu0 }
0x104e   :  { %v10349_v25 = vpop.f32.mrb[65].mxu0 }
0x104f   :  { %v12787_v4 = vpop.f32.mrb[66].mxu0 }
0x1050   :  { %v10350_v44 = vpop.f32.mrb[67].mxu0 }
0x1097   :  { %v2799_v11 = vpop.f32.mrb[64].mxu1 }
0x1098   :  { %v10367_v0 = vpop.f32.mrb[65].mxu1 }
0x1099   :  { %v2802_v2 = vpop.f32.mrb[66].mxu1 }
0x109a   :  { %v11048_v38 = vpack.i.bf16 %v2802_v2, %v2799_v11  ;;  %v10368_v29 = vpop.f32.mrb[67].mxu1 }
0x109b   :  { %v2752_v27 = vpop.f32.mrb[68].mxu0 }
0x109c   :  { %11049 = vrot.lane.b32.xlu1 %v11048_v38, %s11950_s29  ;;  %v10361_v56 = vpop.f32.mrb[69].mxu0 }
0x109d   :  { %v2755_v22 = vpop.f32.mrb[70].mxu0 }
0x109e   :  { %v11053_v30 = vpack.i.bf16 %v2755_v22, %v2752_v27  ;;  %v10362_v58 = vpop.f32.mrb[71].mxu0 }
0x10a0   :  { %11054 = vrot.lane.b32.xlu0 %v11053_v30, %s11950_s29  ;;  %v2893_v55 = vpop.f32.mrb[68].mxu1 }
0x10a1   :  { %v10379_v60 = vpop.f32.mrb[69].mxu1 }
0x10a2   :  { %v2896_v42 = vpop.f32.mrb[70].mxu1 }
0x10a3   :  { %v11058_v32 = vpack.i.bf16 %v2896_v42, %v2893_v55  ;;  %v10380_v57 = vpop.f32.mrb[71].mxu1 }
0x10a4   :  { %v2846_v7 = vpop.f32.mrb[72].mxu0 }
0x10a5   :  { %11059 = vrot.lane.b32.xlu1 %v11058_v32, %s11961_s0  ;;  %v10373_v52 = vpop.f32.mrb[73].mxu0 }
0x10a6   :  { %v2849_v40 = vpop.f32.mrb[74].mxu0 }
0x10a7   :  { %v11063_v6 = vpack.i.bf16 %v2849_v40, %v2846_v7  ;;  %v10374_v18 = vpop.f32.mrb[75].mxu0 }
0x10a8   :  { %v2987_v35 = vpop.f32.mrb[72].mxu1 }
0x10a9   :  { %11064 = vrot.lane.b32.xlu0 %v11063_v6, %s11961_s0  ;;  %v10391_v5 = vpop.f32.mrb[73].mxu1 }
0x10aa   :  { %v2990_v15 = vpop.f32.mrb[74].mxu1 }
0x10ab   :  { %v11073_v31 = vpack.i.bf16 %v2990_v15, %v2987_v35  ;;  %v10392_v39 = vpop.f32.mrb[75].mxu1 }
0x10ac   :  { %v2940_v21 = vpop.f32.mrb[76].mxu0 }
0x10ad   :  { %11074 = vrot.lane.b32.xlu1 %v11073_v31, %s11962_s24  ;;  %v10385_v43 = vpop.f32.mrb[77].mxu0 }
0x10ae   :  { %v2943_v14 = vpop.f32.mrb[78].mxu0 }
0x10af   :  { %v11068_v59 = vpack.i.bf16 %v2943_v14, %v2940_v21  ;;  %v10386_v45 = vpop.f32.mrb[79].mxu0 }
0x10b1   :  { %11069 = vrot.lane.b32.xlu0 %v11068_v59, %s11962_s24 }
0x110e   :  { %v11050_v34 = vpop.permute.xlu1 %11049 }
0x110f   :  { %v11052_v63 = vunpack.i.h.bf16 %v11050_v34  ;;  %v11051_v10 = vunpack.i.l.bf16 %v11050_v34 }
0x1111   :  { %v3045_v1 = vsel %vm453_vm11, %v2708_v24, %v11052_v63  ;;  %v3044_v23 = vsel %vm453_vm11, %v2705_v46, %v11051_v10 }
0x1112   :  { %v11055_v16 = vpop.permute.xlu0 %11054 }
0x1113   :  { %v11057_v17 = vunpack.i.h.bf16 %v11055_v16  ;;  %v11056_v33 = vunpack.i.l.bf16 %v11055_v16 }
0x1115   :  { %v3043_v46 = vsel %vm453_vm11, %v12787_v4, %v11057_v17  ;;  %v3042_v24 = vsel %vm453_vm11, %v12785_v53, %v11056_v33  ;;  %v9657_v4 = vld [vmem:[%s14526_s4 + $0x9] ss:$0 sm:$0xff]  ;;  %v11392_v33 = vld [vmem:[#allocation4 + $0x70] sm:$0xff]  }
0x1116   :  { %10401 = vmatprep.subr.bf16.mxu1 %v11392_v33 }
0x1117   :  { %v11060_v26 = vpop.permute.xlu1 %11059  ;;  %10402 = vmatpush3.bf16.msra.mxu1 %v11392_v33 }
0x1118   :  { %v11062_v41 = vunpack.i.h.bf16 %v11060_v26  ;;  %v11061_v13 = vunpack.i.l.bf16 %v11060_v26 }
0x111a   :  { %v3049_v25 = vsel %vm115_vm0, %v3045_v1, %v11062_v41  ;;  %v3048_v44 = vsel %vm115_vm0, %v3044_v23, %v11061_v13 }
0x111b   :  { %v11065_v36 = vpop.permute.xlu0 %11064 }
0x111c   :  { %v11067_v11 = vunpack.i.h.bf16 %v11065_v36  ;;  %v11066_v0 = vunpack.i.l.bf16 %v11065_v36 }
0x111e   :  { %v3046_v30 = vsel %vm115_vm0, %v3042_v24, %v11066_v0  ;;  %v3047_v58 = vsel %vm115_vm0, %v3043_v46, %v11067_v11 }
0x111f   :  { %v11075_v19 = vpop.permute.xlu1 %11074 }
0x1120   :  { %v11077_v61 = vunpack.i.h.bf16 %v11075_v19  ;;  %v11076_v20 = vunpack.i.l.bf16 %v11075_v19 }
0x1122   :  { %v3053_v2 = vsel %vm1483_vm12, %v3049_v25, %v11077_v61  ;;  %v3052_v38 = vsel %vm1483_vm12, %v3048_v44, %v11076_v20  ;;  %v11393_v61 = vld [vmem:[#allocation4 + $0x78] sm:$0xff]   ;;  %v11394_v20 = vld [vmem:[#allocation4 + $0xa0] sm:$0xff]   ;;  %v11397_v44 = vld [vmem:[#allocation4 + $0x88] sm:$0xff]  }
0x1123   :  { %v3059_v29 = vpack.c.bf16 %v3053_v2, %v3052_v38  ;;  %v11070_v27 = vpop.permute.xlu0 %11069  ;;  %10403 = vmatprep.subr.bf16.mxu1 %v11393_v61  ;;  %v11396_v25 = vld [vmem:[#allocation4 + $0x80] sm:$0xff]  }
0x1124   :  { %v11072_v56 = vunpack.i.h.bf16 %v11070_v27  ;;  %v11071_v22 = vunpack.i.l.bf16 %v11070_v27  ;;  %10404 = vmatpush3.bf16.msra.mxu1 %v11393_v61  ;;  %10409 = vmatprep.subr.bf16.mxu0 %v11396_v25 }
0x1125   :  { %10421 = vmatprep.subr.bf16.mxu1 %v11394_v20 }
0x1126   :  { %v3050_v55 = vsel %vm1483_vm12, %v3046_v30, %v11071_v22  ;;  %v3051_v60 = vsel %vm1483_vm12, %v3047_v58, %v11072_v56 }
0x1127   :  { %v3058_v42 = vpack.c.bf16 %v3051_v60, %v3050_v55  ;;  %v9662_v60 = vld [vmem:[%s14526_s4 + $0xc] ss:$0 sm:$0xff] }
0x1129   :  { %10397 = vmatprep.mubr.msk.bf16.mxu0 %vm346_vm5, %v3058_v42 }
0x112a   :  { %10398 = vmatmul.mubr.msk.bf16.vlgmr.msra.gmra.mrb[80].mxu0 %vm346_vm5, %v3059_v29 }
0x112b   :  { %10410 = vmatpush3.bf16.msra.mxu0 %v11396_v25 }
0x112c   :  { %10411 = vmatprep.subr.bf16.mxu0 %v11397_v44 }
0x112f   :  { %10412 = vmatpush3.bf16.msra.mxu0 %v11397_v44 }
0x11fd   :  { %v10399_v53 = vpop.f32.mrb[80].mxu0 }
0x11fe   :  { %v3117_v47 = vpop.f32.mrb[81].mxu0  ;;  %v3126_v32 = vadd.f32 %v10399_v53, %v9657_v4 }
0x11ff   :  { %v3118_v57 = vadd.f32 %v9657_v4, %v3117_v47  ;;  %v10400_v7 = vpop.f32.mrb[82].mxu0 }
0x1200   :  { %v3120_v52 = vpop.f32.mrb[83].mxu0  ;;  %v3134_v6 = vadd.f32 %v3126_v32, %v12487_v62  ;;  %v3129_v18 = vadd.f32 %v10400_v7, %v9657_v4 }
0x1201   :  { %v3132_v40 = vadd.f32 %v3118_v57, %v12480_v28  ;;  %v3121_v54 = vadd.f32 %v9657_v4, %v3120_v52  ;;  %v9663_v57 = vld [vmem:[%s14526_s4 + $0xd] ss:$0 sm:$0xff] }
0x1202   :  { %v3135_v31 = vadd.f32 %v3129_v18, %v12489_v3  ;;  %v3144_v39 = vsel %vm346_vm5, %v3134_v6, 0.0 }
0x1203   :  { %v3133_v35 = vadd.f32 %v3121_v54, %v12482_v37  ;;  %v3138_v5 = vsel %vm346_vm5, %v3132_v40, 0.0 }
0x1204   :  { %3139 = vadd.xlane.f32.xlu0 %v3138_v5  ;;  %v3147_v21 = vsel %vm346_vm5, %v3135_v31, 0.0 }
0x1205   :  { %v3141_v15 = vsel %vm346_vm5, %v3133_v35, 0.0 }
0x1206   :  { %3142 = vadd.xlane.f32.xlu1 %v3141_v15 }
0x1208   :  { %3145 = vadd.xlane.f32.xlu0 %v3144_v39 }
0x120c   :  { %3148 = vadd.xlane.f32.xlu0 %v3147_v21  ;;  %v11897_v21 = vld [vmem:[#allocation2] sm:$0xff] }
0x1291   :  { %v3140_v28 = vpop.xlane.xlu0 %3139 }
0x1292   :  { %v3150_v43 = vmul.f32 0.03125, %v3140_v28  ;;  %v12843_v28 = vadd.f32 %v11897_v21, %v12197_v49 }
0x1293   :  { %v3143_v62 = vpop.xlane.xlu1 %3142 }
0x1294   :  { %v3154_v14 = vsub.f32 %v3132_v40, %v3150_v43  ;;  %v3151_v59 = vmul.f32 0.03125, %v3143_v62 }
0x1295   :  { %v3146_v37 = vpop.xlane.xlu0 %3145 }
0x1296   :  { %v3155_v45 = vsub.f32 %v3133_v35, %v3151_v59  ;;  %v3152_v34 = vmul.f32 0.03125, %v3146_v37  ;;  %v3158_v16 = vmul.f32 %v3154_v14, %v3154_v14  ;;  %v11395_v59 = vld [vmem:[#allocation4 + $0xa8] sm:$0xff]  }
0x1298   :  { %v3156_v26 = vsub.f32 %v3134_v6, %v3152_v34  ;;  %v3162_v63 = vsel %vm346_vm5, %v3158_v16, 0.0  ;;  %v3159_v10 = vmul.f32 %v3155_v45, %v3155_v45 }
0x1299   :  { %3163 = vadd.xlane.f32.xlu1 %v3162_v63  ;;  %v3149_v3 = vpop.xlane.xlu0 %3148 }
0x129a   :  { %v3153_v41 = vmul.f32 0.03125, %v3149_v3  ;;  %v3165_v13 = vsel %vm346_vm5, %v3159_v10, 0.0  ;;  %v3160_v36 = vmul.f32 %v3156_v26, %v3156_v26 }
0x129b   :  { %3166 = vadd.xlane.f32.xlu0 %v3165_v13 }
0x129c   :  { %v3157_v1 = vsub.f32 %v3135_v31, %v3153_v41  ;;  %v3168_v23 = vsel %vm346_vm5, %v3160_v36, 0.0  ;;  %v11896_v31 = vld [vmem:[#allocation2 + $0x8] sm:$0xff] }
0x129d   :  { %3169 = vadd.xlane.f32.xlu1 %v3168_v23  ;;  %v12840_v39 = vadd.f32 %v11896_v31, %v12195_v48  ;;  %v11898_v48 = vld [vmem:[#allocation2 + $0x18] sm:$0xff] }
0x129e   :  { %v3161_v19 = vmul.f32 %v3157_v1, %v3157_v1  ;;  %v12856_v49 = vadd.f32 %v11898_v48, %v12199_v50  ;;  %v11399_v50 = vld [vmem:[#allocation4 + $0x98] sm:$0xff]  }
0x129f   :  { %v3460_v37 = vpack.c.bf16 %v12840_v39, %v12843_v28 }
0x12a0   :  { %v3171_v17 = vsel %vm346_vm5, %v3161_v19, 0.0 }
0x12a1   :  { %3172 = vadd.xlane.f32.xlu0 %v3171_v17 }
0x1326   :  { %v3164_v11 = vpop.xlane.xlu1 %3163 }
0x1327   :  { %v3174_v0 = vmul.f32 0.03125, %v3164_v11  ;;  %v9678_v11 = vld [vmem:[%s14526_s4 + $0x10] ss:$0 sm:$0xff] }
0x1328   :  { %v3167_v2 = vpop.xlane.xlu0 %3166 }
0x1329   :  { %v3178_v38 = vadd.f32 1e-05, %v3174_v0  ;;  %v3175_v29 = vmul.f32 0.03125, %v3167_v2 }
0x132a   :  { %v3170_v27 = vpop.xlane.xlu1 %3169 }
0x132b   :  { %11576 = vrsqrt.f32 %v3178_v38  ;;  %v3179_v46 = vadd.f32 1e-05, %v3175_v29  ;;  %v3176_v24 = vmul.f32 0.03125, %v3170_v27 }
0x132d   :  { %11578 = vrsqrt.f32 %v3179_v46  ;;  %v3180_v56 = vadd.f32 1e-05, %v3176_v24 }
0x132e   :  { %v3173_v22 = vpop.xlane.xlu0 %3172 }
0x132f   :  { %11580 = vrsqrt.f32 %v3180_v56  ;;  %v3177_v30 = vmul.f32 0.03125, %v3173_v22 }
0x1331   :  { %v3181_v58 = vadd.f32 1e-05, %v3177_v30 }
0x1333   :  { %11582 = vrsqrt.f32 %v3181_v58 }
0x1335   :  { %v11577_v55 = vpop.eup %11576 }
0x1336   :  { %v3186_v42 = vmul.f32 %v11577_v55, %v3154_v14 }
0x1337   :  { %v11579_v4 = vpop.eup %11578 }
0x1338   :  { %v3187_v53 = vmul.f32 %v11579_v4, %v3155_v45  ;;  %v3194_v47 = vmul.f32 %v9662_v60, %v3186_v42  ;;  %v11899_v45 = vld [vmem:[#allocation2 + $0x10] sm:$0xff] }
0x1339   :  { %v11581_v32 = vpop.eup %11580  ;;  %v12859_v34 = vadd.f32 %v11899_v45, %v12201_v51  ;;  %v9664_v51 = vld [vmem:[%s14526_s4 + $0xa] ss:$0 sm:$0xff] }
0x133a   :  { %v3188_v7 = vmul.f32 %v11581_v32, %v3156_v26  ;;  %v3195_v52 = vmul.f32 %v9662_v60, %v3187_v53  ;;  %v12832_v40 = vadd.f32 %v9663_v57, %v3194_v47  ;;  %v11398_v26 = vld [vmem:[#allocation4 + $0x90] sm:$0xff]  }
0x133b   :  { %v3461_v16 = vpack.c.bf16 %v12856_v49, %v12859_v34  ;;  %10413 = vmatprep.subr.bf16.mxu0 %v11398_v26 }
0x133c   :  { %v12834_v54 = vadd.f32 %v9663_v57, %v3195_v52  ;;  %v3196_v5 = vmul.f32 %v9662_v60, %v3188_v7  ;;  %10414 = vmatpush3.bf16.msra.mxu0 %v11398_v26 }
0x133d   :  { %v11583_v6 = vpop.eup %11582  ;;  %10415 = vmatprep.subr.bf16.mxu0 %v11399_v50 }
0x133e   :  { %v3189_v18 = vmul.f32 %v11583_v6, %v3157_v1  ;;  %v3210_v35 = vpack.c.bf16 %v12834_v54, %v12832_v40  ;;  %v12845_v43 = vadd.f32 %v9663_v57, %v3196_v5 }
0x1340   :  { %10405 = vmatprep.mubr.msk.bf16.mxu1 %vm346_vm5, %v3210_v35  ;;  %v3197_v15 = vmul.f32 %v9662_v60, %v3189_v18  ;;  %10416 = vmatpush3.bf16.msra.mxu0 %v11399_v50 }
0x1341   :  { %10435 = vmatprep.subr.bf16.mxu0 %v11955_v12 }
0x1342   :  { %v12847_v62 = vadd.f32 %v9663_v57, %v3197_v15 }
0x1344   :  { %v3211_v14 = vpack.c.bf16 %v12847_v62, %v12845_v43 }
0x1346   :  { %10406 = vmatmul.mubr.msk.bf16.vlgmr.msra.gmra.mrb[76].mxu1 %vm346_vm5, %v3211_v14 }
0x1347   :  { %10422 = vmatpush3.bf16.msra.mxu1 %v11394_v20  ;;  %10425 = vmatprep.mubr.msk.bf16.mxu1 %vm346_vm5, %v3460_v37 }
0x1348   :  { %10423 = vmatprep.subr.bf16.mxu1 %v11395_v59 }
0x134b   :  { %10424 = vmatpush3.bf16.msra.mxu1 %v11395_v59 }
0x134c   :  { %10429 = vmatprep.subr.bf16.mxu1 %v11955_v12 }
0x134e   :  { %10426 = vmatmul.mubr.msk.bf16.vlgmr.msra.gmra.mrb[80].mxu1 %vm346_vm5, %v3461_v16 }
0x134f   :  { %10431 = vmatprep.mubr.msk.bf16.mxu1 %vm11960_vm6, %v11955_v12 }
0x1419   :  { %v10407_v63 = vpop.f32.mrb[76].mxu1 }
0x141a   :  { %v3278_v10 = vadd.f32 %v10407_v63, %v9664_v51  ;;  %v3269_v3 = vpop.f32.mrb[77].mxu1 }
0x141b   :  { %v3270_v41 = vadd.f32 %v9664_v51, %v3269_v3  ;;  %v10408_v13 = vpop.f32.mrb[78].mxu1 }
0x141c   :  { %v3281_v36 = vadd.f32 %v10408_v13, %v9664_v51  ;;  %v3272_v1 = vpop.f32.mrb[79].mxu1  ;;  %v3286_v19 = vmax.f32 %v3278_v10, 0.0 }
0x141d   :  { %v3273_v23 = vadd.f32 %v9664_v51, %v3272_v1  ;;  %v3284_v33 = vmax.f32 %v3270_v41, 0.0 }
0x141e   :  { %v3287_v17 = vmax.f32 %v3281_v36, 0.0 }
0x141f   :  { %v3285_v61 = vmax.f32 %v3273_v23, 0.0 }
0x1420   :  { %v3297_v20 = vpack.c.bf16 %v3287_v17, %v3286_v19 }
0x1421   :  { %v3296_v25 = vpack.c.bf16 %v3285_v61, %v3284_v33  ;;  %v10427_v44 = vpop.f32.mrb[80].mxu1 }
0x1422   :  { %v3519_v0 = vpop.f32.mrb[81].mxu1  ;;  %v3528_v38 = vadd.f32 %v10427_v44, %v9678_v11 }
0x1423   :  { %10417 = vmatprep.mubr.msk.bf16.mxu0 %vm1762_vm13, %v3296_v25  ;;  %v10428_v2 = vpop.f32.mrb[82].mxu1  ;;  %v3520_v46 = vadd.f32 %v9678_v11, %v3519_v0 }
0x1424   :  { %v3531_v29 = vadd.f32 %v10428_v2, %v9678_v11  ;;  %10418 = vmatmul.mubr.msk.bf16.vlgmr.msra.gmra.mrb[84].mxu0 %vm1762_vm13, %v3297_v20  ;;  %v3522_v27 = vpop.f32.mrb[83].mxu1 }
0x1425   :  { %v3523_v24 = vadd.f32 %v9678_v11, %v3522_v27  ;;  %10437 = vmatprep.mubr.msk.bf16.mxu0 %vm11960_vm6, %v11955_v12 }
0x1426   :  { %v11083_v56 = vpack.i.bf16 %v3531_v29, %v3528_v38  ;;  %v12878_v22 = vpack.c.bf16 %v3531_v29, %v3528_v38  ;;  %v311_v29 = vshrl.u32 %v57_v8, 7 }
0x1427   :  { %v11078_v30 = vpack.i.bf16 %v3523_v24, %v3520_v46  ;;  %v3574_v58 = vpack.c.bf16 %v3523_v24, %v3520_v46 }
0x1428   :  { %11084 = vrot.lane.b32.xlu0 %v11083_v56, %s11956_s9  ;;  %v312_v27 = vadd.s32 8, %v311_v29  ;;  %vm313_vm15 = vcmp.gt.s32.totalorder %v12039_v9, %v311_v29 }
0x1429   :  { %11079 = vrot.lane.b32.xlu1 %v11078_v30, %s11956_s9 }
0x142a   :  { %vm314_vm14 = vcmp.gt.s32.totalorder %v12039_v9, %v312_v27 }
0x142b   :  { %v12973_v46 = vsel %vm314_vm14, 1.0, %v11955_v12 }
0x142c   :  { %11099 = vrot.lane.b32.xlu0 %v11078_v30, %s11958_s11  ;;  %v320_v24 = vsub.f32 1.0, %v12973_v46 }
0x142d   :  { %11089 = vrot.lane.b32.xlu1 %v11078_v30, %s11957_s10 }
0x1430   :  { %3583 = vrot.lane.b32.xlu0 %v3574_v58, %s11959_s1 }
0x1431   :  { %11094 = vrot.lane.b32.xlu1 %v11083_v56, %s11957_s10 }
0x1435   :  { %11104 = vrot.lane.b32.xlu1 %v11083_v56, %s11958_s11 }
0x1439   :  { %3633 = vrot.lane.b32.xlu1 %v12878_v22, %s11959_s1 }
0x149a   :  { %v11085_v55 = vpop.permute.xlu0 %11084 }
0x149b   :  { %v11087_v60 = vunpack.i.h.bf16 %v11085_v55  ;;  %v11086_v42 = vunpack.i.l.bf16 %v11085_v55  ;;  %v11080_v4 = vpop.permute.xlu1 %11079 }
0x149c   :  { %v11082_v53 = vunpack.i.h.bf16 %v11080_v4  ;;  %v11081_v47 = vunpack.i.l.bf16 %v11080_v4  ;;  %v12980_v4 = vsel %vm313_vm15, 1.0, %v11955_v12 }
0x149d   :  { %v12889_v32 = vpack.c.bf16 %v11087_v60, %v11086_v42  ;;  %v12977_v42 = vmul.f32 -1e+09, %v320_v24 }
0x149e   :  { %v12891_v57 = vpack.c.bf16 %v11082_v53, %v11081_v47  ;;  %v11100_v7 = vpop.permute.xlu0 %11099 }
0x149f   :  { %3733 = vrot.lane.b32.xlu1 %v12889_v32, %s11959_s1  ;;  %v11090_v52 = vpop.permute.xlu1 %11089  ;;  %v11102_v35 = vunpack.i.h.bf16 %v11100_v7  ;;  %v11101_v5 = vunpack.i.l.bf16 %v11100_v7  ;;  %v319_v7 = vsub.f32 1.0, %v12980_v4 }
0x14a0   :  { %v11092_v6 = vunpack.i.h.bf16 %v11090_v52  ;;  %v11091_v18 = vunpack.i.l.bf16 %v11090_v52  ;;  %3683 = vrot.lane.b32.xlu0 %v12891_v57, %s11959_s1 }
0x14a1   :  { %v12903_v48 = vpack.c.bf16 %v11102_v35, %v11101_v5 }
0x14a2   :  { %v12897_v15 = vpack.c.bf16 %v11092_v6, %v11091_v18  ;;  %v3584_v31 = vpop.permute.xlu0 %3583 }
0x14a3   :  { %v3589_v21 = vsel %vm453_vm11, %v3584_v31, 0  ;;  %v11095_v14 = vpop.permute.xlu1 %11094 }
0x14a4   :  { %v11097_v59 = vunpack.i.h.bf16 %v11095_v14  ;;  %v11096_v37 = vunpack.i.l.bf16 %v11095_v14  ;;  %3783 = vrot.lane.b32.xlu0 %v12897_v15, %s11959_s1  ;;  %10430 = vmatpush3.bf16.xpose.msra.mxu1 %v3589_v21 }
0x14a5   :  { %10441 = vmatprep.subr.bf16.mxu1 %v11955_v12 }
0x14a6   :  { %v12905_v45 = vpack.c.bf16 %v11097_v59, %v11096_v37  ;;  %v12991_v59 = vmul.f32 -1e+09, %v319_v7 }
0x14a7   :  { %v11105_v16 = vpop.permute.xlu1 %11104 }
0x14a8   :  { %v11107_v26 = vunpack.i.h.bf16 %v11105_v16  ;;  %v11106_v50 = vunpack.i.l.bf16 %v11105_v16  ;;  %3833 = vrot.lane.b32.xlu1 %v12905_v45, %s11959_s1  ;;  %3883 = vrot.lane.b32.xlu0 %v12903_v48, %s11959_s1 }
0x14aa   :  { %v12911_v51 = vpack.c.bf16 %v11107_v26, %v11106_v50 }
0x14ab   :  { %v3634_v63 = vpop.permute.xlu1 %3633  ;;  %10432 = vmatmul.mubr.msk.bf16.vlgmr.msra.gmra.mrb[84].mxu1 %vm453_vm11, %v3574_v58 }
0x14ac   :  { %v3639_v10 = vsel %vm453_vm11, %v3634_v63, 0  ;;  %3933 = vrot.lane.b32.xlu1 %v12911_v51, %s11959_s1  ;;  %10443 = vmatprep.mubr.msk.bf16.mxu1 %vm11960_vm6, %v11955_v12 }
0x14ad   :  { %10436 = vmatpush3.bf16.xpose.msra.mxu0 %v3639_v10 }
0x14ae   :  { %10447 = vmatprep.subr.bf16.mxu0 %v11955_v12 }
0x14b0   :  { %4214 = vrot.lane.b32.xlu1 %v3574_v58, %s11952_s2 }
0x14b4   :  { %10438 = vmatmul.mubr.msk.bf16.vlgmr.msra.gmra.mrb[88].mxu0 %vm453_vm11, %v12878_v22 }
0x14b5   :  { %10449 = vmatprep.mubr.msk.bf16.mxu0 %vm11960_vm6, %v11955_v12 }
0x14f7   :  { %v12925_v3 = vpop.f32.mrb[84].mxu0 }
0x14f8   :  { %v12927_v41 = vpop.f32.mrb[85].mxu0 }
0x14f9   :  { %v12929_v13 = vpop.f32.mrb[86].mxu0 }
0x14fa   :  { %v12931_v36 = vpop.f32.mrb[87].mxu0 }
0x1511   :  { %v3734_v1 = vpop.permute.xlu1 %3733 }
0x1512   :  { %v3739_v23 = vsel %vm453_vm11, %v3734_v1, 0  ;;  %v3684_v19 = vpop.permute.xlu0 %3683 }
0x1513   :  { %v3689_v17 = vsel %vm453_vm11, %v3684_v19, 0  ;;  %10448 = vmatpush3.bf16.xpose.msra.mxu0 %v3739_v23 }
0x1514   :  { %10442 = vmatpush3.bf16.xpose.msra.mxu1 %v3689_v17  ;;  %10459 = vmatprep.subr.bf16.mxu0 %v11955_v12 }
0x1515   :  { %10453 = vmatprep.subr.bf16.mxu1 %v11955_v12 }
0x1516   :  { %v3784_v33 = vpop.permute.xlu0 %3783 }
0x1517   :  { %v3789_v20 = vsel %vm453_vm11, %v3784_v33, 0 }
0x151a   :  { %v3834_v61 = vpop.permute.xlu1 %3833  ;;  %10450 = vmatmul.mubr.msk.bf16.vlgmr.msra.gmra.mrb[92].mxu0 %vm453_vm11, %v12889_v32  ;;  %v3884_v44 = vpop.permute.xlu0 %3883 }
0x151b   :  { %v3839_v25 = vsel %vm453_vm11, %v3834_v61, 0  ;;  %10444 = vmatmul.mubr.msk.bf16.vlgmr.msra.gmra.mrb[88].mxu1 %vm453_vm11, %v12891_v57  ;;  %10461 = vmatprep.mubr.msk.bf16.mxu0 %vm11960_vm6, %v11955_v12  ;;  %v3889_v0 = vsel %vm453_vm11, %v3884_v44, 0 }
0x151c   :  { %10454 = vmatpush3.bf16.xpose.msra.mxu1 %v3789_v20  ;;  %10460 = vmatpush3.bf16.xpose.msra.mxu0 %v3839_v25 }
0x151d   :  { %10455 = vmatprep.mubr.msk.bf16.mxu1 %vm11960_vm6, %v11955_v12  ;;  %10465 = vmatprep.subr.bf16.mxu1 %v11955_v12 }
0x151e   :  { %10471 = vmatprep.subr.bf16.mxu0 %v11955_v12  ;;  %v3934_v11 = vpop.permute.xlu1 %3933 }
0x151f   :  { %v3939_v2 = vsel %vm453_vm11, %v3934_v11, 0 }
0x1522   :  { %v4215_v38 = vpop.permute.xlu1 %4214 }
0x1523   :  { %10456 = vmatmul.mubr.msk.bf16.vlgmr.msra.gmra.mrb[92].mxu1 %vm453_vm11, %v12897_v15  ;;  %10462 = vmatmul.mubr.msk.bf16.vlgmr.msra.gmra.mrb[96].mxu0 %vm453_vm11, %v12905_v45 }
0x1524   :  { %10466 = vmatpush3.bf16.xpose.msra.mxu1 %v3889_v0  ;;  %10472 = vmatpush3.bf16.xpose.msra.mxu0 %v3939_v2 }
0x1525   :  { %10467 = vmatprep.mubr.msk.bf16.mxu1 %vm11960_vm6, %v11955_v12  ;;  %10473 = vmatprep.mubr.msk.bf16.mxu0 %vm11960_vm6, %v11955_v12 }
0x1526   :  { %10477 = vmatprep.subr.bf16.mxu1 %v11955_v12  ;;  %10483 = vmatprep.subr.bf16.mxu0 %v11955_v12 }
0x152b   :  { %10468 = vmatmul.mubr.msk.bf16.vlgmr.msra.gmra.mrb[96].mxu1 %vm453_vm11, %v12903_v48  ;;  %10474 = vmatmul.mubr.msk.bf16.vlgmr.msra.gmra.mrb[100].mxu0 %vm453_vm11, %v12911_v51 }
0x152c   :  { %10478 = vmatpush3.bf16.msra.mxu1 %v4215_v38  ;;  %10485 = vmatprep.mubr.msk.bf16.mxu0 %vm11960_vm6, %v11955_v12 }
0x152d   :  { %10479 = vmatprep.mubr.msk.bf16.mxu1 %vm11960_vm6, %v11955_v12  ;;  %10489 = vmatprep.subr.bf16.mxu1 %v11955_v12 }
0x157e   :  { %v3625_v56 = vpop.f32.mrb[84].mxu1 }
0x157f   :  { %v10433_v30 = vpop.f32.mrb[85].mxu1  ;;  %v3982_v47 = vmul.f32 0.35355338, %v3625_v56 }
0x1580   :  { %v3628_v58 = vpop.f32.mrb[86].mxu1 }
0x1581   :  { %v3983_v55 = vmul.f32 0.35355338, %v3628_v58  ;;  %v10434_v60 = vpop.f32.mrb[87].mxu1  ;;  %v3998_v5 = vmul.f32 %v12980_v4, %v3982_v47 }
0x1583   :  { %v3999_v8 = vmul.f32 %v12973_v46, %v3983_v55  ;;  %v13000_v50 = vadd.f32 %v3998_v5, %v12991_v59 }
0x1585   :  { %v12984_v53 = vadd.f32 %v3999_v8, %v12977_v42  ;;  %v4030_v63 = vsel %vm115_vm0, %v13000_v50, -inf }
0x1587   :  { %v3675_v52 = vpop.f32.mrb[88].mxu0  ;;  %v4033_v9 = vsel %vm115_vm0, %v12984_v53, -inf }
0x1588   :  { %v3984_v6 = vmul.f32 0.35355338, %v3675_v52  ;;  %4034 = vmax.xlane.f32.xlu1 %v4033_v9  ;;  %v10439_v18 = vpop.f32.mrb[89].mxu0 }
0x1589   :  { %v3678_v35 = vpop.f32.mrb[90].mxu0 }
0x158a   :  { %v4000_v31 = vmul.f32 %v12980_v4, %v3984_v6  ;;  %v3985_v21 = vmul.f32 0.35355338, %v3678_v35  ;;  %v10440_v14 = vpop.f32.mrb[91].mxu0 }
0x158c   :  { %v12994_v37 = vadd.f32 %v4000_v31, %v12991_v59  ;;  %v4001_v16 = vmul.f32 %v12973_v46, %v3985_v21 }
0x158e   :  { %v4036_v26 = vsel %vm115_vm0, %v12994_v37, -inf  ;;  %v13005_v10 = vadd.f32 %v4001_v16, %v12977_v42 }
0x158f   :  { %4037 = vmax.xlane.f32.xlu0 %v4036_v26 }
0x1590   :  { %v4039_v1 = vsel %vm115_vm0, %v13005_v10, -inf }
0x1593   :  { %4031 = vmax.xlane.f32.xlu0 %v4030_v63 }
0x1597   :  { %4040 = vmax.xlane.f32.xlu0 %v4039_v1 }
0x15ed   :  { %v3775_v23 = vpop.f32.mrb[92].mxu0 }
0x15ee   :  { %v3988_v19 = vmul.f32 0.35355338, %v3775_v23  ;;  %v3725_v17 = vpop.f32.mrb[88].mxu1  ;;  %v10451_v33 = vpop.f32.mrb[93].mxu0 }
0x15ef   :  { %v3986_v61 = vmul.f32 0.35355338, %v3725_v17  ;;  %v10445_v20 = vpop.f32.mrb[89].mxu1  ;;  %v3778_v25 = vpop.f32.mrb[94].mxu0 }
0x15f0   :  { %v4004_v44 = vmul.f32 %v12980_v4, %v3988_v19  ;;  %v3989_v11 = vmul.f32 0.35355338, %v3778_v25  ;;  %v3728_v0 = vpop.f32.mrb[90].mxu1  ;;  %v10452_v2 = vpop.f32.mrb[95].mxu0 }
0x15f1   :  { %v4002_v38 = vmul.f32 %v12980_v4, %v3986_v61  ;;  %v3987_v29 = vmul.f32 0.35355338, %v3728_v0  ;;  %v10446_v27 = vpop.f32.mrb[91].mxu1 }
0x15f2   :  { %v4005_v24 = vmul.f32 %v12973_v46, %v3989_v11  ;;  %v13013_v56 = vadd.f32 %v4004_v44, %v12991_v59 }
0x15f3   :  { %v4003_v30 = vmul.f32 %v12973_v46, %v3987_v29  ;;  %v13022_v60 = vadd.f32 %v4002_v38, %v12991_v59 }
0x15f4   :  { %v4048_v58 = vsel %vm115_vm0, %v13013_v56, -inf  ;;  %v13019_v55 = vadd.f32 %v4005_v24, %v12977_v42 }
0x15f5   :  { %4049 = vmax.xlane.f32.xlu1 %v4048_v58  ;;  %v13027_v52 = vadd.f32 %v4003_v30, %v12977_v42  ;;  %v4042_v21 = vsel %vm115_vm0, %v13022_v60, -inf }
0x15f6   :  { %v3825_v8 = vpop.f32.mrb[92].mxu1  ;;  %v3875_v47 = vpop.f32.mrb[96].mxu0  ;;  %v4051_v7 = vsel %vm115_vm0, %v13019_v55, -inf }
0x15f7   :  { %v3990_v9 = vmul.f32 0.35355338, %v3825_v8  ;;  %v3992_v6 = vmul.f32 0.35355338, %v3875_v47  ;;  %v10457_v18 = vpop.f32.mrb[93].mxu1  ;;  %4052 = vmax.xlane.f32.xlu0 %v4051_v7  ;;  %v10463_v35 = vpop.f32.mrb[97].mxu0 }
0x15f8   :  { %v3828_v5 = vpop.f32.mrb[94].mxu1  ;;  %v3878_v31 = vpop.f32.mrb[98].mxu0  ;;  %v4045_v19 = vsel %vm115_vm0, %v13027_v52, -inf }
0x15f9   :  { %v4006_v14 = vmul.f32 %v12980_v4, %v3990_v9  ;;  %v4008_v16 = vmul.f32 %v12980_v4, %v3992_v6  ;;  %v3991_v26 = vmul.f32 0.35355338, %v3828_v5  ;;  %v3993_v63 = vmul.f32 0.35355338, %v3878_v31  ;;  %v10458_v1 = vpop.f32.mrb[95].mxu1  ;;  %4043 = vmax.xlane.f32.xlu1 %v4042_v21  ;;  %v10464_v23 = vpop.f32.mrb[99].mxu0 }
0x15fb   :  { %v4009_v17 = vmul.f32 %v12973_v46, %v3993_v63  ;;  %4046 = vmax.xlane.f32.xlu0 %v4045_v19  ;;  %v13037_v33 = vadd.f32 %v4008_v16, %v12991_v59  ;;  %v4007_v61 = vmul.f32 %v12973_v46, %v3991_v26  ;;  %v13041_v20 = vadd.f32 %v4006_v14, %v12991_v59 }
0x15fd   :  { %v4060_v25 = vsel %vm115_vm0, %v13037_v33, -inf  ;;  %v13046_v44 = vadd.f32 %v4009_v17, %v12977_v42  ;;  %v4054_v8 = vsel %vm115_vm0, %v13041_v20, -inf  ;;  %v13053_v47 = vadd.f32 %v4007_v61, %v12977_v42 }
0x15fe   :  { %v3925_v11 = vpop.f32.mrb[96].mxu1  ;;  %4061 = vmax.xlane.f32.xlu1 %v4060_v25  ;;  %v3975_v0 = vpop.f32.mrb[100].mxu0 }
0x15ff   :  { %v3994_v2 = vmul.f32 0.35355338, %v3925_v11  ;;  %v3996_v38 = vmul.f32 0.35355338, %v3975_v0  ;;  %v10469_v29 = vpop.f32.mrb[97].mxu1  ;;  %v10475_v27 = vpop.f32.mrb[101].mxu0 }
0x1600   :  { %v3928_v24 = vpop.f32.mrb[98].mxu1  ;;  %v4063_v30 = vsel %vm115_vm0, %v13046_v44, -inf  ;;  %v3978_v58 = vpop.f32.mrb[102].mxu0  ;;  %v4057_v16 = vsel %vm115_vm0, %v13053_v47, -inf }
0x1601   :  { %v4010_v7 = vmul.f32 %v12980_v4, %v3994_v2  ;;  %v4012_v9 = vmul.f32 %v12980_v4, %v3996_v38  ;;  %v3995_v6 = vmul.f32 0.35355338, %v3928_v24  ;;  %4064 = vmax.xlane.f32.xlu0 %v4063_v30  ;;  %v3997_v18 = vmul.f32 0.35355338, %v3978_v58  ;;  %v10470_v35 = vpop.f32.mrb[99].mxu1  ;;  %v10476_v5 = vpop.f32.mrb[103].mxu0 }
0x1602   :  { %4055 = vmax.xlane.f32.xlu1 %v4054_v8 }
0x1603   :  { %v4013_v31 = vmul.f32 %v12973_v46, %v3997_v18  ;;  %v13059_v21 = vadd.f32 %v4012_v9, %v12991_v59  ;;  %v4011_v14 = vmul.f32 %v12973_v46, %v3995_v6  ;;  %v13070_v1 = vadd.f32 %v4010_v7, %v12991_v59 }
0x1605   :  { %4058 = vmax.xlane.f32.xlu0 %v4057_v16  ;;  %v4072_v26 = vsel %vm115_vm0, %v13059_v21, -inf  ;;  %v13067_v63 = vadd.f32 %v4013_v31, %v12977_v42  ;;  %v13075_v19 = vadd.f32 %v4011_v14, %v12977_v42  ;;  %v4066_v17 = vsel %vm115_vm0, %v13070_v1, -inf }
0x1606   :  { %4073 = vmax.xlane.f32.xlu1 %v4072_v26 }
0x1607   :  { %v4075_v23 = vsel %vm115_vm0, %v13067_v63, -inf  ;;  %v4069_v61 = vsel %vm115_vm0, %v13075_v19, -inf }
0x1609   :  { %4076 = vmax.xlane.f32.xlu0 %v4075_v23 }
0x160a   :  { %4067 = vmax.xlane.f32.xlu1 %v4066_v17 }
0x160d   :  { %4070 = vmax.xlane.f32.xlu0 %v4069_v61 }
0x1615   :  { %v4035_v38 = vpop.xlane.xlu1 %4034 }
0x1616   :  { %v4079_v29 = vsub.f32 %v12984_v53, %v4035_v38 }
0x161b   :  { %4308 = vrot.lane.b32.xlu1 %v12891_v57, %s11952_s2 }
0x161c   :  { %v4038_v25 = vpop.xlane.xlu0 %4037 }
0x161d   :  { %v4080_v57 = vsub.f32 %v12994_v37, %v4038_v25 }
0x161f   :  { %4355 = vrot.lane.b32.xlu1 %v12889_v32, %s11952_s2  ;;  %v4098_v27 = vmul.f32 1.442695, %v4080_v57 }
0x1620   :  { %v4032_v11 = vpop.xlane.xlu0 %4031 }
0x1621   :  { %v4078_v24 = vsub.f32 %v13000_v50, %v4032_v11 }
0x1623   :  { %4261 = vrot.lane.b32.xlu0 %v12878_v22, %s11952_s2  ;;  %4449 = vrot.lane.b32.xlu1 %v12905_v45, %s11952_s2  ;;  %v4096_v22 = vmul.f32 1.442695, %v4079_v29  ;;  %v4094_v45 = vmul.f32 1.442695, %v4078_v24 }
0x1624   :  { %v4041_v0 = vpop.xlane.xlu0 %4040 }
0x1625   :  { %v4081_v2 = vsub.f32 %v13005_v10, %v4041_v0 }
0x1627   :  { %4402 = vrot.lane.b32.xlu0 %v12897_v15, %s11952_s2  ;;  %v4100_v32 = vmul.f32 1.442695, %v4081_v2 }
0x1629   :  { %11584 = vpow2.f32 %v4100_v32 }
0x162a   :  { %11586 = vpow2.f32 %v4098_v27 }
0x162b   :  { %11588 = vpow2.f32 %v4096_v22 }
0x162c   :  { %11590 = vpow2.f32 %v4094_v45 }
0x1633   :  { %v13095_v30 = vpop.eup %11584 }
0x1634   :  { %v13097_v15 = vpop.eup %11586  ;;  %v4135_v10 = vsel %vm115_vm0, %v13095_v30, 0.0 }
0x1635   :  { %v13101_v37 = vpop.eup %11588  ;;  %v4132_v53 = vsel %vm115_vm0, %v13097_v15, 0.0 }
0x1636   :  { %v13105_v50 = vpop.eup %11590  ;;  %v4129_v58 = vsel %vm115_vm0, %v13101_v37, 0.0 }
0x1637   :  { %v4126_v8 = vsel %vm115_vm0, %v13105_v50, 0.0 }
0x1646   :  { %4136 = vadd.xlane.f32.xlu0 %v4135_v10 }
0x1647   :  { %4133 = vadd.xlane.f32.xlu1 %v4132_v53 }
0x164a   :  { %4130 = vadd.xlane.f32.xlu0 %v4129_v58 }
0x164b   :  { %4127 = vadd.xlane.f32.xlu1 %v4126_v8 }
0x1682   :  { %v4050_v7 = vpop.xlane.xlu1 %4049 }
0x1683   :  { %v4084_v9 = vsub.f32 %v13013_v56, %v4050_v7 }
0x1684   :  { %v4053_v6 = vpop.xlane.xlu0 %4052 }
0x1685   :  { %v4106_v18 = vmul.f32 1.442695, %v4084_v9  ;;  %v4085_v35 = vsub.f32 %v13019_v55, %v4053_v6 }
0x1686   :  { %v4044_v5 = vpop.xlane.xlu1 %4043 }
0x1687   :  { %11592 = vpow2.f32 %v4106_v18  ;;  %v4108_v31 = vmul.f32 1.442695, %v4085_v35  ;;  %v4082_v14 = vsub.f32 %v13022_v60, %v4044_v5 }
0x1688   :  { %v4047_v16 = vpop.xlane.xlu0 %4046 }
0x1689   :  { %11594 = vpow2.f32 %v4108_v31  ;;  %v4102_v26 = vmul.f32 1.442695, %v4082_v14  ;;  %v4083_v23 = vsub.f32 %v13027_v52, %v4047_v16 }
0x168b   :  { %11596 = vpow2.f32 %v4102_v26  ;;  %v4104_v17 = vmul.f32 1.442695, %v4083_v23  ;;  %v4062_v61 = vpop.xlane.xlu1 %4061 }
0x168c   :  { %v4088_v25 = vsub.f32 %v13037_v33, %v4062_v61 }
0x168d   :  { %11598 = vpow2.f32 %v4104_v17 }
0x168e   :  { %v4114_v56 = vmul.f32 1.442695, %v4088_v25  ;;  %v4065_v11 = vpop.xlane.xlu0 %4064 }
0x168f   :  { %v4089_v55 = vsub.f32 %v13046_v44, %v4065_v11  ;;  %v4056_v0 = vpop.xlane.xlu1 %4055 }
0x1690   :  { %11600 = vpow2.f32 %v4114_v56  ;;  %v4086_v2 = vsub.f32 %v13041_v20, %v4056_v0 }
0x1691   :  { %v13118_v60 = vpop.eup %11592  ;;  %v4116_v38 = vmul.f32 1.442695, %v4089_v55 }
0x1692   :  { %v4110_v57 = vmul.f32 1.442695, %v4086_v2  ;;  %v4059_v29 = vpop.xlane.xlu0 %4058  ;;  %v4144_v52 = vsel %vm115_vm0, %v13118_v60, 0.0 }
0x1693   :  { %v13122_v32 = vpop.eup %11594  ;;  %11602 = vpow2.f32 %v4116_v38  ;;  %v4087_v33 = vsub.f32 %v13053_v47, %v4059_v29  ;;  %4145 = vadd.xlane.f32.xlu1 %v4144_v52  ;;  %v4074_v27 = vpop.xlane.xlu1 %4073 }
0x1694   :  { %11604 = vpow2.f32 %v4110_v57  ;;  %v4092_v44 = vsub.f32 %v13059_v21, %v4074_v27  ;;  %v4147_v20 = vsel %vm115_vm0, %v13122_v32, 0.0 }
0x1695   :  { %v13128_v24 = vpop.eup %11596  ;;  %v4112_v22 = vmul.f32 1.442695, %v4087_v33  ;;  %4148 = vadd.xlane.f32.xlu0 %v4147_v20 }
0x1696   :  { %v4122_v45 = vmul.f32 1.442695, %v4092_v44  ;;  %v4077_v10 = vpop.xlane.xlu0 %4076  ;;  %v4138_v53 = vsel %vm115_vm0, %v13128_v24, 0.0 }
0x1697   :  { %v13132_v58 = vpop.eup %11598  ;;  %11606 = vpow2.f32 %v4112_v22  ;;  %v4093_v47 = vsub.f32 %v13067_v63, %v4077_v10  ;;  %4139 = vadd.xlane.f32.xlu1 %v4138_v53  ;;  %v4068_v8 = vpop.xlane.xlu1 %4067 }
0x1698   :  { %11608 = vpow2.f32 %v4122_v45  ;;  %v4090_v21 = vsub.f32 %v13070_v1, %v4068_v8  ;;  %v4141_v7 = vsel %vm115_vm0, %v13132_v58, 0.0 }
0x1699   :  { %v4124_v9 = vmul.f32 1.442695, %v4093_v47  ;;  %4142 = vadd.xlane.f32.xlu0 %v4141_v7 }
0x169a   :  { %v13138_v6 = vpop.eup %11600  ;;  %v4118_v18 = vmul.f32 1.442695, %v4090_v21  ;;  %v4071_v35 = vpop.xlane.xlu0 %4070 }
0x169b   :  { %11610 = vpow2.f32 %v4124_v9  ;;  %v4091_v5 = vsub.f32 %v13075_v19, %v4071_v35  ;;  %v4156_v63 = vsel %vm115_vm0, %v13138_v6, 0.0  ;;  %v4309_v57 = vpop.permute.xlu1 %4308 }
0x169c   :  { %11612 = vpow2.f32 %v4118_v18  ;;  %4157 = vadd.xlane.f32.xlu1 %v4156_v63 }
0x169d   :  { %v13143_v31 = vpop.eup %11602  ;;  %v4120_v1 = vmul.f32 1.442695, %v4091_v5 }
0x169e   :  { %v13145_v14 = vpop.eup %11604  ;;  %v4262_v16 = vpop.permute.xlu0 %4261  ;;  %v4159_v26 = vsel %vm115_vm0, %v13143_v31, 0.0 }
0x169f   :  { %11614 = vpow2.f32 %v4120_v1  ;;  %4160 = vadd.xlane.f32.xlu0 %v4159_v26  ;;  %10484 = vmatpush3.bf16.msra.mxu0 %v4262_v16  ;;  %v4150_v19 = vsel %vm115_vm0, %v13145_v14, 0.0  ;;  %v4356_v29 = vpop.permute.xlu1 %4355 }
0x16a0   :  { %4151 = vadd.xlane.f32.xlu1 %v4150_v19  ;;  %10495 = vmatprep.subr.bf16.mxu0 %v11955_v12 }
0x16a1   :  { %v13152_v23 = vpop.eup %11606 }
0x16a2   :  { %v13154_v17 = vpop.eup %11608  ;;  %v4153_v61 = vsel %vm115_vm0, %v13152_v23, 0.0  ;;  %v13176_v52 = vpop.permute.xlu0 %4402 }
0x16a3   :  { %4154 = vadd.xlane.f32.xlu0 %v4153_v61  ;;  %v4168_v25 = vsel %vm115_vm0, %v13154_v17, 0.0  ;;  %v4450_v33 = vpop.permute.xlu1 %4449 }
0x16a4   :  { %4169 = vadd.xlane.f32.xlu1 %v4168_v25 }
0x16a5   :  { %v13160_v56 = vpop.eup %11610 }
0x16a6   :  { %v13162_v11 = vpop.eup %11612  ;;  %v4171_v55 = vsel %vm115_vm0, %v13160_v56, 0.0 }
0x16a7   :  { %4172 = vadd.xlane.f32.xlu0 %v4171_v55  ;;  %v4162_v0 = vsel %vm115_vm0, %v13162_v11, 0.0 }
0x16a8   :  { %4163 = vadd.xlane.f32.xlu1 %v4162_v0 }
0x16a9   :  { %v13168_v2 = vpop.eup %11614 }
0x16aa   :  { %v4165_v38 = vsel %vm115_vm0, %v13168_v2, 0.0 }
0x16ab   :  { %4166 = vadd.xlane.f32.xlu0 %v4165_v38 }
0x16b9   :  { %4543 = vrot.lane.b32.xlu1 %v12911_v51, %s11952_s2 }
0x16c1   :  { %4496 = vrot.lane.b32.xlu0 %v12903_v48, %s11952_s2 }
0x16d3   :  { %v4137_v27 = vpop.xlane.xlu0 %4136 }
0x16d4   :  { %11616 = vrcp.f32 %v4137_v27  ;;  %v4134_v44 = vpop.xlane.xlu1 %4133 }
0x16d5   :  { %11618 = vrcp.f32 %v4134_v44 }
0x16d7   :  { %v4131_v20 = vpop.xlane.xlu0 %4130 }
0x16d8   :  { %11620 = vrcp.f32 %v4131_v20  ;;  %v4128_v22 = vpop.xlane.xlu1 %4127 }
0x16d9   :  { %11622 = vrcp.f32 %v4128_v22 }
0x16de   :  { %v11617_v45 = vpop.eup %11616 }
0x16df   :  { %v11619_v10 = vpop.eup %11618  ;;  %v4193_v51 = vmul.f32 %v11617_v45, %v13095_v30 }
0x16e0   :  { %v4192_v53 = vmul.f32 %v11619_v10, %v13097_v15 }
0x16e2   :  { %v11621_v48 = vpop.eup %11620  ;;  %v4207_v47 = vpack.c.bf16 %v4193_v51, %v4192_v53 }
0x16e3   :  { %v11623_v8 = vpop.eup %11622  ;;  %v4191_v21 = vmul.f32 %v11621_v48, %v13101_v37 }
0x16e4   :  { %v4190_v7 = vmul.f32 %v11623_v8, %v13105_v50  ;;  %10486 = vmatmul.mubr.msk.bf16.vlgmr.msra.gmra.mrb[104].mxu0 %vm115_vm0, %v4207_v47 }
0x16e5   :  { %10496 = vmatpush3.bf16.msra.mxu0 %v4356_v29  ;;  %10497 = vmatprep.mubr.msk.bf16.mxu0 %vm11960_vm6, %v11955_v12 }
0x16e6   :  { %v4206_v9 = vpack.c.bf16 %v4191_v21, %v4190_v7  ;;  %10507 = vmatprep.subr.bf16.mxu0 %v11955_v12 }
0x16e8   :  { %10480 = vmatmul.mubr.msk.bf16.vlgmr.msra.gmra.mrb[100].mxu1 %vm115_vm0, %v4206_v9 }
0x16e9   :  { %10490 = vmatpush3.bf16.msra.mxu1 %v4309_v57  ;;  %10491 = vmatprep.mubr.msk.bf16.mxu1 %vm11960_vm6, %v11955_v12 }
0x16ea   :  { %10501 = vmatprep.subr.bf16.mxu1 %v11955_v12 }
0x1720   :  { %v4146_v30 = vpop.xlane.xlu1 %4145 }
0x1721   :  { %11624 = vrcp.f32 %v4146_v30 }
0x1722   :  { %v4149_v15 = vpop.xlane.xlu0 %4148 }
0x1723   :  { %11626 = vrcp.f32 %v4149_v15 }
0x1724   :  { %v4140_v37 = vpop.xlane.xlu1 %4139 }
0x1725   :  { %11628 = vrcp.f32 %v4140_v37 }
0x1726   :  { %v4143_v50 = vpop.xlane.xlu0 %4142 }
0x1727   :  { %11630 = vrcp.f32 %v4143_v50 }
0x1729   :  { %v4158_v18 = vpop.xlane.xlu1 %4157 }
0x172a   :  { %11632 = vrcp.f32 %v4158_v18 }
0x172b   :  { %v11625_v35 = vpop.eup %11624 }
0x172c   :  { %v4161_v5 = vpop.xlane.xlu0 %4160  ;;  %v4196_v16 = vmul.f32 %v11625_v35, %v13118_v60 }
0x172d   :  { %v11627_v63 = vpop.eup %11626  ;;  %11634 = vrcp.f32 %v4161_v5  ;;  %v4152_v1 = vpop.xlane.xlu1 %4151 }
0x172e   :  { %v4197_v26 = vmul.f32 %v11627_v63, %v13122_v32  ;;  %11636 = vrcp.f32 %v4152_v1 }
0x172f   :  { %v11629_v19 = vpop.eup %11628 }
0x1730   :  { %v4155_v61 = vpop.xlane.xlu0 %4154  ;;  %v4209_v25 = vpack.c.bf16 %v4197_v26, %v4196_v16  ;;  %v4194_v38 = vmul.f32 %v11629_v19, %v13128_v24 }
0x1731   :  { %v11631_v55 = vpop.eup %11630  ;;  %11638 = vrcp.f32 %v4155_v61  ;;  %v4170_v0 = vpop.xlane.xlu1 %4169 }
0x1732   :  { %v4195_v57 = vmul.f32 %v11631_v55, %v13132_v58  ;;  %10498 = vmatmul.mubr.msk.bf16.vlgmr.msra.gmra.mrb[108].mxu0 %vm115_vm0, %v4209_v25  ;;  %11640 = vrcp.f32 %v4170_v0 }
0x1733   :  { %10508 = vmatpush3.bf16.msra.mxu0 %v4450_v33  ;;  %10509 = vmatprep.mubr.msk.bf16.mxu0 %vm11960_vm6, %v11955_v12 }
0x1734   :  { %v4173_v60 = vpop.xlane.xlu0 %4172  ;;  %v4208_v32 = vpack.c.bf16 %v4195_v57, %v4194_v38  ;;  %10519 = vmatprep.subr.bf16.mxu0 %v11955_v12  ;;  %v11633_v29 = vpop.eup %11632  ;;  %v11400_v57 = vld [vmem:[#allocation4 + $0xb0] sm:$0xff]  }
0x1735   :  { %11642 = vrcp.f32 %v4173_v60  ;;  %v4164_v27 = vpop.xlane.xlu1 %4163  ;;  %v4200_v24 = vmul.f32 %v11633_v29, %v13138_v6 }
0x1736   :  { %10492 = vmatmul.mubr.msk.bf16.vlgmr.msra.gmra.mrb[104].mxu1 %vm115_vm0, %v4208_v32  ;;  %11644 = vrcp.f32 %v4164_v27 }
0x1737   :  { %v11635_v44 = vpop.eup %11634  ;;  %10502 = vmatpush3.bf16.msra.mxu1 %v13176_v52  ;;  %10503 = vmatprep.mubr.msk.bf16.mxu1 %vm11960_vm6, %v11955_v12 }
0x1738   :  { %v4201_v58 = vmul.f32 %v11635_v44, %v13143_v31  ;;  %v4167_v33 = vpop.xlane.xlu0 %4166  ;;  %10513 = vmatprep.subr.bf16.mxu1 %v11955_v12  ;;  %v11637_v20 = vpop.eup %11636 }
0x1739   :  { %11646 = vrcp.f32 %v4167_v33  ;;  %v4544_v22 = vpop.permute.xlu1 %4543  ;;  %v4198_v51 = vmul.f32 %v11637_v20, %v13145_v14 }
0x173a   :  { %v4211_v45 = vpack.c.bf16 %v4201_v58, %v4200_v24  ;;  %v11401_v24 = vld [vmem:[#allocation4 + $0xb8] sm:$0xff]  }
0x173b   :  { %v11639_v10 = vpop.eup %11638 }
0x173c   :  { %v4199_v53 = vmul.f32 %v11639_v10, %v13152_v23  ;;  %10510 = vmatmul.mubr.msk.bf16.vlgmr.msra.gmra.mrb[112].mxu0 %vm115_vm0, %v4211_v45  ;;  %v11641_v52 = vpop.eup %11640  ;;  %v4497_v8 = vpop.permute.xlu0 %4496 }
0x173d   :  { %10520 = vmatpush3.bf16.msra.mxu0 %v4544_v22  ;;  %10521 = vmatprep.mubr.msk.bf16.mxu0 %vm11960_vm6, %v11955_v12  ;;  %v4204_v48 = vmul.f32 %v11641_v52, %v13154_v17 }
0x173e   :  { %v4210_v6 = vpack.c.bf16 %v4199_v53, %v4198_v51 }
0x173f   :  { %v11643_v31 = vpop.eup %11642 }
0x1740   :  { %v4205_v47 = vmul.f32 %v11643_v31, %v13160_v56  ;;  %10504 = vmatmul.mubr.msk.bf16.vlgmr.msra.gmra.mrb[108].mxu1 %vm115_vm0, %v4210_v6  ;;  %v11645_v21 = vpop.eup %11644 }
0x1741   :  { %10514 = vmatpush3.bf16.msra.mxu1 %v4497_v8  ;;  %10515 = vmatprep.mubr.msk.bf16.mxu1 %vm11960_vm6, %v11955_v12  ;;  %v4202_v7 = vmul.f32 %v11645_v21, %v13162_v11  ;;  %v9669_v8 = vld [vmem:[%s14526_s4 + $0xb] ss:$0 sm:$0xff] }
0x1742   :  { %v4213_v14 = vpack.c.bf16 %v4205_v47, %v4204_v48  ;;  %10525 = vmatprep.subr.bf16.mxu1 %v11400_v57  ;;  %v3368_v21 = vadd.f32 %v9669_v8, %v12927_v41 }
0x1743   :  { %v11647_v23 = vpop.eup %11646 }
0x1744   :  { %v4203_v9 = vmul.f32 %v11647_v23, %v13168_v2  ;;  %10522 = vmatmul.mubr.msk.bf16.vlgmr.msra.gmra.mrb[116].mxu0 %vm115_vm0, %v4213_v14  ;;  %v3371_v14 = vadd.f32 %v9669_v8, %v12931_v36  ;;  %v3376_v23 = vadd.f32 %v12925_v3, %v9669_v8 }
0x1746   :  { %v4212_v30 = vpack.c.bf16 %v4203_v9, %v4202_v7  ;;  %v3382_v7 = vadd.f32 %v3368_v21, %v12832_v40  ;;  %v13241_v9 = vadd.f32 %v3371_v14, %v12834_v54 }
0x1748   :  { %10516 = vmatmul.mubr.msk.bf16.vlgmr.msra.gmra.mrb[112].mxu1 %vm115_vm0, %v4212_v30  ;;  %v13244_v30 = vadd.f32 %v3376_v23, %v12845_v43  ;;  %v3391_v41 = vsel %vm346_vm5, %v13241_v9, 0.0 }
0x1749   :  { %10526 = vmatpush3.bf16.msra.mxu1 %v11400_v57 }
0x174a   :  { %10527 = vmatprep.subr.bf16.mxu1 %v11401_v24  ;;  %v3394_v40 = vsel %vm346_vm5, %v13244_v30, 0.0 }
0x174d   :  { %10528 = vmatpush3.bf16.msra.mxu1 %v11401_v24 }
0x17b7   :  { %v13219_v17 = vpop.f32.mrb[104].mxu0 }
0x17b8   :  { %v10487_v56 = vpop.f32.mrb[105].mxu0 }
0x17b9   :  { %v13221_v15 = vpop.f32.mrb[106].mxu0  ;;  %v3379_v56 = vadd.f32 %v12929_v13, %v9669_v8 }
0x17ba   :  { %v10488_v37 = vpop.f32.mrb[107].mxu0 }
0x17bb   :  { %v13223_v50 = vpop.f32.mrb[100].mxu1  ;;  %v3388_v37 = vsel %vm346_vm5, %v3382_v7, 0.0  ;;  %v13251_v36 = vadd.f32 %v3379_v56, %v12847_v62 }
0x17bc   :  { %v10481_v18 = vpop.f32.mrb[101].mxu1 }
0x17bd   :  { %v13225_v35 = vpop.f32.mrb[102].mxu1  ;;  %v3397_v54 = vsel %vm346_vm5, %v13251_v36, 0.0 }
0x17be   :  { %v10482_v5 = vpop.f32.mrb[103].mxu1 }
0x1805   :  { %v4395_v11 = vpop.f32.mrb[108].mxu0 }
0x1806   :  { %v10499_v63 = vpop.f32.mrb[109].mxu0 }
0x1807   :  { %v4398_v2 = vpop.f32.mrb[110].mxu0 }
0x1808   :  { %v11108_v1 = vpack.i.bf16 %v4398_v2, %v4395_v11  ;;  %v10500_v16 = vpop.f32.mrb[111].mxu0 }
0x1809   :  { %v4348_v26 = vpop.f32.mrb[104].mxu1 }
0x180a   :  { %v10493_v19 = vpop.f32.mrb[105].mxu1  ;;  %11109 = vrot.lane.b32.xlu1 %v11108_v1, %s11950_s29 }
0x180b   :  { %v4351_v61 = vpop.f32.mrb[106].mxu1 }
0x180c   :  { %v11113_v25 = vpack.i.bf16 %v4351_v61, %v4348_v26  ;;  %v10494_v55 = vpop.f32.mrb[107].mxu1 }
0x180e   :  { %11114 = vrot.lane.b32.xlu0 %v11113_v25, %s11950_s29 }
0x180f   :  { %v4489_v0 = vpop.f32.mrb[112].mxu0 }
0x1810   :  { %v10511_v38 = vpop.f32.mrb[113].mxu0 }
0x1811   :  { %v4492_v60 = vpop.f32.mrb[114].mxu0 }
0x1812   :  { %v11118_v32 = vpack.i.bf16 %v4492_v60, %v4489_v0  ;;  %v10512_v29 = vpop.f32.mrb[115].mxu0 }
0x1813   :  { %v4442_v27 = vpop.f32.mrb[108].mxu1 }
0x1814   :  { %v10505_v44 = vpop.f32.mrb[109].mxu1  ;;  %11119 = vrot.lane.b32.xlu1 %v11118_v32, %s11961_s0 }
0x1815   :  { %v4445_v58 = vpop.f32.mrb[110].mxu1 }
0x1816   :  { %v11123_v33 = vpack.i.bf16 %v4445_v58, %v4442_v27  ;;  %v10506_v20 = vpop.f32.mrb[111].mxu1 }
0x1817   :  { %v4583_v22 = vpop.f32.mrb[116].mxu0 }
0x1818   :  { %11124 = vrot.lane.b32.xlu0 %v11123_v33, %s11961_s0  ;;  %v10523_v45 = vpop.f32.mrb[117].mxu0 }
0x1819   :  { %v4586_v10 = vpop.f32.mrb[118].mxu0 }
0x181a   :  { %v11133_v51 = vpack.i.bf16 %v4586_v10, %v4583_v22  ;;  %v10524_v53 = vpop.f32.mrb[119].mxu0 }
0x181b   :  { %v4536_v52 = vpop.f32.mrb[112].mxu1 }
0x181c   :  { %v10517_v6 = vpop.f32.mrb[113].mxu1  ;;  %11134 = vrot.lane.b32.xlu1 %v11133_v51, %s11962_s24 }
0x181d   :  { %v4539_v31 = vpop.f32.mrb[114].mxu1 }
0x181e   :  { %v11128_v48 = vpack.i.bf16 %v4539_v31, %v4536_v52  ;;  %v10518_v47 = vpop.f32.mrb[115].mxu1 }
0x1820   :  { %11129 = vrot.lane.b32.xlu0 %v11128_v48, %s11962_s24 }
0x183f   :  { %3389 = vadd.xlane.f32.xlu0 %v3388_v37 }
0x1840   :  { %3392 = vadd.xlane.f32.xlu1 %v3391_v41 }
0x1843   :  { %3395 = vadd.xlane.f32.xlu0 %v3394_v40 }
0x1847   :  { %3398 = vadd.xlane.f32.xlu0 %v3397_v54 }
0x187c   :  { %v11110_v43 = vpop.permute.xlu1 %11109 }
0x187d   :  { %v11112_v18 = vunpack.i.h.bf16 %v11110_v43  ;;  %v11111_v5 = vunpack.i.l.bf16 %v11110_v43 }
0x187f   :  { %v4641_v62 = vsel %vm453_vm11, %v13221_v15, %v11112_v18  ;;  %v4640_v1 = vsel %vm453_vm11, %v13219_v17, %v11111_v5 }
0x1880   :  { %v11115_v3 = vpop.permute.xlu0 %11114 }
0x1881   :  { %v11117_v26 = vunpack.i.h.bf16 %v11115_v3  ;;  %v11116_v19 = vunpack.i.l.bf16 %v11115_v3 }
0x1883   :  { %v4639_v17 = vsel %vm453_vm11, %v13225_v35, %v11117_v26  ;;  %v4638_v27 = vsel %vm453_vm11, %v13223_v50, %v11116_v19  ;;  %v9699_v50 = vld [vmem:[%s14526_s4 + $0x11] ss:$0 sm:$0xff]  ;;  %v11403_v26 = vld [vmem:[#allocation4 + $0xd8] sm:$0xff]  }
0x1886   :  { %v11120_v13 = vpop.permute.xlu1 %11119 }
0x1887   :  { %v11122_v11 = vunpack.i.h.bf16 %v11120_v13  ;;  %v11121_v63 = vunpack.i.l.bf16 %v11120_v13 }
0x1889   :  { %v4645_v55 = vsel %vm115_vm0, %v4641_v62, %v11122_v11  ;;  %v4644_v0 = vsel %vm115_vm0, %v4640_v1, %v11121_v63 }
0x188a   :  { %v11125_v2 = vpop.permute.xlu0 %11124 }
0x188b   :  { %v11127_v38 = vunpack.i.h.bf16 %v11125_v2  ;;  %v11126_v57 = vunpack.i.l.bf16 %v11125_v2 }
0x188d   :  { %v4642_v58 = vsel %vm115_vm0, %v4638_v27, %v11126_v57  ;;  %v4643_v33 = vsel %vm115_vm0, %v4639_v17, %v11127_v38 }
0x188e   :  { %v11135_v16 = vpop.permute.xlu1 %11134 }
0x188f   :  { %v11137_v61 = vunpack.i.h.bf16 %v11135_v16  ;;  %v11136_v25 = vunpack.i.l.bf16 %v11135_v16  ;;  %v11402_v16 = vld [vmem:[#allocation4 + $0xd0] sm:$0xff]  }
0x1890   :  { %10541 = vmatprep.subr.bf16.mxu1 %v11402_v16 }
0x1891   :  { %v4649_v60 = vsel %vm1483_vm12, %v4645_v55, %v11137_v61  ;;  %v4648_v32 = vsel %vm1483_vm12, %v4644_v0, %v11136_v25 }
0x1892   :  { %v4655_v29 = vpack.c.bf16 %v4649_v60, %v4648_v32  ;;  %v11130_v15 = vpop.permute.xlu0 %11129 }
0x1893   :  { %v11132_v44 = vunpack.i.h.bf16 %v11130_v15  ;;  %v11131_v24 = vunpack.i.l.bf16 %v11130_v15 }
0x1895   :  { %v4646_v20 = vsel %vm1483_vm12, %v4642_v58, %v11131_v24  ;;  %v4647_v22 = vsel %vm1483_vm12, %v4643_v33, %v11132_v44 }
0x1896   :  { %v4654_v45 = vpack.c.bf16 %v4647_v22, %v4646_v20 }
0x1898   :  { %10529 = vmatprep.mubr.msk.bf16.mxu1 %vm346_vm5, %v4654_v45 }
0x1899   :  { %10530 = vmatmul.mubr.msk.bf16.vlgmr.msra.gmra.mrb[116].mxu1 %vm346_vm5, %v4655_v29 }
0x189a   :  { %10542 = vmatpush3.bf16.msra.mxu1 %v11402_v16 }
0x189b   :  { %10543 = vmatprep.subr.bf16.mxu1 %v11403_v26 }
0x189e   :  { %10544 = vmatpush3.bf16.msra.mxu1 %v11403_v26 }
0x189f   :  { %10555 = vmatprep.subr.bf16.mxu1 %v11955_v12 }
0x18cc   :  { %v3390_v10 = vpop.xlane.xlu0 %3389 }
0x18cd   :  { %v3400_v53 = vmul.f32 0.03125, %v3390_v10  ;;  %v3393_v52 = vpop.xlane.xlu1 %3392 }
0x18ce   :  { %v3401_v21 = vmul.f32 0.03125, %v3393_v52 }
0x18cf   :  { %v13279_v37 = vsub.f32 %v3382_v7, %v3400_v53 }
0x18d0   :  { %v3396_v35 = vpop.xlane.xlu0 %3395  ;;  %v13285_v13 = vsub.f32 %v13241_v9, %v3401_v21 }
0x18d1   :  { %v3402_v40 = vmul.f32 0.03125, %v3396_v35 }
0x18d3   :  { %v13290_v7 = vsub.f32 %v13244_v30, %v3402_v40 }
0x18d4   :  { %v3399_v41 = vpop.xlane.xlu0 %3398 }
0x18d5   :  { %v3403_v18 = vmul.f32 0.03125, %v3399_v41  ;;  %v3410_v30 = vmul.f32 %v13290_v7, %v13290_v7 }
0x196c   :  { %v10531_v51 = vpop.f32.mrb[116].mxu1 }
0x196d   :  { %v4713_v6 = vpop.f32.mrb[117].mxu1  ;;  %v4722_v31 = vadd.f32 %v10531_v51, %v9699_v50 }
0x196e   :  { %v4714_v48 = vadd.f32 %v9699_v50, %v4713_v6  ;;  %v10532_v47 = vpop.f32.mrb[118].mxu1 }
0x196f   :  { %v4716_v8 = vpop.f32.mrb[119].mxu1  ;;  %v4725_v23 = vadd.f32 %v10532_v47, %v9699_v50  ;;  %v4730_v54 = vadd.f32 %v4722_v31, %v12859_v34  ;;  %v13296_v34 = vsub.f32 %v13251_v36, %v3403_v18  ;;  %v3418_v36 = vsel %vm346_vm5, %v3410_v30, 0.0 }
0x1970   :  { %v4728_v14 = vadd.f32 %v4714_v48, %v12843_v28  ;;  %v4717_v56 = vadd.f32 %v9699_v50, %v4716_v8 }
0x1971   :  { %v4731_v5 = vadd.f32 %v4725_v23, %v12856_v49  ;;  %v4740_v11 = vsel %vm346_vm5, %v4730_v54, 0.0  ;;  %v3409_v49 = vmul.f32 %v13285_v13, %v13285_v13  ;;  %v3411_v62 = vmul.f32 %v13296_v34, %v13296_v34  ;;  %v9676_v23 = vld [vmem:[%s14526_s4 + $0xe] ss:$0 sm:$0xff] }
0x1972   :  { %v4729_v43 = vadd.f32 %v4717_v56, %v12840_v39  ;;  %v4734_v3 = vsel %vm346_vm5, %v4728_v14, 0.0  ;;  %v3408_v39 = vmul.f32 %v13279_v37, %v13279_v37 }
0x1973   :  { %4735 = vadd.xlane.f32.xlu1 %v4734_v3  ;;  %v4743_v9 = vsel %vm346_vm5, %v4731_v5, 0.0  ;;  %v3415_v2 = vsel %vm346_vm5, %v3409_v49, 0.0  ;;  %v3421_v1 = vsel %vm346_vm5, %v3411_v62, 0.0  ;;  %v9677_v3 = vld [vmem:[%s14526_s4 + $0xf] ss:$0 sm:$0xff] }
0x1974   :  { %v4737_v28 = vsel %vm346_vm5, %v4729_v43, 0.0  ;;  %v3412_v63 = vsel %vm346_vm5, %v3408_v39, 0.0 }
0x1975   :  { %4738 = vadd.xlane.f32.xlu0 %v4737_v28 }
0x1977   :  { %4741 = vadd.xlane.f32.xlu1 %v4740_v11 }
0x1979   :  { %4744 = vadd.xlane.f32.xlu0 %v4743_v9 }
0x197b   :  { %3413 = vadd.xlane.f32.xlu1 %v3412_v63 }
0x197d   :  { %3416 = vadd.xlane.f32.xlu0 %v3415_v2 }
0x197f   :  { %3419 = vadd.xlane.f32.xlu1 %v3418_v36 }
0x1981   :  { %3422 = vadd.xlane.f32.xlu0 %v3421_v1 }
0x1a00   :  { %v4736_v19 = vpop.xlane.xlu1 %4735 }
0x1a01   :  { %v4746_v61 = vmul.f32 0.03125, %v4736_v19 }
0x1a02   :  { %v4739_v25 = vpop.xlane.xlu0 %4738 }
0x1a03   :  { %v13310_v55 = vsub.f32 %v4728_v14, %v4746_v61  ;;  %v4747_v0 = vmul.f32 0.03125, %v4739_v25 }
0x1a04   :  { %v4742_v38 = vpop.xlane.xlu1 %4741 }
0x1a05   :  { %v13312_v57 = vsub.f32 %v4729_v43, %v4747_v0  ;;  %v4748_v60 = vmul.f32 0.03125, %v4742_v38  ;;  %v4754_v32 = vmul.f32 %v13310_v55, %v13310_v55 }
0x1a06   :  { %v4745_v29 = vpop.xlane.xlu0 %4744 }
0x1a07   :  { %v13316_v15 = vsub.f32 %v4730_v54, %v4748_v60  ;;  %v4749_v17 = vmul.f32 0.03125, %v4745_v29  ;;  %v4758_v27 = vsel %vm346_vm5, %v4754_v32, 0.0  ;;  %v4755_v44 = vmul.f32 %v13312_v57, %v13312_v57 }
0x1a08   :  { %v3414_v24 = vpop.xlane.xlu1 %3413  ;;  %4759 = vadd.xlane.f32.xlu1 %v4758_v27 }
0x1a09   :  { %v13321_v58 = vsub.f32 %v4731_v5, %v4749_v17  ;;  %v3424_v33 = vmul.f32 0.03125, %v3414_v24  ;;  %v4761_v20 = vsel %vm346_vm5, %v4755_v44, 0.0  ;;  %v4756_v22 = vmul.f32 %v13316_v15, %v13316_v15  ;;  %v9704_v17 = vld [vmem:[%s14526_s4 + $0x17] ss:$0 sm:$0xff] }
0x1a0a   :  { %4762 = vadd.xlane.f32.xlu0 %v4761_v20  ;;  %v3417_v45 = vpop.xlane.xlu0 %3416 }
0x1a0b   :  { %v3428_v10 = vadd.f32 1e-05, %v3424_v33  ;;  %v3425_v35 = vmul.f32 0.03125, %v3417_v45  ;;  %v4764_v50 = vsel %vm346_vm5, %v4756_v22, 0.0  ;;  %v4757_v51 = vmul.f32 %v13321_v58, %v13321_v58  ;;  %v9705_v22 = vld [vmem:[%s14526_s4 + $0x18] ss:$0 sm:$0xff] }
0x1a0c   :  { %4765 = vadd.xlane.f32.xlu1 %v4764_v50  ;;  %v3420_v53 = vpop.xlane.xlu1 %3419 }
0x1a0d   :  { %11648 = vrsqrt.f32 %v3428_v10  ;;  %v3429_v52 = vadd.f32 1e-05, %v3425_v35  ;;  %v3426_v6 = vmul.f32 0.03125, %v3420_v53  ;;  %v4767_v31 = vsel %vm346_vm5, %v4757_v51, 0.0 }
0x1a0e   :  { %4768 = vadd.xlane.f32.xlu0 %v4767_v31  ;;  %v3423_v48 = vpop.xlane.xlu0 %3422 }
0x1a0f   :  { %11650 = vrsqrt.f32 %v3429_v52  ;;  %v3430_v47 = vadd.f32 1e-05, %v3426_v6  ;;  %v3427_v8 = vmul.f32 0.03125, %v3423_v48  ;;  %v9711_v48 = vld [vmem:[%s14526_s4 + $0x13] ss:$0 sm:$0xff] }
0x1a11   :  { %11652 = vrsqrt.f32 %v3430_v47  ;;  %v3431_v21 = vadd.f32 1e-05, %v3427_v8 }
0x1a13   :  { %11654 = vrsqrt.f32 %v3431_v21 }
0x1a17   :  { %v11649_v14 = vpop.eup %11648 }
0x1a18   :  { %v3436_v56 = vmul.f32 %v11649_v14, %v13279_v37 }
0x1a19   :  { %v11651_v41 = vpop.eup %11650 }
0x1a1a   :  { %v3437_v40 = vmul.f32 %v11651_v41, %v13285_v13  ;;  %v3444_v54 = vmul.f32 %v9676_v23, %v3436_v56 }
0x1a1b   :  { %v11653_v43 = vpop.eup %11652 }
0x1a1c   :  { %v3438_v18 = vmul.f32 %v11653_v43, %v13290_v7  ;;  %v3445_v5 = vmul.f32 %v9676_v23, %v3437_v40  ;;  %v3452_v39 = vadd.f32 %v9677_v3, %v3444_v54  ;;  %v11404_v7 = vld [vmem:[#allocation4 + $0xc0] sm:$0xff]  }
0x1a1d   :  { %v11655_v28 = vpop.eup %11654  ;;  %10533 = vmatprep.subr.bf16.mxu0 %v11404_v7 }
0x1a1e   :  { %v3439_v11 = vmul.f32 %v11655_v28, %v13296_v34  ;;  %v3453_v9 = vadd.f32 %v9677_v3, %v3445_v5  ;;  %v3446_v49 = vmul.f32 %v9676_v23, %v3438_v18  ;;  %v11405_v34 = vld [vmem:[#allocation4 + $0xc8] sm:$0xff]   ;;  %10534 = vmatpush3.bf16.msra.mxu0 %v11404_v7 }
0x1a1f   :  { %10535 = vmatprep.subr.bf16.mxu0 %v11405_v34 }
0x1a20   :  { %v13340_v63 = vpack.c.bf16 %v3453_v9, %v3452_v39  ;;  %v3447_v37 = vmul.f32 %v9676_v23, %v3439_v11  ;;  %v3454_v13 = vadd.f32 %v9677_v3, %v3446_v49 }
0x1a22   :  { %10545 = vmatprep.mubr.msk.bf16.mxu1 %vm346_vm5, %v13340_v63  ;;  %v3455_v30 = vadd.f32 %v9677_v3, %v3447_v37  ;;  %10536 = vmatpush3.bf16.msra.mxu0 %v11405_v34 }
0x1a23   :  { %10549 = vmatprep.subr.bf16.mxu0 %v11955_v12 }
0x1a24   :  { %v13344_v2 = vpack.c.bf16 %v3455_v30, %v3454_v13  ;;  %v9706_v30 = vld [vmem:[%s14526_s4 + $0x12] ss:$0 sm:$0xff] }
0x1a26   :  { %10546 = vmatmul.mubr.msk.bf16.vlgmr.msra.gmra.mrb[120].mxu1 %vm346_vm5, %v13344_v2 }
0x1a27   :  { %10557 = vmatprep.mubr.msk.bf16.mxu1 %vm11960_vm6, %v11955_v12 }
0x1a95   :  { %v4760_v62 = vpop.xlane.xlu1 %4759 }
0x1a96   :  { %v4770_v36 = vmul.f32 0.03125, %v4760_v62 }
0x1a97   :  { %v4763_v1 = vpop.xlane.xlu0 %4762 }
0x1a98   :  { %v4774_v16 = vadd.f32 1e-05, %v4770_v36  ;;  %v4771_v26 = vmul.f32 0.03125, %v4763_v1 }
0x1a99   :  { %v4766_v19 = vpop.xlane.xlu1 %4765 }
0x1a9a   :  { %11656 = vrsqrt.f32 %v4774_v16  ;;  %v4775_v61 = vadd.f32 1e-05, %v4771_v26  ;;  %v4772_v25 = vmul.f32 0.03125, %v4766_v19 }
0x1a9b   :  { %v4769_v0 = vpop.xlane.xlu0 %4768 }
0x1a9c   :  { %11658 = vrsqrt.f32 %v4775_v61  ;;  %v4776_v38 = vadd.f32 1e-05, %v4772_v25  ;;  %v4773_v60 = vmul.f32 0.03125, %v4769_v0 }
0x1a9e   :  { %11660 = vrsqrt.f32 %v4776_v38  ;;  %v4777_v32 = vadd.f32 1e-05, %v4773_v60 }
0x1aa0   :  { %11662 = vrsqrt.f32 %v4777_v32 }
0x1aa4   :  { %v11657_v29 = vpop.eup %11656 }
0x1aa5   :  { %v4782_v27 = vmul.f32 %v11657_v29, %v13310_v55 }
0x1aa6   :  { %v11659_v44 = vpop.eup %11658 }
0x1aa7   :  { %v4783_v24 = vmul.f32 %v11659_v44, %v13312_v57  ;;  %v4790_v33 = vmul.f32 %v9704_v17, %v4782_v27 }
0x1aa8   :  { %v11661_v20 = vpop.eup %11660 }
0x1aa9   :  { %v4784_v45 = vmul.f32 %v11661_v20, %v13316_v15  ;;  %v4791_v10 = vmul.f32 %v9704_v17, %v4783_v24  ;;  %v13361_v51 = vadd.f32 %v9705_v22, %v4790_v33 }
0x1aaa   :  { %v11663_v35 = vpop.eup %11662 }
0x1aab   :  { %v4785_v50 = vmul.f32 %v11663_v35, %v13321_v58  ;;  %v13363_v53 = vadd.f32 %v9705_v22, %v4791_v10  ;;  %v4792_v55 = vmul.f32 %v9704_v17, %v4784_v45 }
0x1aad   :  { %v4806_v57 = vpack.c.bf16 %v13363_v53, %v13361_v51  ;;  %v4793_v52 = vmul.f32 %v9704_v17, %v4785_v50  ;;  %v13368_v6 = vadd.f32 %v9705_v22, %v4792_v55 }
0x1aaf   :  { %10537 = vmatprep.mubr.msk.bf16.mxu0 %vm346_vm5, %v4806_v57  ;;  %v13370_v31 = vadd.f32 %v9705_v22, %v4793_v52 }
0x1ab1   :  { %v4807_v15 = vpack.c.bf16 %v13370_v31, %v13368_v6 }
0x1ab3   :  { %10538 = vmatmul.mubr.msk.bf16.vlgmr.msra.gmra.mrb[120].mxu0 %vm346_vm5, %v4807_v15 }
0x1ab4   :  { %10551 = vmatprep.mubr.msk.bf16.mxu0 %vm11960_vm6, %v11955_v12 }
0x1af9   :  { %v10547_v58 = vpop.f32.mrb[120].mxu1 }
0x1afa   :  { %v4943_v47 = vpop.f32.mrb[121].mxu1  ;;  %v4952_v21 = vadd.f32 %v10547_v58, %v9711_v48 }
0x1afb   :  { %v10548_v8 = vpop.f32.mrb[122].mxu1  ;;  %v4944_v56 = vadd.f32 %v9711_v48, %v4943_v47 }
0x1afc   :  { %v4955_v14 = vadd.f32 %v10548_v8, %v9711_v48  ;;  %v4946_v23 = vpop.f32.mrb[123].mxu1 }
0x1afd   :  { %v4947_v41 = vadd.f32 %v9711_v48, %v4946_v23 }
0x1afe   :  { %v11143_v40 = vpack.i.bf16 %v4955_v14, %v4952_v21  ;;  %v13380_v54 = vpack.c.bf16 %v4955_v14, %v4952_v21 }
0x1aff   :  { %v11138_v43 = vpack.i.bf16 %v4947_v41, %v4944_v56  ;;  %v5046_v3 = vpack.c.bf16 %v4947_v41, %v4944_v56 }
0x1b00   :  { %11144 = vrot.lane.b32.xlu0 %v11143_v40, %s11956_s9  ;;  %v5105_v18 = vsel %vm453_vm11, %v13380_v54, 0 }
0x1b01   :  { %10556 = vmatpush3.bf16.xpose.msra.mxu1 %v5105_v18  ;;  %11139 = vrot.lane.b32.xlu1 %v11138_v43, %s11956_s9  ;;  %v5058_v5 = vsel %vm453_vm11, %v5046_v3, 0 }
0x1b02   :  { %10550 = vmatpush3.bf16.xpose.msra.mxu0 %v5058_v5  ;;  %10567 = vmatprep.subr.bf16.mxu1 %v11955_v12 }
0x1b03   :  { %10561 = vmatprep.subr.bf16.mxu0 %v11955_v12 }
0x1b05   :  { %11149 = vrot.lane.b32.xlu1 %v11138_v43, %s11957_s10 }
0x1b72   :  { %v11145_v28 = vpop.permute.xlu0 %11144 }
0x1b73   :  { %v11140_v11 = vpop.permute.xlu1 %11139  ;;  %v11147_v39 = vunpack.i.h.bf16 %v11145_v28  ;;  %v11146_v9 = vunpack.i.l.bf16 %v11145_v28 }
0x1b74   :  { %v11142_v49 = vunpack.i.h.bf16 %v11140_v11  ;;  %v11141_v37 = vunpack.i.l.bf16 %v11140_v11 }
0x1b75   :  { %v13393_v16 = vpack.c.bf16 %v11147_v39, %v11146_v9 }
0x1b76   :  { %v13395_v61 = vpack.c.bf16 %v11142_v49, %v11141_v37 }
0x1b77   :  { %v5199_v32 = vsel %vm453_vm11, %v13393_v16, 0  ;;  %v11150_v17 = vpop.permute.xlu1 %11149 }
0x1b78   :  { %v5152_v29 = vsel %vm453_vm11, %v13395_v61, 0  ;;  %v11152_v27 = vunpack.i.h.bf16 %v11150_v17  ;;  %v11151_v44 = vunpack.i.l.bf16 %v11150_v17 }
0x1b7a   :  { %v13419_v35 = vpack.c.bf16 %v11152_v27, %v11151_v44 }
0x1b7c   :  { %v5246_v48 = vsel %vm453_vm11, %v13419_v35, 0 }
0x1b86   :  { %v10539_v13 = vpop.f32.mrb[120].mxu0 }
0x1b87   :  { %v4865_v7 = vpop.f32.mrb[121].mxu0  ;;  %v4874_v62 = vadd.f32 %v10539_v13, %v9706_v30 }
0x1b88   :  { %v10540_v34 = vpop.f32.mrb[122].mxu0  ;;  %v4866_v26 = vadd.f32 %v9706_v30, %v4865_v7 }
0x1b89   :  { %v4877_v36 = vadd.f32 %v10540_v34, %v9706_v30  ;;  %v4868_v1 = vpop.f32.mrb[123].mxu0 }
0x1b8a   :  { %v4869_v19 = vadd.f32 %v9706_v30, %v4868_v1 }
0x1b8b   :  { %v5039_v25 = vpack.c.bf16 %v4877_v36, %v4874_v62  ;;  %v11153_v0 = vpack.i.bf16 %v4877_v36, %v4874_v62 }
0x1b8c   :  { %v5038_v38 = vpack.c.bf16 %v4869_v19, %v4866_v26  ;;  %v11158_v60 = vpack.i.bf16 %v4869_v19, %v4866_v26 }
0x1b8d   :  { %11154 = vrot.lane.b32.xlu0 %v11153_v0, %s11956_s9  ;;  %10558 = vmatmul.mubr.msk.bf16.vlgmr.msra.gmra.mrb[124].mxu1 %vm453_vm11, %v5039_v25 }
0x1b8e   :  { %10568 = vmatpush3.bf16.xpose.msra.mxu1 %v5199_v32  ;;  %11159 = vrot.lane.b32.xlu1 %v11158_v60, %s11956_s9 }
0x1b8f   :  { %10552 = vmatmul.mubr.msk.bf16.vlgmr.msra.gmra.mrb[124].mxu0 %vm453_vm11, %v5038_v38  ;;  %10569 = vmatprep.mubr.msk.bf16.mxu1 %vm11960_vm6, %v11955_v12 }
0x1b90   :  { %10562 = vmatpush3.bf16.xpose.msra.mxu0 %v5152_v29  ;;  %10563 = vmatprep.mubr.msk.bf16.mxu0 %vm11960_vm6, %v11955_v12 }
0x1b91   :  { %11174 = vrot.lane.b32.xlu0 %v11158_v60, %s11957_s10  ;;  %10573 = vmatprep.subr.bf16.mxu0 %v11955_v12 }
0x1b92   :  { %11164 = vrot.lane.b32.xlu1 %v11143_v40, %s11957_s10  ;;  %10579 = vmatprep.subr.bf16.mxu1 %v11955_v12 }
0x1b95   :  { %11179 = vrot.lane.b32.xlu0 %v11153_v0, %s11957_s10 }
0x1b96   :  { %11169 = vrot.lane.b32.xlu1 %v11138_v43, %s11958_s11 }
0x1b99   :  { %11189 = vrot.lane.b32.xlu0 %v11158_v60, %s11958_s11 }
0x1b9a   :  { %11184 = vrot.lane.b32.xlu1 %v11143_v40, %s11958_s11 }
0x1b9e   :  { %11194 = vrot.lane.b32.xlu1 %v11153_v0, %s11958_s11 }
0x1ba2   :  { %5631 = vrot.lane.b32.xlu1 %v5046_v3, %s11959_s1 }
0x1bff   :  { %v11155_v24 = vpop.permute.xlu0 %11154 }
0x1c00   :  { %v11157_v33 = vunpack.i.h.bf16 %v11155_v24  ;;  %v11156_v20 = vunpack.i.l.bf16 %v11155_v24  ;;  %v11160_v22 = vpop.permute.xlu1 %11159 }
0x1c01   :  { %v11162_v45 = vunpack.i.h.bf16 %v11160_v22  ;;  %v11161_v10 = vunpack.i.l.bf16 %v11160_v22 }
0x1c02   :  { %v5041_v50 = vpack.c.bf16 %v11157_v33, %v11156_v20 }
0x1c03   :  { %v5040_v55 = vpack.c.bf16 %v11162_v45, %v11161_v10  ;;  %v11175_v57 = vpop.permute.xlu0 %11174 }
0x1c04   :  { %v11165_v52 = vpop.permute.xlu1 %11164  ;;  %10570 = vmatmul.mubr.msk.bf16.vlgmr.msra.gmra.mrb[128].mxu1 %vm453_vm11, %v5041_v50  ;;  %v11177_v47 = vunpack.i.h.bf16 %v11175_v57  ;;  %v11176_v8 = vunpack.i.l.bf16 %v11175_v57 }
0x1c05   :  { %v11167_v15 = vunpack.i.h.bf16 %v11165_v52  ;;  %v11166_v58 = vunpack.i.l.bf16 %v11165_v52  ;;  %10564 = vmatmul.mubr.msk.bf16.vlgmr.msra.gmra.mrb[128].mxu0 %vm453_vm11, %v5040_v55  ;;  %10581 = vmatprep.mubr.msk.bf16.mxu1 %vm11960_vm6, %v11955_v12 }
0x1c06   :  { %10574 = vmatpush3.bf16.xpose.msra.mxu0 %v5246_v48  ;;  %10575 = vmatprep.mubr.msk.bf16.mxu0 %vm11960_vm6, %v11955_v12  ;;  %v5042_v43 = vpack.c.bf16 %v11177_v47, %v11176_v8 }
0x1c07   :  { %v11180_v21 = vpop.permute.xlu0 %11179  ;;  %v13429_v14 = vpack.c.bf16 %v11167_v15, %v11166_v58  ;;  %10585 = vmatprep.subr.bf16.mxu0 %v11955_v12 }
0x1c08   :  { %v11170_v23 = vpop.permute.xlu1 %11169  ;;  %v11182_v3 = vunpack.i.h.bf16 %v11180_v21  ;;  %v11181_v18 = vunpack.i.l.bf16 %v11180_v21 }
0x1c09   :  { %v11172_v56 = vunpack.i.h.bf16 %v11170_v23  ;;  %v11171_v41 = vunpack.i.l.bf16 %v11170_v23  ;;  %v5293_v40 = vsel %vm453_vm11, %v13429_v14, 0 }
0x1c0a   :  { %10580 = vmatpush3.bf16.xpose.msra.mxu1 %v5293_v40  ;;  %v5043_v37 = vpack.c.bf16 %v11182_v3, %v11181_v18 }
0x1c0b   :  { %v13434_v5 = vpack.c.bf16 %v11172_v56, %v11171_v41  ;;  %10591 = vmatprep.subr.bf16.mxu1 %v11955_v12  ;;  %v11190_v28 = vpop.permute.xlu0 %11189 }
0x1c0c   :  { %v11185_v11 = vpop.permute.xlu1 %11184  ;;  %v11192_v13 = vunpack.i.h.bf16 %v11190_v28  ;;  %v11191_v30 = vunpack.i.l.bf16 %v11190_v28 }
0x1c0d   :  { %v11187_v39 = vunpack.i.h.bf16 %v11185_v11  ;;  %v11186_v9 = vunpack.i.l.bf16 %v11185_v11  ;;  %10576 = vmatmul.mubr.msk.bf16.vlgmr.msra.gmra.mrb[132].mxu0 %vm453_vm11, %v5042_v43  ;;  %v5340_v49 = vsel %vm453_vm11, %v13434_v5, 0 }
0x1c0e   :  { %10586 = vmatpush3.bf16.xpose.msra.mxu0 %v5340_v49  ;;  %10587 = vmatprep.mubr.msk.bf16.mxu0 %vm11960_vm6, %v11955_v12  ;;  %v5044_v36 = vpack.c.bf16 %v11192_v13, %v11191_v30 }
0x1c0f   :  { %v13442_v7 = vpack.c.bf16 %v11187_v39, %v11186_v9  ;;  %10597 = vmatprep.subr.bf16.mxu0 %v11955_v12 }
0x1c10   :  { %v11195_v34 = vpop.permute.xlu1 %11194 }
0x1c11   :  { %10582 = vmatmul.mubr.msk.bf16.vlgmr.msra.gmra.mrb[132].mxu1 %vm453_vm11, %v5043_v37  ;;  %v5387_v62 = vsel %vm453_vm11, %v13442_v7, 0  ;;  %v11197_v1 = vunpack.i.h.bf16 %v11195_v34  ;;  %v11196_v26 = vunpack.i.l.bf16 %v11195_v34 }
0x1c12   :  { %10592 = vmatpush3.bf16.xpose.msra.mxu1 %v5387_v62  ;;  %10593 = vmatprep.mubr.msk.bf16.mxu1 %vm11960_vm6, %v11955_v12 }
0x1c13   :  { %10603 = vmatprep.subr.bf16.mxu1 %v11955_v12  ;;  %v5045_v25 = vpack.c.bf16 %v11197_v1, %v11196_v26 }
0x1c14   :  { %v5632_v19 = vpop.permute.xlu1 %5631 }
0x1c15   :  { %10588 = vmatmul.mubr.msk.bf16.vlgmr.msra.gmra.mrb[136].mxu0 %vm453_vm11, %v5044_v36 }
0x1c16   :  { %10598 = vmatpush3.bf16.msra.mxu0 %v5632_v19  ;;  %10599 = vmatprep.mubr.msk.bf16.mxu0 %vm11960_vm6, %v11955_v12 }
0x1c17   :  { %10609 = vmatprep.subr.bf16.mxu0 %v11955_v12 }
0x1c19   :  { %10594 = vmatmul.mubr.msk.bf16.vlgmr.msra.gmra.mrb[136].mxu1 %vm453_vm11, %v5045_v25 }
0x1c1a   :  { %10605 = vmatprep.mubr.msk.bf16.mxu1 %vm11960_vm6, %v11955_v12 }
0x1c60   :  { %v5141_v0 = vpop.f32.mrb[124].mxu1 }
0x1c61   :  { %v13458_v38 = vmul.f32 0.35355338, %v5141_v0  ;;  %v10559_v60 = vpop.f32.mrb[125].mxu1 }
0x1c62   :  { %v5094_v32 = vpop.f32.mrb[124].mxu0  ;;  %v5144_v29 = vpop.f32.mrb[126].mxu1 }
0x1c63   :  { %v10553_v17 = vpop.f32.mrb[125].mxu0  ;;  %v10560_v27 = vpop.f32.mrb[127].mxu1  ;;  %v13460_v44 = vmul.f32 0.35355338, %v5094_v32  ;;  %v5452_v33 = vsel %vm115_vm0, %v13458_v38, -inf }
0x1c64   :  { %v5097_v24 = vpop.f32.mrb[126].mxu0  ;;  %5453 = vmax.xlane.f32.xlu0 %v5452_v33  ;;  %v13468_v10 = vmul.f32 0.35355338, %v5144_v29 }
0x1c65   :  { %v13464_v20 = vmul.f32 0.35355338, %v5097_v24  ;;  %v10554_v22 = vpop.f32.mrb[127].mxu0  ;;  %v5446_v50 = vsel %vm115_vm0, %v13460_v44, -inf }
0x1c66   :  { %v5455_v55 = vsel %vm115_vm0, %v13468_v10, -inf }
0x1c67   :  { %v5449_v45 = vsel %vm115_vm0, %v13464_v20, -inf }
0x1c68   :  { %5450 = vmax.xlane.f32.xlu1 %v5449_v45  ;;  %5447 = vmax.xlane.f32.xlu0 %v5446_v50 }
0x1c6c   :  { %5456 = vmax.xlane.f32.xlu0 %v5455_v55 }
0x1cd7   :  { %v5235_v57 = vpop.f32.mrb[128].mxu1 }
0x1cd8   :  { %v13474_v52 = vmul.f32 0.35355338, %v5235_v57  ;;  %v5188_v15 = vpop.f32.mrb[128].mxu0  ;;  %v10571_v58 = vpop.f32.mrb[129].mxu1 }
0x1cd9   :  { %v13476_v48 = vmul.f32 0.35355338, %v5188_v15  ;;  %v10565_v47 = vpop.f32.mrb[129].mxu0  ;;  %v5238_v8 = vpop.f32.mrb[130].mxu1 }
0x1cda   :  { %v13478_v21 = vmul.f32 0.35355338, %v5238_v8  ;;  %v5191_v23 = vpop.f32.mrb[130].mxu0  ;;  %v10572_v56 = vpop.f32.mrb[131].mxu1  ;;  %v5464_v41 = vsel %vm115_vm0, %v13474_v52, -inf }
0x1cdb   :  { %v10566_v40 = vpop.f32.mrb[131].mxu0  ;;  %5465 = vmax.xlane.f32.xlu1 %v5464_v41  ;;  %v13482_v43 = vmul.f32 0.35355338, %v5191_v23  ;;  %v5458_v18 = vsel %vm115_vm0, %v13476_v48, -inf }
0x1cdc   :  { %v5467_v3 = vsel %vm115_vm0, %v13478_v21, -inf }
0x1cdd   :  { %5468 = vmax.xlane.f32.xlu0 %v5467_v3  ;;  %v5461_v11 = vsel %vm115_vm0, %v13482_v43, -inf }
0x1cdf   :  { %5459 = vmax.xlane.f32.xlu1 %v5458_v18 }
0x1ce0   :  { %v5282_v28 = vpop.f32.mrb[132].mxu0 }
0x1ce1   :  { %v10577_v39 = vpop.f32.mrb[133].mxu0  ;;  %5462 = vmax.xlane.f32.xlu0 %v5461_v11  ;;  %v13492_v62 = vmul.f32 0.35355338, %v5282_v28 }
0x1ce2   :  { %v5285_v9 = vpop.f32.mrb[134].mxu0 }
0x1ce3   :  { %v10578_v49 = vpop.f32.mrb[135].mxu0  ;;  %v13498_v25 = vmul.f32 0.35355338, %v5285_v9  ;;  %v5470_v17 = vsel %vm115_vm0, %v13492_v62, -inf }
0x1ce4   :  { %v5329_v37 = vpop.f32.mrb[132].mxu1 }
0x1ce5   :  { %v13490_v13 = vmul.f32 0.35355338, %v5329_v37  ;;  %v10583_v30 = vpop.f32.mrb[133].mxu1  ;;  %v5473_v22 = vsel %vm115_vm0, %v13498_v25, -inf }
0x1ce6   :  { %v5332_v34 = vpop.f32.mrb[134].mxu1 }
0x1ce7   :  { %v13494_v36 = vmul.f32 0.35355338, %v5332_v34  ;;  %v10584_v1 = vpop.f32.mrb[135].mxu1  ;;  %v5476_v26 = vsel %vm115_vm0, %v13490_v13, -inf }
0x1ce8   :  { %v5376_v19 = vpop.f32.mrb[136].mxu0  ;;  %5477 = vmax.xlane.f32.xlu1 %v5476_v26 }
0x1ce9   :  { %v10589_v0 = vpop.f32.mrb[137].mxu0  ;;  %v5479_v60 = vsel %vm115_vm0, %v13494_v36, -inf  ;;  %v13508_v50 = vmul.f32 0.35355338, %v5376_v19 }
0x1cea   :  { %v5379_v32 = vpop.f32.mrb[138].mxu0  ;;  %5480 = vmax.xlane.f32.xlu0 %v5479_v60 }
0x1ceb   :  { %v10590_v29 = vpop.f32.mrb[139].mxu0  ;;  %v13514_v58 = vmul.f32 0.35355338, %v5379_v32  ;;  %v5482_v8 = vsel %vm115_vm0, %v13508_v50, -inf }
0x1cec   :  { %5471 = vmax.xlane.f32.xlu1 %v5470_v17  ;;  %v5423_v27 = vpop.f32.mrb[136].mxu1 }
0x1ced   :  { %v13504_v24 = vmul.f32 0.35355338, %v5423_v27  ;;  %v10595_v33 = vpop.f32.mrb[137].mxu1  ;;  %v5485_v23 = vsel %vm115_vm0, %v13514_v58, -inf }
0x1cee   :  { %5474 = vmax.xlane.f32.xlu0 %v5473_v22  ;;  %v5426_v45 = vpop.f32.mrb[138].mxu1 }
0x1cef   :  { %v13510_v55 = vmul.f32 0.35355338, %v5426_v45  ;;  %v10596_v57 = vpop.f32.mrb[139].mxu1  ;;  %v5488_v15 = vsel %vm115_vm0, %v13504_v24, -inf }
0x1cf0   :  { %5489 = vmax.xlane.f32.xlu1 %v5488_v15 }
0x1cf1   :  { %v5491_v47 = vsel %vm115_vm0, %v13510_v55, -inf  ;;  %v5454_v56 = vpop.xlane.xlu0 %5453 }
0x1cf2   :  { %5492 = vmax.xlane.f32.xlu0 %v5491_v47 }
0x1cf4   :  { %5483 = vmax.xlane.f32.xlu1 %v5482_v8 }
0x1cf5   :  { %v5448_v41 = vpop.xlane.xlu0 %5447  ;;  %v5451_v18 = vpop.xlane.xlu1 %5450 }
0x1cf6   :  { %5486 = vmax.xlane.f32.xlu0 %v5485_v23  ;;  %v5495_v28 = vsub.f32 %v13464_v20, %v5451_v18  ;;  %v5494_v39 = vsub.f32 %v13460_v44, %v5448_v41 }
0x1cf9   :  { %v5457_v40 = vpop.xlane.xlu0 %5456 }
0x1cfa   :  { %v5497_v3 = vsub.f32 %v13468_v10, %v5457_v40 }
0x1d05   :  { %5727 = vrot.lane.b32.xlu1 %v13395_v61, %s11959_s1  ;;  %v5496_v61 = vsub.f32 %v13458_v38, %v5454_v56 }
0x1d07   :  { %v5514_v11 = vmul.f32 1.442695, %v5496_v61 }
0x1d09   :  { %5775 = vrot.lane.b32.xlu1 %v13393_v16, %s11959_s1  ;;  %v5516_v16 = vmul.f32 1.442695, %v5497_v3 }
0x1d0b   :  { %11664 = vpow2.f32 %v5516_v16 }
0x1d0c   :  { %5679 = vrot.lane.b32.xlu0 %v13380_v54, %s11959_s1  ;;  %v5512_v54 = vmul.f32 1.442695, %v5495_v28  ;;  %11666 = vpow2.f32 %v5514_v11 }
0x1d0d   :  { %5871 = vrot.lane.b32.xlu1 %v13429_v14, %s11959_s1  ;;  %v5510_v14 = vmul.f32 1.442695, %v5494_v39 }
0x1d0e   :  { %11668 = vpow2.f32 %v5512_v54 }
0x1d0f   :  { %11670 = vpow2.f32 %v5510_v14 }
0x1d10   :  { %5823 = vrot.lane.b32.xlu0 %v13419_v35, %s11959_s1 }
0x1d15   :  { %v13536_v9 = vpop.eup %11664 }
0x1d16   :  { %v13538_v35 = vpop.eup %11666  ;;  %v5551_v10 = vsel %vm115_vm0, %v13536_v9, 0.0 }
0x1d17   :  { %v5548_v20 = vsel %vm115_vm0, %v13538_v35, 0.0 }
0x1d18   :  { %v13542_v38 = vpop.eup %11668 }
0x1d19   :  { %v13546_v44 = vpop.eup %11670  ;;  %v5545_v49 = vsel %vm115_vm0, %v13542_v38, 0.0 }
0x1d1a   :  { %v5542_v37 = vsel %vm115_vm0, %v13546_v44, 0.0 }
0x1d2f   :  { %5552 = vadd.xlane.f32.xlu0 %v5551_v10 }
0x1d31   :  { %5549 = vadd.xlane.f32.xlu1 %v5548_v20 }
0x1d33   :  { %5546 = vadd.xlane.f32.xlu0 %v5545_v49 }
0x1d35   :  { %5543 = vadd.xlane.f32.xlu1 %v5542_v37 }
0x1d68   :  { %v5466_v30 = vpop.xlane.xlu1 %5465 }
0x1d69   :  { %v5500_v34 = vsub.f32 %v13474_v52, %v5466_v30 }
0x1d6a   :  { %v5469_v1 = vpop.xlane.xlu0 %5468 }
0x1d6b   :  { %v5522_v26 = vmul.f32 1.442695, %v5500_v34  ;;  %v5501_v19 = vsub.f32 %v13478_v21, %v5469_v1 }
0x1d6c   :  { %v5460_v0 = vpop.xlane.xlu1 %5459 }
0x1d6d   :  { %11672 = vpow2.f32 %v5522_v26  ;;  %v5524_v60 = vmul.f32 1.442695, %v5501_v19  ;;  %v5498_v32 = vsub.f32 %v13476_v48, %v5460_v0 }
0x1d6e   :  { %v5463_v29 = vpop.xlane.xlu0 %5462 }
0x1d6f   :  { %11674 = vpow2.f32 %v5524_v60  ;;  %v5518_v17 = vmul.f32 1.442695, %v5498_v32  ;;  %v5499_v27 = vsub.f32 %v13482_v43, %v5463_v29 }
0x1d71   :  { %11676 = vpow2.f32 %v5518_v17  ;;  %v5520_v33 = vmul.f32 1.442695, %v5499_v27 }
0x1d73   :  { %11678 = vpow2.f32 %v5520_v33 }
0x1d75   :  { %v5478_v22 = vpop.xlane.xlu1 %5477 }
0x1d76   :  { %v5504_v52 = vsub.f32 %v13490_v13, %v5478_v22 }
0x1d77   :  { %v13557_v45 = vpop.eup %11672  ;;  %v5481_v57 = vpop.xlane.xlu0 %5480 }
0x1d78   :  { %v5530_v21 = vmul.f32 1.442695, %v5504_v52  ;;  %v5505_v15 = vsub.f32 %v13494_v36, %v5481_v57  ;;  %v5560_v48 = vsel %vm115_vm0, %v13557_v45, 0.0 }
0x1d79   :  { %v13562_v47 = vpop.eup %11674  ;;  %v5472_v8 = vpop.xlane.xlu1 %5471  ;;  %5561 = vadd.xlane.f32.xlu1 %v5560_v48 }
0x1d7a   :  { %11680 = vpow2.f32 %v5530_v21  ;;  %v5532_v43 = vmul.f32 1.442695, %v5505_v15  ;;  %v5502_v23 = vsub.f32 %v13492_v62, %v5472_v8  ;;  %v5563_v13 = vsel %vm115_vm0, %v13562_v47, 0.0 }
0x1d7b   :  { %v13567_v56 = vpop.eup %11676  ;;  %v5475_v41 = vpop.xlane.xlu0 %5474  ;;  %5564 = vadd.xlane.f32.xlu0 %v5563_v13 }
0x1d7c   :  { %11682 = vpow2.f32 %v5532_v43  ;;  %v5526_v36 = vmul.f32 1.442695, %v5502_v23  ;;  %v5503_v40 = vsub.f32 %v13498_v25, %v5475_v41  ;;  %v5554_v3 = vsel %vm115_vm0, %v13567_v56, 0.0 }
0x1d7d   :  { %v13572_v18 = vpop.eup %11678  ;;  %5555 = vadd.xlane.f32.xlu1 %v5554_v3  ;;  %v5490_v61 = vpop.xlane.xlu1 %5489 }
0x1d7e   :  { %11684 = vpow2.f32 %v5526_v36  ;;  %v5528_v62 = vmul.f32 1.442695, %v5503_v40  ;;  %v5508_v28 = vsub.f32 %v13504_v24, %v5490_v61  ;;  %v5557_v16 = vsel %vm115_vm0, %v13572_v18, 0.0 }
0x1d7f   :  { %5558 = vadd.xlane.f32.xlu0 %v5557_v16  ;;  %v5493_v11 = vpop.xlane.xlu0 %5492 }
0x1d80   :  { %11686 = vpow2.f32 %v5528_v62  ;;  %v5538_v39 = vmul.f32 1.442695, %v5508_v28  ;;  %v5509_v25 = vsub.f32 %v13510_v55, %v5493_v11 }
0x1d81   :  { %v5484_v54 = vpop.xlane.xlu1 %5483 }
0x1d82   :  { %11688 = vpow2.f32 %v5538_v39  ;;  %v5540_v14 = vmul.f32 1.442695, %v5509_v25  ;;  %v5506_v10 = vsub.f32 %v13508_v50, %v5484_v54 }
0x1d83   :  { %v5487_v20 = vpop.xlane.xlu0 %5486 }
0x1d84   :  { %v13579_v49 = vpop.eup %11680  ;;  %11690 = vpow2.f32 %v5540_v14  ;;  %v5534_v37 = vmul.f32 1.442695, %v5506_v10  ;;  %v5507_v24 = vsub.f32 %v13514_v58, %v5487_v20 }
0x1d85   :  { %v5572_v30 = vsel %vm115_vm0, %v13579_v49, 0.0  ;;  %v5728_v57 = vpop.permute.xlu1 %5727 }
0x1d86   :  { %v13584_v34 = vpop.eup %11682  ;;  %11692 = vpow2.f32 %v5534_v37  ;;  %v5536_v1 = vmul.f32 1.442695, %v5507_v24  ;;  %5573 = vadd.xlane.f32.xlu1 %v5572_v30 }
0x1d87   :  { %v5680_v55 = vpop.permute.xlu0 %5679  ;;  %v5575_v26 = vsel %vm115_vm0, %v13584_v34, 0.0 }
0x1d88   :  { %v13588_v50 = vpop.eup %11684  ;;  %11694 = vpow2.f32 %v5536_v1  ;;  %5576 = vadd.xlane.f32.xlu0 %v5575_v26  ;;  %10604 = vmatpush3.bf16.msra.mxu1 %v5680_v55 }
0x1d89   :  { %v5566_v58 = vsel %vm115_vm0, %v13588_v50, 0.0  ;;  %10615 = vmatprep.subr.bf16.mxu1 %v11955_v12  ;;  %v5776_v21 = vpop.permute.xlu1 %5775 }
0x1d8a   :  { %v13593_v19 = vpop.eup %11686  ;;  %5567 = vadd.xlane.f32.xlu1 %v5566_v58 }
0x1d8b   :  { %v5569_v0 = vsel %vm115_vm0, %v13593_v19, 0.0  ;;  %v5824_v15 = vpop.permute.xlu0 %5823 }
0x1d8c   :  { %v13597_v60 = vpop.eup %11688  ;;  %5570 = vadd.xlane.f32.xlu0 %v5569_v0 }
0x1d8d   :  { %v5584_v32 = vsel %vm115_vm0, %v13597_v60, 0.0  ;;  %v5872_v48 = vpop.permute.xlu1 %5871 }
0x1d8e   :  { %v13601_v29 = vpop.eup %11690  ;;  %5585 = vadd.xlane.f32.xlu1 %v5584_v32 }
0x1d8f   :  { %v5587_v17 = vsel %vm115_vm0, %v13601_v29, 0.0 }
0x1d90   :  { %v13605_v27 = vpop.eup %11692  ;;  %5588 = vadd.xlane.f32.xlu0 %v5587_v17 }
0x1d91   :  { %v5578_v33 = vsel %vm115_vm0, %v13605_v27, 0.0 }
0x1d92   :  { %v13609_v22 = vpop.eup %11694  ;;  %5579 = vadd.xlane.f32.xlu1 %v5578_v33 }
0x1d93   :  { %v5581_v52 = vsel %vm115_vm0, %v13609_v22, 0.0 }
0x1d94   :  { %5582 = vadd.xlane.f32.xlu0 %v5581_v52 }
0x1da3   :  { %5967 = vrot.lane.b32.xlu1 %v13442_v7, %s11959_s1 }
0x1daa   :  { %5919 = vrot.lane.b32.xlu0 %v13434_v5, %s11959_s1 }
0x1dbc   :  { %v5553_v8 = vpop.xlane.xlu0 %5552 }
0x1dbd   :  { %11696 = vrcp.f32 %v5553_v8 }
0x1dbe   :  { %v5550_v43 = vpop.xlane.xlu1 %5549 }
0x1dbf   :  { %11698 = vrcp.f32 %v5550_v43 }
0x1dc0   :  { %v5547_v23 = vpop.xlane.xlu0 %5546 }
0x1dc1   :  { %11700 = vrcp.f32 %v5547_v23 }
0x1dc2   :  { %v5544_v13 = vpop.xlane.xlu1 %5543 }
0x1dc3   :  { %11702 = vrcp.f32 %v5544_v13 }
0x1dc7   :  { %v11697_v41 = vpop.eup %11696 }
0x1dc8   :  { %v5609_v40 = vmul.f32 %v11697_v41, %v13536_v9 }
0x1dc9   :  { %v11699_v36 = vpop.eup %11698 }
0x1dca   :  { %v5608_v7 = vmul.f32 %v11699_v36, %v13538_v35 }
0x1dcb   :  { %v11701_v3 = vpop.eup %11700 }
0x1dcc   :  { %v5623_v5 = vpack.c.bf16 %v5609_v40, %v5608_v7  ;;  %v5607_v62 = vmul.f32 %v11701_v3, %v13542_v38 }
0x1dcd   :  { %v11703_v61 = vpop.eup %11702 }
0x1dce   :  { %v5606_v28 = vmul.f32 %v11703_v61, %v13546_v44  ;;  %10606 = vmatmul.mubr.msk.bf16.vlgmr.msra.gmra.mrb[140].mxu1 %vm115_vm0, %v5623_v5 }
0x1dcf   :  { %10616 = vmatpush3.bf16.msra.mxu1 %v5776_v21  ;;  %10617 = vmatprep.mubr.msk.bf16.mxu1 %vm11960_vm6, %v11955_v12 }
0x1dd0   :  { %v5622_v16 = vpack.c.bf16 %v5607_v62, %v5606_v28  ;;  %10627 = vmatprep.subr.bf16.mxu1 %v11955_v12 }
0x1dd2   :  { %10600 = vmatmul.mubr.msk.bf16.vlgmr.msra.gmra.mrb[140].mxu0 %vm115_vm0, %v5622_v16 }
0x1dd3   :  { %10610 = vmatpush3.bf16.msra.mxu0 %v5728_v57  ;;  %10611 = vmatprep.mubr.msk.bf16.mxu0 %vm11960_vm6, %v11955_v12 }
0x1dd4   :  { %10621 = vmatprep.subr.bf16.mxu0 %v11955_v12 }
0x1e06   :  { %v5562_v9 = vpop.xlane.xlu1 %5561 }
0x1e07   :  { %11704 = vrcp.f32 %v5562_v9 }
0x1e08   :  { %v5565_v35 = vpop.xlane.xlu0 %5564 }
0x1e09   :  { %11706 = vrcp.f32 %v5565_v35 }
0x1e0a   :  { %v5556_v38 = vpop.xlane.xlu1 %5555 }
0x1e0b   :  { %11708 = vrcp.f32 %v5556_v38 }
0x1e0c   :  { %v5559_v44 = vpop.xlane.xlu0 %5558 }
0x1e0d   :  { %11710 = vrcp.f32 %v5559_v44 }
0x1e11   :  { %v11705_v11 = vpop.eup %11704 }
0x1e12   :  { %v5612_v54 = vmul.f32 %v11705_v11, %v13557_v45 }
0x1e13   :  { %v11707_v39 = vpop.eup %11706  ;;  %v5574_v25 = vpop.xlane.xlu1 %5573 }
0x1e14   :  { %v5613_v14 = vmul.f32 %v11707_v39, %v13562_v47  ;;  %11712 = vrcp.f32 %v5574_v25 }
0x1e15   :  { %v11709_v10 = vpop.eup %11708  ;;  %v5577_v20 = vpop.xlane.xlu0 %5576 }
0x1e16   :  { %11714 = vrcp.f32 %v5577_v20  ;;  %v5625_v37 = vpack.c.bf16 %v5613_v14, %v5612_v54  ;;  %v5610_v1 = vmul.f32 %v11709_v10, %v13567_v56 }
0x1e17   :  { %v11711_v24 = vpop.eup %11710  ;;  %v5568_v30 = vpop.xlane.xlu1 %5567 }
0x1e18   :  { %v5611_v55 = vmul.f32 %v11711_v24, %v13572_v18  ;;  %11716 = vrcp.f32 %v5568_v30  ;;  %10618 = vmatmul.mubr.msk.bf16.vlgmr.msra.gmra.mrb[144].mxu1 %vm115_vm0, %v5625_v37  ;;  %v11406_v24 = vld [vmem:[#allocation4 + $0xe0] sm:$0xff]  }
0x1e19   :  { %10628 = vmatpush3.bf16.msra.mxu1 %v5872_v48  ;;  %v5571_v26 = vpop.xlane.xlu0 %5570  ;;  %10629 = vmatprep.mubr.msk.bf16.mxu1 %vm11960_vm6, %v11955_v12 }
0x1e1a   :  { %11718 = vrcp.f32 %v5571_v26  ;;  %v5624_v45 = vpack.c.bf16 %v5611_v55, %v5610_v1  ;;  %10639 = vmatprep.subr.bf16.mxu1 %v11955_v12 }
0x1e1b   :  { %v5586_v47 = vpop.xlane.xlu1 %5585 }
0x1e1c   :  { %11720 = vrcp.f32 %v5586_v47  ;;  %10612 = vmatmul.mubr.msk.bf16.vlgmr.msra.gmra.mrb[144].mxu0 %vm115_vm0, %v5624_v45  ;;  %v11407_v47 = vld [vmem:[#allocation4 + $0xe8] sm:$0xff]  }
0x1e1d   :  { %10622 = vmatpush3.bf16.msra.mxu0 %v5824_v15  ;;  %v5589_v56 = vpop.xlane.xlu0 %5588  ;;  %10623 = vmatprep.mubr.msk.bf16.mxu0 %vm11960_vm6, %v11955_v12 }
0x1e1e   :  { %v11713_v18 = vpop.eup %11712  ;;  %11722 = vrcp.f32 %v5589_v56  ;;  %10633 = vmatprep.subr.bf16.mxu0 %v11955_v12 }
0x1e1f   :  { %v5580_v58 = vpop.xlane.xlu1 %5579  ;;  %v5616_v32 = vmul.f32 %v11713_v18, %v13579_v49 }
0x1e20   :  { %v11715_v0 = vpop.eup %11714  ;;  %11724 = vrcp.f32 %v5580_v58 }
0x1e21   :  { %v5617_v17 = vmul.f32 %v11715_v0, %v13584_v34  ;;  %v5583_v33 = vpop.xlane.xlu0 %5582 }
0x1e22   :  { %v11717_v52 = vpop.eup %11716  ;;  %11726 = vrcp.f32 %v5583_v33 }
0x1e23   :  { %v5968_v57 = vpop.permute.xlu1 %5967  ;;  %v5627_v21 = vpack.c.bf16 %v5617_v17, %v5616_v32  ;;  %v5614_v48 = vmul.f32 %v11717_v52, %v13588_v50 }
0x1e24   :  { %v11719_v15 = vpop.eup %11718 }
0x1e25   :  { %v5615_v8 = vmul.f32 %v11719_v15, %v13593_v19  ;;  %10630 = vmatmul.mubr.msk.bf16.vlgmr.msra.gmra.mrb[148].mxu1 %vm115_vm0, %v5627_v21  ;;  %v5920_v41 = vpop.permute.xlu0 %5919 }
0x1e26   :  { %v11721_v43 = vpop.eup %11720  ;;  %10640 = vmatpush3.bf16.msra.mxu1 %v5968_v57  ;;  %10641 = vmatprep.mubr.msk.bf16.mxu1 %vm11960_vm6, %v11955_v12 }
0x1e27   :  { %v5626_v49 = vpack.c.bf16 %v5615_v8, %v5614_v48  ;;  %v5620_v34 = vmul.f32 %v11721_v43, %v13597_v60 }
0x1e28   :  { %v11723_v23 = vpop.eup %11722 }
0x1e29   :  { %v5621_v13 = vmul.f32 %v11723_v23, %v13601_v29  ;;  %10624 = vmatmul.mubr.msk.bf16.vlgmr.msra.gmra.mrb[148].mxu0 %vm115_vm0, %v5626_v49 }
0x1e2a   :  { %v11725_v36 = vpop.eup %11724  ;;  %10634 = vmatpush3.bf16.msra.mxu0 %v5920_v41  ;;  %10635 = vmatprep.mubr.msk.bf16.mxu0 %vm11960_vm6, %v11955_v12 }
0x1e2b   :  { %v5629_v50 = vpack.c.bf16 %v5621_v13, %v5620_v34  ;;  %v5618_v40 = vmul.f32 %v11725_v36, %v13605_v27  ;;  %10645 = vmatprep.subr.bf16.mxu0 %v11406_v24 }
0x1e2c   :  { %v11727_v19 = vpop.eup %11726 }
0x1e2d   :  { %v5619_v7 = vmul.f32 %v11727_v19, %v13609_v22  ;;  %10642 = vmatmul.mubr.msk.bf16.vlgmr.msra.gmra.mrb[152].mxu1 %vm115_vm0, %v5629_v50 }
0x1e2f   :  { %v5628_v3 = vpack.c.bf16 %v5619_v7, %v5618_v40 }
0x1e31   :  { %10636 = vmatmul.mubr.msk.bf16.vlgmr.msra.gmra.mrb[152].mxu0 %vm115_vm0, %v5628_v3 }
0x1e32   :  { %10646 = vmatpush3.bf16.msra.mxu0 %v11406_v24 }
0x1e33   :  { %10647 = vmatprep.subr.bf16.mxu0 %v11407_v47 }
0x1e36   :  { %10648 = vmatpush3.bf16.msra.mxu0 %v11407_v47 }
0x1ea1   :  { %v5719_v60 = vpop.f32.mrb[140].mxu1 }
0x1ea2   :  { %v10607_v29 = vpop.f32.mrb[141].mxu1 }
0x1ea3   :  { %v5722_v5 = vpop.f32.mrb[142].mxu1 }
0x1ea4   :  { %v10608_v61 = vpop.f32.mrb[143].mxu1 }
0x1ea5   :  { %v13657_v62 = vpop.f32.mrb[140].mxu0 }
0x1ea6   :  { %v10601_v28 = vpop.f32.mrb[141].mxu0 }
0x1ea7   :  { %v13659_v16 = vpop.f32.mrb[142].mxu0 }
0x1ea8   :  { %v10602_v9 = vpop.f32.mrb[143].mxu0 }
0x1eeb   :  { %v5815_v35 = vpop.f32.mrb[144].mxu1 }
0x1eec   :  { %v10619_v38 = vpop.f32.mrb[145].mxu1 }
0x1eed   :  { %v5818_v27 = vpop.f32.mrb[146].mxu1 }
0x1eee   :  { %v11198_v44 = vpack.i.bf16 %v5818_v27, %v5815_v35  ;;  %v10620_v22 = vpop.f32.mrb[147].mxu1 }
0x1eef   :  { %v5767_v11 = vpop.f32.mrb[144].mxu0 }
0x1ef0   :  { %v10613_v39 = vpop.f32.mrb[145].mxu0  ;;  %11199 = vrot.lane.b32.xlu1 %v11198_v44, %s11950_s29 }
0x1ef1   :  { %v5770_v25 = vpop.f32.mrb[146].mxu0 }
0x1ef2   :  { %v11203_v54 = vpack.i.bf16 %v5770_v25, %v5767_v11  ;;  %v10614_v14 = vpop.f32.mrb[147].mxu0 }
0x1ef4   :  { %11204 = vrot.lane.b32.xlu0 %v11203_v54, %s11950_s29 }
0x1ef8   :  { %v5911_v10 = vpop.f32.mrb[148].mxu1 }
0x1ef9   :  { %v10631_v20 = vpop.f32.mrb[149].mxu1 }
0x1efa   :  { %v5914_v37 = vpop.f32.mrb[150].mxu1 }
0x1efb   :  { %v11208_v30 = vpack.i.bf16 %v5914_v37, %v5911_v10  ;;  %v10632_v1 = vpop.f32.mrb[151].mxu1 }
0x1efc   :  { %v5863_v55 = vpop.f32.mrb[148].mxu0 }
0x1efd   :  { %v10625_v26 = vpop.f32.mrb[149].mxu0  ;;  %11209 = vrot.lane.b32.xlu1 %v11208_v30, %s11961_s0 }
0x1efe   :  { %v5866_v45 = vpop.f32.mrb[150].mxu0 }
0x1eff   :  { %v11213_v56 = vpack.i.bf16 %v5866_v45, %v5863_v55  ;;  %v10626_v18 = vpop.f32.mrb[151].mxu0 }
0x1f00   :  { %v6007_v58 = vpop.f32.mrb[152].mxu1 }
0x1f01   :  { %11214 = vrot.lane.b32.xlu0 %v11213_v56, %s11961_s0  ;;  %v10643_v0 = vpop.f32.mrb[153].mxu1 }
0x1f02   :  { %v6010_v32 = vpop.f32.mrb[154].mxu1 }
0x1f03   :  { %v11223_v17 = vpack.i.bf16 %v6010_v32, %v6007_v58  ;;  %v10644_v33 = vpop.f32.mrb[155].mxu1 }
0x1f04   :  { %v5959_v52 = vpop.f32.mrb[152].mxu0 }
0x1f05   :  { %v10637_v57 = vpop.f32.mrb[153].mxu0  ;;  %11224 = vrot.lane.b32.xlu1 %v11223_v17, %s11962_s24 }
0x1f06   :  { %v5962_v21 = vpop.f32.mrb[154].mxu0 }
0x1f07   :  { %v11218_v15 = vpack.i.bf16 %v5962_v21, %v5959_v52  ;;  %v10638_v48 = vpop.f32.mrb[155].mxu0 }
0x1f09   :  { %11219 = vrot.lane.b32.xlu0 %v11218_v15, %s11962_s24 }
0x1f62   :  { %v11200_v8 = vpop.permute.xlu1 %11199 }
0x1f63   :  { %v11202_v23 = vunpack.i.h.bf16 %v11200_v8  ;;  %v11201_v34 = vunpack.i.l.bf16 %v11200_v8 }
0x1f65   :  { %v6065_v50 = vsel %vm453_vm11, %v5722_v5, %v11202_v23  ;;  %v6064_v19 = vsel %vm453_vm11, %v5719_v60, %v11201_v34 }
0x1f66   :  { %v11205_v43 = vpop.permute.xlu0 %11204 }
0x1f67   :  { %v11207_v7 = vunpack.i.h.bf16 %v11205_v43  ;;  %v11206_v3 = vunpack.i.l.bf16 %v11205_v43 }
0x1f69   :  { %v6063_v60 = vsel %vm453_vm11, %v13659_v16, %v11207_v7  ;;  %v6062_v5 = vsel %vm453_vm11, %v13657_v62, %v11206_v3  ;;  %v9732_v16 = vld [vmem:[%s14526_s4 + $0x14] ss:$0 sm:$0xff] }
0x1f6a   :  { %v11408_v3 = vld [vmem:[#allocation4 + $0xf0] sm:$0xff]  }
0x1f6b   :  { %10653 = vmatprep.subr.bf16.mxu1 %v11408_v3 }
0x1f6c   :  { %10654 = vmatpush3.bf16.msra.mxu1 %v11408_v3 }
0x1f6f   :  { %v11210_v49 = vpop.permute.xlu1 %11209 }
0x1f70   :  { %v11212_v13 = vunpack.i.h.bf16 %v11210_v49  ;;  %v11211_v41 = vunpack.i.l.bf16 %v11210_v49 }
0x1f72   :  { %v6069_v28 = vsel %vm115_vm0, %v6065_v50, %v11212_v13  ;;  %v6068_v9 = vsel %vm115_vm0, %v6064_v19, %v11211_v41 }
0x1f73   :  { %v11215_v36 = vpop.permute.xlu0 %11214 }
0x1f74   :  { %v11217_v35 = vunpack.i.h.bf16 %v11215_v36  ;;  %v11216_v38 = vunpack.i.l.bf16 %v11215_v36 }
0x1f76   :  { %v6066_v54 = vsel %vm115_vm0, %v6062_v5, %v11216_v38  ;;  %v6067_v14 = vsel %vm115_vm0, %v6063_v60, %v11217_v35 }
0x1f77   :  { %v11225_v40 = vpop.permute.xlu1 %11224 }
0x1f78   :  { %v11227_v29 = vunpack.i.h.bf16 %v11225_v40  ;;  %v11226_v61 = vunpack.i.l.bf16 %v11225_v40 }
0x1f7a   :  { %v6073_v27 = vsel %vm1483_vm12, %v6069_v28, %v11227_v29  ;;  %v6072_v44 = vsel %vm1483_vm12, %v6068_v9, %v11226_v61  ;;  %v11409_v29 = vld [vmem:[#allocation4 + $0xf8] sm:$0xff]   ;;  %v11410_v61 = vld [vmem:[#allocation4 + $0x100] sm:$0xff]   ;;  %v11411_v28 = vld [vmem:[#allocation4 + $0x108] sm:$0xff]  }
0x1f7b   :  { %v6079_v22 = vpack.c.bf16 %v6073_v27, %v6072_v44  ;;  %v11220_v11 = vpop.permute.xlu0 %11219  ;;  %10655 = vmatprep.subr.bf16.mxu1 %v11409_v29  ;;  %10661 = vmatprep.subr.bf16.mxu0 %v11410_v61 }
0x1f7c   :  { %v11222_v39 = vunpack.i.h.bf16 %v11220_v11  ;;  %v11221_v25 = vunpack.i.l.bf16 %v11220_v11  ;;  %10656 = vmatpush3.bf16.msra.mxu1 %v11409_v29 }
0x1f7e   :  { %v6070_v10 = vsel %vm1483_vm12, %v6066_v54, %v11221_v25  ;;  %v6071_v20 = vsel %vm1483_vm12, %v6067_v14, %v11222_v39 }
0x1f7f   :  { %v6078_v37 = vpack.c.bf16 %v6071_v20, %v6070_v10  ;;  %v9737_v10 = vld [vmem:[%s14526_s4 + $0x19] ss:$0 sm:$0xff] }
0x1f81   :  { %10649 = vmatprep.mubr.msk.bf16.mxu0 %vm346_vm5, %v6078_v37 }
0x1f82   :  { %10650 = vmatmul.mubr.msk.bf16.vlgmr.msra.gmra.mrb[156].mxu0 %vm346_vm5, %v6079_v22 }
0x1f83   :  { %10662 = vmatpush3.bf16.msra.mxu0 %v11410_v61 }
0x1f84   :  { %10663 = vmatprep.subr.bf16.mxu0 %v11411_v28 }
0x1f87   :  { %10664 = vmatpush3.bf16.msra.mxu0 %v11411_v28 }
0x2055   :  { %v10651_v62 = vpop.f32.mrb[156].mxu0 }
0x2056   :  { %v6137_v24 = vpop.f32.mrb[157].mxu0  ;;  %v6146_v30 = vadd.f32 %v10651_v62, %v9732_v16 }
0x2057   :  { %v6138_v1 = vadd.f32 %v9732_v16, %v6137_v24  ;;  %v10652_v55 = vpop.f32.mrb[158].mxu0 }
0x2058   :  { %v6140_v26 = vpop.f32.mrb[159].mxu0  ;;  %v6154_v56 = vadd.f32 %v6146_v30, %v13368_v6  ;;  %v6149_v18 = vadd.f32 %v10652_v55, %v9732_v16  ;;  %v9738_v30 = vld [vmem:[%s14526_s4 + $0x1a] ss:$0 sm:$0xff] }
0x2059   :  { %v6152_v45 = vadd.f32 %v6138_v1, %v13361_v51  ;;  %v6141_v47 = vadd.f32 %v9732_v16, %v6140_v26 }
0x205a   :  { %v6155_v17 = vadd.f32 %v6149_v18, %v13370_v31  ;;  %v6164_v33 = vsel %vm346_vm5, %v6154_v56, 0.0 }
0x205b   :  { %v6153_v58 = vadd.f32 %v6141_v47, %v13363_v53  ;;  %v6158_v0 = vsel %vm346_vm5, %v6152_v45, 0.0 }
0x205c   :  { %6159 = vadd.xlane.f32.xlu0 %v6158_v0  ;;  %v6167_v52 = vsel %vm346_vm5, %v6155_v17, 0.0 }
0x205d   :  { %v6161_v32 = vsel %vm346_vm5, %v6153_v58, 0.0 }
0x205e   :  { %6162 = vadd.xlane.f32.xlu1 %v6161_v32 }
0x2060   :  { %6165 = vadd.xlane.f32.xlu0 %v6164_v33 }
0x2064   :  { %6168 = vadd.xlane.f32.xlu0 %v6167_v52  ;;  %v11412_v52 = vld [vmem:[#allocation4 + $0x110] sm:$0xff]  }
0x2065   :  { %10665 = vmatprep.subr.bf16.mxu0 %v11412_v52 }
0x2066   :  { %10666 = vmatpush3.bf16.msra.mxu0 %v11412_v52 }
0x20e9   :  { %v6160_v51 = vpop.xlane.xlu0 %6159 }
0x20ea   :  { %v6170_v57 = vmul.f32 0.03125, %v6160_v51  ;;  %v11413_v51 = vld [vmem:[#allocation4 + $0x118] sm:$0xff]  }
0x20eb   :  { %v6163_v6 = vpop.xlane.xlu1 %6162  ;;  %10667 = vmatprep.subr.bf16.mxu0 %v11413_v51 }
0x20ec   :  { %v6174_v21 = vsub.f32 %v6152_v45, %v6170_v57  ;;  %v6171_v15 = vmul.f32 0.03125, %v6163_v6  ;;  %10668 = vmatpush3.bf16.msra.mxu0 %v11413_v51  ;;  %v9739_v57 = vld [vmem:[%s14526_s4 + $0x15] ss:$0 sm:$0xff] }
0x20ed   :  { %v6166_v53 = vpop.xlane.xlu0 %6165  ;;  %10687 = vmatprep.subr.bf16.mxu0 %v11955_v12 }
0x20ee   :  { %v6175_v48 = vsub.f32 %v6153_v58, %v6171_v15  ;;  %v6172_v8 = vmul.f32 0.03125, %v6166_v53  ;;  %v6178_v43 = vmul.f32 %v6174_v21, %v6174_v21 }
0x20f0   :  { %v6176_v49 = vsub.f32 %v6154_v56, %v6172_v8  ;;  %v6182_v23 = vsel %vm346_vm5, %v6178_v43, 0.0  ;;  %v6179_v34 = vmul.f32 %v6175_v48, %v6175_v48 }
0x20f1   :  { %6183 = vadd.xlane.f32.xlu1 %v6182_v23  ;;  %v6169_v31 = vpop.xlane.xlu0 %6168 }
0x20f2   :  { %v6173_v13 = vmul.f32 0.03125, %v6169_v31  ;;  %v6185_v41 = vsel %vm346_vm5, %v6179_v34, 0.0  ;;  %v6180_v36 = vmul.f32 %v6176_v49, %v6176_v49 }
0x20f3   :  { %6186 = vadd.xlane.f32.xlu0 %v6185_v41 }
0x20f4   :  { %v6177_v50 = vsub.f32 %v6155_v17, %v6173_v13  ;;  %v6188_v19 = vsel %vm346_vm5, %v6180_v36, 0.0 }
0x20f5   :  { %6189 = vadd.xlane.f32.xlu1 %v6188_v19 }
0x20f6   :  { %v6181_v40 = vmul.f32 %v6177_v50, %v6177_v50 }
0x20f8   :  { %v6191_v7 = vsel %vm346_vm5, %v6181_v40, 0.0 }
0x20f9   :  { %6192 = vadd.xlane.f32.xlu0 %v6191_v7 }
0x217e   :  { %v6184_v9 = vpop.xlane.xlu1 %6183 }
0x217f   :  { %v6194_v35 = vmul.f32 0.03125, %v6184_v9 }
0x2180   :  { %v6187_v38 = vpop.xlane.xlu0 %6186 }
0x2181   :  { %v6198_v27 = vadd.f32 1e-05, %v6194_v35  ;;  %v6195_v44 = vmul.f32 0.03125, %v6187_v38 }
0x2182   :  { %v6190_v22 = vpop.xlane.xlu1 %6189 }
0x2183   :  { %11728 = vrsqrt.f32 %v6198_v27  ;;  %v6199_v11 = vadd.f32 1e-05, %v6195_v44  ;;  %v6196_v60 = vmul.f32 0.03125, %v6190_v22 }
0x2185   :  { %11730 = vrsqrt.f32 %v6199_v11  ;;  %v6200_v5 = vadd.f32 1e-05, %v6196_v60 }
0x2186   :  { %v6193_v39 = vpop.xlane.xlu0 %6192 }
0x2187   :  { %11732 = vrsqrt.f32 %v6200_v5  ;;  %v6197_v25 = vmul.f32 0.03125, %v6193_v39 }
0x2189   :  { %v6201_v54 = vadd.f32 1e-05, %v6197_v25 }
0x218b   :  { %11734 = vrsqrt.f32 %v6201_v54 }
0x218d   :  { %v11729_v14 = vpop.eup %11728 }
0x218e   :  { %v6206_v20 = vmul.f32 %v11729_v14, %v6174_v21 }
0x218f   :  { %v11731_v37 = vpop.eup %11730 }
0x2190   :  { %v6207_v16 = vmul.f32 %v11731_v37, %v6175_v48  ;;  %v6214_v62 = vmul.f32 %v9737_v10, %v6206_v20 }
0x2191   :  { %v11733_v24 = vpop.eup %11732 }
0x2192   :  { %v6208_v1 = vmul.f32 %v11733_v24, %v6176_v49  ;;  %v6215_v55 = vmul.f32 %v9737_v10, %v6207_v16  ;;  %v6222_v26 = vadd.f32 %v9738_v30, %v6214_v62 }
0x2194   :  { %v6223_v45 = vadd.f32 %v9738_v30, %v6215_v55  ;;  %v6216_v58 = vmul.f32 %v9737_v10, %v6208_v1 }
0x2195   :  { %v11735_v47 = vpop.eup %11734 }
0x2196   :  { %v6209_v56 = vmul.f32 %v11735_v47, %v6177_v50  ;;  %v6230_v18 = vpack.c.bf16 %v6223_v45, %v6222_v26  ;;  %v6224_v32 = vadd.f32 %v9738_v30, %v6216_v58  ;;  %v9744_v50 = vld [vmem:[%s14526_s4 + $0x16] ss:$0 sm:$0xff] }
0x2198   :  { %10657 = vmatprep.mubr.msk.bf16.mxu1 %vm346_vm5, %v6230_v18  ;;  %v6217_v0 = vmul.f32 %v9737_v10, %v6209_v56 }
0x219a   :  { %v6225_v17 = vadd.f32 %v9738_v30, %v6217_v0 }
0x219c   :  { %v6231_v33 = vpack.c.bf16 %v6225_v17, %v6224_v32 }
0x219e   :  { %10658 = vmatmul.mubr.msk.bf16.vlgmr.msra.gmra.mrb[156].mxu1 %vm346_vm5, %v6231_v33 }
0x2271   :  { %v10659_v6 = vpop.f32.mrb[156].mxu1 }
0x2272   :  { %v6298_v21 = vadd.f32 %v10659_v6, %v9739_v57  ;;  %v6289_v15 = vpop.f32.mrb[157].mxu1 }
0x2273   :  { %v6290_v53 = vadd.f32 %v9739_v57, %v6289_v15  ;;  %v10660_v48 = vpop.f32.mrb[158].mxu1 }
0x2274   :  { %v6301_v8 = vadd.f32 %v10660_v48, %v9739_v57  ;;  %v6292_v43 = vpop.f32.mrb[159].mxu1  ;;  %v6306_v23 = vmax.f32 %v6298_v21, 0.0 }
0x2275   :  { %v6293_v49 = vadd.f32 %v9739_v57, %v6292_v43  ;;  %v6304_v31 = vmax.f32 %v6290_v53, 0.0 }
0x2276   :  { %v6307_v34 = vmax.f32 %v6301_v8, 0.0 }
0x2277   :  { %v6305_v13 = vmax.f32 %v6293_v49, 0.0 }
0x2278   :  { %v6317_v41 = vpack.c.bf16 %v6307_v34, %v6306_v23  ;;  %v9751_v34 = vld [vmem:[%s14526_s4 + $0x1b] ss:$0 sm:$0xff] }
0x2279   :  { %v6316_v36 = vpack.c.bf16 %v6305_v13, %v6304_v31 }
0x227b   :  { %10669 = vmatprep.mubr.msk.bf16.mxu0 %vm1762_vm13, %v6316_v36 }
0x227c   :  { %10670 = vmatmul.mubr.msk.bf16.vlgmr.msra.gmra.mrb[160].mxu0 %vm1762_vm13, %v6317_v41 }
0x227d   :  { %10689 = vmatprep.mubr.msk.bf16.mxu0 %vm11960_vm6, %v11955_v12 }
0x234f   :  { %v10671_v19 = vpop.f32.mrb[160].mxu0 }
0x2350   :  { %v6387_v40 = vpop.f32.mrb[161].mxu0  ;;  %v6396_v7 = vadd.f32 %v10671_v19, %v9744_v50  ;;  %v9752_v19 = vld [vmem:[%s14526_s4 + $0x1c] ss:$0 sm:$0xff] }
0x2351   :  { %v6388_v3 = vadd.f32 %v9744_v50, %v6387_v40  ;;  %v10672_v29 = vpop.f32.mrb[162].mxu0 }
0x2352   :  { %v6390_v61 = vpop.f32.mrb[163].mxu0  ;;  %v6399_v9 = vadd.f32 %v10672_v29, %v9744_v50  ;;  %v6404_v38 = vadd.f32 %v6396_v7, %v6224_v32  ;;  %v11414_v32 = vld [vmem:[#allocation4 + $0x120] sm:$0xff]  }
0x2353   :  { %v6402_v28 = vadd.f32 %v6388_v3, %v6222_v26  ;;  %v6391_v35 = vadd.f32 %v9744_v50, %v6390_v61  ;;  %10673 = vmatprep.subr.bf16.mxu1 %v11414_v32 }
0x2354   :  { %v6405_v22 = vadd.f32 %v6399_v9, %v6225_v17  ;;  %v6414_v60 = vsel %vm346_vm5, %v6404_v38, 0.0  ;;  %v11415_v17 = vld [vmem:[#allocation4 + $0x128] sm:$0xff]   ;;  %10674 = vmatpush3.bf16.msra.mxu1 %v11414_v32 }
0x2355   :  { %v6403_v27 = vadd.f32 %v6391_v35, %v6223_v45  ;;  %v6408_v44 = vsel %vm346_vm5, %v6402_v28, 0.0  ;;  %10675 = vmatprep.subr.bf16.mxu1 %v11415_v17 }
0x2356   :  { %6409 = vadd.xlane.f32.xlu1 %v6408_v44  ;;  %v6417_v5 = vsel %vm346_vm5, %v6405_v22, 0.0 }
0x2357   :  { %v6411_v11 = vsel %vm346_vm5, %v6403_v27, 0.0 }
0x2358   :  { %6412 = vadd.xlane.f32.xlu0 %v6411_v11  ;;  %10676 = vmatpush3.bf16.msra.mxu1 %v11415_v17 }
0x2359   :  { %10681 = vmatprep.subr.bf16.mxu1 %v11955_v12 }
0x235a   :  { %6415 = vadd.xlane.f32.xlu1 %v6414_v60  ;;  %v9753_v60 = vld [vmem:[%s14526_s4 + $0x1d] ss:$0 sm:$0xff] }
0x235c   :  { %6418 = vadd.xlane.f32.xlu0 %v6417_v5 }
0x23e3   :  { %v6410_v39 = vpop.xlane.xlu1 %6409 }
0x23e4   :  { %v6420_v25 = vmul.f32 0.03125, %v6410_v39 }
0x23e5   :  { %v6413_v54 = vpop.xlane.xlu0 %6412 }
0x23e6   :  { %v6424_v14 = vsub.f32 %v6402_v28, %v6420_v25  ;;  %v6421_v10 = vmul.f32 0.03125, %v6413_v54 }
0x23e7   :  { %v6416_v20 = vpop.xlane.xlu1 %6415 }
0x23e8   :  { %v6425_v37 = vsub.f32 %v6403_v27, %v6421_v10  ;;  %v6422_v16 = vmul.f32 0.03125, %v6416_v20  ;;  %v6428_v62 = vmul.f32 %v6424_v14, %v6424_v14 }
0x23e9   :  { %v6419_v24 = vpop.xlane.xlu0 %6418 }
0x23ea   :  { %v6426_v30 = vsub.f32 %v6404_v38, %v6422_v16  ;;  %v6423_v1 = vmul.f32 0.03125, %v6419_v24  ;;  %v6432_v55 = vsel %vm346_vm5, %v6428_v62, 0.0  ;;  %v6429_v26 = vmul.f32 %v6425_v37, %v6425_v37 }
0x23eb   :  { %6433 = vadd.xlane.f32.xlu1 %v6432_v55 }
0x23ec   :  { %v6427_v45 = vsub.f32 %v6405_v22, %v6423_v1  ;;  %v6435_v47 = vsel %vm346_vm5, %v6429_v26, 0.0  ;;  %v6430_v56 = vmul.f32 %v6426_v30, %v6426_v30 }
0x23ed   :  { %6436 = vadd.xlane.f32.xlu0 %v6435_v47 }
0x23ee   :  { %v6438_v18 = vsel %vm346_vm5, %v6430_v56, 0.0  ;;  %v6431_v58 = vmul.f32 %v6427_v45, %v6427_v45 }
0x23ef   :  { %6439 = vadd.xlane.f32.xlu1 %v6438_v18 }
0x23f0   :  { %v6441_v0 = vsel %vm346_vm5, %v6431_v58, 0.0 }
0x23f1   :  { %6442 = vadd.xlane.f32.xlu0 %v6441_v0 }
0x2478   :  { %v6434_v33 = vpop.xlane.xlu1 %6433 }
0x2479   :  { %v6444_v52 = vmul.f32 0.03125, %v6434_v33 }
0x247a   :  { %v6437_v51 = vpop.xlane.xlu0 %6436 }
0x247b   :  { %v6448_v57 = vadd.f32 1e-05, %v6444_v52  ;;  %v6445_v6 = vmul.f32 0.03125, %v6437_v51 }
0x247c   :  { %v6440_v21 = vpop.xlane.xlu1 %6439 }
0x247d   :  { %11736 = vrsqrt.f32 %v6448_v57  ;;  %v6449_v15 = vadd.f32 1e-05, %v6445_v6  ;;  %v6446_v53 = vmul.f32 0.03125, %v6440_v21 }
0x247e   :  { %v6443_v48 = vpop.xlane.xlu0 %6442 }
0x247f   :  { %11738 = vrsqrt.f32 %v6449_v15  ;;  %v6450_v8 = vadd.f32 1e-05, %v6446_v53  ;;  %v6447_v43 = vmul.f32 0.03125, %v6443_v48 }
0x2481   :  { %11740 = vrsqrt.f32 %v6450_v8  ;;  %v6451_v49 = vadd.f32 1e-05, %v6447_v43 }
0x2483   :  { %11742 = vrsqrt.f32 %v6451_v49 }
0x2487   :  { %v11737_v23 = vpop.eup %11736 }
0x2488   :  { %v6456_v31 = vmul.f32 %v11737_v23, %v6424_v14 }
0x2489   :  { %v11739_v13 = vpop.eup %11738 }
0x248a   :  { %v6457_v41 = vmul.f32 %v11739_v13, %v6425_v37  ;;  %v6464_v36 = vmul.f32 %v9751_v34, %v6456_v31 }
0x248b   :  { %v11741_v50 = vpop.eup %11740 }
0x248c   :  { %v6458_v40 = vmul.f32 %v11741_v50, %v6426_v30  ;;  %v6465_v7 = vmul.f32 %v9751_v34, %v6457_v41  ;;  %v13732_v61 = vadd.f32 %v9752_v19, %v6464_v36 }
0x248d   :  { %v11743_v3 = vpop.eup %11742 }
0x248e   :  { %v6459_v29 = vmul.f32 %v11743_v3, %v6427_v45  ;;  %v13734_v28 = vadd.f32 %v9752_v19, %v6465_v7  ;;  %v6466_v9 = vmul.f32 %v9751_v34, %v6458_v40 }
0x2490   :  { %v6480_v35 = vpack.c.bf16 %v13734_v28, %v13732_v61  ;;  %v6467_v38 = vmul.f32 %v9751_v34, %v6459_v29  ;;  %v13739_v27 = vadd.f32 %v9752_v19, %v6466_v9 }
0x2492   :  { %10677 = vmatprep.mubr.msk.bf16.mxu1 %vm346_vm5, %v6480_v35  ;;  %v13741_v44 = vadd.f32 %v9752_v19, %v6467_v38 }
0x2494   :  { %v6481_v22 = vpack.c.bf16 %v13741_v44, %v13739_v27 }
0x2496   :  { %10678 = vmatmul.mubr.msk.bf16.vlgmr.msra.gmra.mrb[160].mxu1 %vm346_vm5, %v6481_v22 }
0x2497   :  { %10683 = vmatprep.mubr.msk.bf16.mxu1 %vm11960_vm6, %v11955_v12 }
0x2569   :  { %v10679_v11 = vpop.f32.mrb[160].mxu1 }
0x256a   :  { %v6539_v5 = vpop.f32.mrb[161].mxu1  ;;  %v6548_v25 = vadd.f32 %v10679_v11, %v9753_v60 }
0x256b   :  { %v10680_v39 = vpop.f32.mrb[162].mxu1  ;;  %v6540_v10 = vadd.f32 %v9753_v60, %v6539_v5 }
0x256c   :  { %v6551_v54 = vadd.f32 %v10680_v39, %v9753_v60  ;;  %v6542_v14 = vpop.f32.mrb[163].mxu1 }
0x256d   :  { %v6543_v20 = vadd.f32 %v9753_v60, %v6542_v14 }
0x256e   :  { %v11233_v37 = vpack.i.bf16 %v6551_v54, %v6548_v25  ;;  %v13751_v16 = vpack.c.bf16 %v6551_v54, %v6548_v25 }
0x256f   :  { %v11228_v62 = vpack.i.bf16 %v6543_v20, %v6540_v10  ;;  %v6594_v24 = vpack.c.bf16 %v6543_v20, %v6540_v10 }
0x2570   :  { %11234 = vrot.lane.b32.xlu0 %v11233_v37, %s11956_s9 }
0x2571   :  { %11229 = vrot.lane.b32.xlu1 %v11228_v62, %s11956_s9 }
0x2574   :  { %11249 = vrot.lane.b32.xlu0 %v11228_v62, %s11958_s11 }
0x2575   :  { %11239 = vrot.lane.b32.xlu1 %v11228_v62, %s11957_s10 }
0x2578   :  { %6603 = vrot.lane.b32.xlu0 %v6594_v24, %s11959_s1 }
0x2579   :  { %11244 = vrot.lane.b32.xlu1 %v11233_v37, %s11957_s10 }
0x257d   :  { %11254 = vrot.lane.b32.xlu1 %v11233_v37, %s11958_s11 }
0x2581   :  { %6653 = vrot.lane.b32.xlu1 %v13751_v16, %s11959_s1 }
0x25e2   :  { %v11235_v30 = vpop.permute.xlu0 %11234 }
0x25e3   :  { %v11237_v1 = vunpack.i.h.bf16 %v11235_v30  ;;  %v11236_v55 = vunpack.i.l.bf16 %v11235_v30  ;;  %v11230_v26 = vpop.permute.xlu1 %11229 }
0x25e4   :  { %v11232_v45 = vunpack.i.h.bf16 %v11230_v26  ;;  %v11231_v47 = vunpack.i.l.bf16 %v11230_v26 }
0x25e5   :  { %v13762_v56 = vpack.c.bf16 %v11237_v1, %v11236_v55 }
0x25e6   :  { %v13764_v18 = vpack.c.bf16 %v11232_v45, %v11231_v47  ;;  %v11250_v58 = vpop.permute.xlu0 %11249 }
0x25e7   :  { %6753 = vrot.lane.b32.xlu1 %v13762_v56, %s11959_s1  ;;  %v11240_v0 = vpop.permute.xlu1 %11239  ;;  %v11252_v33 = vunpack.i.h.bf16 %v11250_v58  ;;  %v11251_v52 = vunpack.i.l.bf16 %v11250_v58 }
0x25e8   :  { %v11242_v32 = vunpack.i.h.bf16 %v11240_v0  ;;  %v11241_v17 = vunpack.i.l.bf16 %v11240_v0  ;;  %6703 = vrot.lane.b32.xlu0 %v13764_v18, %s11959_s1 }
0x25e9   :  { %v13776_v48 = vpack.c.bf16 %v11252_v33, %v11251_v52 }
0x25ea   :  { %v13770_v51 = vpack.c.bf16 %v11242_v32, %v11241_v17  ;;  %v6604_v57 = vpop.permute.xlu0 %6603 }
0x25eb   :  { %v6609_v6 = vsel %vm453_vm11, %v6604_v57, 0  ;;  %v11245_v21 = vpop.permute.xlu1 %11244 }
0x25ec   :  { %v11247_v15 = vunpack.i.h.bf16 %v11245_v21  ;;  %v11246_v53 = vunpack.i.l.bf16 %v11245_v21  ;;  %6803 = vrot.lane.b32.xlu0 %v13770_v51, %s11959_s1  ;;  %10682 = vmatpush3.bf16.xpose.msra.mxu1 %v6609_v6 }
0x25ed   :  { %10693 = vmatprep.subr.bf16.mxu1 %v11955_v12 }
0x25ee   :  { %v13778_v8 = vpack.c.bf16 %v11247_v15, %v11246_v53 }
0x25ef   :  { %v11255_v43 = vpop.permute.xlu1 %11254 }
0x25f0   :  { %v11257_v49 = vunpack.i.h.bf16 %v11255_v43  ;;  %v11256_v23 = vunpack.i.l.bf16 %v11255_v43  ;;  %6853 = vrot.lane.b32.xlu1 %v13778_v8, %s11959_s1  ;;  %6903 = vrot.lane.b32.xlu0 %v13776_v48, %s11959_s1 }
0x25f2   :  { %v13784_v34 = vpack.c.bf16 %v11257_v49, %v11256_v23 }
0x25f3   :  { %v6654_v31 = vpop.permute.xlu1 %6653  ;;  %10684 = vmatmul.mubr.msk.bf16.vlgmr.msra.gmra.mrb[164].mxu1 %vm453_vm11, %v6594_v24 }
0x25f4   :  { %v6659_v13 = vsel %vm453_vm11, %v6654_v31, 0  ;;  %6953 = vrot.lane.b32.xlu1 %v13784_v34, %s11959_s1  ;;  %10695 = vmatprep.mubr.msk.bf16.mxu1 %vm11960_vm6, %v11955_v12 }
0x25f5   :  { %10688 = vmatpush3.bf16.xpose.msra.mxu0 %v6659_v13 }
0x25f6   :  { %10699 = vmatprep.subr.bf16.mxu0 %v11955_v12 }
0x25f8   :  { %7234 = vrot.lane.b32.xlu1 %v6594_v24, %s11952_s2 }
0x25fc   :  { %10690 = vmatmul.mubr.msk.bf16.vlgmr.msra.gmra.mrb[164].mxu0 %vm453_vm11, %v13751_v16 }
0x25fd   :  { %10701 = vmatprep.mubr.msk.bf16.mxu0 %vm11960_vm6, %v11955_v12 }
0x2659   :  { %v6754_v41 = vpop.permute.xlu1 %6753 }
0x265a   :  { %v6759_v36 = vsel %vm453_vm11, %v6754_v41, 0  ;;  %v6704_v50 = vpop.permute.xlu0 %6703 }
0x265b   :  { %v6709_v19 = vsel %vm453_vm11, %v6704_v50, 0  ;;  %10700 = vmatpush3.bf16.xpose.msra.mxu0 %v6759_v36 }
0x265c   :  { %10694 = vmatpush3.bf16.xpose.msra.mxu1 %v6709_v19  ;;  %10711 = vmatprep.subr.bf16.mxu0 %v11955_v12 }
0x265d   :  { %10705 = vmatprep.subr.bf16.mxu1 %v11955_v12 }
0x265e   :  { %v6804_v40 = vpop.permute.xlu0 %6803 }
0x265f   :  { %v6809_v3 = vsel %vm453_vm11, %v6804_v40, 0 }
0x2662   :  { %10702 = vmatmul.mubr.msk.bf16.vlgmr.msra.gmra.mrb[168].mxu0 %vm453_vm11, %v13762_v56  ;;  %v6854_v7 = vpop.permute.xlu1 %6853  ;;  %v6904_v9 = vpop.permute.xlu0 %6903 }
0x2663   :  { %v6859_v29 = vsel %vm453_vm11, %v6854_v7, 0  ;;  %10696 = vmatmul.mubr.msk.bf16.vlgmr.msra.gmra.mrb[168].mxu1 %vm453_vm11, %v13764_v18  ;;  %10713 = vmatprep.mubr.msk.bf16.mxu0 %vm11960_vm6, %v11955_v12  ;;  %v6909_v38 = vsel %vm453_vm11, %v6904_v9, 0 }
0x2664   :  { %10706 = vmatpush3.bf16.xpose.msra.mxu1 %v6809_v3  ;;  %10712 = vmatpush3.bf16.xpose.msra.mxu0 %v6859_v29 }
0x2665   :  { %10707 = vmatprep.mubr.msk.bf16.mxu1 %vm11960_vm6, %v11955_v12  ;;  %10717 = vmatprep.subr.bf16.mxu1 %v11955_v12 }
0x2666   :  { %10723 = vmatprep.subr.bf16.mxu0 %v11955_v12  ;;  %v6954_v35 = vpop.permute.xlu1 %6953 }
0x2667   :  { %v6959_v22 = vsel %vm453_vm11, %v6954_v35, 0 }
0x266a   :  { %v7235_v11 = vpop.permute.xlu1 %7234 }
0x266b   :  { %10708 = vmatmul.mubr.msk.bf16.vlgmr.msra.gmra.mrb[172].mxu1 %vm453_vm11, %v13770_v51  ;;  %10714 = vmatmul.mubr.msk.bf16.vlgmr.msra.gmra.mrb[172].mxu0 %vm453_vm11, %v13778_v8 }
0x266c   :  { %10718 = vmatpush3.bf16.xpose.msra.mxu1 %v6909_v38  ;;  %10724 = vmatpush3.bf16.xpose.msra.mxu0 %v6959_v22 }
0x266d   :  { %10719 = vmatprep.mubr.msk.bf16.mxu1 %vm11960_vm6, %v11955_v12  ;;  %10725 = vmatprep.mubr.msk.bf16.mxu0 %vm11960_vm6, %v11955_v12 }
0x266e   :  { %10729 = vmatprep.subr.bf16.mxu1 %v11955_v12  ;;  %10735 = vmatprep.subr.bf16.mxu0 %v11955_v12 }
0x2673   :  { %10720 = vmatmul.mubr.msk.bf16.vlgmr.msra.gmra.mrb[176].mxu1 %vm453_vm11, %v13776_v48  ;;  %10726 = vmatmul.mubr.msk.bf16.vlgmr.msra.gmra.mrb[176].mxu0 %vm453_vm11, %v13784_v34 }
0x2674   :  { %10730 = vmatpush3.bf16.msra.mxu1 %v7235_v11  ;;  %10737 = vmatprep.mubr.msk.bf16.mxu0 %vm11960_vm6, %v11955_v12 }
0x2675   :  { %10731 = vmatprep.mubr.msk.bf16.mxu1 %vm11960_vm6, %v11955_v12  ;;  %10741 = vmatprep.subr.bf16.mxu1 %v11955_v12 }
0x26c6   :  { %v6645_v60 = vpop.f32.mrb[164].mxu1 }
0x26c7   :  { %v10685_v5 = vpop.f32.mrb[165].mxu1  ;;  %v7002_v20 = vmul.f32 0.35355338, %v6645_v60 }
0x26c8   :  { %v6648_v39 = vpop.f32.mrb[166].mxu1 }
0x26c9   :  { %v7003_v25 = vmul.f32 0.35355338, %v6648_v39  ;;  %v10686_v54 = vpop.f32.mrb[167].mxu1  ;;  %v7018_v55 = vmul.f32 %v12980_v4, %v7002_v20 }
0x26cb   :  { %v7019_v14 = vmul.f32 %v12973_v46, %v7003_v25  ;;  %v13850_v17 = vadd.f32 %v7018_v55, %v12991_v59 }
0x26cd   :  { %v13837_v10 = vadd.f32 %v7019_v14, %v12977_v42  ;;  %v7050_v33 = vsel %vm115_vm0, %v13850_v17, -inf }
0x26cf   :  { %v6695_v37 = vpop.f32.mrb[164].mxu0  ;;  %v7053_v62 = vsel %vm115_vm0, %v13837_v10, -inf }
0x26d0   :  { %v7004_v24 = vmul.f32 0.35355338, %v6695_v37  ;;  %v10691_v30 = vpop.f32.mrb[165].mxu0  ;;  %7054 = vmax.xlane.f32.xlu1 %v7053_v62 }
0x26d1   :  { %v6698_v1 = vpop.f32.mrb[166].mxu0 }
0x26d2   :  { %v7020_v26 = vmul.f32 %v12980_v4, %v7004_v24  ;;  %v7005_v45 = vmul.f32 0.35355338, %v6698_v1  ;;  %v10692_v47 = vpop.f32.mrb[167].mxu0 }
0x26d4   :  { %v13844_v58 = vadd.f32 %v7020_v26, %v12991_v59  ;;  %v7021_v0 = vmul.f32 %v12973_v46, %v7005_v45 }
0x26d6   :  { %v7056_v32 = vsel %vm115_vm0, %v13844_v58, -inf  ;;  %v13855_v52 = vadd.f32 %v7021_v0, %v12977_v42 }
0x26d7   :  { %7057 = vmax.xlane.f32.xlu0 %v7056_v32 }
0x26d8   :  { %v7059_v57 = vsel %vm115_vm0, %v13855_v52, -inf }
0x26db   :  { %7051 = vmax.xlane.f32.xlu0 %v7050_v33 }
0x26df   :  { %7060 = vmax.xlane.f32.xlu0 %v7059_v57 }
0x2735   :  { %v6795_v6 = vpop.f32.mrb[168].mxu0 }
0x2736   :  { %v7008_v21 = vmul.f32 0.35355338, %v6795_v6  ;;  %v6745_v15 = vpop.f32.mrb[168].mxu1  ;;  %v10703_v53 = vpop.f32.mrb[169].mxu0 }
0x2737   :  { %v7006_v43 = vmul.f32 0.35355338, %v6745_v15  ;;  %v10697_v49 = vpop.f32.mrb[169].mxu1  ;;  %v6798_v23 = vpop.f32.mrb[170].mxu0 }
0x2738   :  { %v7024_v31 = vmul.f32 %v12980_v4, %v7008_v21  ;;  %v7009_v13 = vmul.f32 0.35355338, %v6798_v23  ;;  %v6748_v41 = vpop.f32.mrb[170].mxu1  ;;  %v10704_v36 = vpop.f32.mrb[171].mxu0 }
0x2739   :  { %v7022_v50 = vmul.f32 %v12980_v4, %v7006_v43  ;;  %v7007_v19 = vmul.f32 0.35355338, %v6748_v41  ;;  %v10698_v40 = vpop.f32.mrb[171].mxu1 }
0x273a   :  { %v7025_v7 = vmul.f32 %v12973_v46, %v7009_v13  ;;  %v13863_v3 = vadd.f32 %v7024_v31, %v12991_v59 }
0x273b   :  { %v7023_v29 = vmul.f32 %v12973_v46, %v7007_v19  ;;  %v13872_v38 = vadd.f32 %v7022_v50, %v12991_v59 }
0x273c   :  { %v7068_v9 = vsel %vm115_vm0, %v13863_v3, -inf  ;;  %v13869_v35 = vadd.f32 %v7025_v7, %v12977_v42 }
0x273d   :  { %7069 = vmax.xlane.f32.xlu1 %v7068_v9  ;;  %v13877_v5 = vadd.f32 %v7023_v29, %v12977_v42  ;;  %v7062_v62 = vsel %vm115_vm0, %v13872_v38, -inf }
0x273e   :  { %v6845_v22 = vpop.f32.mrb[172].mxu1  ;;  %v6895_v11 = vpop.f32.mrb[172].mxu0  ;;  %v7071_v60 = vsel %vm115_vm0, %v13869_v35, -inf }
0x273f   :  { %v7010_v39 = vmul.f32 0.35355338, %v6845_v22  ;;  %v7012_v25 = vmul.f32 0.35355338, %v6895_v11  ;;  %v10715_v54 = vpop.f32.mrb[173].mxu0  ;;  %7072 = vmax.xlane.f32.xlu0 %v7071_v60  ;;  %v10709_v14 = vpop.f32.mrb[173].mxu1 }
0x2740   :  { %v6848_v20 = vpop.f32.mrb[174].mxu1  ;;  %v6898_v37 = vpop.f32.mrb[174].mxu0  ;;  %v7065_v47 = vsel %vm115_vm0, %v13877_v5, -inf }
0x2741   :  { %v7026_v24 = vmul.f32 %v12980_v4, %v7010_v39  ;;  %v7028_v30 = vmul.f32 %v12980_v4, %v7012_v25  ;;  %v7011_v1 = vmul.f32 0.35355338, %v6848_v20  ;;  %v7013_v55 = vmul.f32 0.35355338, %v6898_v37  ;;  %v10716_v26 = vpop.f32.mrb[175].mxu0  ;;  %7063 = vmax.xlane.f32.xlu1 %v7062_v62  ;;  %v10710_v45 = vpop.f32.mrb[175].mxu1 }
0x2743   :  { %v7029_v0 = vmul.f32 %v12973_v46, %v7013_v55  ;;  %7066 = vmax.xlane.f32.xlu0 %v7065_v47  ;;  %v13887_v32 = vadd.f32 %v7028_v30, %v12991_v59  ;;  %v7027_v33 = vmul.f32 %v12973_v46, %v7011_v1  ;;  %v13891_v57 = vadd.f32 %v7026_v24, %v12991_v59 }
0x2745   :  { %v7080_v6 = vsel %vm115_vm0, %v13887_v32, -inf  ;;  %v13896_v21 = vadd.f32 %v7029_v0, %v12977_v42  ;;  %v7074_v50 = vsel %vm115_vm0, %v13891_v57, -inf  ;;  %v13903_v19 = vadd.f32 %v7027_v33, %v12977_v42 }
0x2746   :  { %v6995_v15 = vpop.f32.mrb[176].mxu0  ;;  %7081 = vmax.xlane.f32.xlu1 %v7080_v6  ;;  %v6945_v53 = vpop.f32.mrb[176].mxu1 }
0x2747   :  { %v7016_v43 = vmul.f32 0.35355338, %v6995_v15  ;;  %v7014_v49 = vmul.f32 0.35355338, %v6945_v53  ;;  %v10721_v23 = vpop.f32.mrb[177].mxu1  ;;  %v10727_v31 = vpop.f32.mrb[177].mxu0 }
0x2748   :  { %v6998_v13 = vpop.f32.mrb[178].mxu0  ;;  %v7083_v41 = vsel %vm115_vm0, %v13896_v21, -inf  ;;  %v6948_v36 = vpop.f32.mrb[178].mxu1  ;;  %v7077_v54 = vsel %vm115_vm0, %v13903_v19, -inf }
0x2749   :  { %v7032_v40 = vmul.f32 %v12980_v4, %v7016_v43  ;;  %v7030_v7 = vmul.f32 %v12980_v4, %v7014_v49  ;;  %v7017_v29 = vmul.f32 0.35355338, %v6998_v13  ;;  %7084 = vmax.xlane.f32.xlu0 %v7083_v41  ;;  %v7015_v9 = vmul.f32 0.35355338, %v6948_v36  ;;  %v10722_v22 = vpop.f32.mrb[179].mxu1  ;;  %v10728_v11 = vpop.f32.mrb[179].mxu0 }
0x274a   :  { %7075 = vmax.xlane.f32.xlu1 %v7074_v50 }
0x274b   :  { %v7033_v60 = vmul.f32 %v12973_v46, %v7017_v29  ;;  %v13909_v39 = vadd.f32 %v7032_v40, %v12991_v59  ;;  %v7031_v25 = vmul.f32 %v12973_v46, %v7015_v9  ;;  %v13920_v20 = vadd.f32 %v7030_v7, %v12991_v59 }
0x274d   :  { %7078 = vmax.xlane.f32.xlu0 %v7077_v54  ;;  %v7092_v4 = vsel %vm115_vm0, %v13909_v39, -inf  ;;  %v13917_v14 = vadd.f32 %v7033_v60, %v12977_v42  ;;  %v13925_v62 = vadd.f32 %v7031_v25, %v12977_v42  ;;  %v7086_v46 = vsel %vm115_vm0, %v13920_v20, -inf }
0x274e   :  { %7093 = vmax.xlane.f32.xlu1 %v7092_v4 }
0x274f   :  { %v7095_v37 = vsel %vm115_vm0, %v13917_v14, -inf  ;;  %v7089_v24 = vsel %vm115_vm0, %v13925_v62, -inf }
0x2751   :  { %7096 = vmax.xlane.f32.xlu0 %v7095_v37 }
0x2752   :  { %7087 = vmax.xlane.f32.xlu1 %v7086_v46 }
0x2755   :  { %7090 = vmax.xlane.f32.xlu0 %v7089_v24 }
0x275d   :  { %v7055_v55 = vpop.xlane.xlu1 %7054 }
0x275e   :  { %v7099_v26 = vsub.f32 %v13837_v10, %v7055_v55 }
0x2763   :  { %7328 = vrot.lane.b32.xlu1 %v13764_v18, %s11952_s2 }
0x2764   :  { %v7058_v59 = vpop.xlane.xlu0 %7057 }
0x2765   :  { %v7100_v18 = vsub.f32 %v13844_v58, %v7058_v59 }
0x2767   :  { %7375 = vrot.lane.b32.xlu1 %v13762_v56, %s11952_s2  ;;  %v7118_v45 = vmul.f32 1.442695, %v7100_v18 }
0x2768   :  { %v7052_v42 = vpop.xlane.xlu0 %7051 }
0x2769   :  { %v7098_v47 = vsub.f32 %v13850_v17, %v7052_v42 }
0x276b   :  { %7281 = vrot.lane.b32.xlu0 %v13751_v16, %s11952_s2  ;;  %7469 = vrot.lane.b32.xlu1 %v13778_v8, %s11952_s2  ;;  %v7116_v16 = vmul.f32 1.442695, %v7099_v26  ;;  %v7114_v8 = vmul.f32 1.442695, %v7098_v47 }
0x276c   :  { %v7061_v30 = vpop.xlane.xlu0 %7060 }
0x276d   :  { %v7101_v1 = vsub.f32 %v13855_v52, %v7061_v30 }
0x276f   :  { %7422 = vrot.lane.b32.xlu0 %v13770_v51, %s11952_s2  ;;  %v7120_v56 = vmul.f32 1.442695, %v7101_v1 }
0x2771   :  { %11744 = vpow2.f32 %v7120_v56 }
0x2772   :  { %11746 = vpow2.f32 %v7118_v45 }
0x2773   :  { %11748 = vpow2.f32 %v7116_v16 }
0x2774   :  { %11750 = vpow2.f32 %v7114_v8 }
0x277b   :  { %v13945_v0 = vpop.eup %11744 }
0x277c   :  { %v13947_v51 = vpop.eup %11746  ;;  %v7155_v52 = vsel %vm115_vm0, %v13945_v0, 0.0 }
0x277d   :  { %v13951_v58 = vpop.eup %11748  ;;  %v7152_v10 = vsel %vm115_vm0, %v13947_v51, 0.0 }
0x277e   :  { %v13955_v17 = vpop.eup %11750  ;;  %v7149_v33 = vsel %vm115_vm0, %v13951_v58, 0.0 }
0x277f   :  { %v7146_v6 = vsel %vm115_vm0, %v13955_v17, 0.0 }
0x278e   :  { %7156 = vadd.xlane.f32.xlu0 %v7155_v52 }
0x278f   :  { %7153 = vadd.xlane.f32.xlu1 %v7152_v10 }
0x2792   :  { %7150 = vadd.xlane.f32.xlu0 %v7149_v33 }
0x2793   :  { %7147 = vadd.xlane.f32.xlu1 %v7146_v6 }
0x27ca   :  { %v7070_v15 = vpop.xlane.xlu1 %7069 }
0x27cb   :  { %v7104_v53 = vsub.f32 %v13863_v3, %v7070_v15 }
0x27cc   :  { %v7073_v43 = vpop.xlane.xlu0 %7072 }
0x27cd   :  { %v7126_v49 = vmul.f32 1.442695, %v7104_v53  ;;  %v7105_v23 = vsub.f32 %v13869_v35, %v7073_v43 }
0x27ce   :  { %v7064_v31 = vpop.xlane.xlu1 %7063 }
0x27cf   :  { %11752 = vpow2.f32 %v7126_v49  ;;  %v7128_v13 = vmul.f32 1.442695, %v7105_v23  ;;  %v7102_v41 = vsub.f32 %v13872_v38, %v7064_v31 }
0x27d0   :  { %v7067_v36 = vpop.xlane.xlu0 %7066 }
0x27d1   :  { %11754 = vpow2.f32 %v7128_v13  ;;  %v7122_v50 = vmul.f32 1.442695, %v7102_v41  ;;  %v7103_v40 = vsub.f32 %v13877_v5, %v7067_v36 }
0x27d3   :  { %11756 = vpow2.f32 %v7122_v50  ;;  %v7124_v7 = vmul.f32 1.442695, %v7103_v40  ;;  %v7082_v29 = vpop.xlane.xlu1 %7081 }
0x27d4   :  { %v7108_v9 = vsub.f32 %v13887_v32, %v7082_v29 }
0x27d5   :  { %11758 = vpow2.f32 %v7124_v7 }
0x27d6   :  { %v7134_v3 = vmul.f32 1.442695, %v7108_v9  ;;  %v7085_v22 = vpop.xlane.xlu0 %7084 }
0x27d7   :  { %v7109_v35 = vsub.f32 %v13896_v21, %v7085_v22  ;;  %v7076_v11 = vpop.xlane.xlu1 %7075 }
0x27d8   :  { %11760 = vpow2.f32 %v7134_v3  ;;  %v7106_v60 = vsub.f32 %v13891_v57, %v7076_v11 }
0x27d9   :  { %v13968_v38 = vpop.eup %11752  ;;  %v7136_v25 = vmul.f32 1.442695, %v7109_v35 }
0x27da   :  { %v7130_v54 = vmul.f32 1.442695, %v7106_v60  ;;  %v7079_v4 = vpop.xlane.xlu0 %7078  ;;  %v7164_v5 = vsel %vm115_vm0, %v13968_v38, 0.0 }
0x27db   :  { %v13972_v37 = vpop.eup %11754  ;;  %11762 = vpow2.f32 %v7136_v25  ;;  %v7107_v32 = vsub.f32 %v13903_v19, %v7079_v4  ;;  %v7094_v46 = vpop.xlane.xlu1 %7093  ;;  %7165 = vadd.xlane.f32.xlu1 %v7164_v5 }
0x27dc   :  { %11764 = vpow2.f32 %v7130_v54  ;;  %v7112_v21 = vsub.f32 %v13909_v39, %v7094_v46  ;;  %v7167_v57 = vsel %vm115_vm0, %v13972_v37, 0.0 }
0x27dd   :  { %v13978_v24 = vpop.eup %11756  ;;  %v7132_v59 = vmul.f32 1.442695, %v7107_v32  ;;  %7168 = vadd.xlane.f32.xlu0 %v7167_v57 }
0x27de   :  { %v7142_v42 = vmul.f32 1.442695, %v7112_v21  ;;  %v7097_v30 = vpop.xlane.xlu0 %7096  ;;  %v7158_v1 = vsel %vm115_vm0, %v13978_v24, 0.0 }
0x27df   :  { %v13982_v55 = vpop.eup %11758  ;;  %11766 = vpow2.f32 %v7132_v59  ;;  %v7113_v19 = vsub.f32 %v13917_v14, %v7097_v30  ;;  %v7088_v18 = vpop.xlane.xlu1 %7087  ;;  %7159 = vadd.xlane.f32.xlu1 %v7158_v1 }
0x27e0   :  { %11768 = vpow2.f32 %v7142_v42  ;;  %v7110_v39 = vsub.f32 %v13920_v20, %v7088_v18  ;;  %v7161_v26 = vsel %vm115_vm0, %v13982_v55, 0.0 }
0x27e1   :  { %v7144_v56 = vmul.f32 1.442695, %v7113_v19  ;;  %7162 = vadd.xlane.f32.xlu0 %v7161_v26 }
0x27e2   :  { %v13988_v45 = vpop.eup %11760  ;;  %v7138_v47 = vmul.f32 1.442695, %v7110_v39  ;;  %v7091_v16 = vpop.xlane.xlu0 %7090 }
0x27e3   :  { %11770 = vpow2.f32 %v7144_v56  ;;  %v7111_v8 = vsub.f32 %v13925_v62, %v7091_v16  ;;  %v7176_v14 = vsel %vm115_vm0, %v13988_v45, 0.0  ;;  %v7329_v40 = vpop.permute.xlu1 %7328 }
0x27e4   :  { %11772 = vpow2.f32 %v7138_v47  ;;  %7177 = vadd.xlane.f32.xlu1 %v7176_v14 }
0x27e5   :  { %v13993_v52 = vpop.eup %11762  ;;  %v7140_v20 = vmul.f32 1.442695, %v7111_v8 }
0x27e6   :  { %v13995_v10 = vpop.eup %11764  ;;  %v7282_v33 = vpop.permute.xlu0 %7281  ;;  %v7179_v6 = vsel %vm115_vm0, %v13993_v52, 0.0 }
0x27e7   :  { %11774 = vpow2.f32 %v7140_v20  ;;  %7180 = vadd.xlane.f32.xlu0 %v7179_v6  ;;  %10736 = vmatpush3.bf16.msra.mxu0 %v7282_v33  ;;  %v7170_v62 = vsel %vm115_vm0, %v13995_v10, 0.0  ;;  %v7376_v7 = vpop.permute.xlu1 %7375 }
0x27e8   :  { %7171 = vadd.xlane.f32.xlu1 %v7170_v62  ;;  %10747 = vmatprep.subr.bf16.mxu0 %v11955_v12 }
0x27e9   :  { %v14002_v15 = vpop.eup %11766 }
0x27ea   :  { %v14004_v53 = vpop.eup %11768  ;;  %v7173_v43 = vsel %vm115_vm0, %v14002_v15, 0.0  ;;  %v14026_v29 = vpop.permute.xlu0 %7422 }
0x27eb   :  { %7174 = vadd.xlane.f32.xlu0 %v7173_v43  ;;  %v7188_v49 = vsel %vm115_vm0, %v14004_v53, 0.0  ;;  %v7470_v9 = vpop.permute.xlu1 %7469 }
0x27ec   :  { %7189 = vadd.xlane.f32.xlu1 %v7188_v49 }
0x27ed   :  { %v14010_v23 = vpop.eup %11770 }
0x27ee   :  { %v14012_v31 = vpop.eup %11772  ;;  %v7191_v13 = vsel %vm115_vm0, %v14010_v23, 0.0 }
0x27ef   :  { %7192 = vadd.xlane.f32.xlu0 %v7191_v13  ;;  %v7182_v41 = vsel %vm115_vm0, %v14012_v31, 0.0 }
0x27f0   :  { %7183 = vadd.xlane.f32.xlu1 %v7182_v41 }
0x27f1   :  { %v14018_v36 = vpop.eup %11774 }
0x27f2   :  { %v7185_v50 = vsel %vm115_vm0, %v14018_v36, 0.0 }
0x27f3   :  { %7186 = vadd.xlane.f32.xlu0 %v7185_v50 }
0x2801   :  { %7563 = vrot.lane.b32.xlu1 %v13784_v34, %s11952_s2 }
0x2809   :  { %7516 = vrot.lane.b32.xlu0 %v13776_v48, %s11952_s2 }
0x281b   :  { %v7157_v3 = vpop.xlane.xlu0 %7156 }
0x281c   :  { %11776 = vrcp.f32 %v7157_v3  ;;  %v7154_v22 = vpop.xlane.xlu1 %7153 }
0x281d   :  { %11778 = vrcp.f32 %v7154_v22 }
0x281f   :  { %v7151_v35 = vpop.xlane.xlu0 %7150 }
0x2820   :  { %11780 = vrcp.f32 %v7151_v35  ;;  %v7148_v11 = vpop.xlane.xlu1 %7147 }
0x2821   :  { %11782 = vrcp.f32 %v7148_v11 }
0x2826   :  { %v11777_v60 = vpop.eup %11776 }
0x2827   :  { %v11779_v25 = vpop.eup %11778  ;;  %v7213_v34 = vmul.f32 %v11777_v60, %v13945_v0 }
0x2828   :  { %v7212_v54 = vmul.f32 %v11779_v25, %v13947_v51 }
0x282a   :  { %v11781_v48 = vpop.eup %11780  ;;  %v7227_v4 = vpack.c.bf16 %v7213_v34, %v7212_v54 }
0x282b   :  { %v11783_v5 = vpop.eup %11782  ;;  %v7211_v32 = vmul.f32 %v11781_v48, %v13951_v58 }
0x282c   :  { %v7210_v46 = vmul.f32 %v11783_v5, %v13955_v17  ;;  %10738 = vmatmul.mubr.msk.bf16.vlgmr.msra.gmra.mrb[180].mxu0 %vm115_vm0, %v7227_v4 }
0x282d   :  { %10748 = vmatpush3.bf16.msra.mxu0 %v7376_v7  ;;  %10749 = vmatprep.mubr.msk.bf16.mxu0 %vm11960_vm6, %v11955_v12 }
0x282e   :  { %v7226_v21 = vpack.c.bf16 %v7211_v32, %v7210_v46  ;;  %10759 = vmatprep.subr.bf16.mxu0 %v11955_v12 }
0x2830   :  { %10732 = vmatmul.mubr.msk.bf16.vlgmr.msra.gmra.mrb[180].mxu1 %vm115_vm0, %v7226_v21 }
0x2831   :  { %10742 = vmatpush3.bf16.msra.mxu1 %v7329_v40  ;;  %10743 = vmatprep.mubr.msk.bf16.mxu1 %vm11960_vm6, %v11955_v12 }
0x2832   :  { %10753 = vmatprep.subr.bf16.mxu1 %v11955_v12 }
0x2868   :  { %v7166_v0 = vpop.xlane.xlu1 %7165 }
0x2869   :  { %11784 = vrcp.f32 %v7166_v0 }
0x286a   :  { %v7169_v51 = vpop.xlane.xlu0 %7168 }
0x286b   :  { %11786 = vrcp.f32 %v7169_v51 }
0x286c   :  { %v7160_v58 = vpop.xlane.xlu1 %7159 }
0x286d   :  { %11788 = vrcp.f32 %v7160_v58 }
0x286e   :  { %v7163_v17 = vpop.xlane.xlu0 %7162 }
0x286f   :  { %11790 = vrcp.f32 %v7163_v17 }
0x2871   :  { %v7178_v57 = vpop.xlane.xlu1 %7177 }
0x2872   :  { %11792 = vrcp.f32 %v7178_v57 }
0x2873   :  { %v11785_v59 = vpop.eup %11784 }
0x2874   :  { %v7181_v42 = vpop.xlane.xlu0 %7180  ;;  %v7216_v19 = vmul.f32 %v11785_v59, %v13968_v38 }
0x2875   :  { %v11787_v30 = vpop.eup %11786  ;;  %11794 = vrcp.f32 %v7181_v42  ;;  %v7172_v1 = vpop.xlane.xlu1 %7171 }
0x2876   :  { %v7217_v18 = vmul.f32 %v11787_v30, %v13972_v37  ;;  %11796 = vrcp.f32 %v7172_v1  ;;  %v11416_v30 = vld [vmem:[#allocation4 + $0x130] sm:$0xff]  }
0x2877   :  { %v11789_v39 = vpop.eup %11788 }
0x2878   :  { %v7175_v26 = vpop.xlane.xlu0 %7174  ;;  %v7229_v56 = vpack.c.bf16 %v7217_v18, %v7216_v19  ;;  %v7214_v8 = vmul.f32 %v11789_v39, %v13978_v24 }
0x2879   :  { %v11791_v47 = vpop.eup %11790  ;;  %11798 = vrcp.f32 %v7175_v26  ;;  %v7190_v16 = vpop.xlane.xlu1 %7189 }
0x287a   :  { %v7215_v14 = vmul.f32 %v11791_v47, %v13982_v55  ;;  %10750 = vmatmul.mubr.msk.bf16.vlgmr.msra.gmra.mrb[184].mxu0 %vm115_vm0, %v7229_v56  ;;  %11800 = vrcp.f32 %v7190_v16  ;;  %v11417_v56 = vld [vmem:[#allocation4 + $0x138] sm:$0xff]  }
0x287b   :  { %10760 = vmatpush3.bf16.msra.mxu0 %v7470_v9  ;;  %10761 = vmatprep.mubr.msk.bf16.mxu0 %vm11960_vm6, %v11955_v12 }
0x287c   :  { %v7193_v38 = vpop.xlane.xlu0 %7192  ;;  %v7228_v37 = vpack.c.bf16 %v7215_v14, %v7214_v8  ;;  %10771 = vmatprep.subr.bf16.mxu0 %v11955_v12  ;;  %v11793_v20 = vpop.eup %11792 }
0x287d   :  { %11802 = vrcp.f32 %v7193_v38  ;;  %v7184_v33 = vpop.xlane.xlu1 %7183  ;;  %v7220_v24 = vmul.f32 %v11793_v20, %v13988_v45 }
0x287e   :  { %10744 = vmatmul.mubr.msk.bf16.vlgmr.msra.gmra.mrb[184].mxu1 %vm115_vm0, %v7228_v37  ;;  %11804 = vrcp.f32 %v7184_v33  ;;  %v11418_v37 = vld [vmem:[#allocation4 + $0x150] sm:$0xff]  }
0x287f   :  { %v11795_v6 = vpop.eup %11794  ;;  %10754 = vmatpush3.bf16.msra.mxu1 %v14026_v29  ;;  %10755 = vmatprep.mubr.msk.bf16.mxu1 %vm11960_vm6, %v11955_v12 }
0x2880   :  { %v7221_v55 = vmul.f32 %v11795_v6, %v13993_v52  ;;  %v7187_v62 = vpop.xlane.xlu0 %7186  ;;  %10765 = vmatprep.subr.bf16.mxu1 %v11955_v12  ;;  %v11797_v43 = vpop.eup %11796 }
0x2881   :  { %11806 = vrcp.f32 %v7187_v62  ;;  %v7564_v49 = vpop.permute.xlu1 %7563  ;;  %v7218_v50 = vmul.f32 %v11797_v43, %v13995_v10 }
0x2882   :  { %v7231_v13 = vpack.c.bf16 %v7221_v55, %v7220_v24 }
0x2883   :  { %v11799_v41 = vpop.eup %11798 }
0x2884   :  { %v7219_v40 = vmul.f32 %v11799_v41, %v14002_v15  ;;  %10762 = vmatmul.mubr.msk.bf16.vlgmr.msra.gmra.mrb[188].mxu0 %vm115_vm0, %v7231_v13  ;;  %v11801_v7 = vpop.eup %11800  ;;  %v7517_v3 = vpop.permute.xlu0 %7516 }
0x2885   :  { %10772 = vmatpush3.bf16.msra.mxu0 %v7564_v49  ;;  %10773 = vmatprep.mubr.msk.bf16.mxu0 %vm11960_vm6, %v11955_v12  ;;  %v7224_v29 = vmul.f32 %v11801_v7, %v14004_v53 }
0x2886   :  { %v7230_v45 = vpack.c.bf16 %v7219_v40, %v7218_v50 }
0x2887   :  { %v11803_v52 = vpop.eup %11802 }
0x2888   :  { %v7225_v9 = vmul.f32 %v11803_v52, %v14010_v23  ;;  %10756 = vmatmul.mubr.msk.bf16.vlgmr.msra.gmra.mrb[188].mxu1 %vm115_vm0, %v7230_v45  ;;  %v11805_v22 = vpop.eup %11804 }
0x2889   :  { %10766 = vmatpush3.bf16.msra.mxu1 %v7517_v3  ;;  %10767 = vmatprep.mubr.msk.bf16.mxu1 %vm11960_vm6, %v11955_v12  ;;  %v7222_v35 = vmul.f32 %v11805_v22, %v14012_v31 }
0x288a   :  { %v7233_v10 = vpack.c.bf16 %v7225_v9, %v7224_v29  ;;  %10777 = vmatprep.subr.bf16.mxu1 %v11416_v30 }
0x288b   :  { %v11807_v15 = vpop.eup %11806 }
0x288c   :  { %v7223_v11 = vmul.f32 %v11807_v15, %v14018_v36  ;;  %10774 = vmatmul.mubr.msk.bf16.vlgmr.msra.gmra.mrb[192].mxu0 %vm115_vm0, %v7233_v10 }
0x288e   :  { %v7232_v60 = vpack.c.bf16 %v7223_v11, %v7222_v35 }
0x2890   :  { %10768 = vmatmul.mubr.msk.bf16.vlgmr.msra.gmra.mrb[192].mxu1 %vm115_vm0, %v7232_v60 }
0x2891   :  { %10778 = vmatpush3.bf16.msra.mxu1 %v11416_v30 }
0x2892   :  { %10779 = vmatprep.subr.bf16.mxu1 %v11417_v56 }
0x2895   :  { %10780 = vmatpush3.bf16.msra.mxu1 %v11417_v56 }
0x2896   :  { %10793 = vmatprep.subr.bf16.mxu1 %v11418_v37 }
0x28ff   :  { %v7321_v53 = vpop.f32.mrb[180].mxu0 }
0x2900   :  { %v10739_v23 = vpop.f32.mrb[181].mxu0 }
0x2901   :  { %v7324_v25 = vpop.f32.mrb[182].mxu0 }
0x2902   :  { %v10740_v34 = vpop.f32.mrb[183].mxu0 }
0x2903   :  { %v14069_v54 = vpop.f32.mrb[180].mxu1 }
0x2904   :  { %v10733_v48 = vpop.f32.mrb[181].mxu1 }
0x2905   :  { %v14071_v4 = vpop.f32.mrb[182].mxu1 }
0x2906   :  { %v10734_v5 = vpop.f32.mrb[183].mxu1 }
0x294d   :  { %v7415_v32 = vpop.f32.mrb[184].mxu0 }
0x294e   :  { %v10751_v46 = vpop.f32.mrb[185].mxu0 }
0x294f   :  { %v7418_v31 = vpop.f32.mrb[186].mxu0 }
0x2950   :  { %v11258_v21 = vpack.i.bf16 %v7418_v31, %v7415_v32  ;;  %v10752_v36 = vpop.f32.mrb[187].mxu0 }
0x2951   :  { %v7368_v0 = vpop.f32.mrb[184].mxu1 }
0x2952   :  { %11259 = vrot.lane.b32.xlu1 %v11258_v21, %s11950_s29  ;;  %v10745_v51 = vpop.f32.mrb[185].mxu1 }
0x2953   :  { %v7371_v58 = vpop.f32.mrb[186].mxu1 }
0x2954   :  { %v11263_v17 = vpack.i.bf16 %v7371_v58, %v7368_v0  ;;  %v10746_v57 = vpop.f32.mrb[187].mxu1 }
0x2956   :  { %11264 = vrot.lane.b32.xlu0 %v11263_v17, %s11950_s29 }
0x2957   :  { %v7509_v59 = vpop.f32.mrb[188].mxu0 }
0x2958   :  { %v10763_v42 = vpop.f32.mrb[189].mxu0 }
0x2959   :  { %v7512_v1 = vpop.f32.mrb[190].mxu0 }
0x295a   :  { %v11268_v19 = vpack.i.bf16 %v7512_v1, %v7509_v59  ;;  %v10764_v18 = vpop.f32.mrb[191].mxu0  ;;  %v11419_v59 = vld [vmem:[#allocation4 + $0x158] sm:$0xff]  }
0x295b   :  { %v7462_v39 = vpop.f32.mrb[188].mxu1 }
0x295c   :  { %11269 = vrot.lane.b32.xlu1 %v11268_v19, %s11961_s0  ;;  %v10757_v26 = vpop.f32.mrb[189].mxu1 }
0x295d   :  { %v7465_v47 = vpop.f32.mrb[190].mxu1 }
0x295e   :  { %v11273_v16 = vpack.i.bf16 %v7465_v47, %v7462_v39  ;;  %v10758_v8 = vpop.f32.mrb[191].mxu1 }
0x295f   :  { %v7603_v14 = vpop.f32.mrb[192].mxu0 }
0x2960   :  { %11274 = vrot.lane.b32.xlu0 %v11273_v16, %s11961_s0  ;;  %v10775_v38 = vpop.f32.mrb[193].mxu0  ;;  %v9786_v16 = vld [vmem:[%s14526_s4 + $0x20] ss:$0 sm:$0xff] }
0x2961   :  { %v7606_v20 = vpop.f32.mrb[194].mxu0 }
0x2962   :  { %v11283_v33 = vpack.i.bf16 %v7606_v20, %v7603_v14  ;;  %v10776_v6 = vpop.f32.mrb[195].mxu0 }
0x2963   :  { %v7556_v24 = vpop.f32.mrb[192].mxu1 }
0x2964   :  { %11284 = vrot.lane.b32.xlu1 %v11283_v33, %s11962_s24  ;;  %v10769_v55 = vpop.f32.mrb[193].mxu1 }
0x2965   :  { %v7559_v62 = vpop.f32.mrb[194].mxu1 }
0x2966   :  { %v11278_v43 = vpack.i.bf16 %v7559_v62, %v7556_v24  ;;  %v10770_v49 = vpop.f32.mrb[195].mxu1 }
0x2968   :  { %11279 = vrot.lane.b32.xlu0 %v11278_v43, %s11962_s24 }
0x29c4   :  { %v11260_v13 = vpop.permute.xlu1 %11259 }
0x29c5   :  { %v11262_v40 = vunpack.i.h.bf16 %v11260_v13  ;;  %v11261_v7 = vunpack.i.l.bf16 %v11260_v13 }
0x29c7   :  { %v7661_v9 = vsel %vm453_vm11, %v7324_v25, %v11262_v40  ;;  %v7660_v3 = vsel %vm453_vm11, %v7321_v53, %v11261_v7 }
0x29c8   :  { %v11265_v41 = vpop.permute.xlu0 %11264 }
0x29c9   :  { %v11267_v10 = vunpack.i.h.bf16 %v11265_v41  ;;  %v11266_v15 = vunpack.i.l.bf16 %v11265_v41 }
0x29cb   :  { %v7659_v53 = vsel %vm453_vm11, %v14071_v4, %v11267_v10  ;;  %v7658_v25 = vsel %vm453_vm11, %v14069_v54, %v11266_v15  ;;  %v9774_v54 = vld [vmem:[%s14526_s4 + $0x1e] ss:$0 sm:$0xff] }
0x29ce   :  { %v11270_v50 = vpop.permute.xlu1 %11269 }
0x29cf   :  { %v11272_v45 = vunpack.i.h.bf16 %v11270_v50  ;;  %v11271_v52 = vunpack.i.l.bf16 %v11270_v50 }
0x29d1   :  { %v7665_v60 = vsel %vm115_vm0, %v7661_v9, %v11272_v45  ;;  %v7664_v23 = vsel %vm115_vm0, %v7660_v3, %v11271_v52 }
0x29d2   :  { %v11275_v29 = vpop.permute.xlu0 %11274 }
0x29d3   :  { %v11277_v34 = vunpack.i.h.bf16 %v11275_v29  ;;  %v11276_v48 = vunpack.i.l.bf16 %v11275_v29 }
0x29d5   :  { %v7662_v0 = vsel %vm115_vm0, %v7658_v25, %v11276_v48  ;;  %v7663_v51 = vsel %vm115_vm0, %v7659_v53, %v11277_v34 }
0x29d6   :  { %v11285_v22 = vpop.permute.xlu1 %11284 }
0x29d7   :  { %v11287_v35 = vunpack.i.h.bf16 %v11285_v22  ;;  %v11286_v11 = vunpack.i.l.bf16 %v11285_v22 }
0x29d9   :  { %v7669_v5 = vsel %vm1483_vm12, %v7665_v60, %v11287_v35  ;;  %v7668_v32 = vsel %vm1483_vm12, %v7664_v23, %v11286_v11 }
0x29da   :  { %v7675_v46 = vpack.c.bf16 %v7669_v5, %v7668_v32  ;;  %v11280_v31 = vpop.permute.xlu0 %11279 }
0x29db   :  { %v11282_v21 = vunpack.i.h.bf16 %v11280_v31  ;;  %v11281_v36 = vunpack.i.l.bf16 %v11280_v31  ;;  %v11421_v31 = vld [vmem:[#allocation4 + $0x148] sm:$0xff]  }
0x29dd   :  { %v7666_v58 = vsel %vm1483_vm12, %v7662_v0, %v11281_v36  ;;  %v7667_v17 = vsel %vm1483_vm12, %v7663_v51, %v11282_v21 }
0x29de   :  { %v7674_v57 = vpack.c.bf16 %v7667_v17, %v7666_v58 }
0x29e0   :  { %10781 = vmatprep.mubr.msk.bf16.mxu1 %vm346_vm5, %v7674_v57 }
0x29e1   :  { %10782 = vmatmul.mubr.msk.bf16.vlgmr.msra.gmra.mrb[196].mxu1 %vm346_vm5, %v7675_v46  ;;  %v11420_v46 = vld [vmem:[#allocation4 + $0x140] sm:$0xff]  }
0x29e2   :  { %10794 = vmatpush3.bf16.msra.mxu1 %v11418_v37  ;;  %10797 = vmatprep.mubr.msk.bf16.mxu1 %vm346_vm5, %v13340_v63 }
0x29e3   :  { %10795 = vmatprep.subr.bf16.mxu1 %v11419_v59  ;;  %10785 = vmatprep.subr.bf16.mxu0 %v11420_v46 }
0x29e4   :  { %10786 = vmatpush3.bf16.msra.mxu0 %v11420_v46 }
0x29e5   :  { %10787 = vmatprep.subr.bf16.mxu0 %v11421_v31 }
0x29e6   :  { %10796 = vmatpush3.bf16.msra.mxu1 %v11419_v59 }
0x29e7   :  { %10807 = vmatprep.subr.bf16.mxu1 %v11955_v12 }
0x29e8   :  { %10788 = vmatpush3.bf16.msra.mxu0 %v11421_v31 }
0x29e9   :  { %10798 = vmatmul.mubr.msk.bf16.vlgmr.msra.gmra.mrb[200].mxu1 %vm346_vm5, %v13344_v2  ;;  %10801 = vmatprep.subr.bf16.mxu0 %v11955_v12 }
0x29ea   :  { %10809 = vmatprep.mubr.msk.bf16.mxu1 %vm11960_vm6, %v11955_v12 }
0x2ab4   :  { %v10783_v4 = vpop.f32.mrb[196].mxu1 }
0x2ab5   :  { %v7733_v42 = vpop.f32.mrb[197].mxu1  ;;  %v7742_v30 = vadd.f32 %v10783_v4, %v9774_v54 }
0x2ab6   :  { %v7734_v1 = vadd.f32 %v9774_v54, %v7733_v42  ;;  %v10784_v19 = vpop.f32.mrb[198].mxu1 }
0x2ab7   :  { %v7736_v63 = vpop.f32.mrb[199].mxu1  ;;  %v7745_v39 = vadd.f32 %v10784_v19, %v9774_v54  ;;  %v7750_v56 = vadd.f32 %v7742_v30, %v13739_v27  ;;  %v9779_v30 = vld [vmem:[%s14526_s4 + $0x24] ss:$0 sm:$0xff] }
0x2ab8   :  { %v7748_v18 = vadd.f32 %v7734_v1, %v13732_v61  ;;  %v7737_v26 = vadd.f32 %v9774_v54, %v7736_v63 }
0x2ab9   :  { %v7751_v8 = vadd.f32 %v7745_v39, %v13741_v44  ;;  %v7760_v27 = vsel %vm346_vm5, %v7750_v56, 0.0 }
0x2aba   :  { %v7749_v2 = vadd.f32 %v7737_v26, %v13734_v28  ;;  %v7754_v47 = vsel %vm346_vm5, %v7748_v18, 0.0  ;;  %v9780_v26 = vld [vmem:[%s14526_s4 + $0x25] ss:$0 sm:$0xff] }
0x2abb   :  { %7755 = vadd.xlane.f32.xlu0 %v7754_v47  ;;  %v7763_v55 = vsel %vm346_vm5, %v7751_v8, 0.0 }
0x2abc   :  { %v10799_v14 = vpop.f32.mrb[200].mxu1  ;;  %v7757_v38 = vsel %vm346_vm5, %v7749_v2, 0.0 }
0x2abd   :  { %v7955_v37 = vpop.f32.mrb[201].mxu1  ;;  %7758 = vadd.xlane.f32.xlu1 %v7757_v38  ;;  %v7964_v33 = vadd.f32 %v10799_v14, %v9786_v16 }
0x2abe   :  { %v7956_v61 = vadd.f32 %v9786_v16, %v7955_v37  ;;  %v10800_v20 = vpop.f32.mrb[202].mxu1 }
0x2abf   :  { %v7967_v28 = vadd.f32 %v10800_v20, %v9786_v16  ;;  %v7958_v6 = vpop.f32.mrb[203].mxu1  ;;  %7761 = vadd.xlane.f32.xlu0 %v7760_v27 }
0x2ac0   :  { %v7959_v24 = vadd.f32 %v9786_v16, %v7958_v6 }
0x2ac1   :  { %v14116_v62 = vpack.c.bf16 %v7967_v28, %v7964_v33  ;;  %v14118_v43 = vpack.i.bf16 %v7967_v28, %v7964_v33 }
0x2ac2   :  { %v14120_v44 = vpack.i.bf16 %v7959_v24, %v7956_v61  ;;  %v14122_v49 = vpack.c.bf16 %v7959_v24, %v7956_v61 }
0x2ac3   :  { %7764 = vadd.xlane.f32.xlu0 %v7763_v55  ;;  %v8117_v13 = vsel %vm453_vm11, %v14116_v62, 0 }
0x2ac4   :  { %10808 = vmatpush3.bf16.xpose.msra.mxu1 %v8117_v13  ;;  %v8070_v28 = vsel %vm453_vm11, %v14122_v49, 0 }
0x2ac5   :  { %10819 = vmatprep.subr.bf16.mxu1 %v11955_v12 }
0x2b48   :  { %v7756_v41 = vpop.xlane.xlu0 %7755 }
0x2b49   :  { %v7766_v50 = vmul.f32 0.03125, %v7756_v41 }
0x2b4a   :  { %v7759_v40 = vpop.xlane.xlu1 %7758 }
0x2b4b   :  { %v7770_v7 = vsub.f32 %v7748_v18, %v7766_v50  ;;  %v7767_v45 = vmul.f32 0.03125, %v7759_v40 }
0x2b4c   :  { %v7762_v52 = vpop.xlane.xlu0 %7761 }
0x2b4d   :  { %v7771_v29 = vsub.f32 %v7749_v2, %v7767_v45  ;;  %v7768_v9 = vmul.f32 0.03125, %v7762_v52  ;;  %v7774_v3 = vmul.f32 %v7770_v7, %v7770_v7 }
0x2b4f   :  { %v7772_v22 = vsub.f32 %v7750_v56, %v7768_v9  ;;  %v7778_v10 = vsel %vm346_vm5, %v7774_v3, 0.0  ;;  %v7775_v15 = vmul.f32 %v7771_v29, %v7771_v29 }
0x2b50   :  { %7779 = vadd.xlane.f32.xlu1 %v7778_v10  ;;  %v7765_v35 = vpop.xlane.xlu0 %7764 }
0x2b51   :  { %v7769_v11 = vmul.f32 0.03125, %v7765_v35  ;;  %v7781_v60 = vsel %vm346_vm5, %v7775_v15, 0.0  ;;  %v7776_v23 = vmul.f32 %v7772_v22, %v7772_v22 }
0x2b52   :  { %7782 = vadd.xlane.f32.xlu0 %v7781_v60 }
0x2b53   :  { %v7773_v34 = vsub.f32 %v7751_v8, %v7769_v11  ;;  %v7784_v48 = vsel %vm346_vm5, %v7776_v23, 0.0 }
0x2b54   :  { %7785 = vadd.xlane.f32.xlu1 %v7784_v48 }
0x2b55   :  { %v7777_v5 = vmul.f32 %v7773_v34, %v7773_v34 }
0x2b57   :  { %v7787_v32 = vsel %vm346_vm5, %v7777_v5, 0.0 }
0x2b58   :  { %7788 = vadd.xlane.f32.xlu0 %v7787_v32 }
0x2b65   :  { %11289 = vrot.lane.b32.xlu1 %v14120_v44, %s11956_s9 }
0x2b69   :  { %11299 = vrot.lane.b32.xlu1 %v14120_v44, %s11957_s10 }
0x2b6e   :  { %11294 = vrot.lane.b32.xlu0 %v14118_v43, %s11956_s9 }
0x2bdd   :  { %v7780_v53 = vpop.xlane.xlu1 %7779 }
0x2bde   :  { %v7790_v25 = vmul.f32 0.03125, %v7780_v53 }
0x2bdf   :  { %v7783_v21 = vpop.xlane.xlu0 %7782 }
0x2be0   :  { %v7794_v36 = vadd.f32 1e-05, %v7790_v25  ;;  %v7791_v0 = vmul.f32 0.03125, %v7783_v21 }
0x2be1   :  { %v7786_v51 = vpop.xlane.xlu1 %7785 }
0x2be2   :  { %11808 = vrsqrt.f32 %v7794_v36  ;;  %v7795_v58 = vadd.f32 1e-05, %v7791_v0  ;;  %v7792_v17 = vmul.f32 0.03125, %v7786_v51 }
0x2be4   :  { %11810 = vrsqrt.f32 %v7795_v58  ;;  %v7796_v57 = vadd.f32 1e-05, %v7792_v17 }
0x2be5   :  { %v7789_v59 = vpop.xlane.xlu0 %7788  ;;  %v11290_v24 = vpop.permute.xlu1 %11289 }
0x2be6   :  { %11812 = vrsqrt.f32 %v7796_v57  ;;  %v7793_v54 = vmul.f32 0.03125, %v7789_v59  ;;  %v11292_v41 = vunpack.i.h.bf16 %v11290_v24  ;;  %v11291_v50 = vunpack.i.l.bf16 %v11290_v24 }
0x2be8   :  { %v7797_v4 = vadd.f32 1e-05, %v7793_v54  ;;  %v14168_v10 = vpack.c.bf16 %v11292_v41, %v11291_v50 }
0x2be9   :  { %v11295_v6 = vpop.permute.xlu0 %11294  ;;  %v11300_v32 = vpop.permute.xlu1 %11299 }
0x2bea   :  { %11814 = vrsqrt.f32 %v7797_v4  ;;  %v11297_v55 = vunpack.i.h.bf16 %v11295_v6  ;;  %v11296_v13 = vunpack.i.l.bf16 %v11295_v6  ;;  %v8164_v5 = vsel %vm453_vm11, %v14168_v10, 0 }
0x2beb   :  { %v11302_v46 = vunpack.i.h.bf16 %v11300_v32  ;;  %v11301_v31 = vunpack.i.l.bf16 %v11300_v32 }
0x2bec   :  { %v11809_v42 = vpop.eup %11808 }
0x2bed   :  { %v7802_v1 = vmul.f32 %v11809_v42, %v7770_v7  ;;  %v9781_v7 = vld [vmem:[%s14526_s4 + $0x1f] ss:$0 sm:$0xff]  ;;  %v14196_v0 = vpack.c.bf16 %v11302_v46, %v11301_v31 }
0x2bee   :  { %v11811_v19 = vpop.eup %11810 }
0x2bef   :  { %v7803_v63 = vmul.f32 %v11811_v19, %v7771_v29  ;;  %v7810_v18 = vmul.f32 %v9779_v30, %v7802_v1  ;;  %v14166_v29 = vpack.c.bf16 %v11297_v55, %v11296_v13 }
0x2bf0   :  { %v11813_v39 = vpop.eup %11812 }
0x2bf1   :  { %v7804_v56 = vmul.f32 %v11813_v39, %v7772_v22  ;;  %v7811_v2 = vmul.f32 %v9779_v30, %v7803_v63  ;;  %v14144_v47 = vadd.f32 %v9780_v26, %v7810_v18  ;;  %v8211_v48 = vsel %vm453_vm11, %v14166_v29, 0 }
0x2bf3   :  { %v14146_v16 = vadd.f32 %v9780_v26, %v7811_v2  ;;  %v7812_v14 = vmul.f32 %v9779_v30, %v7804_v56 }
0x2bf4   :  { %v11815_v8 = vpop.eup %11814 }
0x2bf5   :  { %v7805_v38 = vmul.f32 %v11815_v8, %v7773_v34  ;;  %v7826_v37 = vpack.c.bf16 %v14146_v16, %v14144_v47  ;;  %v14151_v20 = vadd.f32 %v9780_v26, %v7812_v14 }
0x2bf7   :  { %v7813_v61 = vmul.f32 %v9779_v30, %v7805_v38  ;;  %10789 = vmatprep.mubr.msk.bf16.mxu0 %vm346_vm5, %v7826_v37 }
0x2bf9   :  { %v14153_v27 = vadd.f32 %v9780_v26, %v7813_v61 }
0x2bfb   :  { %v7827_v33 = vpack.c.bf16 %v14153_v27, %v14151_v20 }
0x2bfd   :  { %10790 = vmatmul.mubr.msk.bf16.vlgmr.msra.gmra.mrb[196].mxu0 %vm346_vm5, %v7827_v33 }
0x2bfe   :  { %10802 = vmatpush3.bf16.xpose.msra.mxu0 %v8070_v28  ;;  %10803 = vmatprep.mubr.msk.bf16.mxu0 %vm11960_vm6, %v11955_v12 }
0x2bff   :  { %10813 = vmatprep.subr.bf16.mxu0 %v11955_v12 }
0x2cd0   :  { %v10791_v40 = vpop.f32.mrb[196].mxu0 }
0x2cd1   :  { %v7885_v45 = vpop.f32.mrb[197].mxu0  ;;  %v7894_v9 = vadd.f32 %v10791_v40, %v9781_v7 }
0x2cd2   :  { %v10792_v52 = vpop.f32.mrb[198].mxu0  ;;  %v7886_v15 = vadd.f32 %v9781_v7, %v7885_v45 }
0x2cd3   :  { %v7897_v3 = vadd.f32 %v10792_v52, %v9781_v7  ;;  %v7888_v22 = vpop.f32.mrb[199].mxu0 }
0x2cd4   :  { %v7889_v35 = vadd.f32 %v9781_v7, %v7888_v22 }
0x2cd5   :  { %v8051_v11 = vpack.c.bf16 %v7897_v3, %v7894_v9  ;;  %v11303_v60 = vpack.i.bf16 %v7897_v3, %v7894_v9 }
0x2cd6   :  { %v8050_v23 = vpack.c.bf16 %v7889_v35, %v7886_v15  ;;  %v11308_v34 = vpack.i.bf16 %v7889_v35, %v7886_v15 }
0x2cd7   :  { %11304 = vrot.lane.b32.xlu0 %v11303_v60, %s11956_s9  ;;  %10810 = vmatmul.mubr.msk.bf16.vlgmr.msra.gmra.mrb[204].mxu1 %vm453_vm11, %v8051_v11 }
0x2cd8   :  { %10820 = vmatpush3.bf16.xpose.msra.mxu1 %v8211_v48  ;;  %11309 = vrot.lane.b32.xlu1 %v11308_v34, %s11956_s9 }
0x2cd9   :  { %10804 = vmatmul.mubr.msk.bf16.vlgmr.msra.gmra.mrb[200].mxu0 %vm453_vm11, %v8050_v23  ;;  %10821 = vmatprep.mubr.msk.bf16.mxu1 %vm11960_vm6, %v11955_v12 }
0x2cda   :  { %10814 = vmatpush3.bf16.xpose.msra.mxu0 %v8164_v5  ;;  %10815 = vmatprep.mubr.msk.bf16.mxu0 %vm11960_vm6, %v11955_v12 }
0x2cdb   :  { %11324 = vrot.lane.b32.xlu0 %v11308_v34, %s11957_s10  ;;  %10825 = vmatprep.subr.bf16.mxu0 %v11955_v12 }
0x2cdc   :  { %11314 = vrot.lane.b32.xlu1 %v14118_v43, %s11957_s10  ;;  %10831 = vmatprep.subr.bf16.mxu1 %v11955_v12 }
0x2cdf   :  { %11329 = vrot.lane.b32.xlu0 %v11303_v60, %s11957_s10 }
0x2ce0   :  { %11319 = vrot.lane.b32.xlu1 %v14120_v44, %s11958_s11 }
0x2ce3   :  { %11339 = vrot.lane.b32.xlu0 %v11308_v34, %s11958_s11 }
0x2ce4   :  { %11334 = vrot.lane.b32.xlu1 %v14118_v43, %s11958_s11 }
0x2ce8   :  { %11344 = vrot.lane.b32.xlu1 %v11303_v60, %s11958_s11 }
0x2cec   :  { %8643 = vrot.lane.b32.xlu1 %v14122_v49, %s11959_s1  ;;  %v8258_v49 = vsel %vm453_vm11, %v14196_v0, 0 }
0x2d49   :  { %v11305_v53 = vpop.permute.xlu0 %11304 }
0x2d4a   :  { %v11307_v25 = vunpack.i.h.bf16 %v11305_v53  ;;  %v11306_v21 = vunpack.i.l.bf16 %v11305_v53  ;;  %v11310_v36 = vpop.permute.xlu1 %11309 }
0x2d4b   :  { %v11312_v44 = vunpack.i.h.bf16 %v11310_v36  ;;  %v11311_v51 = vunpack.i.l.bf16 %v11310_v36 }
0x2d4c   :  { %v8053_v58 = vpack.c.bf16 %v11307_v25, %v11306_v21 }
0x2d4d   :  { %v8052_v17 = vpack.c.bf16 %v11312_v44, %v11311_v51  ;;  %v11325_v57 = vpop.permute.xlu0 %11324 }
0x2d4e   :  { %v11315_v43 = vpop.permute.xlu1 %11314  ;;  %10822 = vmatmul.mubr.msk.bf16.vlgmr.msra.gmra.mrb[208].mxu1 %vm453_vm11, %v8053_v58  ;;  %v11327_v4 = vunpack.i.h.bf16 %v11325_v57  ;;  %v11326_v42 = vunpack.i.l.bf16 %v11325_v57 }
0x2d4f   :  { %v11317_v59 = vunpack.i.h.bf16 %v11315_v43  ;;  %v11316_v54 = vunpack.i.l.bf16 %v11315_v43  ;;  %10816 = vmatmul.mubr.msk.bf16.vlgmr.msra.gmra.mrb[204].mxu0 %vm453_vm11, %v8052_v17  ;;  %10833 = vmatprep.mubr.msk.bf16.mxu1 %vm11960_vm6, %v11955_v12 }
0x2d50   :  { %10826 = vmatpush3.bf16.xpose.msra.mxu0 %v8258_v49  ;;  %10827 = vmatprep.mubr.msk.bf16.mxu0 %vm11960_vm6, %v11955_v12  ;;  %v8054_v26 = vpack.c.bf16 %v11327_v4, %v11326_v42 }
0x2d51   :  { %v14206_v30 = vpack.c.bf16 %v11317_v59, %v11316_v54  ;;  %v11330_v1 = vpop.permute.xlu0 %11329  ;;  %10837 = vmatprep.subr.bf16.mxu0 %v11955_v12 }
0x2d52   :  { %v11320_v19 = vpop.permute.xlu1 %11319  ;;  %v11332_v56 = vunpack.i.h.bf16 %v11330_v1  ;;  %v11331_v2 = vunpack.i.l.bf16 %v11330_v1 }
0x2d53   :  { %v11322_v63 = vunpack.i.h.bf16 %v11320_v19  ;;  %v11321_v18 = vunpack.i.l.bf16 %v11320_v19  ;;  %v8305_v39 = vsel %vm453_vm11, %v14206_v30, 0 }
0x2d54   :  { %10832 = vmatpush3.bf16.xpose.msra.mxu1 %v8305_v39  ;;  %v8055_v28 = vpack.c.bf16 %v11332_v56, %v11331_v2 }
0x2d55   :  { %v14211_v8 = vpack.c.bf16 %v11322_v63, %v11321_v18  ;;  %10843 = vmatprep.subr.bf16.mxu1 %v11955_v12  ;;  %v11340_v14 = vpop.permute.xlu0 %11339 }
0x2d56   :  { %v11335_v38 = vpop.permute.xlu1 %11334  ;;  %v11342_v6 = vunpack.i.h.bf16 %v11340_v14  ;;  %v11341_v24 = vunpack.i.l.bf16 %v11340_v14 }
0x2d57   :  { %v11337_v37 = vunpack.i.h.bf16 %v11335_v38  ;;  %v11336_v61 = vunpack.i.l.bf16 %v11335_v38  ;;  %10828 = vmatmul.mubr.msk.bf16.vlgmr.msra.gmra.mrb[208].mxu0 %vm453_vm11, %v8054_v26  ;;  %v8352_v33 = vsel %vm453_vm11, %v14211_v8, 0 }
0x2d58   :  { %10838 = vmatpush3.bf16.xpose.msra.mxu0 %v8352_v33  ;;  %10839 = vmatprep.mubr.msk.bf16.mxu0 %vm11960_vm6, %v11955_v12  ;;  %v8056_v50 = vpack.c.bf16 %v11342_v6, %v11341_v24 }
0x2d59   :  { %v14219_v55 = vpack.c.bf16 %v11337_v37, %v11336_v61  ;;  %10849 = vmatprep.subr.bf16.mxu0 %v11955_v12 }
0x2d5a   :  { %v11345_v13 = vpop.permute.xlu1 %11344 }
0x2d5b   :  { %10834 = vmatmul.mubr.msk.bf16.vlgmr.msra.gmra.mrb[212].mxu1 %vm453_vm11, %v8055_v28  ;;  %v8399_v41 = vsel %vm453_vm11, %v14219_v55, 0  ;;  %v11347_v40 = vunpack.i.h.bf16 %v11345_v13  ;;  %v11346_v7 = vunpack.i.l.bf16 %v11345_v13 }
0x2d5c   :  { %10844 = vmatpush3.bf16.xpose.msra.mxu1 %v8399_v41  ;;  %10845 = vmatprep.mubr.msk.bf16.mxu1 %vm11960_vm6, %v11955_v12 }
0x2d5d   :  { %10855 = vmatprep.subr.bf16.mxu1 %v11955_v12  ;;  %v8057_v52 = vpack.c.bf16 %v11347_v40, %v11346_v7 }
0x2d5e   :  { %v8644_v45 = vpop.permute.xlu1 %8643 }
0x2d5f   :  { %10840 = vmatmul.mubr.msk.bf16.vlgmr.msra.gmra.mrb[212].mxu0 %vm453_vm11, %v8056_v50 }
0x2d60   :  { %10850 = vmatpush3.bf16.msra.mxu0 %v8644_v45  ;;  %10851 = vmatprep.mubr.msk.bf16.mxu0 %vm11960_vm6, %v11955_v12 }
0x2d61   :  { %10861 = vmatprep.subr.bf16.mxu0 %v11955_v12 }
0x2d63   :  { %10846 = vmatmul.mubr.msk.bf16.vlgmr.msra.gmra.mrb[216].mxu1 %vm453_vm11, %v8057_v52 }
0x2d64   :  { %10857 = vmatprep.mubr.msk.bf16.mxu1 %vm11960_vm6, %v11955_v12 }
0x2daa   :  { %v8153_v9 = vpop.f32.mrb[204].mxu1 }
0x2dab   :  { %v14235_v3 = vmul.f32 0.35355338, %v8153_v9  ;;  %v10811_v22 = vpop.f32.mrb[205].mxu1 }
0x2dac   :  { %v8106_v15 = vpop.f32.mrb[200].mxu0  ;;  %v8156_v35 = vpop.f32.mrb[206].mxu1 }
0x2dad   :  { %v10805_v11 = vpop.f32.mrb[201].mxu0  ;;  %v10812_v60 = vpop.f32.mrb[207].mxu1  ;;  %v14237_v23 = vmul.f32 0.35355338, %v8106_v15  ;;  %v8464_v48 = vsel %vm115_vm0, %v14235_v3, -inf }
0x2dae   :  { %v8109_v34 = vpop.f32.mrb[202].mxu0  ;;  %8465 = vmax.xlane.f32.xlu0 %v8464_v48  ;;  %v14245_v31 = vmul.f32 0.35355338, %v8156_v35 }
0x2daf   :  { %v14241_v5 = vmul.f32 0.35355338, %v8109_v34  ;;  %v10806_v32 = vpop.f32.mrb[203].mxu0  ;;  %v8458_v53 = vsel %vm115_vm0, %v14237_v23, -inf }
0x2db0   :  { %v8467_v25 = vsel %vm115_vm0, %v14245_v31, -inf }
0x2db1   :  { %v8461_v46 = vsel %vm115_vm0, %v14241_v5, -inf }
0x2db2   :  { %8462 = vmax.xlane.f32.xlu1 %v8461_v46  ;;  %8459 = vmax.xlane.f32.xlu0 %v8458_v53 }
0x2db6   :  { %8468 = vmax.xlane.f32.xlu0 %v8467_v25 }
0x2e21   :  { %v8247_v21 = vpop.f32.mrb[208].mxu1 }
0x2e22   :  { %v14251_v36 = vmul.f32 0.35355338, %v8247_v21  ;;  %v8200_v44 = vpop.f32.mrb[204].mxu0  ;;  %v10823_v51 = vpop.f32.mrb[209].mxu1 }
0x2e23   :  { %v14253_v58 = vmul.f32 0.35355338, %v8200_v44  ;;  %v10817_v17 = vpop.f32.mrb[205].mxu0  ;;  %v8250_v57 = vpop.f32.mrb[210].mxu1 }
0x2e24   :  { %v14255_v43 = vmul.f32 0.35355338, %v8250_v57  ;;  %v8203_v59 = vpop.f32.mrb[206].mxu0  ;;  %v10824_v54 = vpop.f32.mrb[211].mxu1  ;;  %v8476_v49 = vsel %vm115_vm0, %v14251_v36, -inf }
0x2e25   :  { %v10818_v4 = vpop.f32.mrb[207].mxu0  ;;  %8477 = vmax.xlane.f32.xlu1 %v8476_v49  ;;  %v14259_v42 = vmul.f32 0.35355338, %v8203_v59  ;;  %v8470_v19 = vsel %vm115_vm0, %v14253_v58, -inf }
0x2e26   :  { %v8479_v1 = vsel %vm115_vm0, %v14255_v43, -inf }
0x2e27   :  { %8480 = vmax.xlane.f32.xlu0 %v8479_v1  ;;  %v8473_v18 = vsel %vm115_vm0, %v14259_v42, -inf }
0x2e29   :  { %8471 = vmax.xlane.f32.xlu1 %v8470_v19 }
0x2e2a   :  { %v8294_v63 = vpop.f32.mrb[208].mxu0 }
0x2e2b   :  { %v10829_v39 = vpop.f32.mrb[209].mxu0  ;;  %8474 = vmax.xlane.f32.xlu0 %v8473_v18  ;;  %v14269_v61 = vmul.f32 0.35355338, %v8294_v63 }
0x2e2c   :  { %v8297_v26 = vpop.f32.mrb[210].mxu0 }
0x2e2d   :  { %v10830_v56 = vpop.f32.mrb[211].mxu0  ;;  %v14275_v13 = vmul.f32 0.35355338, %v8297_v26  ;;  %v8482_v45 = vsel %vm115_vm0, %v14269_v61, -inf }
0x2e2e   :  { %v8341_v2 = vpop.f32.mrb[212].mxu1 }
0x2e2f   :  { %v14267_v14 = vmul.f32 0.35355338, %v8341_v2  ;;  %v10835_v38 = vpop.f32.mrb[213].mxu1  ;;  %v8485_v15 = vsel %vm115_vm0, %v14275_v13, -inf }
0x2e30   :  { %v8344_v37 = vpop.f32.mrb[214].mxu1 }
0x2e31   :  { %v14271_v33 = vmul.f32 0.35355338, %v8344_v37  ;;  %v10836_v28 = vpop.f32.mrb[215].mxu1  ;;  %v8488_v6 = vsel %vm115_vm0, %v14267_v14, -inf }
0x2e32   :  { %v8388_v24 = vpop.f32.mrb[212].mxu0  ;;  %8489 = vmax.xlane.f32.xlu1 %v8488_v6 }
0x2e33   :  { %v10841_v41 = vpop.f32.mrb[213].mxu0  ;;  %v8491_v50 = vsel %vm115_vm0, %v14271_v33, -inf  ;;  %v14285_v11 = vmul.f32 0.35355338, %v8388_v24 }
0x2e34   :  { %v8391_v40 = vpop.f32.mrb[214].mxu0  ;;  %8492 = vmax.xlane.f32.xlu0 %v8491_v50 }
0x2e35   :  { %v10842_v7 = vpop.f32.mrb[215].mxu0  ;;  %v14291_v32 = vmul.f32 0.35355338, %v8391_v40  ;;  %v8494_v53 = vsel %vm115_vm0, %v14285_v11, -inf }
0x2e36   :  { %8483 = vmax.xlane.f32.xlu1 %v8482_v45  ;;  %v8435_v52 = vpop.f32.mrb[216].mxu1 }
0x2e37   :  { %v14281_v9 = vmul.f32 0.35355338, %v8435_v52  ;;  %v10847_v22 = vpop.f32.mrb[217].mxu1  ;;  %v8497_v25 = vsel %vm115_vm0, %v14291_v32, -inf }
0x2e38   :  { %8486 = vmax.xlane.f32.xlu0 %v8485_v15  ;;  %v8438_v35 = vpop.f32.mrb[218].mxu1 }
0x2e39   :  { %v14287_v60 = vmul.f32 0.35355338, %v8438_v35  ;;  %v10848_v34 = vpop.f32.mrb[219].mxu1  ;;  %v8500_v48 = vsel %vm115_vm0, %v14281_v9, -inf }
0x2e3a   :  { %8501 = vmax.xlane.f32.xlu1 %v8500_v48 }
0x2e3b   :  { %v8503_v46 = vsel %vm115_vm0, %v14287_v60, -inf  ;;  %v8466_v21 = vpop.xlane.xlu0 %8465 }
0x2e3c   :  { %8504 = vmax.xlane.f32.xlu0 %v8503_v46 }
0x2e3e   :  { %8495 = vmax.xlane.f32.xlu1 %v8494_v53 }
0x2e3f   :  { %v8460_v44 = vpop.xlane.xlu0 %8459  ;;  %v8463_v57 = vpop.xlane.xlu1 %8462 }
0x2e40   :  { %8498 = vmax.xlane.f32.xlu0 %v8497_v25  ;;  %v8507_v59 = vsub.f32 %v14241_v5, %v8463_v57  ;;  %v8506_v49 = vsub.f32 %v14237_v23, %v8460_v44 }
0x2e43   :  { %v8469_v51 = vpop.xlane.xlu0 %8468 }
0x2e44   :  { %v8509_v17 = vsub.f32 %v14245_v31, %v8469_v51 }
0x2e4f   :  { %8739 = vrot.lane.b32.xlu1 %v14168_v10, %s11959_s1  ;;  %v8508_v10 = vsub.f32 %v14235_v3, %v8466_v21 }
0x2e51   :  { %v8526_v54 = vmul.f32 1.442695, %v8508_v10 }
0x2e53   :  { %8787 = vrot.lane.b32.xlu1 %v14166_v29, %s11959_s1  ;;  %v8528_v29 = vmul.f32 1.442695, %v8509_v17 }
0x2e55   :  { %11816 = vpow2.f32 %v8528_v29 }
0x2e56   :  { %8691 = vrot.lane.b32.xlu0 %v14116_v62, %s11959_s1  ;;  %v8524_v62 = vmul.f32 1.442695, %v8507_v59  ;;  %11818 = vpow2.f32 %v8526_v54 }
0x2e57   :  { %8883 = vrot.lane.b32.xlu1 %v14206_v30, %s11959_s1  ;;  %v8522_v30 = vmul.f32 1.442695, %v8506_v49 }
0x2e58   :  { %11820 = vpow2.f32 %v8524_v62 }
0x2e59   :  { %11822 = vpow2.f32 %v8522_v30 }
0x2e5a   :  { %8835 = vrot.lane.b32.xlu0 %v14196_v0, %s11959_s1 }
0x2e5f   :  { %v14313_v4 = vpop.eup %11816 }
0x2e60   :  { %v14315_v0 = vpop.eup %11818  ;;  %v8563_v31 = vsel %vm115_vm0, %v14313_v4, 0.0 }
0x2e61   :  { %v8560_v5 = vsel %vm115_vm0, %v14315_v0, 0.0 }
0x2e62   :  { %v14319_v3 = vpop.eup %11820 }
0x2e63   :  { %v14323_v23 = vpop.eup %11822  ;;  %v8557_v1 = vsel %vm115_vm0, %v14319_v3, 0.0 }
0x2e64   :  { %v8554_v19 = vsel %vm115_vm0, %v14323_v23, 0.0 }
0x2e79   :  { %8564 = vadd.xlane.f32.xlu0 %v8563_v31 }
0x2e7b   :  { %8561 = vadd.xlane.f32.xlu1 %v8560_v5 }
0x2e7d   :  { %8558 = vadd.xlane.f32.xlu0 %v8557_v1 }
0x2e7f   :  { %8555 = vadd.xlane.f32.xlu1 %v8554_v19 }
0x2eb2   :  { %v8478_v63 = vpop.xlane.xlu1 %8477 }
0x2eb3   :  { %v8512_v18 = vsub.f32 %v14251_v36, %v8478_v63 }
0x2eb4   :  { %v8481_v39 = vpop.xlane.xlu0 %8480 }
0x2eb5   :  { %v8534_v26 = vmul.f32 1.442695, %v8512_v18  ;;  %v8513_v56 = vsub.f32 %v14255_v43, %v8481_v39 }
0x2eb6   :  { %v8472_v2 = vpop.xlane.xlu1 %8471 }
0x2eb7   :  { %11824 = vpow2.f32 %v8534_v26  ;;  %v8536_v38 = vmul.f32 1.442695, %v8513_v56  ;;  %v8510_v37 = vsub.f32 %v14253_v58, %v8472_v2 }
0x2eb8   :  { %v8475_v28 = vpop.xlane.xlu0 %8474 }
0x2eb9   :  { %11826 = vpow2.f32 %v8536_v38  ;;  %v8530_v6 = vmul.f32 1.442695, %v8510_v37  ;;  %v8511_v24 = vsub.f32 %v14259_v42, %v8475_v28 }
0x2ebb   :  { %11828 = vpow2.f32 %v8530_v6  ;;  %v8532_v41 = vmul.f32 1.442695, %v8511_v24 }
0x2ebd   :  { %11830 = vpow2.f32 %v8532_v41 }
0x2ebf   :  { %v8490_v50 = vpop.xlane.xlu1 %8489 }
0x2ec0   :  { %v8516_v36 = vsub.f32 %v14267_v14, %v8490_v50 }
0x2ec1   :  { %v14334_v40 = vpop.eup %11824  ;;  %v8493_v7 = vpop.xlane.xlu0 %8492 }
0x2ec2   :  { %v8542_v43 = vmul.f32 1.442695, %v8516_v36  ;;  %v8517_v45 = vsub.f32 %v14271_v33, %v8493_v7  ;;  %v8572_v58 = vsel %vm115_vm0, %v14334_v40, 0.0 }
0x2ec3   :  { %v14339_v52 = vpop.eup %11826  ;;  %v8484_v22 = vpop.xlane.xlu1 %8483  ;;  %8573 = vadd.xlane.f32.xlu1 %v8572_v58 }
0x2ec4   :  { %11832 = vpow2.f32 %v8542_v43  ;;  %v8544_v42 = vmul.f32 1.442695, %v8517_v45  ;;  %v8514_v15 = vsub.f32 %v14269_v61, %v8484_v22  ;;  %v8575_v14 = vsel %vm115_vm0, %v14339_v52, 0.0 }
0x2ec5   :  { %v14344_v35 = vpop.eup %11828  ;;  %v8487_v34 = vpop.xlane.xlu0 %8486  ;;  %8576 = vadd.xlane.f32.xlu0 %v8575_v14 }
0x2ec6   :  { %11834 = vpow2.f32 %v8544_v42  ;;  %v8538_v33 = vmul.f32 1.442695, %v8514_v15  ;;  %v8515_v48 = vsub.f32 %v14275_v13, %v8487_v34  ;;  %v8566_v46 = vsel %vm115_vm0, %v14344_v35, 0.0 }
0x2ec7   :  { %v14349_v53 = vpop.eup %11830  ;;  %8567 = vadd.xlane.f32.xlu1 %v8566_v46  ;;  %v8502_v25 = vpop.xlane.xlu1 %8501 }
0x2ec8   :  { %11836 = vpow2.f32 %v8538_v33  ;;  %v8540_v61 = vmul.f32 1.442695, %v8515_v48  ;;  %v8520_v21 = vsub.f32 %v14281_v9, %v8502_v25  ;;  %v8569_v44 = vsel %vm115_vm0, %v14349_v53, 0.0 }
0x2ec9   :  { %8570 = vadd.xlane.f32.xlu0 %v8569_v44  ;;  %v8505_v51 = vpop.xlane.xlu0 %8504 }
0x2eca   :  { %11838 = vpow2.f32 %v8540_v61  ;;  %v8550_v17 = vmul.f32 1.442695, %v8520_v21  ;;  %v8521_v13 = vsub.f32 %v14287_v60, %v8505_v51 }
0x2ecb   :  { %v8496_v57 = vpop.xlane.xlu1 %8495 }
0x2ecc   :  { %11840 = vpow2.f32 %v8550_v17  ;;  %v8552_v10 = vmul.f32 1.442695, %v8521_v13  ;;  %v8518_v59 = vsub.f32 %v14285_v11, %v8496_v57 }
0x2ecd   :  { %v8499_v29 = vpop.xlane.xlu0 %8498 }
0x2ece   :  { %v14356_v54 = vpop.eup %11832  ;;  %11842 = vpow2.f32 %v8552_v10  ;;  %v8546_v49 = vmul.f32 1.442695, %v8518_v59  ;;  %v8519_v9 = vsub.f32 %v14291_v32, %v8499_v29 }
0x2ecf   :  { %v8584_v62 = vsel %vm115_vm0, %v14356_v54, 0.0  ;;  %v8740_v28 = vpop.permute.xlu1 %8739 }
0x2ed0   :  { %v14361_v30 = vpop.eup %11834  ;;  %11844 = vpow2.f32 %v8546_v49  ;;  %v8548_v31 = vmul.f32 1.442695, %v8519_v9  ;;  %8585 = vadd.xlane.f32.xlu1 %v8584_v62 }
0x2ed1   :  { %v8692_v60 = vpop.permute.xlu0 %8691  ;;  %v8587_v5 = vsel %vm115_vm0, %v14361_v30, 0.0 }
0x2ed2   :  { %v14365_v11 = vpop.eup %11836  ;;  %11846 = vpow2.f32 %v8548_v31  ;;  %8588 = vadd.xlane.f32.xlu0 %v8587_v5  ;;  %10856 = vmatpush3.bf16.msra.mxu1 %v8692_v60 }
0x2ed3   :  { %v8578_v32 = vsel %vm115_vm0, %v14365_v11, 0.0  ;;  %10867 = vmatprep.subr.bf16.mxu1 %v11955_v12  ;;  %v8788_v6 = vpop.permute.xlu1 %8787 }
0x2ed4   :  { %v14370_v1 = vpop.eup %11838  ;;  %8579 = vadd.xlane.f32.xlu1 %v8578_v32 }
0x2ed5   :  { %v8581_v19 = vsel %vm115_vm0, %v14370_v1, 0.0  ;;  %v8836_v24 = vpop.permute.xlu0 %8835 }
0x2ed6   :  { %v14374_v63 = vpop.eup %11840  ;;  %8582 = vadd.xlane.f32.xlu0 %v8581_v19 }
0x2ed7   :  { %v8596_v18 = vsel %vm115_vm0, %v14374_v63, 0.0  ;;  %v8884_v41 = vpop.permute.xlu1 %8883 }
0x2ed8   :  { %v14378_v39 = vpop.eup %11842  ;;  %8597 = vadd.xlane.f32.xlu1 %v8596_v18 }
0x2ed9   :  { %v8599_v26 = vsel %vm115_vm0, %v14378_v39, 0.0 }
0x2eda   :  { %v14382_v56 = vpop.eup %11844  ;;  %8600 = vadd.xlane.f32.xlu0 %v8599_v26 }
0x2edb   :  { %v8590_v2 = vsel %vm115_vm0, %v14382_v56, 0.0 }
0x2edc   :  { %v14386_v38 = vpop.eup %11846  ;;  %8591 = vadd.xlane.f32.xlu1 %v8590_v2 }
0x2edd   :  { %v8593_v37 = vsel %vm115_vm0, %v14386_v38, 0.0 }
0x2ede   :  { %8594 = vadd.xlane.f32.xlu0 %v8593_v37 }
0x2eed   :  { %8979 = vrot.lane.b32.xlu1 %v14219_v55, %s11959_s1 }
0x2ef4   :  { %8931 = vrot.lane.b32.xlu0 %v14211_v8, %s11959_s1 }
0x2f06   :  { %v8565_v50 = vpop.xlane.xlu0 %8564 }
0x2f07   :  { %11848 = vrcp.f32 %v8565_v50 }
0x2f08   :  { %v8562_v36 = vpop.xlane.xlu1 %8561 }
0x2f09   :  { %11850 = vrcp.f32 %v8562_v36 }
0x2f0a   :  { %v8559_v7 = vpop.xlane.xlu0 %8558 }
0x2f0b   :  { %11852 = vrcp.f32 %v8559_v7 }
0x2f0c   :  { %v8556_v43 = vpop.xlane.xlu1 %8555 }
0x2f0d   :  { %11854 = vrcp.f32 %v8556_v43 }
0x2f11   :  { %v11849_v45 = vpop.eup %11848 }
0x2f12   :  { %v8621_v22 = vmul.f32 %v11849_v45, %v14313_v4 }
0x2f13   :  { %v11851_v58 = vpop.eup %11850 }
0x2f14   :  { %v8620_v55 = vmul.f32 %v11851_v58, %v14315_v0 }
0x2f15   :  { %v11853_v42 = vpop.eup %11852 }
0x2f16   :  { %v8635_v8 = vpack.c.bf16 %v8621_v22, %v8620_v55  ;;  %v8619_v14 = vmul.f32 %v11853_v42, %v14319_v3 }
0x2f17   :  { %v11855_v15 = vpop.eup %11854 }
0x2f18   :  { %v8618_v34 = vmul.f32 %v11855_v15, %v14323_v23  ;;  %10858 = vmatmul.mubr.msk.bf16.vlgmr.msra.gmra.mrb[220].mxu1 %vm115_vm0, %v8635_v8 }
0x2f19   :  { %10868 = vmatpush3.bf16.msra.mxu1 %v8788_v6  ;;  %10869 = vmatprep.mubr.msk.bf16.mxu1 %vm11960_vm6, %v11955_v12 }
0x2f1a   :  { %v8634_v33 = vpack.c.bf16 %v8619_v14, %v8618_v34  ;;  %10879 = vmatprep.subr.bf16.mxu1 %v11955_v12 }
0x2f1c   :  { %10852 = vmatmul.mubr.msk.bf16.vlgmr.msra.gmra.mrb[216].mxu0 %vm115_vm0, %v8634_v33 }
0x2f1d   :  { %10862 = vmatpush3.bf16.msra.mxu0 %v8740_v28  ;;  %10863 = vmatprep.mubr.msk.bf16.mxu0 %vm11960_vm6, %v11955_v12 }
0x2f1e   :  { %10873 = vmatprep.subr.bf16.mxu0 %v11955_v12 }
0x2f50   :  { %v8574_v4 = vpop.xlane.xlu1 %8573 }
0x2f51   :  { %11856 = vrcp.f32 %v8574_v4 }
0x2f52   :  { %v8577_v0 = vpop.xlane.xlu0 %8576 }
0x2f53   :  { %11858 = vrcp.f32 %v8577_v0 }
0x2f54   :  { %v8568_v3 = vpop.xlane.xlu1 %8567 }
0x2f55   :  { %11860 = vrcp.f32 %v8568_v3 }
0x2f56   :  { %v8571_v23 = vpop.xlane.xlu0 %8570 }
0x2f57   :  { %11862 = vrcp.f32 %v8571_v23 }
0x2f5b   :  { %v11857_v48 = vpop.eup %11856 }
0x2f5c   :  { %v8624_v61 = vmul.f32 %v11857_v48, %v14334_v40 }
0x2f5d   :  { %v11859_v46 = vpop.eup %11858  ;;  %v8586_v25 = vpop.xlane.xlu1 %8585 }
0x2f5e   :  { %v8625_v21 = vmul.f32 %v11859_v46, %v14339_v52  ;;  %11864 = vrcp.f32 %v8586_v25  ;;  %v11422_v46 = vld [vmem:[#allocation4 + $0x160] sm:$0xff]  }
0x2f5f   :  { %v11861_v44 = vpop.eup %11860  ;;  %v8589_v51 = vpop.xlane.xlu0 %8588 }
0x2f60   :  { %11866 = vrcp.f32 %v8589_v51  ;;  %v8637_v17 = vpack.c.bf16 %v8625_v21, %v8624_v61  ;;  %v8622_v10 = vmul.f32 %v11861_v44, %v14344_v35 }
0x2f61   :  { %v11863_v13 = vpop.eup %11862  ;;  %v8580_v57 = vpop.xlane.xlu1 %8579 }
0x2f62   :  { %v8623_v59 = vmul.f32 %v11863_v13, %v14349_v53  ;;  %11868 = vrcp.f32 %v8580_v57  ;;  %10870 = vmatmul.mubr.msk.bf16.vlgmr.msra.gmra.mrb[224].mxu1 %vm115_vm0, %v8637_v17  ;;  %v11423_v17 = vld [vmem:[#allocation4 + $0x168] sm:$0xff]  }
0x2f63   :  { %10880 = vmatpush3.bf16.msra.mxu1 %v8884_v41  ;;  %v8583_v29 = vpop.xlane.xlu0 %8582  ;;  %10881 = vmatprep.mubr.msk.bf16.mxu1 %vm11960_vm6, %v11955_v12 }
0x2f64   :  { %11870 = vrcp.f32 %v8583_v29  ;;  %v8636_v40 = vpack.c.bf16 %v8623_v59, %v8622_v10  ;;  %10891 = vmatprep.subr.bf16.mxu1 %v11955_v12 }
0x2f65   :  { %v8598_v52 = vpop.xlane.xlu1 %8597 }
0x2f66   :  { %11872 = vrcp.f32 %v8598_v52  ;;  %10864 = vmatmul.mubr.msk.bf16.vlgmr.msra.gmra.mrb[220].mxu0 %vm115_vm0, %v8636_v40 }
0x2f67   :  { %10874 = vmatpush3.bf16.msra.mxu0 %v8836_v24  ;;  %v8601_v35 = vpop.xlane.xlu0 %8600  ;;  %10875 = vmatprep.mubr.msk.bf16.mxu0 %vm11960_vm6, %v11955_v12 }
0x2f68   :  { %v11865_v53 = vpop.eup %11864  ;;  %11874 = vrcp.f32 %v8601_v35  ;;  %10885 = vmatprep.subr.bf16.mxu0 %v11955_v12 }
0x2f69   :  { %v8592_v49 = vpop.xlane.xlu1 %8591  ;;  %v8628_v62 = vmul.f32 %v11865_v53, %v14356_v54 }
0x2f6a   :  { %v11867_v9 = vpop.eup %11866  ;;  %11876 = vrcp.f32 %v8592_v49 }
0x2f6b   :  { %v8629_v31 = vmul.f32 %v11867_v9, %v14361_v30  ;;  %v8595_v60 = vpop.xlane.xlu0 %8594 }
0x2f6c   :  { %v11869_v5 = vpop.eup %11868  ;;  %11878 = vrcp.f32 %v8595_v60 }
0x2f6d   :  { %v8980_v32 = vpop.permute.xlu1 %8979  ;;  %v8639_v19 = vpack.c.bf16 %v8629_v31, %v8628_v62  ;;  %v8626_v26 = vmul.f32 %v11869_v5, %v14365_v11 }
0x2f6e   :  { %v11871_v18 = vpop.eup %11870 }
0x2f6f   :  { %v8627_v2 = vmul.f32 %v11871_v18, %v14370_v1  ;;  %10882 = vmatmul.mubr.msk.bf16.vlgmr.msra.gmra.mrb[228].mxu1 %vm115_vm0, %v8639_v19  ;;  %v8932_v24 = vpop.permute.xlu0 %8931 }
0x2f70   :  { %v11873_v37 = vpop.eup %11872  ;;  %10892 = vmatpush3.bf16.msra.mxu1 %v8980_v32  ;;  %10893 = vmatprep.mubr.msk.bf16.mxu1 %vm11960_vm6, %v11955_v12 }
0x2f71   :  { %v8638_v54 = vpack.c.bf16 %v8627_v2, %v8626_v26  ;;  %v8632_v30 = vmul.f32 %v11873_v37, %v14374_v63 }
0x2f72   :  { %v11875_v28 = vpop.eup %11874 }
0x2f73   :  { %v8633_v6 = vmul.f32 %v11875_v28, %v14378_v39  ;;  %10876 = vmatmul.mubr.msk.bf16.vlgmr.msra.gmra.mrb[224].mxu0 %vm115_vm0, %v8638_v54 }
0x2f74   :  { %v11877_v41 = vpop.eup %11876  ;;  %10886 = vmatpush3.bf16.msra.mxu0 %v8932_v24  ;;  %10887 = vmatprep.mubr.msk.bf16.mxu0 %vm11960_vm6, %v11955_v12 }
0x2f75   :  { %v8641_v11 = vpack.c.bf16 %v8633_v6, %v8632_v30  ;;  %v8630_v50 = vmul.f32 %v11877_v41, %v14382_v56  ;;  %10897 = vmatprep.subr.bf16.mxu0 %v11422_v46 }
0x2f76   :  { %v11879_v1 = vpop.eup %11878 }
0x2f77   :  { %v8631_v36 = vmul.f32 %v11879_v1, %v14386_v38  ;;  %10894 = vmatmul.mubr.msk.bf16.vlgmr.msra.gmra.mrb[232].mxu1 %vm115_vm0, %v8641_v11 }
0x2f79   :  { %v8640_v7 = vpack.c.bf16 %v8631_v36, %v8630_v50 }
0x2f7b   :  { %10888 = vmatmul.mubr.msk.bf16.vlgmr.msra.gmra.mrb[228].mxu0 %vm115_vm0, %v8640_v7 }
0x2f7c   :  { %10898 = vmatpush3.bf16.msra.mxu0 %v11422_v46 }
0x2f7d   :  { %10899 = vmatprep.subr.bf16.mxu0 %v11423_v17 }
0x2f80   :  { %10900 = vmatpush3.bf16.msra.mxu0 %v11423_v17 }
0x2feb   :  { %v8731_v63 = vpop.f32.mrb[220].mxu1 }
0x2fec   :  { %v10859_v39 = vpop.f32.mrb[221].mxu1 }
0x2fed   :  { %v8734_v43 = vpop.f32.mrb[222].mxu1 }
0x2fee   :  { %v10860_v45 = vpop.f32.mrb[223].mxu1 }
0x2fef   :  { %v14434_v58 = vpop.f32.mrb[216].mxu0 }
0x2ff0   :  { %v10853_v22 = vpop.f32.mrb[217].mxu0 }
0x2ff1   :  { %v14436_v55 = vpop.f32.mrb[218].mxu0 }
0x2ff2   :  { %v10854_v12 = vpop.f32.mrb[219].mxu0 }
0x3035   :  { %v8827_v42 = vpop.f32.mrb[224].mxu1 }
0x3036   :  { %v10871_v8 = vpop.f32.mrb[225].mxu1 }
0x3037   :  { %v8830_v56 = vpop.f32.mrb[226].mxu1 }
0x3038   :  { %v11348_v15 = vpack.i.bf16 %v8830_v56, %v8827_v42  ;;  %v10872_v38 = vpop.f32.mrb[227].mxu1 }
0x3039   :  { %v8779_v14 = vpop.f32.mrb[220].mxu0 }
0x303a   :  { %v10865_v34 = vpop.f32.mrb[221].mxu0  ;;  %11349 = vrot.lane.b32.xlu1 %v11348_v15, %s11950_s29 }
0x303b   :  { %v8782_v33 = vpop.f32.mrb[222].mxu0 }
0x303c   :  { %v11353_v4 = vpack.i.bf16 %v8782_v33, %v8779_v14  ;;  %v10866_v0 = vpop.f32.mrb[223].mxu0 }
0x303e   :  { %11354 = vrot.lane.b32.xlu0 %v11353_v4, %s11950_s29 }
0x3042   :  { %v8923_v3 = vpop.f32.mrb[228].mxu1 }
0x3043   :  { %v10883_v23 = vpop.f32.mrb[229].mxu1 }
0x3044   :  { %v8926_v48 = vpop.f32.mrb[230].mxu1 }
0x3045   :  { %v11358_v25 = vpack.i.bf16 %v8926_v48, %v8923_v3  ;;  %v10884_v61 = vpop.f32.mrb[231].mxu1 }
0x3046   :  { %v8875_v21 = vpop.f32.mrb[224].mxu0 }
0x3047   :  { %v10877_v44 = vpop.f32.mrb[225].mxu0  ;;  %11359 = vrot.lane.b32.xlu1 %v11358_v25, %s11961_s0 }
0x3048   :  { %v8878_v51 = vpop.f32.mrb[226].mxu0 }
0x3049   :  { %v11363_v13 = vpack.i.bf16 %v8878_v51, %v8875_v21  ;;  %v10878_v57 = vpop.f32.mrb[227].mxu0 }
0x304a   :  { %v9019_v10 = vpop.f32.mrb[232].mxu1 }
0x304b   :  { %11364 = vrot.lane.b32.xlu0 %v11363_v13, %s11961_s0  ;;  %v10895_v59 = vpop.f32.mrb[233].mxu1 }
0x304c   :  { %v9022_v29 = vpop.f32.mrb[234].mxu1 }
0x304d   :  { %v11373_v40 = vpack.i.bf16 %v9022_v29, %v9019_v10  ;;  %v10896_v52 = vpop.f32.mrb[235].mxu1 }
0x304e   :  { %v8971_v35 = vpop.f32.mrb[228].mxu0 }
0x304f   :  { %v10889_v53 = vpop.f32.mrb[229].mxu0  ;;  %11374 = vrot.lane.b32.xlu1 %v11373_v40, %s11962_s24 }
0x3050   :  { %v8974_v49 = vpop.f32.mrb[230].mxu0 }
0x3051   :  { %v11368_v9 = vpack.i.bf16 %v8974_v49, %v8971_v35  ;;  %v10890_v62 = vpop.f32.mrb[231].mxu0 }
0x3053   :  { %11369 = vrot.lane.b32.xlu0 %v11368_v9, %s11962_s24 }
0x30ac   :  { %v11350_v31 = vpop.permute.xlu1 %11349 }
0x30ad   :  { %v11352_v32 = vunpack.i.h.bf16 %v11350_v31  ;;  %v11351_v19 = vunpack.i.l.bf16 %v11350_v31 }
0x30af   :  { %v9077_v37 = vsel %vm453_vm11, %v8734_v43, %v11352_v32  ;;  %v9076_v54 = vsel %vm453_vm11, %v8731_v63, %v11351_v19 }
0x30b0   :  { %v11355_v60 = vpop.permute.xlu0 %11354 }
0x30b1   :  { %v11357_v30 = vunpack.i.h.bf16 %v11355_v60  ;;  %v11356_v6 = vunpack.i.l.bf16 %v11355_v60 }
0x30b3   :  { %v9075_v63 = vsel %vm453_vm11, %v14436_v55, %v11357_v30  ;;  %v9074_v43 = vsel %vm453_vm11, %v14434_v58, %v11356_v6  ;;  %v9807_v55 = vld [vmem:[%s14526_s4 + $0x21] ss:$0 sm:$0xff] }
0x30b9   :  { %v11360_v5 = vpop.permute.xlu1 %11359 }
0x30ba   :  { %v11362_v18 = vunpack.i.h.bf16 %v11360_v5  ;;  %v11361_v26 = vunpack.i.l.bf16 %v11360_v5 }
0x30bc   :  { %v9081_v11 = vsel %vm115_vm0, %v9077_v37, %v11362_v18  ;;  %v9080_v1 = vsel %vm115_vm0, %v9076_v54, %v11361_v26  ;;  %v11424_v18 = vld [vmem:[#allocation4 + $0x170] sm:$0xff]   ;;  %v11425_v26 = vld [vmem:[#allocation4 + $0x178] sm:$0xff]   ;;  %v11427_v37 = vld [vmem:[#allocation4 + $0x188] sm:$0xff]  }
0x30bd   :  { %v11365_v2 = vpop.permute.xlu0 %11364  ;;  %10905 = vmatprep.subr.bf16.mxu1 %v11424_v18 }
0x30be   :  { %v11367_v50 = vunpack.i.h.bf16 %v11365_v2  ;;  %v11366_v36 = vunpack.i.l.bf16 %v11365_v2  ;;  %10906 = vmatpush3.bf16.msra.mxu1 %v11424_v18  ;;  %v11426_v2 = vld [vmem:[#allocation4 + $0x180] sm:$0xff]  }
0x30bf   :  { %10907 = vmatprep.subr.bf16.mxu1 %v11425_v26  ;;  %10913 = vmatprep.subr.bf16.mxu0 %v11426_v2 }
0x30c0   :  { %v9078_v8 = vsel %vm115_vm0, %v9074_v43, %v11366_v36  ;;  %v9079_v56 = vsel %vm115_vm0, %v9075_v63, %v11367_v50 }
0x30c1   :  { %v11375_v28 = vpop.permute.xlu1 %11374 }
0x30c2   :  { %v11377_v24 = vunpack.i.h.bf16 %v11375_v28  ;;  %v11376_v41 = vunpack.i.l.bf16 %v11375_v28  ;;  %10908 = vmatpush3.bf16.msra.mxu1 %v11425_v26 }
0x30c4   :  { %v9085_v7 = vsel %vm1483_vm12, %v9081_v11, %v11377_v24  ;;  %v9084_v39 = vsel %vm1483_vm12, %v9080_v1, %v11376_v41 }
0x30c5   :  { %v9091_v45 = vpack.c.bf16 %v9085_v7, %v9084_v39  ;;  %v11370_v22 = vpop.permute.xlu0 %11369 }
0x30c6   :  { %v11372_v12 = vunpack.i.h.bf16 %v11370_v22  ;;  %v11371_v42 = vunpack.i.l.bf16 %v11370_v22  ;;  %v9812_v22 = vld [vmem:[%s14526_s4 + $0x26] ss:$0 sm:$0xff] }
0x30c8   :  { %v9082_v15 = vsel %vm1483_vm12, %v9078_v8, %v11371_v42  ;;  %v9083_v38 = vsel %vm1483_vm12, %v9079_v56, %v11372_v12  ;;  %v9813_v56 = vld [vmem:[%s14526_s4 + $0x27] ss:$0 sm:$0xff] }
0x30c9   :  { %v9090_v14 = vpack.c.bf16 %v9083_v38, %v9082_v15 }
0x30cb   :  { %10901 = vmatprep.mubr.msk.bf16.mxu0 %vm346_vm5, %v9090_v14 }
0x30cc   :  { %10902 = vmatmul.mubr.msk.bf16.vlgmr.msra.gmra.mrb[232].mxu0 %vm346_vm5, %v9091_v45 }
0x30cd   :  { %10914 = vmatpush3.bf16.msra.mxu0 %v11426_v2 }
0x30ce   :  { %10915 = vmatprep.subr.bf16.mxu0 %v11427_v37 }
0x30d1   :  { %10916 = vmatpush3.bf16.msra.mxu0 %v11427_v37 }
0x319f   :  { %v10903_v58 = vpop.f32.mrb[232].mxu0 }
0x31a0   :  { %v9149_v34 = vpop.f32.mrb[233].mxu0  ;;  %v9158_v33 = vadd.f32 %v10903_v58, %v9807_v55 }
0x31a1   :  { %v9150_v4 = vadd.f32 %v9807_v55, %v9149_v34  ;;  %v10904_v0 = vpop.f32.mrb[234].mxu0 }
0x31a2   :  { %v9152_v3 = vpop.f32.mrb[235].mxu0  ;;  %v9166_v46 = vadd.f32 %v9158_v33, %v14151_v20  ;;  %v9161_v25 = vadd.f32 %v10904_v0, %v9807_v55 }
0x31a3   :  { %v9164_v23 = vadd.f32 %v9150_v4, %v14144_v47  ;;  %v9153_v48 = vadd.f32 %v9807_v55, %v9152_v3 }
0x31a4   :  { %v9167_v51 = vadd.f32 %v9161_v25, %v14153_v27  ;;  %v9176_v17 = vsel %vm346_vm5, %v9166_v46, 0.0  ;;  %v11429_v25 = vld [vmem:[#allocation4 + $0x198] sm:$0xff]  }
0x31a5   :  { %v9165_v61 = vadd.f32 %v9153_v48, %v14146_v16  ;;  %v9170_v21 = vsel %vm346_vm5, %v9164_v23, 0.0 }
0x31a6   :  { %9171 = vadd.xlane.f32.xlu0 %v9170_v21  ;;  %v9179_v13 = vsel %vm346_vm5, %v9167_v51, 0.0 }
0x31a7   :  { %v9173_v44 = vsel %vm346_vm5, %v9165_v61, 0.0 }
0x31a8   :  { %9174 = vadd.xlane.f32.xlu1 %v9173_v44 }
0x31aa   :  { %9177 = vadd.xlane.f32.xlu0 %v9176_v17 }
0x31ae   :  { %9180 = vadd.xlane.f32.xlu0 %v9179_v13 }
0x3233   :  { %v9172_v47 = vpop.xlane.xlu0 %9171 }
0x3234   :  { %v9182_v57 = vmul.f32 0.03125, %v9172_v47 }
0x3235   :  { %v9175_v20 = vpop.xlane.xlu1 %9174 }
0x3236   :  { %v9186_v10 = vsub.f32 %v9164_v23, %v9182_v57  ;;  %v9183_v59 = vmul.f32 0.03125, %v9175_v20 }
0x3237   :  { %v9178_v16 = vpop.xlane.xlu0 %9177 }
0x3238   :  { %v9187_v29 = vsub.f32 %v9165_v61, %v9183_v59  ;;  %v9184_v40 = vmul.f32 0.03125, %v9178_v16  ;;  %v9190_v52 = vmul.f32 %v9186_v10, %v9186_v10  ;;  %v9814_v61 = vld [vmem:[%s14526_s4 + $0x22] ss:$0 sm:$0xff] }
0x323a   :  { %v9188_v35 = vsub.f32 %v9166_v46, %v9184_v40  ;;  %v9194_v53 = vsel %vm346_vm5, %v9190_v52, 0.0  ;;  %v9191_v49 = vmul.f32 %v9187_v29, %v9187_v29  ;;  %v11428_v46 = vld [vmem:[#allocation4 + $0x190] sm:$0xff]  }
0x323b   :  { %9195 = vadd.xlane.f32.xlu1 %v9194_v53  ;;  %v9181_v27 = vpop.xlane.xlu0 %9180  ;;  %10917 = vmatprep.subr.bf16.mxu0 %v11428_v46 }
0x323c   :  { %v9185_v9 = vmul.f32 0.03125, %v9181_v27  ;;  %v9197_v62 = vsel %vm346_vm5, %v9191_v49, 0.0  ;;  %v9192_v31 = vmul.f32 %v9188_v35, %v9188_v35  ;;  %10918 = vmatpush3.bf16.msra.mxu0 %v11428_v46 }
0x323d   :  { %9198 = vadd.xlane.f32.xlu0 %v9197_v62  ;;  %10919 = vmatprep.subr.bf16.mxu0 %v11429_v25 }
0x323e   :  { %v9189_v60 = vsub.f32 %v9167_v51, %v9185_v9  ;;  %v9200_v5 = vsel %vm346_vm5, %v9192_v31, 0.0 }
0x323f   :  { %9201 = vadd.xlane.f32.xlu1 %v9200_v5 }
0x3240   :  { %v9193_v32 = vmul.f32 %v9189_v60, %v9189_v60  ;;  %10920 = vmatpush3.bf16.msra.mxu0 %v11429_v25 }
0x3242   :  { %v9203_v19 = vsel %vm346_vm5, %v9193_v32, 0.0 }
0x3243   :  { %9204 = vadd.xlane.f32.xlu0 %v9203_v19 }
0x32c8   :  { %v9196_v54 = vpop.xlane.xlu1 %9195 }
0x32c9   :  { %v9206_v28 = vmul.f32 0.03125, %v9196_v54 }
0x32ca   :  { %v9199_v30 = vpop.xlane.xlu0 %9198 }
0x32cb   :  { %v9210_v6 = vadd.f32 1e-05, %v9206_v28  ;;  %v9207_v24 = vmul.f32 0.03125, %v9199_v30 }
0x32cc   :  { %v9202_v41 = vpop.xlane.xlu1 %9201 }
0x32cd   :  { %11880 = vrsqrt.f32 %v9210_v6  ;;  %v9211_v11 = vadd.f32 1e-05, %v9207_v24  ;;  %v9208_v1 = vmul.f32 0.03125, %v9202_v41 }
0x32cf   :  { %11882 = vrsqrt.f32 %v9211_v11  ;;  %v9212_v50 = vadd.f32 1e-05, %v9208_v1 }
0x32d0   :  { %v9205_v36 = vpop.xlane.xlu0 %9204 }
0x32d1   :  { %11884 = vrsqrt.f32 %v9212_v50  ;;  %v9209_v7 = vmul.f32 0.03125, %v9205_v36 }
0x32d3   :  { %v9213_v39 = vadd.f32 1e-05, %v9209_v7 }
0x32d5   :  { %11886 = vrsqrt.f32 %v9213_v39 }
0x32d7   :  { %v11881_v45 = vpop.eup %11880 }
0x32d8   :  { %v9218_v63 = vmul.f32 %v11881_v45, %v9186_v10 }
0x32d9   :  { %v11883_v43 = vpop.eup %11882 }
0x32da   :  { %v9219_v12 = vmul.f32 %v11883_v43, %v9187_v29  ;;  %v9226_v42 = vmul.f32 %v9812_v22, %v9218_v63 }
0x32db   :  { %v11885_v8 = vpop.eup %11884 }
0x32dc   :  { %v9220_v15 = vmul.f32 %v11885_v8, %v9188_v35  ;;  %v9227_v38 = vmul.f32 %v9812_v22, %v9219_v12  ;;  %v9234_v14 = vadd.f32 %v9813_v56, %v9226_v42  ;;  %v9819_v35 = vld [vmem:[%s14526_s4 + $0x23] ss:$0 sm:$0xff] }
0x32de   :  { %v9235_v55 = vadd.f32 %v9813_v56, %v9227_v38  ;;  %v9228_v34 = vmul.f32 %v9812_v22, %v9220_v15 }
0x32df   :  { %v11887_v58 = vpop.eup %11886 }
0x32e0   :  { %v9221_v33 = vmul.f32 %v11887_v58, %v9189_v60  ;;  %v9242_v4 = vpack.c.bf16 %v9235_v55, %v9234_v14  ;;  %v9236_v3 = vadd.f32 %v9813_v56, %v9228_v34 }
0x32e2   :  { %v9229_v0 = vmul.f32 %v9812_v22, %v9221_v33  ;;  %10909 = vmatprep.mubr.msk.bf16.mxu1 %vm346_vm5, %v9242_v4 }
0x32e4   :  { %v9237_v23 = vadd.f32 %v9813_v56, %v9229_v0 }
0x32e6   :  { %v9243_v48 = vpack.c.bf16 %v9237_v23, %v9236_v3 }
0x32e8   :  { %10910 = vmatmul.mubr.msk.bf16.vlgmr.msra.gmra.mrb[236].mxu1 %vm346_vm5, %v9243_v48 }
0x33bb   :  { %v10911_v21 = vpop.f32.mrb[236].mxu1 }
0x33bc   :  { %v9310_v44 = vadd.f32 %v10911_v21, %v9814_v61  ;;  %v9301_v51 = vpop.f32.mrb[237].mxu1 }
0x33bd   :  { %v9302_v17 = vadd.f32 %v9814_v61, %v9301_v51  ;;  %v10912_v13 = vpop.f32.mrb[238].mxu1  ;;  %v9826_v51 = vld [vmem:[%s14526_s4 + $0x28] ss:$0 sm:$0xff] }
0x33be   :  { %v9313_v47 = vadd.f32 %v10912_v13, %v9814_v61  ;;  %v9304_v57 = vpop.f32.mrb[239].mxu1  ;;  %v9318_v10 = vmax.f32 %v9310_v44, 0.0 }
0x33bf   :  { %v9305_v20 = vadd.f32 %v9814_v61, %v9304_v57  ;;  %v9316_v16 = vmax.f32 %v9302_v17, 0.0 }
0x33c0   :  { %v9319_v59 = vmax.f32 %v9313_v47, 0.0 }
0x33c1   :  { %v9317_v29 = vmax.f32 %v9305_v20, 0.0 }
0x33c2   :  { %v9329_v40 = vpack.c.bf16 %v9319_v59, %v9318_v10  ;;  %v9827_v10 = vld [vmem:[%s14526_s4 + $0x29] ss:$0 sm:$0xff] }
0x33c3   :  { %v9328_v52 = vpack.c.bf16 %v9317_v29, %v9316_v16 }
0x33c5   :  { %10921 = vmatprep.mubr.msk.bf16.mxu0 %vm1762_vm13, %v9328_v52 }
0x33c6   :  { %10922 = vmatmul.mubr.msk.bf16.vlgmr.msra.gmra.mrb[236].mxu0 %vm1762_vm13, %v9329_v40 }
0x3499   :  { %v10923_v53 = vpop.f32.mrb[236].mxu0 }
0x349a   :  { %v9399_v49 = vpop.f32.mrb[237].mxu0  ;;  %v9408_v27 = vadd.f32 %v10923_v53, %v9819_v35 }
0x349b   :  { %v9400_v9 = vadd.f32 %v9819_v35, %v9399_v49  ;;  %v10924_v62 = vpop.f32.mrb[238].mxu0 }
0x349c   :  { %v9402_v31 = vpop.f32.mrb[239].mxu0  ;;  %v9411_v5 = vadd.f32 %v10924_v62, %v9819_v35  ;;  %v9416_v19 = vadd.f32 %v9408_v27, %v9236_v3 }
0x349d   :  { %v9414_v60 = vadd.f32 %v9400_v9, %v9234_v14  ;;  %v9403_v32 = vadd.f32 %v9819_v35, %v9402_v31  ;;  %v11430_v14 = vld [vmem:[#allocation4 + $0x1a0] sm:$0xff]  }
0x349e   :  { %v9417_v2 = vadd.f32 %v9411_v5, %v9237_v23  ;;  %v9426_v54 = vsel %vm346_vm5, %v9416_v19, 0.0  ;;  %10925 = vmatprep.subr.bf16.mxu1 %v11430_v14 }
0x349f   :  { %v9415_v18 = vadd.f32 %v9403_v32, %v9235_v55  ;;  %v9420_v26 = vsel %vm346_vm5, %v9414_v60, 0.0  ;;  %v11431_v55 = vld [vmem:[#allocation4 + $0x1a8] sm:$0xff]   ;;  %10926 = vmatpush3.bf16.msra.mxu1 %v11430_v14 }
0x34a0   :  { %9421 = vadd.xlane.f32.xlu1 %v9420_v26  ;;  %v9429_v28 = vsel %vm346_vm5, %v9417_v2, 0.0  ;;  %10927 = vmatprep.subr.bf16.mxu1 %v11431_v55 }
0x34a1   :  { %v9423_v37 = vsel %vm346_vm5, %v9415_v18, 0.0 }
0x34a2   :  { %9424 = vadd.xlane.f32.xlu0 %v9423_v37 }
0x34a3   :  { %10928 = vmatpush3.bf16.msra.mxu1 %v11431_v55 }
0x34a4   :  { %9427 = vadd.xlane.f32.xlu1 %v9426_v54 }
0x34a6   :  { %9430 = vadd.xlane.f32.xlu0 %v9429_v28 }
0x352d   :  { %v9422_v30 = vpop.xlane.xlu1 %9421 }
0x352e   :  { %v9432_v6 = vmul.f32 0.03125, %v9422_v30 }
0x352f   :  { %v9425_v24 = vpop.xlane.xlu0 %9424 }
0x3530   :  { %v9436_v41 = vsub.f32 %v9414_v60, %v9432_v6  ;;  %v9433_v11 = vmul.f32 0.03125, %v9425_v24  ;;  %v9828_v60 = vld [vmem:[%s14526_s4 + $0x2a] ss:$0 sm:$0xff] }
0x3531   :  { %v9428_v1 = vpop.xlane.xlu1 %9427 }
0x3532   :  { %v9437_v50 = vsub.f32 %v9415_v18, %v9433_v11  ;;  %v9434_v36 = vmul.f32 0.03125, %v9428_v1  ;;  %v9440_v7 = vmul.f32 %v9436_v41, %v9436_v41 }
0x3533   :  { %v9431_v39 = vpop.xlane.xlu0 %9430 }
0x3534   :  { %v9438_v45 = vsub.f32 %v9416_v19, %v9434_v36  ;;  %v9435_v22 = vmul.f32 0.03125, %v9431_v39  ;;  %v9444_v63 = vsel %vm346_vm5, %v9440_v7, 0.0  ;;  %v9441_v43 = vmul.f32 %v9437_v50, %v9437_v50 }
0x3535   :  { %9445 = vadd.xlane.f32.xlu1 %v9444_v63 }
0x3536   :  { %v9439_v12 = vsub.f32 %v9417_v2, %v9435_v22  ;;  %v9447_v42 = vsel %vm346_vm5, %v9441_v43, 0.0  ;;  %v9442_v8 = vmul.f32 %v9438_v45, %v9438_v45 }
0x3537   :  { %9448 = vadd.xlane.f32.xlu0 %v9447_v42 }
0x3538   :  { %v9450_v56 = vsel %vm346_vm5, %v9442_v8, 0.0  ;;  %v9443_v15 = vmul.f32 %v9439_v12, %v9439_v12 }
0x3539   :  { %9451 = vadd.xlane.f32.xlu1 %v9450_v56 }
0x353a   :  { %v9453_v38 = vsel %vm346_vm5, %v9443_v15, 0.0 }
0x353b   :  { %9454 = vadd.xlane.f32.xlu0 %v9453_v38 }
0x35c2   :  { %v9446_v58 = vpop.xlane.xlu1 %9445 }
0x35c3   :  { %v9456_v34 = vmul.f32 0.03125, %v9446_v58 }
0x35c4   :  { %v9449_v33 = vpop.xlane.xlu0 %9448 }
0x35c5   :  { %v9460_v4 = vadd.f32 1e-05, %v9456_v34  ;;  %v9457_v0 = vmul.f32 0.03125, %v9449_v33 }
0x35c6   :  { %v9452_v3 = vpop.xlane.xlu1 %9451 }
0x35c7   :  { %11888 = vrsqrt.f32 %v9460_v4  ;;  %v9461_v23 = vadd.f32 1e-05, %v9457_v0  ;;  %v9458_v48 = vmul.f32 0.03125, %v9452_v3 }
0x35c8   :  { %v9455_v46 = vpop.xlane.xlu0 %9454 }
0x35c9   :  { %11890 = vrsqrt.f32 %v9461_v23  ;;  %v9462_v25 = vadd.f32 1e-05, %v9458_v48  ;;  %v9459_v61 = vmul.f32 0.03125, %v9455_v46 }
0x35cb   :  { %11892 = vrsqrt.f32 %v9462_v25  ;;  %v9463_v21 = vadd.f32 1e-05, %v9459_v61 }
0x35cd   :  { %11894 = vrsqrt.f32 %v9463_v21 }
0x35d1   :  { %v11889_v44 = vpop.eup %11888 }
0x35d2   :  { %v9468_v17 = vmul.f32 %v11889_v44, %v9436_v41 }
0x35d3   :  { %v11891_v13 = vpop.eup %11890 }
0x35d4   :  { %v9469_v47 = vmul.f32 %v11891_v13, %v9437_v50  ;;  %v9476_v57 = vmul.f32 %v9826_v51, %v9468_v17 }
0x35d5   :  { %v11893_v20 = vpop.eup %11892 }
0x35d6   :  { %v9470_v59 = vmul.f32 %v11893_v20, %v9438_v45  ;;  %v9477_v16 = vmul.f32 %v9826_v51, %v9469_v47  ;;  %v9484_v35 = vadd.f32 %v9827_v10, %v9476_v57 }
0x35d7   :  { %v11895_v29 = vpop.eup %11894 }
0x35d8   :  { %v9478_v40 = vmul.f32 %v9826_v51, %v9470_v59  ;;  %v9471_v52 = vmul.f32 %v11895_v29, %v9439_v12  ;;  %v9485_v53 = vadd.f32 %v9827_v10, %v9477_v16 }
0x35da   :  { %v9479_v49 = vmul.f32 %v9826_v51, %v9471_v52  ;;  %v9492_v27 = vpack.c.bf16 %v9485_v53, %v9484_v35  ;;  %v9486_v9 = vadd.f32 %v9827_v10, %v9478_v40 }
0x35dc   :  { %10929 = vmatprep.mubr.msk.bf16.mxu1 %vm346_vm5, %v9492_v27  ;;  %v9487_v62 = vadd.f32 %v9827_v10, %v9479_v49 }
0x35de   :  { %v9493_v31 = vpack.c.bf16 %v9487_v62, %v9486_v9 }
0x35e0   :  { %10930 = vmatmul.mubr.msk.bf16.vlgmr.msra.gmra.mrb[240].mxu1 %vm346_vm5, %v9493_v31 }
0x36b3   :  { %v10931_v5 = vpop.f32.mrb[240].mxu1 }
0x36b4   :  { %v9560_v32 = vadd.f32 %v10931_v5, %v9828_v60  ;;  %v9551_v19 = vpop.f32.mrb[241].mxu1 }
0x36b5   :  { %v9552_v18 = vadd.f32 %v9828_v60, %v9551_v19  ;;  %v10932_v26 = vpop.f32.mrb[242].mxu1 }
0x36b6   :  { %9568 = vst [vmem:[%s14527_s5 + $0x10] sm:$0xff] %v9560_v32  ;;  %v9563_v2 = vadd.f32 %v10932_v26, %v9828_v60  ;;  %v9554_v37 = vpop.f32.mrb[243].mxu1 }
0x36b7   :  { %9566 = vst [vmem:[%s14527_s5] sm:$0xff] %v9552_v18  ;;  %v9555_v54 = vadd.f32 %v9828_v60, %v9554_v37 }
0x36b8   :  { %9569 = vst [vmem:[%s14527_s5 + $0x18] sm:$0xff] %v9563_v2 }
0x36b9   :  { %9567 = vst [vmem:[%s14527_s5 + $0x8] sm:$0xff] %v9555_v54 }
0x36ba   :  { %9574 = vsyncpa [#allocation3], 1 }
0x36bb   :  { %9575 = vsyncpa [#allocation5], 1 }

</bundles_post_ra>
